<compile_context>
chip_gen: v5e
topology: v5e:2x2
jax: 0.10.0
libtpu: 0.0.40
codegen_flags: <defaults>
</compile_context>

<pallas_src>
import math
from functools import partial

import jax
import jax.numpy as jnp
from jax.experimental import pallas as pl
from jax.experimental.pallas import tpu as pltpu

LN_EPS = 1e-5
NEG_INF = -1e9


def _layer_norm(x, g, b):
    mu = jnp.mean(x, axis=-1, keepdims=True)
    var = jnp.mean(jnp.square(x - mu), axis=-1, keepdims=True)
    return (x - mu) * jax.lax.rsqrt(var + LN_EPS) * g + b


# ------------------------- fused Pallas kernel -------------------------

def clip_encoder_kernel(n_heads,
                        lens_ref,                       # scalar prefetch (SMEM): (B,) int32
                        x_ref,                          # (Bb, S, H) f32 embeddings
                        ln1_g, ln1_b,
                        qkvw, qkvb,                     # fused q/k/v projection (bf16 / f32)
                        ow, ob,
                        ln2_g, ln2_b,
                        f1w, f1b, f2w, f2b,
                        fln_g, fln_b,
                        o_ref,                          # (Bb, S, H) f32
                        x_sc):                          # VMEM scratch (Bb, S, H) f32
    """All L encoder layers + final LayerNorm for one block of Bb batch rows.

    grid = (B//Bb, L).  The L axis is 'arbitrary'; the f32 residual stream is carried in
    a VMEM scratch so the next layer's (bf16) weights DMA behind this layer's compute.
    """
    l = pl.program_id(1)
    n_layers = pl.num_programs(1)
    Bb, S, H = x_sc.shape
    nh = n_heads
    head_dim = H // nh

    @pl.when(l == 0)
    def _():
        x_sc[...] = x_ref[...]                          # load embeddings into the carry

    x = x_sc[...]                                       # (Bb, S, H) f32 residual stream
    x2 = x.reshape(Bb * S, H)                           # flat rows -> larger MXU M dim

    # causal + padding additive bias, built in-kernel from prefetched per-row lengths
    row = jax.lax.broadcasted_iota(jnp.int32, (S, S), 0)
    col = jax.lax.broadcasted_iota(jnp.int32, (S, S), 1)
    causal_ok = col <= row
    b0 = pl.program_id(0) * Bb
    bias = jnp.stack(
        [jnp.where(causal_ok & (col < lens_ref[b0 + i]), 0.0, NEG_INF)
         for i in range(Bb)], axis=0)                   # (Bb, S, S) f32

    # --- self-attention block (pre-LN), fused q/k/v projection ---
    h = _layer_norm(x2, ln1_g[0], ln1_b[0])
    hb = h.astype(jnp.bfloat16)
    qkv = jnp.dot(hb, qkvw[0], preferred_element_type=jnp.float32) + qkvb[0]   # (Bb*S, 3H)
    q = qkv[:, :H]                                      # 1/sqrt(head_dim) folded into weights
    k = qkv[:, H:2 * H]
    v = qkv[:, 2 * H:]

    def to_heads(t):                                    # (Bb*S, H) -> (Bb*nh, S, head_dim)
        return jnp.swapaxes(t.reshape(Bb, S, nh, head_dim), 1, 2).reshape(
            Bb * nh, S, head_dim)

    qh = to_heads(q).astype(jnp.bfloat16)
    kh = to_heads(k).astype(jnp.bfloat16)
    vh = to_heads(v).astype(jnp.bfloat16)

    s = jnp.einsum("bqd,bkd->bqk", qh, kh, preferred_element_type=jnp.float32)
    s = s.reshape(Bb, nh, S, S) + bias[:, None]
    s = s - jnp.max(s, axis=-1, keepdims=True)
    p = jnp.exp(s)
    p = p * pl.reciprocal(jnp.sum(p, axis=-1, keepdims=True), approx=True)

    a = jnp.einsum("bqk,bkd->bqd",
                   p.reshape(Bb * nh, S, S).astype(jnp.bfloat16), vh,
                   preferred_element_type=jnp.float32)               # (Bb*nh, S, head_dim)
    attn = jnp.swapaxes(a.reshape(Bb, nh, S, head_dim), 1, 2).reshape(Bb * S, H)
    attn = jnp.dot(attn.astype(jnp.bfloat16), ow[0],
                   preferred_element_type=jnp.float32) + ob[0]
    x2 = x2 + attn

    # --- MLP block (quick_gelu: x * sigmoid(1.702 x)) ---
    h2 = _layer_norm(x2, ln2_g[0], ln2_b[0])
    m = jnp.dot(h2.astype(jnp.bfloat16), f1w[0],
                preferred_element_type=jnp.float32) + f1b[0]
    m = m * jax.nn.sigmoid(1.702 * m)
    m = jnp.dot(m.astype(jnp.bfloat16), f2w[0],
                preferred_element_type=jnp.float32) + f2b[0]
    x2 = x2 + m

    x_sc[...] = x2.reshape(Bb, S, H)                    # carry to the next layer

    @pl.when(l == n_layers - 1)
    def _():
        o_ref[...] = _layer_norm(x2, fln_g[...], fln_b[...]).reshape(Bb, S, H)


# ------------------------- wrapper helpers -------------------------

def _choose_block_b(B, target=8):
    """Largest divisor of B <= target; keep >=2 parallel blocks for the 2 v7x TCs."""
    divisors = [d for d in range(1, min(B, target) + 1) if B % d == 0]
    bb = max(divisors)
    if B >= 2 and B // bb < 2:
        smaller = [d for d in divisors if B // d >= 2]
        if smaller:
            bb = max(smaller)
    return bb
    # TODO(synk): when B == 1 only one TensorCore is used on v7x; splitting heads or the
    # padded S dim across another parallel grid axis would recover the 2nd core.


def _vmem_limit_bytes(Bb, S, H, I, n_heads):
    """Computed VMEM budget: 2x per-layer bf16 weights + activations + scores + headroom."""
    per_layer_w = (H * 3 * H + H * H + H * I + I * H) * 2      # bf16 matmul weights
    per_layer_b = (3 * H + H + I + H + 4 * H) * 4              # f32 biases + LN params
    acts = Bb * S * H * 4
    scores = Bb * n_heads * S * S * 4
    needed = 2 * (per_layer_w + per_layer_b) + 4 * acts + 2 * scores + (8 << 20)
    kind = ""
    try:
        kind = jax.devices()[0].device_kind.lower()
    except Exception:
        pass
    # v5e/v6e have 128 MiB physical VMEM per core; v7x only 64 MiB -> stay well below it.
    cap = (96 << 20) if ("v5" in kind or "v6" in kind) else (48 << 20)
    return int(min(max(needed, 32 << 20), cap))


def _pack_qkv(params, n_heads):
    """Stack q/k/v projections into one (L, H, 3H) bf16 weight; fold 1/sqrt(hd) into q."""
    H = params["qw"].shape[1]
    scale = 1.0 / math.sqrt(H // n_heads)
    qw = (params["qw"].astype(jnp.float32) * scale).astype(jnp.bfloat16)
    qb = params["qb"] * scale
    qkvw = jnp.concatenate([qw, params["kw"], params["vw"]], axis=-1)   # (L, H, 3H) bf16
    qkvb = jnp.concatenate([qb, params["kb"], params["vb"]], axis=-1)   # (L, 1, 3H) f32
    return qkvw, qkvb


def run_encoder(x_emb, lens, params, n_heads, block_b=None):
    B, S, H = x_emb.shape
    L = params["qkvw"].shape[0]
    I = params["f1w"].shape[2]
    Bb = block_b if block_b is not None else _choose_block_b(B)
    assert B % Bb == 0

    def w_spec(*shape):   # one layer's slice of an L-stacked parameter
        return pl.BlockSpec((1,) + shape, lambda b, l, lens_ref: (l,) + (0,) * len(shape))

    def g_spec(shape):    # same full block for every grid point
        return pl.BlockSpec(shape, lambda b, l, lens_ref: (0,) * len(shape))

    grid_spec = pltpu.PrefetchScalarGridSpec(
        num_scalar_prefetch=1,                         # per-row valid lengths -> SMEM
        grid=(B // Bb, L),
        in_specs=[
            pl.BlockSpec((Bb, S, H), lambda b, l, lens_ref: (b, 0, 0)),   # embeddings
            w_spec(1, H), w_spec(1, H),                                   # ln1 gamma/beta
            w_spec(H, 3 * H), w_spec(1, 3 * H),                           # fused qkv proj
            w_spec(H, H), w_spec(1, H),                                   # out proj
            w_spec(1, H), w_spec(1, H),                                   # ln2 gamma/beta
            w_spec(H, I), w_spec(1, I),                                   # fc1
            w_spec(I, H), w_spec(1, H),                                   # fc2
            g_spec((1, H)), g_spec((1, H)),                               # final LN
        ],
        out_specs=pl.BlockSpec((Bb, S, H), lambda b, l, lens_ref: (b, 0, 0)),
        scratch_shapes=[pltpu.VMEM((Bb, S, H), jnp.float32)],
    )
    return pl.pallas_call(
        partial(clip_encoder_kernel, n_heads),
        out_shape=jax.ShapeDtypeStruct((B, S, H), jnp.float32),
        grid_spec=grid_spec,
        compiler_params=pltpu.CompilerParams(
            dimension_semantics=("parallel", "arbitrary"),
            vmem_limit_bytes=_vmem_limit_bytes(Bb, S, H, I, n_heads)),
    )(lens, x_emb,
      params["ln1_g"], params["ln1_b"],
      params["qkvw"], params["qkvb"],
      params["ow"], params["ob"],
      params["ln2_g"], params["ln2_b"],
      params["f1w"], params["f1b"], params["f2w"], params["f2b"],
      params["fln_g"], params["fln_b"])


def clip_text_encoder_pallas(input_ids, attention_mask, params, n_heads, block_b=None):
    """Returns last_hidden_state, shape (B, S, H), float32."""
    B, S = input_ids.shape
    # embedding lookup (gather) is plain-JAX glue outside the kernel
    x = (params["tok_emb"][input_ids] + params["pos_emb"][None, :S, :]).astype(jnp.float32)
    # pad the sequence to a lane-dense multiple of 128; padded keys are masked via lens,
    # padded query rows are sliced off at the end.
    S_pad = ((S + 127) // 128) * 128
    if S_pad != S:
        x = jnp.pad(x, ((0, 0), (0, S_pad - S), (0, 0)))
    # attention_mask is a prefix mask (padding='max_length'), so per-row lengths suffice
    lens = jnp.sum(attention_mask.astype(jnp.int32), axis=-1)            # (B,)
    kernel_params = dict(params)
    kernel_params["qkvw"], kernel_params["qkvb"] = _pack_qkv(params, n_heads)
    out = run_encoder(x, lens, kernel_params, n_heads, block_b)
    return out[:, :S, :]


# ------------------------- pure-JAX f32 reference -------------------------

def clip_text_encoder_ref(input_ids, attention_mask, params, n_heads):
    B, S = input_ids.shape
    x = params["tok_emb"][input_ids] + params["pos_emb"][None, :S, :]
    H = x.shape[-1]
    L = params["qw"].shape[0]
    head_dim = H // n_heads
    scale = 1.0 / math.sqrt(head_dim)
    row = jnp.arange(S)[:, None]
    col = jnp.arange(S)[None, :]
    causal = jnp.where(col > row, NEG_INF, 0.0)
    pad = jnp.where(attention_mask[:, None, :] > 0, 0.0, NEG_INF)
    bias = causal[None] + pad
    f32 = lambda a: a.astype(jnp.float32)
    for l in range(L):
        h = _layer_norm(x, params["ln1_g"][l], params["ln1_b"][l])
        q = h @ f32(params["qw"][l]) + params["qb"][l]
        k = h @ f32(params["kw"][l]) + params["kb"][l]
        v = h @ f32(params["vw"][l]) + params["vb"][l]
        qh = q.reshape(B, S, n_heads, head_dim).transpose(0, 2, 1, 3) * scale
        kh = k.reshape(B, S, n_heads, head_dim).transpose(0, 2, 1, 3)
        vh = v.reshape(B, S, n_heads, head_dim).transpose(0, 2, 1, 3)
        s = jnp.einsum("bhqd,bhkd->bhqk", qh, kh) + bias[:, None]
        p = jax.nn.softmax(s, axis=-1)
        a = jnp.einsum("bhqk,bhkd->bhqd", p, vh)
        a = a.transpose(0, 2, 1, 3).reshape(B, S, H)
        x = x + (a @ f32(params["ow"][l]) + params["ob"][l])
        h2 = _layer_norm(x, params["ln2_g"][l], params["ln2_b"][l])
        m = h2 @ f32(params["f1w"][l]) + params["f1b"][l]
        m = m * jax.nn.sigmoid(1.702 * m)
        x = x + (m @ f32(params["f2w"][l]) + params["f2b"][l])
    return _layer_norm(x, params["fln_g"], params["fln_b"])


# ------------------------- param init (L-stacked) -------------------------

def init_params(key, vocab, max_pos, hidden, inter, n_layers):
    ks = iter(jax.random.split(key, 4 + 12 * n_layers))

    def w(shape, scale=0.02, dtype=jnp.bfloat16):
        return (scale * jax.random.normal(next(ks), shape, jnp.float32)).astype(dtype)

    L = n_layers
    return {
        "tok_emb": 0.02 * jax.random.normal(next(ks), (vocab, hidden), jnp.float32),
        "pos_emb": 0.01 * jax.random.normal(next(ks), (max_pos, hidden), jnp.float32),
        "ln1_g": jnp.ones((L, 1, hidden), jnp.float32),
        "ln1_b": jnp.zeros((L, 1, hidden), jnp.float32),
        "qw": w((L, hidden, hidden)), "qb": w((L, 1, hidden), 0.01, jnp.float32),
        "kw": w((L, hidden, hidden)), "kb": w((L, 1, hidden), 0.01, jnp.float32),
        "vw": w((L, hidden, hidden)), "vb": w((L, 1, hidden), 0.01, jnp.float32),
        "ow": w((L, hidden, hidden)), "ob": w((L, 1, hidden), 0.01, jnp.float32),
        "ln2_g": jnp.ones((L, 1, hidden), jnp.float32),
        "ln2_b": jnp.zeros((L, 1, hidden), jnp.float32),
        "f1w": w((L, hidden, inter)), "f1b": w((L, 1, inter), 0.01, jnp.float32),
        "f2w": w((L, inter, hidden)), "f2b": w((L, 1, hidden), 0.01, jnp.float32),
        "fln_g": jnp.ones((1, hidden), jnp.float32),
        "fln_b": jnp.zeros((1, hidden), jnp.float32),
    }


if __name__ == "__main__":
    # small CLIP-text-like config
    B, S, H, HEADS, LAYERS = 2, 8, 32, 2, 2
    VOCAB, INTER = 64, 4 * H

    key = jax.random.PRNGKey(0)
    k_param, k_ids = jax.random.split(key)
    params = init_params(k_param, VOCAB, S, H, INTER, LAYERS)

    # synthetic "tokenized" prompts, padded to max_length=S
    input_ids = jax.random.randint(k_ids, (B, S), 0, VOCAB, dtype=jnp.int32)
    lens = jnp.array([S, S - 3], dtype=jnp.int32)
    attention_mask = (jnp.arange(S)[None, :] < lens[:, None]).astype(jnp.int32)

    out = clip_text_encoder_pallas(input_ids, attention_mask, params, HEADS)
    out = jax.block_until_ready(out)

    ref = clip_text_encoder_ref(input_ids, attention_mask, params, HEADS)
    assert out.shape == (B, S, H) and out.dtype == jnp.float32
    assert bool(jnp.all(jnp.isfinite(out)))
    max_diff = float(jnp.max(jnp.abs(out - ref)))
    assert max_diff < 5e-2, f"mismatch vs reference: {max_diff}"
    print("KERNEL_OK")
</pallas_src>

<mosaic_0001>
module attributes {stable_mosaic.version = 11 : i64} {
  func.func @clip_encoder_kernel(%arg0: i32, %arg1: i32, %arg2: memref<2xi32, #tpu.memory_space<smem>>, %arg3: memref<1x128x32xf32, #tpu.memory_space<vmem>>, %arg4: memref<1x1x32xf32, #tpu.memory_space<vmem>>, %arg5: memref<1x1x32xf32, #tpu.memory_space<vmem>>, %arg6: memref<1x32x96xbf16, #tpu.memory_space<vmem>>, %arg7: memref<1x1x96xf32, #tpu.memory_space<vmem>>, %arg8: memref<1x32x32xbf16, #tpu.memory_space<vmem>>, %arg9: memref<1x1x32xf32, #tpu.memory_space<vmem>>, %arg10: memref<1x1x32xf32, #tpu.memory_space<vmem>>, %arg11: memref<1x1x32xf32, #tpu.memory_space<vmem>>, %arg12: memref<1x32x128xbf16, #tpu.memory_space<vmem>>, %arg13: memref<1x1x128xf32, #tpu.memory_space<vmem>>, %arg14: memref<1x128x32xbf16, #tpu.memory_space<vmem>>, %arg15: memref<1x1x32xf32, #tpu.memory_space<vmem>>, %arg16: memref<1x32xf32, #tpu.memory_space<vmem>>, %arg17: memref<1x32xf32, #tpu.memory_space<vmem>>, %arg18: memref<1x128x32xf32, #tpu.memory_space<vmem>>, %arg19: memref<1x128x32xf32, #tpu.memory_space<vmem>>) attributes {dimension_semantics = [#tpu.dimension_semantics<parallel>, #tpu.dimension_semantics<arbitrary>], iteration_bounds = array<i64: 2, 2>, scalar_prefetch = 1 : i64, scratch_operands = 1 : i64, tpu.core_type = #tpu.core_type<tc>, window_params = [{transform_indices = @transform_0, window_bounds = array<i64: 1, 128, 32>}, {transform_indices = @transform_1, window_bounds = array<i64: 1, 1, 32>}, {transform_indices = @transform_2, window_bounds = array<i64: 1, 1, 32>}, {transform_indices = @transform_3, window_bounds = array<i64: 1, 32, 96>}, {transform_indices = @transform_4, window_bounds = array<i64: 1, 1, 96>}, {transform_indices = @transform_5, window_bounds = array<i64: 1, 32, 32>}, {transform_indices = @transform_6, window_bounds = array<i64: 1, 1, 32>}, {transform_indices = @transform_7, window_bounds = array<i64: 1, 1, 32>}, {transform_indices = @transform_8, window_bounds = array<i64: 1, 1, 32>}, {transform_indices = @transform_9, window_bounds = array<i64: 1, 32, 128>}, {transform_indices = @transform_10, window_bounds = array<i64: 1, 1, 128>}, {transform_indices = @transform_11, window_bounds = array<i64: 1, 128, 32>}, {transform_indices = @transform_12, window_bounds = array<i64: 1, 1, 32>}, {pipeline_mode = #tpu.pipeline_mode<synchronous>, transform_indices = @transform_13, window_bounds = array<i64: 1, 32>}, {pipeline_mode = #tpu.pipeline_mode<synchronous>, transform_indices = @transform_14, window_bounds = array<i64: 1, 32>}, {transform_indices = @transform_15, window_bounds = array<i64: 1, 128, 32>}]} {
    %c0_i32 = arith.constant 0 : i32
    %0 = arith.cmpi eq, %arg1, %c0_i32 : i32
    %1 = arith.extui %0 : i1 to i32
    %c0_i32_0 = arith.constant 0 : i32
    %2 = arith.cmpi ne, %1, %c0_i32_0 : i32
    scf.if %2 {
      %c0_66 = arith.constant 0 : index
      %c0_67 = arith.constant 0 : index
      %c0_68 = arith.constant 0 : index
      %154 = vector.load %arg3[%c0_66, %c0_67, %c0_68] : memref<1x128x32xf32, #tpu.memory_space<vmem>>, vector<1x128x32xf32>
      %c0_69 = arith.constant 0 : index
      %c0_70 = arith.constant 0 : index
      %c0_71 = arith.constant 0 : index
      %155 = vector.load %arg19[%c0_69, %c0_70, %c0_71] : memref<1x128x32xf32, #tpu.memory_space<vmem>>, vector<1x128x32xf32>
      tpu.vector_store %arg19[%c0_69, %c0_70, %c0_71], %154 {strides = array<i32>} : memref<1x128x32xf32, #tpu.memory_space<vmem>>, vector<1x128x32xf32>,
    } else {
    }
    %c0 = arith.constant 0 : index
    %c0_1 = arith.constant 0 : index
    %c0_2 = arith.constant 0 : index
    %3 = vector.load %arg19[%c0, %c0_1, %c0_2] : memref<1x128x32xf32, #tpu.memory_space<vmem>>, vector<1x128x32xf32>
    %4 = vector.shape_cast %3 : vector<1x128x32xf32> to vector<128x32xf32>
    %5 = tpu.iota {dimensions = array<i32: 0>} : vector<128x128xi32>
    %6 = tpu.iota {dimensions = array<i32: 1>} : vector<128x128xi32>
    %7 = arith.cmpi sle, %6, %5 : vector<128x128xi32>
    %c1_i32 = arith.constant 1 : i32
    %8 = arith.muli %arg0, %c1_i32 : i32
    %c0_i32_3 = arith.constant 0 : i32
    %9 = arith.addi %8, %c0_i32_3 : i32
    %10 = arith.index_cast %9 : i32 to index
    %11 = memref.load %arg2[%10] : memref<2xi32, #tpu.memory_space<smem>>
    %12 = vector.broadcast %11 : i32 to vector<128x128xi32>
    %13 = arith.cmpi slt, %6, %12 : vector<128x128xi32>
    %14 = arith.andi %7, %13 : vector<128x128xi1>
    %cst = arith.constant 0.000000e+00 : f32
    %cst_4 = arith.constant -1.000000e+09 : f32
    %15 = vector.broadcast %cst : f32 to vector<128x128xf32>
    %16 = vector.broadcast %cst_4 : f32 to vector<128x128xf32>
    %17 = arith.select %14, %15, %16 : vector<128x128xi1>, vector<128x128xf32>
    %18 = vector.shape_cast %17 : vector<128x128xf32> to vector<1x128x128xf32>
    %c0_5 = arith.constant 0 : index
    %c0_6 = arith.constant 0 : index
    %c0_7 = arith.constant 0 : index
    %19 = vector.load %arg4[%c0_5, %c0_6, %c0_7] : memref<1x1x32xf32, #tpu.memory_space<vmem>>, vector<1x1x32xf32>
    %20 = vector.shape_cast %19 : vector<1x1x32xf32> to vector<1x32xf32>
    %c0_8 = arith.constant 0 : index
    %c0_9 = arith.constant 0 : index
    %c0_10 = arith.constant 0 : index
    %21 = vector.load %arg5[%c0_8, %c0_9, %c0_10] : memref<1x1x32xf32, #tpu.memory_space<vmem>>, vector<1x1x32xf32>
    %22 = vector.shape_cast %21 : vector<1x1x32xf32> to vector<1x32xf32>
    %cst_11 = arith.constant dense<0.000000e+00> : vector<128xf32>
    %23 = vector.multi_reduction <add>, %4, %cst_11 [1] : vector<128x32xf32> to vector<128xf32>
    %24 = vector.shape_cast %23 : vector<128xf32> to vector<128x1xf32>
    %cst_12 = arith.constant 3.200000e+01 : f32
    %25 = vector.broadcast %cst_12 : f32 to vector<128x1xf32>
    %26 = arith.divf %24, %25 : vector<128x1xf32>
    %27 = vector.broadcast %26 : vector<128x1xf32> to vector<128x32xf32>
    %28 = arith.subf %4, %27 : vector<128x32xf32>
    %29 = arith.mulf %28, %28 : vector<128x32xf32>
    %cst_13 = arith.constant dense<0.000000e+00> : vector<128xf32>
    %30 = vector.multi_reduction <add>, %29, %cst_13 [1] : vector<128x32xf32> to vector<128xf32>
    %31 = vector.shape_cast %30 : vector<128xf32> to vector<128x1xf32>
    %cst_14 = arith.constant 3.200000e+01 : f32
    %32 = vector.broadcast %cst_14 : f32 to vector<128x1xf32>
    %33 = arith.divf %31, %32 : vector<128x1xf32>
    %34 = vector.broadcast %26 : vector<128x1xf32> to vector<128x32xf32>
    %35 = arith.subf %4, %34 : vector<128x32xf32>
    %cst_15 = arith.constant 9.99999974E-6 : f32
    %36 = vector.broadcast %cst_15 : f32 to vector<128x1xf32>
    %37 = arith.addf %33, %36 : vector<128x1xf32>
    %38 = math.rsqrt %37 : vector<128x1xf32>
    %39 = vector.broadcast %38 : vector<128x1xf32> to vector<128x32xf32>
    %40 = arith.mulf %35, %39 : vector<128x32xf32>
    %41 = vector.broadcast %20 : vector<1x32xf32> to vector<128x32xf32>
    %42 = arith.mulf %40, %41 : vector<128x32xf32>
    %43 = vector.broadcast %22 : vector<1x32xf32> to vector<128x32xf32>
    %44 = arith.addf %42, %43 : vector<128x32xf32>
    %45 = arith.truncf %44 : vector<128x32xf32> to vector<128x32xbf16>
    %c0_16 = arith.constant 0 : index
    %c0_17 = arith.constant 0 : index
    %c0_18 = arith.constant 0 : index
    %46 = vector.load %arg6[%c0_16, %c0_17, %c0_18] : memref<1x32x96xbf16, #tpu.memory_space<vmem>>, vector<1x32x96xbf16>
    %47 = vector.shape_cast %46 : vector<1x32x96xbf16> to vector<32x96xbf16>
    %cst_19 = arith.constant dense<0.000000e+00> : vector<128x96xf32>
    %48 = tpu.matmul %45, %47, %cst_19 {dimension_numbers = #tpu.dot_dimension_numbers<[1], [0], [0], [1], [0, 0, 1, 1], [], []>} : vector<128x32xbf16>, vector<32x96xbf16>, vector<128x96xf32> -> vector<128x96xf32>
    %c0_20 = arith.constant 0 : index
    %c0_21 = arith.constant 0 : index
    %c0_22 = arith.constant 0 : index
    %49 = vector.load %arg7[%c0_20, %c0_21, %c0_22] : memref<1x1x96xf32, #tpu.memory_space<vmem>>, vector<1x1x96xf32>
    %50 = vector.shape_cast %49 : vector<1x1x96xf32> to vector<1x96xf32>
    %51 = vector.broadcast %50 : vector<1x96xf32> to vector<128x96xf32>
    %52 = arith.addf %48, %51 : vector<128x96xf32>
    %53 = vector.extract_strided_slice %52 {offsets = [0, 0], sizes = [128, 32], strides = [1, 1]} : vector<128x96xf32> to vector<128x32xf32>
    %54 = vector.extract_strided_slice %52 {offsets = [0, 32], sizes = [128, 32], strides = [1, 1]} : vector<128x96xf32> to vector<128x32xf32>
    %55 = vector.extract_strided_slice %52 {offsets = [0, 64], sizes = [128, 32], strides = [1, 1]} : vector<128x96xf32> to vector<128x32xf32>
    %56 = vector.shape_cast %53 : vector<128x32xf32> to vector<1x128x2x16xf32>
    %57 = tpu.transpose %56, [0, 2, 1, 3] : vector<1x128x2x16xf32> -> vector<1x2x128x16xf32>
    %58 = vector.shape_cast %57 : vector<1x2x128x16xf32> to vector<2x128x16xf32>
    %59 = arith.truncf %58 : vector<2x128x16xf32> to vector<2x128x16xbf16>
    %60 = vector.shape_cast %54 : vector<128x32xf32> to vector<1x128x2x16xf32>
    %61 = tpu.transpose %60, [0, 2, 1, 3] : vector<1x128x2x16xf32> -> vector<1x2x128x16xf32>
    %62 = vector.shape_cast %61 : vector<1x2x128x16xf32> to vector<2x128x16xf32>
    %63 = arith.truncf %62 : vector<2x128x16xf32> to vector<2x128x16xbf16>
    %64 = vector.shape_cast %55 : vector<128x32xf32> to vector<1x128x2x16xf32>
    %65 = tpu.transpose %64, [0, 2, 1, 3] : vector<1x128x2x16xf32> -> vector<1x2x128x16xf32>
    %66 = vector.shape_cast %65 : vector<1x2x128x16xf32> to vector<2x128x16xf32>
    %67 = arith.truncf %66 : vector<2x128x16xf32> to vector<2x128x16xbf16>
    "tpu.trace_start"() <{level = 10 : i32, message = "bqd,bkd->bqk"}> : () -> ()
    %cst_23 = arith.constant dense<0.000000e+00> : vector<2x128x128xf32>
    %68 = tpu.matmul %59, %63, %cst_23 {dimension_numbers = #tpu.dot_dimension_numbers<[2], [2], [1], [1], [0, 0, 0, 1, 1, 1], [0], [0]>} : vector<2x128x16xbf16>, vector<2x128x16xbf16>, vector<2x128x128xf32> -> vector<2x128x128xf32>
    "tpu.trace_stop"() : () -> ()
    %69 = vector.shape_cast %68 : vector<2x128x128xf32> to vector<1x2x128x128xf32>
    %70 = vector.shape_cast %18 : vector<1x128x128xf32> to vector<1x1x128x128xf32>
    %71 = vector.broadcast %70 : vector<1x1x128x128xf32> to vector<1x2x128x128xf32>
    %72 = arith.addf %69, %71 : vector<1x2x128x128xf32>
    %cst_24 = arith.constant dense<0xFF800000> : vector<1x2x128xf32>
    %73 = vector.multi_reduction <maximumf>, %72, %cst_24 [3] : vector<1x2x128x128xf32> to vector<1x2x128xf32>
    %74 = vector.shape_cast %73 : vector<1x2x128xf32> to vector<1x2x128x1xf32>
    %75 = vector.broadcast %74 : vector<1x2x128x1xf32> to vector<1x2x128x128xf32>
    %76 = arith.subf %72, %75 : vector<1x2x128x128xf32>
    %77 = math.exp %76 : vector<1x2x128x128xf32>
    %cst_25 = arith.constant dense<0.000000e+00> : vector<1x2x128xf32>
    %78 = vector.multi_reduction <add>, %77, %cst_25 [3] : vector<1x2x128x128xf32> to vector<1x2x128xf32>
    %79 = vector.shape_cast %78 : vector<1x2x128xf32> to vector<1x2x128x1xf32>
    %80 = tpu.reciprocal %79 {approx = true} : vector<1x2x128x1xf32> -> vector<1x2x128x1xf32>
    %81 = vector.broadcast %80 : vector<1x2x128x1xf32> to vector<1x2x128x128xf32>
    %82 = arith.mulf %77, %81 : vector<1x2x128x128xf32>
    %83 = vector.shape_cast %82 : vector<1x2x128x128xf32> to vector<2x128x128xf32>
    %84 = arith.truncf %83 : vector<2x128x128xf32> to vector<2x128x128xbf16>
    "tpu.trace_start"() <{level = 10 : i32, message = "bqk,bkd->bqd"}> : () -> ()
    %cst_26 = arith.constant dense<0.000000e+00> : vector<2x128x16xf32>
    %85 = tpu.matmul %84, %67, %cst_26 {dimension_numbers = #tpu.dot_dimension_numbers<[2], [1], [1], [2], [0, 0, 0, 1, 1, 2], [0], [0]>} : vector<2x128x128xbf16>, vector<2x128x16xbf16>, vector<2x128x16xf32> -> vector<2x128x16xf32>
    "tpu.trace_stop"() : () -> ()
    %86 = vector.shape_cast %85 : vector<2x128x16xf32> to vector<1x2x128x16xf32>
    %87 = tpu.transpose %86, [0, 2, 1, 3] : vector<1x2x128x16xf32> -> vector<1x128x2x16xf32>
    %88 = vector.shape_cast %87 : vector<1x128x2x16xf32> to vector<128x32xf32>
    %89 = arith.truncf %88 : vector<128x32xf32> to vector<128x32xbf16>
    %c0_27 = arith.constant 0 : index
    %c0_28 = arith.constant 0 : index
    %c0_29 = arith.constant 0 : index
    %90 = vector.load %arg8[%c0_27, %c0_28, %c0_29] : memref<1x32x32xbf16, #tpu.memory_space<vmem>>, vector<1x32x32xbf16>
    %91 = vector.shape_cast %90 : vector<1x32x32xbf16> to vector<32x32xbf16>
    %cst_30 = arith.constant dense<0.000000e+00> : vector<128x32xf32>
    %92 = tpu.matmul %89, %91, %cst_30 {dimension_numbers = #tpu.dot_dimension_numbers<[1], [0], [0], [1], [0, 0, 1, 1], [], []>} : vector<128x32xbf16>, vector<32x32xbf16>, vector<128x32xf32> -> vector<128x32xf32>
    %c0_31 = arith.constant 0 : index
    %c0_32 = arith.constant 0 : index
    %c0_33 = arith.constant 0 : index
    %93 = vector.load %arg9[%c0_31, %c0_32, %c0_33] : memref<1x1x32xf32, #tpu.memory_space<vmem>>, vector<1x1x32xf32>
    %94 = vector.shape_cast %93 : vector<1x1x32xf32> to vector<1x32xf32>
    %95 = vector.broadcast %94 : vector<1x32xf32> to vector<128x32xf32>
    %96 = arith.addf %92, %95 : vector<128x32xf32>
    %97 = arith.addf %4, %96 : vector<128x32xf32>
    %c0_34 = arith.constant 0 : index
    %c0_35 = arith.constant 0 : index
    %c0_36 = arith.constant 0 : index
    %98 = vector.load %arg10[%c0_34, %c0_35, %c0_36] : memref<1x1x32xf32, #tpu.memory_space<vmem>>, vector<1x1x32xf32>
    %99 = vector.shape_cast %98 : vector<1x1x32xf32> to vector<1x32xf32>
    %c0_37 = arith.constant 0 : index
    %c0_38 = arith.constant 0 : index
    %c0_39 = arith.constant 0 : index
    %100 = vector.load %arg11[%c0_37, %c0_38, %c0_39] : memref<1x1x32xf32, #tpu.memory_space<vmem>>, vector<1x1x32xf32>
    %101 = vector.shape_cast %100 : vector<1x1x32xf32> to vector<1x32xf32>
    %cst_40 = arith.constant dense<0.000000e+00> : vector<128xf32>
    %102 = vector.multi_reduction <add>, %97, %cst_40 [1] : vector<128x32xf32> to vector<128xf32>
    %103 = vector.shape_cast %102 : vector<128xf32> to vector<128x1xf32>
    %cst_41 = arith.constant 3.200000e+01 : f32
    %104 = vector.broadcast %cst_41 : f32 to vector<128x1xf32>
    %105 = arith.divf %103, %104 : vector<128x1xf32>
    %106 = vector.broadcast %105 : vector<128x1xf32> to vector<128x32xf32>
    %107 = arith.subf %97, %106 : vector<128x32xf32>
    %108 = arith.mulf %107, %107 : vector<128x32xf32>
    %cst_42 = arith.constant dense<0.000000e+00> : vector<128xf32>
    %109 = vector.multi_reduction <add>, %108, %cst_42 [1] : vector<128x32xf32> to vector<128xf32>
    %110 = vector.shape_cast %109 : vector<128xf32> to vector<128x1xf32>
    %cst_43 = arith.constant 3.200000e+01 : f32
    %111 = vector.broadcast %cst_43 : f32 to vector<128x1xf32>
    %112 = arith.divf %110, %111 : vector<128x1xf32>
    %113 = vector.broadcast %105 : vector<128x1xf32> to vector<128x32xf32>
    %114 = arith.subf %97, %113 : vector<128x32xf32>
    %cst_44 = arith.constant 9.99999974E-6 : f32
    %115 = vector.broadcast %cst_44 : f32 to vector<128x1xf32>
    %116 = arith.addf %112, %115 : vector<128x1xf32>
    %117 = math.rsqrt %116 : vector<128x1xf32>
    %118 = vector.broadcast %117 : vector<128x1xf32> to vector<128x32xf32>
    %119 = arith.mulf %114, %118 : vector<128x32xf32>
    %120 = vector.broadcast %99 : vector<1x32xf32> to vector<128x32xf32>
    %121 = arith.mulf %119, %120 : vector<128x32xf32>
    %122 = vector.broadcast %101 : vector<1x32xf32> to vector<128x32xf32>
    %123 = arith.addf %121, %122 : vector<128x32xf32>
    %124 = arith.truncf %123 : vector<128x32xf32> to vector<128x32xbf16>
    %c0_45 = arith.constant 0 : index
    %c0_46 = arith.constant 0 : index
    %c0_47 = arith.constant 0 : index
    %125 = vector.load %arg12[%c0_45, %c0_46, %c0_47] : memref<1x32x128xbf16, #tpu.memory_space<vmem>>, vector<1x32x128xbf16>
    %126 = vector.shape_cast %125 : vector<1x32x128xbf16> to vector<32x128xbf16>
    %cst_48 = arith.constant dense<0.000000e+00> : vector<128x128xf32>
    %127 = tpu.matmul %124, %126, %cst_48 {dimension_numbers = #tpu.dot_dimension_numbers<[1], [0], [0], [1], [0, 0, 1, 1], [], []>} : vector<128x32xbf16>, vector<32x128xbf16>, vector<128x128xf32> -> vector<128x128xf32>
    %c0_49 = arith.constant 0 : index
    %c0_50 = arith.constant 0 : index
    %c0_51 = arith.constant 0 : index
    %128 = vector.load %arg13[%c0_49, %c0_50, %c0_51] : memref<1x1x128xf32, #tpu.memory_space<vmem>>, vector<1x1x128xf32>
    %129 = vector.shape_cast %128 : vector<1x1x128xf32> to vector<1x128xf32>
    %130 = vector.broadcast %129 : vector<1x128xf32> to vector<128x128xf32>
    %131 = arith.addf %127, %130 : vector<128x128xf32>
    %cst_52 = arith.constant 1.702000e+00 : f32
    %132 = vector.broadcast %cst_52 : f32 to vector<128x128xf32>
    %133 = arith.mulf %132, %131 : vector<128x128xf32>
    %134 = arith.negf %133 : vector<128x128xf32>
    %135 = math.exp %134 : vector<128x128xf32>
    %cst_53 = arith.constant 1.000000e+00 : f32
    %136 = vector.broadcast %cst_53 : f32 to vector<128x128xf32>
    %137 = arith.addf %136, %135 : vector<128x128xf32>
    %138 = arith.divf %136, %137 : vector<128x128xf32>
    %139 = arith.mulf %131, %138 : vector<128x128xf32>
    %140 = arith.truncf %139 : vector<128x128xf32> to vector<128x128xbf16>
    %c0_54 = arith.constant 0 : index
    %c0_55 = arith.constant 0 : index
    %c0_56 = arith.constant 0 : index
    %141 = vector.load %arg14[%c0_54, %c0_55, %c0_56] : memref<1x128x32xbf16, #tpu.memory_space<vmem>>, vector<1x128x32xbf16>
    %142 = vector.shape_cast %141 : vector<1x128x32xbf16> to vector<128x32xbf16>
    %cst_57 = arith.constant dense<0.000000e+00> : vector<128x32xf32>
    %143 = tpu.matmul %140, %142, %cst_57 {dimension_numbers = #tpu.dot_dimension_numbers<[1], [0], [0], [1], [0, 0, 1, 1], [], []>} : vector<128x128xbf16>, vector<128x32xbf16>, vector<128x32xf32> -> vector<128x32xf32>
    %c0_58 = arith.constant 0 : index
    %c0_59 = arith.constant 0 : index
    %c0_60 = arith.constant 0 : index
    %144 = vector.load %arg15[%c0_58, %c0_59, %c0_60] : memref<1x1x32xf32, #tpu.memory_space<vmem>>, vector<1x1x32xf32>
    %145 = vector.shape_cast %144 : vector<1x1x32xf32> to vector<1x32xf32>
    %146 = vector.broadcast %145 : vector<1x32xf32> to vector<128x32xf32>
    %147 = arith.addf %143, %146 : vector<128x32xf32>
    %148 = arith.addf %97, %147 : vector<128x32xf32>
    %149 = vector.shape_cast %148 : vector<128x32xf32> to vector<1x128x32xf32>
    %c0_61 = arith.constant 0 : index
    %c0_62 = arith.constant 0 : index
    %c0_63 = arith.constant 0 : index
    %150 = vector.load %arg19[%c0_61, %c0_62, %c0_63] : memref<1x128x32xf32, #tpu.memory_space<vmem>>, vector<1x128x32xf32>
    tpu.vector_store %arg19[%c0_61, %c0_62, %c0_63], %149 {strides = array<i32>} : memref<1x128x32xf32, #tpu.memory_space<vmem>>, vector<1x128x32xf32>,
    %c1_i32_64 = arith.constant 1 : i32
    %151 = arith.cmpi eq, %arg1, %c1_i32_64 : i32
    %152 = arith.extui %151 : i1 to i32
    %c0_i32_65 = arith.constant 0 : i32
    %153 = arith.cmpi ne, %152, %c0_i32_65 : i32
    scf.if %153 {
      %c0_66 = arith.constant 0 : index
      %c0_67 = arith.constant 0 : index
      %154 = vector.load %arg16[%c0_66, %c0_67] : memref<1x32xf32, #tpu.memory_space<vmem>>, vector<1x32xf32>
      %c0_68 = arith.constant 0 : index
      %c0_69 = arith.constant 0 : index
      %155 = vector.load %arg17[%c0_68, %c0_69] : memref<1x32xf32, #tpu.memory_space<vmem>>, vector<1x32xf32>
      %cst_70 = arith.constant dense<0.000000e+00> : vector<128xf32>
      %156 = vector.multi_reduction <add>, %148, %cst_70 [1] : vector<128x32xf32> to vector<128xf32>
      %157 = vector.shape_cast %156 : vector<128xf32> to vector<128x1xf32>
      %cst_71 = arith.constant 3.200000e+01 : f32
      %158 = vector.broadcast %cst_71 : f32 to vector<128x1xf32>
      %159 = arith.divf %157, %158 : vector<128x1xf32>
      %160 = vector.broadcast %159 : vector<128x1xf32> to vector<128x32xf32>
      %161 = arith.subf %148, %160 : vector<128x32xf32>
      %162 = arith.mulf %161, %161 : vector<128x32xf32>
      %cst_72 = arith.constant dense<0.000000e+00> : vector<128xf32>
      %163 = vector.multi_reduction <add>, %162, %cst_72 [1] : vector<128x32xf32> to vector<128xf32>
      %164 = vector.shape_cast %163 : vector<128xf32> to vector<128x1xf32>
      %cst_73 = arith.constant 3.200000e+01 : f32
      %165 = vector.broadcast %cst_73 : f32 to vector<128x1xf32>
      %166 = arith.divf %164, %165 : vector<128x1xf32>
      %167 = vector.broadcast %159 : vector<128x1xf32> to vector<128x32xf32>
      %168 = arith.subf %148, %167 : vector<128x32xf32>
      %cst_74 = arith.constant 9.99999974E-6 : f32
      %169 = vector.broadcast %cst_74 : f32 to vector<128x1xf32>
      %170 = arith.addf %166, %169 : vector<128x1xf32>
      %171 = math.rsqrt %170 : vector<128x1xf32>
      %172 = vector.broadcast %171 : vector<128x1xf32> to vector<128x32xf32>
      %173 = arith.mulf %168, %172 : vector<128x32xf32>
      %174 = vector.broadcast %154 : vector<1x32xf32> to vector<128x32xf32>
      %175 = arith.mulf %173, %174 : vector<128x32xf32>
      %176 = vector.broadcast %155 : vector<1x32xf32> to vector<128x32xf32>
      %177 = arith.addf %175, %176 : vector<128x32xf32>
      %178 = vector.shape_cast %177 : vector<128x32xf32> to vector<1x128x32xf32>
      %c0_75 = arith.constant 0 : index
      %c0_76 = arith.constant 0 : index
      %c0_77 = arith.constant 0 : index
      %179 = vector.load %arg18[%c0_75, %c0_76, %c0_77] : memref<1x128x32xf32, #tpu.memory_space<vmem>>, vector<1x128x32xf32>
      tpu.vector_store %arg18[%c0_75, %c0_76, %c0_77], %178 {strides = array<i32>} : memref<1x128x32xf32, #tpu.memory_space<vmem>>, vector<1x128x32xf32>,
    } else {
    }
    return
  }
  func.func @transform_0(%arg0: i32, %arg1: i32, %arg2: memref<2xi32, #tpu.memory_space<smem>>) -> (i32, i32, i32) {
    %c0_i32 = arith.constant 0 : i32
    %c0_i32_0 = arith.constant 0 : i32
    %c0_i32_1 = arith.constant 0 : i32
    return %arg0, %c0_i32, %c0_i32_0 : i32, i32, i32
  }
  func.func @transform_1(%arg0: i32, %arg1: i32, %arg2: memref<2xi32, #tpu.memory_space<smem>>) -> (i32, i32, i32) {
    %c0_i32 = arith.constant 0 : i32
    %c0_i32_0 = arith.constant 0 : i32
    %c0_i32_1 = arith.constant 0 : i32
    return %arg1, %c0_i32, %c0_i32_0 : i32, i32, i32
  }
  func.func @transform_2(%arg0: i32, %arg1: i32, %arg2: memref<2xi32, #tpu.memory_space<smem>>) -> (i32, i32, i32) {
    %c0_i32 = arith.constant 0 : i32
    %c0_i32_0 = arith.constant 0 : i32
    %c0_i32_1 = arith.constant 0 : i32
    return %arg1, %c0_i32, %c0_i32_0 : i32, i32, i32
  }
  func.func @transform_3(%arg0: i32, %arg1: i32, %arg2: memref<2xi32, #tpu.memory_space<smem>>) -> (i32, i32, i32) {
    %c0_i32 = arith.constant 0 : i32
    %c0_i32_0 = arith.constant 0 : i32
    %c0_i32_1 = arith.constant 0 : i32
    return %arg1, %c0_i32, %c0_i32_0 : i32, i32, i32
  }
  func.func @transform_4(%arg0: i32, %arg1: i32, %arg2: memref<2xi32, #tpu.memory_space<smem>>) -> (i32, i32, i32) {
    %c0_i32 = arith.constant 0 : i32
    %c0_i32_0 = arith.constant 0 : i32
    %c0_i32_1 = arith.constant 0 : i32
    return %arg1, %c0_i32, %c0_i32_0 : i32, i32, i32
  }
  func.func @transform_5(%arg0: i32, %arg1: i32, %arg2: memref<2xi32, #tpu.memory_space<smem>>) -> (i32, i32, i32) {
    %c0_i32 = arith.constant 0 : i32
    %c0_i32_0 = arith.constant 0 : i32
    %c0_i32_1 = arith.constant 0 : i32
    return %arg1, %c0_i32, %c0_i32_0 : i32, i32, i32
  }
  func.func @transform_6(%arg0: i32, %arg1: i32, %arg2: memref<2xi32, #tpu.memory_space<smem>>) -> (i32, i32, i32) {
    %c0_i32 = arith.constant 0 : i32
    %c0_i32_0 = arith.constant 0 : i32
    %c0_i32_1 = arith.constant 0 : i32
    return %arg1, %c0_i32, %c0_i32_0 : i32, i32, i32
  }
  func.func @transform_7(%arg0: i32, %arg1: i32, %arg2: memref<2xi32, #tpu.memory_space<smem>>) -> (i32, i32, i32) {
    %c0_i32 = arith.constant 0 : i32
    %c0_i32_0 = arith.constant 0 : i32
    %c0_i32_1 = arith.constant 0 : i32
    return %arg1, %c0_i32, %c0_i32_0 : i32, i32, i32
  }
  func.func @transform_8(%arg0: i32, %arg1: i32, %arg2: memref<2xi32, #tpu.memory_space<smem>>) -> (i32, i32, i32) {
    %c0_i32 = arith.constant 0 : i32
    %c0_i32_0 = arith.constant 0 : i32
    %c0_i32_1 = arith.constant 0 : i32
    return %arg1, %c0_i32, %c0_i32_0 : i32, i32, i32
  }
  func.func @transform_9(%arg0: i32, %arg1: i32, %arg2: memref<2xi32, #tpu.memory_space<smem>>) -> (i32, i32, i32) {
    %c0_i32 = arith.constant 0 : i32
    %c0_i32_0 = arith.constant 0 : i32
    %c0_i32_1 = arith.constant 0 : i32
    return %arg1, %c0_i32, %c0_i32_0 : i32, i32, i32
  }
  func.func @transform_10(%arg0: i32, %arg1: i32, %arg2: memref<2xi32, #tpu.memory_space<smem>>) -> (i32, i32, i32) {
    %c0_i32 = arith.constant 0 : i32
    %c0_i32_0 = arith.constant 0 : i32
    %c0_i32_1 = arith.constant 0 : i32
    return %arg1, %c0_i32, %c0_i32_0 : i32, i32, i32
  }
  func.func @transform_11(%arg0: i32, %arg1: i32, %arg2: memref<2xi32, #tpu.memory_space<smem>>) -> (i32, i32, i32) {
    %c0_i32 = arith.constant 0 : i32
    %c0_i32_0 = arith.constant 0 : i32
    %c0_i32_1 = arith.constant 0 : i32
    return %arg1, %c0_i32, %c0_i32_0 : i32, i32, i32
  }
  func.func @transform_12(%arg0: i32, %arg1: i32, %arg2: memref<2xi32, #tpu.memory_space<smem>>) -> (i32, i32, i32) {
    %c0_i32 = arith.constant 0 : i32
    %c0_i32_0 = arith.constant 0 : i32
    %c0_i32_1 = arith.constant 0 : i32
    return %arg1, %c0_i32, %c0_i32_0 : i32, i32, i32
  }
  func.func @transform_13(%arg0: i32, %arg1: i32, %arg2: memref<2xi32, #tpu.memory_space<smem>>) -> (i32, i32) {
    %c0_i32 = arith.constant 0 : i32
    %c0_i32_0 = arith.constant 0 : i32
    %c0_i32_1 = arith.constant 0 : i32
    return %c0_i32, %c0_i32_0 : i32, i32
  }
  func.func @transform_14(%arg0: i32, %arg1: i32, %arg2: memref<2xi32, #tpu.memory_space<smem>>) -> (i32, i32) {
    %c0_i32 = arith.constant 0 : i32
    %c0_i32_0 = arith.constant 0 : i32
    %c0_i32_1 = arith.constant 0 : i32
    return %c0_i32, %c0_i32_0 : i32, i32
  }
  func.func @transform_15(%arg0: i32, %arg1: i32, %arg2: memref<2xi32, #tpu.memory_space<smem>>) -> (i32, i32, i32) {
    %c0_i32 = arith.constant 0 : i32
    %c0_i32_0 = arith.constant 0 : i32
    %c0_i32_1 = arith.constant 0 : i32
    return %arg0, %c0_i32, %c0_i32_0 : i32, i32, i32
  }
}

</mosaic_0001>

<bundles_post_ra>
// kernel: tpu_custom_call.1
= control target key start
LH: loop header
LB: loop body
LE: loop exit
PB: predicated region body
PF: predicated region fallthrough
CT: control target
= control target key end

     0   :  { %s11046_s24 = smov [#allocation4]   ;;  %s17442_s0 = inlined_call_operand.vmem [shape: s32[2], index: 0, kind: input, shape index: {}]   ;;  %s17443_s1 = inlined_call_operand.vmem [shape: f32[2,128,32], index: 1, kind: input, shape index: {}]   ;;  %s17444_s2 = inlined_call_operand.vmem [shape: f32[2,1,32], index: 2, kind: input, shape index: {}]   ;;  %s17445_s3 = inlined_call_operand.vmem [shape: f32[2,1,32], index: 3, kind: input, shape index: {}]   ;;  %s17446_s4 = inlined_call_operand.vmem [shape: bf16[2,32,96], index: 4, kind: input, shape index: {}]   ;;  %s17447_s5 = inlined_call_operand.vmem [shape: f32[2,1,96], index: 5, kind: input, shape index: {}]   ;;  %s17448_s6 = inlined_call_operand.vmem [shape: bf16[2,32,32], index: 6, kind: input, shape index: {}]   ;;  %s17449_s7 = inlined_call_operand.vmem [shape: f32[2,1,32], index: 7, kind: input, shape index: {}]   ;;  %s17450_s8 = inlined_call_operand.vmem [shape: f32[2,1,32], index: 8, kind: input, shape index: {}]   ;;  %s17451_s9 = inlined_call_operand.vmem [shape: f32[2,1,32], index: 9, kind: input, shape index: {}]   ;;  %s17452_s10 = inlined_call_operand.vmem [shape: bf16[2,32,128], index: 10, kind: input, shape index: {}]   ;;  %s17453_s11 = inlined_call_operand.vmem [shape: f32[2,1,128], index: 11, kind: input, shape index: {}]   ;;  %s17454_s12 = inlined_call_operand.vmem [shape: bf16[2,128,32], index: 12, kind: input, shape index: {}]   ;;  %s17455_s13 = inlined_call_operand.vmem [shape: f32[2,1,32], index: 13, kind: input, shape index: {}]   ;;  %s17456_s14 = inlined_call_operand.vmem [shape: f32[1,32], index: 14, kind: input, shape index: {}]   ;;  %s17457_s15 = inlined_call_operand.vmem [shape: f32[1,32], index: 15, kind: input, shape index: {}]   ;;  %s17458_s16 = inlined_call_operand.vmem [shape: f32[2,128,32], index: 16, kind: output, shape index: {}]  }
   0x1   :  { %17686 = sst [smem:[#allocation218_spill]] %s17442_s0 }
   0x2   :  { %17687 = sst [smem:[#allocation219_spill]] %s17443_s1 }
   0x3   :  { %17688 = sst [smem:[#allocation220_spill]] %s17445_s3 }
   0x4   :  { %17689 = sst [smem:[#allocation221_spill]] %s17446_s4 }
   0x5   :  { %17690 = sst [smem:[#allocation222_spill]] %s17448_s6 }
   0x6   :  { %17691 = sst [smem:[#allocation223_spill]] %s17452_s10 }
   0x7   :  { %17692 = sst [smem:[#allocation224_spill]] %s17456_s14 }
   0x8   :  { %17693 = sst [smem:[#allocation225_spill]] %s17457_s15 }
   0x9   :  { %s17694_s23 = sld [smem:[#allocation218_spill]] }
   0xf   :  { %s22_s10 = sshll.u32 %s17694_s23, 4  ;;  %s23_s10 = int_to_ptr.vmem [resolvable:$true] %s22_s10 }
  0x10   :  { %25 = dma.vmem_to_smem %s23_s10, 16, %s11046_s24, [#allocation3] }
  0x11   :  { %11024 = dma.done.wait [#allocation3], 16 }
  0x12   :  { %11025 = vsyncadd [#allocation3], 4294967280 }
  0x13   :  { %28 = sfence }
  0x14   :  { %s11143_s25 = smov 0   ;;  %s11145_s26 = smov 0  }
  0x15   :  { %s11147_s27 = smov 0   ;;  %s11149_s28 = smov 0  }
  0x16   :  { %s11151_s29 = smov 0  }
  0x17 LB: > { %17695 = sst [smem:[#allocation6_spill]] %s11032_s26  ;;  %s43_s10 = sadd.s32 1, %s11036_s27  ;;  %s11044_s29 = sphi %s11151_s29, %s34_s29   ;;  %s11040_s28 = sphi %s11149_s28, %s18385_s28   ;;  %s11036_s27 = sphi %s11147_s27, %s18384_s27   ;;  %s11032_s26 = sphi %s11145_s26, %s18383_s26   ;;  %s11028_s25 = sphi %s11143_s25, %s18382_s25  }
  0x18   : > { %17696 = sst [smem:[#allocation7_spill]] %s11036_s27  ;;  %s46_s30 = sadd.s32 1, %s11040_s28 }
  0x19   : > { %17697 = sst [smem:[#allocation8_spill]] %s11040_s28  ;;  %p44_p0 = scmp.ge.s32.totalorder %s43_s10, 2 }
  0x1a   : > { %17698 = sst [smem:[#allocation9_spill]] %s11044_s29  ;;  %p10228_p1 = scmp.ge.s32.totalorder %s11044_s29, 1 }
  0x1b   : > { %p562_p2 = scmp.lt.s32.totalorder %s11044_s29, 5  ;;  %s18387_s10 = smov (%p44_p0, %s43_s10), 0 }
  0x1c   : > { %17699 = sst [smem:[#allocation10_spill]] %s18387_s10  ;;  %s18389_s30 = smov (!%p44_p0, %s46_s30), %s11040_s28 }
  0x1d   : > { %p563_p3 = pnand %p10228_p1, %p562_p2  ;;  %p48_p4 = scmp.ge.s32.totalorder %s18389_s30, 2 }
  0x1f   : > { %s18391_s30 = smov (%p48_p4, %s18389_s30), 0  ;;  %566 = sbr.rel (%p563_p3) target bundleno = 3379 (0xd33), region = 80 }
  0x20   : > { %17700 = sst [smem:[#allocation11_spill]] %s18391_s30 }
  0x24   : > { %p654_p5 = scmp.lt.s32.totalorder %s11032_s26, 1  ;;  %p659_p6 = scmp.lt.s32.totalorder %s11028_s25, 1 }
  0x25   : > { %s17701_s1 = sld [smem:[#allocation219_spill]]  ;;  %p10241_p7 = scmp.ne.s32.totalorder %s11028_s25, 0 }
  0x26   : > { %s655_s0 = scalar_select %p654_p5, %s11032_s26, 1 }
  0x27   : > { %s11181_s17 = scalar_select %p659_p6, %s11028_s25, 1 }
  0x28   : > { %s10357_s18 = sshll.u32 %s655_s0, 7  ;;  %s17704_s4 = sld [smem:[#allocation221_spill]] }
  0x29   : > { %s10358_s27 = sshll.u32 %s11181_s17, 4  ;;  %s17705_s6 = sld [smem:[#allocation222_spill]] }
  0x2a   : > { %s17707_s0 = sld [smem:[#allocation223_spill]]  ;;  %s702_s10 = scalar_lea.vmem %s17455_s13, %s11181_s17 }
  0x2b   : > { %s11186_s21 = scalar_lea.vmem %s17701_s1, %s10357_s18  ;;  %s11245_s3 = scalar_lea.vmem %s17458_s16, %s10357_s18 }
  0x2c   : > { %17702 = sst [smem:[#allocation12_spill]] %s11186_s21 }
  0x2e   : > { %s11200_s14 = scalar_lea.vmem %s17704_s4, %s10358_s27  ;;  %s686_s4 = scalar_lea.vmem %s17451_s9, %s11181_s17 }
  0x2f   : > { %s11209_s21 = scalar_lea.vmem %s17705_s6, %s10358_s27  ;;  %s694_s6 = scalar_lea.vmem %s17453_s11, %s11181_s17 }
  0x30   : > { %17706 = sst [smem:[#allocation13_spill]] %s11209_s21  ;;  %s11226_s19 = scalar_lea.vmem %s17707_s0, %s10358_s27 }
  0x31   : > { %s10361_s21 = sshll.u32 %s11181_s17, 6  ;;  %712 = sbr.rel (%p10241_p7) target bundleno = 73 (0x49), region = 84 }
  0x32   : > { %s11240_s24 = scalar_lea.vmem %s17454_s12, %s10361_s21  ;;  %s17708_s27 = sld [smem:[#allocation12_spill]] (!%p10241_p7) }
  0x36   : > { %vm729_vm0 = vcmask 261120  }
  0x38   : > { %v713_v0 = vld [vmem:[%s17708_s27] sm:$0xff]  ;;  %v714_v1 = vld [vmem:[%s17708_s27 + $0x8] sm:$0xff]  ;;  %v715_v2 = vld [vmem:[%s17708_s27 + $0x10] sm:$0xff] }
  0x39   : > { %730 = vst.msk [vmem:[#allocation2] sm:$0xff] %vm729_vm0, %v713_v0  ;;  %v716_v3 = vld [vmem:[%s17708_s27 + $0x18] sm:$0xff]  ;;  %v717_v4 = vld [vmem:[%s17708_s27 + $0x20] sm:$0xff]  ;;  %v718_v5 = vld [vmem:[%s17708_s27 + $0x28] sm:$0xff] }
  0x3a   : > { %731 = vst.msk [vmem:[#allocation2 + $0x8] sm:$0xff] %vm729_vm0, %v714_v1  ;;  %v719_v6 = vld [vmem:[%s17708_s27 + $0x30] sm:$0xff]  ;;  %v720_v7 = vld [vmem:[%s17708_s27 + $0x38] sm:$0xff]  ;;  %v721_v8 = vld [vmem:[%s17708_s27 + $0x40] sm:$0xff] }
  0x3b   : > { %732 = vst.msk [vmem:[#allocation2 + $0x10] sm:$0xff] %vm729_vm0, %v715_v2  ;;  %v722_v9 = vld [vmem:[%s17708_s27 + $0x48] sm:$0xff]  ;;  %v723_v10 = vld [vmem:[%s17708_s27 + $0x50] sm:$0xff]  ;;  %v724_v11 = vld [vmem:[%s17708_s27 + $0x58] sm:$0xff] }
  0x3c   : > { %733 = vst.msk [vmem:[#allocation2 + $0x18] sm:$0xff] %vm729_vm0, %v716_v3  ;;  %v725_v12 = vld [vmem:[%s17708_s27 + $0x60] sm:$0xff]  ;;  %v726_v13 = vld [vmem:[%s17708_s27 + $0x68] sm:$0xff]  ;;  %v727_v14 = vld [vmem:[%s17708_s27 + $0x70] sm:$0xff] }
  0x3d   : > { %734 = vst.msk [vmem:[#allocation2 + $0x20] sm:$0xff] %vm729_vm0, %v717_v4  ;;  %v728_v15 = vld [vmem:[%s17708_s27 + $0x78] sm:$0xff] }
  0x3e   : > { %735 = vst.msk [vmem:[#allocation2 + $0x28] sm:$0xff] %vm729_vm0, %v718_v5 }
  0x3f   : > { %736 = vst.msk [vmem:[#allocation2 + $0x30] sm:$0xff] %vm729_vm0, %v719_v6 }
  0x40   : > { %737 = vst.msk [vmem:[#allocation2 + $0x38] sm:$0xff] %vm729_vm0, %v720_v7 }
  0x41   : > { %738 = vst.msk [vmem:[#allocation2 + $0x40] sm:$0xff] %vm729_vm0, %v721_v8 }
  0x42   : > { %739 = vst.msk [vmem:[#allocation2 + $0x48] sm:$0xff] %vm729_vm0, %v722_v9 }
  0x43   : > { %740 = vst.msk [vmem:[#allocation2 + $0x50] sm:$0xff] %vm729_vm0, %v723_v10 }
  0x44   : > { %741 = vst.msk [vmem:[#allocation2 + $0x58] sm:$0xff] %vm729_vm0, %v724_v11 }
  0x45   : > { %742 = vst.msk [vmem:[#allocation2 + $0x60] sm:$0xff] %vm729_vm0, %v725_v12 }
  0x46   : > { %743 = vst.msk [vmem:[#allocation2 + $0x68] sm:$0xff] %vm729_vm0, %v726_v13 }
  0x47   : > { %744 = vst.msk [vmem:[#allocation2 + $0x70] sm:$0xff] %vm729_vm0, %v727_v14 }
  0x48   : > { %745 = vst.msk [vmem:[#allocation2 + $0x78] sm:$0xff] %vm729_vm0, %v728_v15 }
  0x49 PF: > { %v748_v16 = vld [vmem:[#allocation2 + $0x10] sm:$0xff]  ;;  %vm834_vm1 = vcmask 261120   ;;  %v746_v17 = vld [vmem:[#allocation2] sm:$0xff]  ;;  %v749_v21 = vld [vmem:[#allocation2 + $0x18] sm:$0xff]  ;;  %v11047_v30 = vmov 32.0   ;;  %s17714_s21 = scalar_lea.vmem %s17444_s2, %s11181_s17  ;;  %s17715_s1 = sld [smem:[#allocation220_spill]] }
  0x4a   : > { %v841_v18 = vsel %vm834_vm1, %v748_v16, 0.0  ;;  %v835_v19 = vsel %vm834_vm1, %v746_v17, 0.0  ;;  %v750_v20 = vld [vmem:[#allocation2 + $0x20] sm:$0xff]  ;;  %v747_v23 = vld [vmem:[#allocation2 + $0x8] sm:$0xff]  ;;  %v844_v25 = vsel %vm834_vm1, %v749_v21, 0.0  ;;  %v752_v28 = vld [vmem:[#allocation2 + $0x30] sm:$0xff]  ;;  %10684 = vrcp.f32 %v11047_v30  ;;  %s17723_s28 = scalar_lea.vmem %s17447_s5, %s11181_s17  ;;  %s18375_s23 = scalar_lea.vmem %s17450_s8, %s11181_s17 }
  0x4b   : > { %842 = vadd.xlane.f32.xlu1 %v841_v18  ;;  %836 = vadd.xlane.f32.xlu0 %v835_v19  ;;  %v847_v22 = vsel %vm834_vm1, %v750_v20, 0.0  ;;  %v751_v24 = vld [vmem:[#allocation2 + $0x28] sm:$0xff]  ;;  %v838_v26 = vsel %vm834_vm1, %v747_v23, 0.0  ;;  %v853_v29 = vsel %vm834_vm1, %v752_v28, 0.0  ;;  %v11299_v50 = vld [vmem:[#allocation2 + $0x38] sm:$0xff]  ;;  %v11320_v63 = vld [vmem:[#allocation2 + $0x40] sm:$0xff] }
  0x4c   : > { %848 = vadd.xlane.f32.xlu2 %v847_v22  ;;  %v850_v27 = vsel %vm834_vm1, %v751_v24, 0.0  ;;  %v856_v56 = vsel %vm834_vm1, %v11299_v50, 0.0  ;;  %v859_v3 = vsel %vm834_vm1, %v11320_v63, 0.0  ;;  %v11333_v8 = vld [vmem:[#allocation2 + $0x58] sm:$0xff]  ;;  %v11335_v9 = vld [vmem:[#allocation2 + $0x48] sm:$0xff]  ;;  %v11346_v15 = vld [vmem:[#allocation2 + $0x60] sm:$0xff] }
  0x4d   : > { %v868_v11 = vsel %vm834_vm1, %v11333_v8, 0.0  ;;  %v862_v13 = vsel %vm834_vm1, %v11335_v9, 0.0  ;;  %s11048_s30 = smov 112   ;;  %s11049_s15 = smov 96  }
  0x4e   : > { %v11359_v22 = vld [vmem:[#allocation2 + $0x70] sm:$0xff]  ;;  %s11052_s29 = smov 64   ;;  %s18366_s27 = sld [smem:[#allocation6_spill]] }
  0x4f   : > { %s17716_s20 = scalar_lea.vmem %s17715_s1, %s11181_s17  ;;  %s18372_s18 = sld [smem:[#allocation13_spill]] }
  0x50   : > { %v10685_v31 = vpop.eup %10684  ;;  %s18373_s1 = scalar_lea.vmem %s17449_s7, %s11181_s17  ;;  %p10354_p8 = scmp.ne.s32.totalorder %s11028_s25, 1 }
  0x51   : > { %v884_v32 = vmul.f32 32.0, %v10685_v31  ;;  %vm888_vm2 = vweird.f32 %v10685_v31 }
  0x53   : > { %845 = vadd.xlane.f32.xlu1 %v844_v25  ;;  %839 = vadd.xlane.f32.xlu0 %v838_v26  ;;  %v885_v33 = vsub.f32 1.0, %v884_v32  ;;  %v10364_v25 = vld [vmem:[%s11200_s14 + $0x8] sm:$0xff] }
  0x54   : > { %851 = vadd.xlane.f32.xlu2 %v850_v27  ;;  %1290 = vmatpush.bf16.msra.mxu0 %v10364_v25 }
  0x55   : > { %v886_v34 = vmul.f32 %v10685_v31, %v885_v33 }
  0x57   : > { %v887_v35 = vadd.f32 %v10685_v31, %v886_v34 }
  0x59   : > { %v11287_v36 = vsel %vm888_vm2, %v10685_v31, %v887_v35 }
  0x5a   : > { %17709 = vst [vmem:[#allocation14_spill] sm:$0xff] %v11287_v36 }
  0x5c   : > { %854 = vadd.xlane.f32.xlu2 %v853_v29 }
  0xbe   : > { %v843_v37 = vpop.xlane.xlu1 %842  ;;  %v837_v38 = vpop.xlane.xlu0 %836 }
  0xbf   : > { %v890_v39 = vmul.f32 %v11287_v36, %v837_v38  ;;  %v849_v40 = vpop.xlane.xlu2 %848  ;;  %v892_v49 = vmul.f32 %v11287_v36, %v843_v37 }
  0xc0   : > { %v894_v48 = vmul.f32 %v11287_v36, %v849_v40 }
  0xc1   : > { %v11290_v41 = vsub.f32 %v746_v17, %v890_v39  ;;  %v11313_v58 = vsub.f32 %v748_v16, %v892_v49  ;;  %v11348_v16 = vld [vmem:[#allocation2 + $0x50] sm:$0xff]  ;;  %v871_v17 = vsel %vm834_vm1, %v11346_v15, 0.0 }
  0xc2   : > { %v11305_v54 = vsub.f32 %v750_v20, %v894_v48  ;;  %v865_v19 = vsel %vm834_vm1, %v11348_v16, 0.0  ;;  %v11355_v20 = vld [vmem:[#allocation2 + $0x68] sm:$0xff] }
  0xc3   : > { %v922_v42 = vmul.f32 %v11290_v41, %v11290_v41  ;;  %v924_v0 = vmul.f32 %v11313_v58, %v11313_v58 }
  0xc4   : > { %v926_v62 = vmul.f32 %v11305_v54, %v11305_v54 }
  0xc5   : > { %v938_v43 = vsel %vm834_vm1, %v922_v42, 0.0  ;;  %v944_v4 = vsel %vm834_vm1, %v924_v0, 0.0 }
  0xc6   : > { %v846_v44 = vpop.xlane.xlu1 %845  ;;  %939 = vadd.xlane.f32.xlu0 %v938_v43  ;;  %v840_v45 = vpop.xlane.xlu0 %839  ;;  %v950_v2 = vsel %vm834_vm1, %v926_v62, 0.0 }
  0xc7   : > { %v893_v46 = vmul.f32 %v11287_v36, %v846_v44  ;;  %v891_v47 = vmul.f32 %v11287_v36, %v840_v45  ;;  %v852_v53 = vpop.xlane.xlu2 %851 }
  0xc8   : > { %v895_v61 = vmul.f32 %v11287_v36, %v852_v53 }
  0xc9   : > { %v11301_v51 = vsub.f32 %v749_v21, %v893_v46  ;;  %v11303_v52 = vsub.f32 %v747_v23, %v891_v47  ;;  %v874_v21 = vsel %vm834_vm1, %v11355_v20, 0.0  ;;  %v877_v23 = vsel %vm834_vm1, %v11359_v22, 0.0 }
  0xca   : > { %v11324_v1 = vsub.f32 %v751_v24, %v895_v61 }
  0xcb   : > { %v925_v55 = vmul.f32 %v11301_v51, %v11301_v51  ;;  %v923_v57 = vmul.f32 %v11303_v52, %v11303_v52 }
  0xcc   : > { %v927_v7 = vmul.f32 %v11324_v1, %v11324_v1 }
  0xcd   : > { %v947_v59 = vsel %vm834_vm1, %v925_v55, 0.0  ;;  %v941_v60 = vsel %vm834_vm1, %v923_v57, 0.0 }
  0xce   : > { %948 = vadd.xlane.f32.xlu2 %v947_v59  ;;  %857 = vadd.xlane.f32.xlu0 %v856_v56  ;;  %v953_v12 = vsel %vm834_vm1, %v927_v7, 0.0 }
  0xcf   : > { %942 = vadd.xlane.f32.xlu1 %v941_v60  ;;  %v855_v5 = vpop.xlane.xlu2 %854 }
  0xd0   : > { %v896_v6 = vmul.f32 %v11287_v36, %v855_v5 }
  0xd2   : > { %v11337_v10 = vsub.f32 %v752_v28, %v896_v6  ;;  %v10363_v28 = vld [vmem:[%s11200_s14] sm:$0xff]  ;;  %s797_s14 = sld [smem:[#allocation4 + %s18366_s27]] }
  0xd3   : > { %1291 = vmatpush.bf16.msra.mxu0 %v10363_v28  ;;  %v11423_v28 = vld [vmem:[#allocation2 + $0x78] sm:$0xff]  ;;  %s18380_s27 = sld [smem:[#allocation225_spill]] (!%p10354_p8) }
  0xd4   : > { %v928_v14 = vmul.f32 %v11337_v10, %v11337_v10 }
  0xd6   : > { %951 = vadd.xlane.f32.xlu2 %v950_v2  ;;  %860 = vadd.xlane.f32.xlu0 %v859_v3  ;;  %v956_v18 = vsel %vm834_vm1, %v928_v14, 0.0 }
  0xd7   : > { %945 = vadd.xlane.f32.xlu1 %v944_v4 }
  0xde   : > { %869 = vadd.xlane.f32.xlu2 %v868_v11  ;;  %954 = vadd.xlane.f32.xlu0 %v953_v12 }
  0xdf   : > { %863 = vadd.xlane.f32.xlu1 %v862_v13 }
  0xe6   : > { %872 = vadd.xlane.f32.xlu2 %v871_v17  ;;  %957 = vadd.xlane.f32.xlu0 %v956_v18 }
  0xe7   : > { %866 = vadd.xlane.f32.xlu1 %v865_v19 }
  0xee   : > { %875 = vadd.xlane.f32.xlu0 %v874_v21 }
  0xf6   : > { %878 = vadd.xlane.f32.xlu0 %v877_v23 }
 0x139   : > { %v940_v24 = vpop.xlane.xlu0 %939 }
 0x13a   : > { %v986_v26 = vmul.f32 %v940_v24, %v11287_v36 }
 0x13c   : > { %v1002_v27 = vadd.f32 1e-05, %v986_v26 }
 0x13e   : > { %10686 = vrsqrt.f32 %v1002_v27  ;;  %vm1024_vm4 = vweird.f32 %v1002_v27 }
 0x141   : > { %v949_v29 = vpop.xlane.xlu2 %948  ;;  %v858_v30 = vpop.xlane.xlu0 %857 }
 0x142   : > { %v989_v31 = vmul.f32 %v949_v29, %v11287_v36  ;;  %v943_v32 = vpop.xlane.xlu1 %942  ;;  %v897_v33 = vmul.f32 %v11287_v36, %v858_v30 }
 0x143   : > { %v987_v34 = vmul.f32 %v943_v32, %v11287_v36 }
 0x144   : > { %v10687_v35 = vpop.eup %10686  ;;  %v11369_v37 = vadd.f32 1e-05, %v989_v31  ;;  %v11372_v38 = vsub.f32 %v11299_v50, %v897_v33  ;;  %v11434_v31 = vld [vmem:[%s17714_s21] ss:$0 sm:$0xff]  ;;  %s11054_s21 = smov 16  }
 0x145   : > { %v1019_v39 = vmul.f32 %v10687_v35, %v1002_v27  ;;  %v1003_v40 = vadd.f32 1e-05, %v987_v34  ;;  %vm1025_vm3 = vweird.f32 %v10687_v35 }
 0x146   : > { %10688 = vrsqrt.f32 %v11369_v37  ;;  %v929_v42 = vmul.f32 %v11372_v38, %v11372_v38  ;;  %vm11395_vm7 = vmor %vm1024_vm4, %vm1025_vm3  ;;  %vm1054_vm11 = vweird.f32 %v11369_v37 }
 0x147   : > { %v1020_v43 = vmul.f32 %v10687_v35, %v1019_v39  ;;  %10690 = vrsqrt.f32 %v1003_v40  ;;  %vm1034_vm5 = vweird.f32 %v1003_v40 }
 0x148   : > { %v959_v44 = vsel %vm834_vm1, %v929_v42, 0.0 }
 0x149   : > { %v1021_v45 = vmul.f32 0.5, %v1020_v43  ;;  %v952_v46 = vpop.xlane.xlu2 %951  ;;  %960 = vadd.xlane.f32.xlu1 %v959_v44  ;;  %v861_v47 = vpop.xlane.xlu0 %860 }
 0x14a   : > { %v946_v48 = vpop.xlane.xlu1 %945  ;;  %v898_v49 = vmul.f32 %v11287_v36, %v861_v47  ;;  %v990_v59 = vmul.f32 %v952_v46, %v11287_v36 }
 0x14b   : > { %v1022_v50 = vsub.f32 1.5, %v1021_v45  ;;  %v988_v53 = vmul.f32 %v946_v48, %v11287_v36 }
 0x14c   : > { %v11380_v55 = vpop.eup %10688  ;;  %v11383_v56 = vsub.f32 %v11320_v63, %v898_v49  ;;  %v11393_v63 = vadd.f32 1e-05, %v990_v59  ;;  %v11458_v49 = vld [vmem:[%s17716_s20] ss:$0 sm:$0xff] }
 0x14d   : > { %v10691_v57 = vpop.eup %10690  ;;  %v11386_v60 = vadd.f32 1e-05, %v988_v53  ;;  %v1023_v62 = vmul.f32 %v10687_v35, %v1022_v50  ;;  %v1049_v0 = vmul.f32 %v11380_v55, %v11369_v37  ;;  %vm1055_vm12 = vweird.f32 %v11380_v55 }
 0x14e   : > { %v1029_v61 = vmul.f32 %v10691_v57, %v1003_v40  ;;  %v930_v3 = vmul.f32 %v11383_v56, %v11383_v56  ;;  %vm1035_vm6 = vweird.f32 %v10691_v57  ;;  %vm11490_vm14 = vmor %vm1054_vm11, %vm1055_vm12  ;;  %vm1064_vm2 = vweird.f32 %v11393_v63 }
 0x14f   : > { %10692 = vrsqrt.f32 %v11386_v60  ;;  %v1027_v17 = vsel %vm11395_vm7, %v10687_v35, %v1023_v62  ;;  %v1050_v18 = vmul.f32 %v11380_v55, %v1049_v0  ;;  %vm11415_vm8 = vmor %vm1034_vm5, %vm1035_vm6  ;;  %vm1044_vm9 = vweird.f32 %v11386_v60 }
 0x150   : > { %v1030_v2 = vmul.f32 %v10691_v57, %v1029_v61  ;;  %v962_v13 = vsel %vm834_vm1, %v930_v3, 0.0  ;;  %10694 = vrsqrt.f32 %v11393_v63  ;;  %v1178_v30 = vmul.f32 %v1027_v17, %v11290_v41 }
 0x151   : > { %v870_v4 = vpop.xlane.xlu2 %869  ;;  %v955_v5 = vpop.xlane.xlu0 %954  ;;  %963 = vadd.xlane.f32.xlu1 %v962_v13  ;;  %v1051_v32 = vmul.f32 0.5, %v1050_v18  ;;  %v880_v41 = vsel %vm834_vm1, %v11423_v28, 0.0 }
 0x152   : > { %v1031_v7 = vmul.f32 0.5, %v1030_v2  ;;  %v901_v11 = vmul.f32 %v11287_v36, %v870_v4  ;;  %v864_v12 = vpop.xlane.xlu1 %863  ;;  %v991_v14 = vmul.f32 %v955_v5, %v11287_v36  ;;  %v1197_v48 = vmul.f32 %v11434_v31, %v1178_v30 }
 0x153   : > { %v899_v19 = vmul.f32 %v11287_v36, %v864_v12  ;;  %v1052_v53 = vsub.f32 1.5, %v1051_v32 }
 0x154   : > { %v1032_v21 = vsub.f32 1.5, %v1031_v7  ;;  %v11407_v23 = vsub.f32 %v11333_v8, %v901_v11  ;;  %v11409_v24 = vadd.f32 1e-05, %v991_v14 }
 0x155   : > { %v11411_v25 = vpop.eup %10692  ;;  %v11421_v27 = vsub.f32 %v11335_v9, %v899_v19  ;;  %v1053_v37 = vmul.f32 %v11380_v55, %v1052_v53 }
 0x156   : > { %v1033_v29 = vmul.f32 %v10691_v57, %v1032_v21  ;;  %v1039_v8 = vmul.f32 %v11411_v25, %v11386_v60  ;;  %10696 = vrsqrt.f32 %v11409_v24  ;;  %v933_v9 = vmul.f32 %v11407_v23, %v11407_v23  ;;  %v11460_v50 = vpop.eup %10694 }
 0x157   : > { %v931_v35 = vmul.f32 %v11421_v27, %v11421_v27  ;;  %vm1045_vm10 = vweird.f32 %v11411_v25  ;;  %v1059_v6 = vmul.f32 %v11460_v50, %v11393_v63  ;;  %v1057_v21 = vsel %vm11490_vm14, %v11380_v55, %v1053_v37 }
 0x158   : > { %v1037_v33 = vsel %vm11415_vm8, %v10691_v57, %v1033_v29  ;;  %v1040_v34 = vmul.f32 %v11411_v25, %v1039_v8  ;;  %v971_v40 = vsel %vm834_vm1, %v933_v9, 0.0  ;;  %vm11477_vm13 = vmor %vm1044_vm9, %vm1045_vm10  ;;  %v1181_v32 = vmul.f32 %v1057_v21, %v11301_v51 }
 0x159   : > { %v873_v39 = vpop.xlane.xlu2 %872  ;;  %v11447_v42 = vpop.xlane.xlu0 %957  ;;  %v1179_v43 = vmul.f32 %v1037_v33, %v11303_v52  ;;  %972 = vadd.xlane.f32.xlu0 %v971_v40  ;;  %v965_v46 = vsel %vm834_vm1, %v931_v35, 0.0  ;;  %881 = vadd.xlane.f32.xlu1 %v880_v41  ;;  %v1060_v26 = vmul.f32 %v11460_v50, %v1059_v6  ;;  %vm1074_vm15 = vweird.f32 %v11409_v24 }
 0x15a   : > { %v1041_v44 = vmul.f32 0.5, %v1040_v34  ;;  %v902_v45 = vmul.f32 %v11287_v36, %v873_v39  ;;  %v867_v47 = vpop.xlane.xlu1 %866  ;;  %966 = vadd.xlane.f32.xlu2 %v965_v46  ;;  %vm1065_vm3 = vweird.f32 %v11460_v50 }
 0x15b   : > { %v900_v52 = vmul.f32 %v11287_v36, %v867_v47  ;;  %v1198_v57 = vmul.f32 %v11434_v31, %v1179_v43  ;;  %v1061_v9 = vmul.f32 0.5, %v1060_v26  ;;  %vm1066_vm5 = vmor %vm1064_vm2, %vm1065_vm3 }
 0x15c   : > { %v10697_v59 = vpop.eup %10696  ;;  %v1042_v61 = vsub.f32 1.5, %v1041_v44  ;;  %v11466_v62 = vsub.f32 %v11346_v15, %v902_v45  ;;  %v1216_v15 = vadd.f32 %v11458_v49, %v1197_v48 }
 0x15d   : > { %v1069_v0 = vmul.f32 %v10697_v59, %v11409_v24  ;;  %v11472_v2 = vsub.f32 %v11348_v16, %v900_v52  ;;  %v1217_v5 = vadd.f32 %v11458_v49, %v1198_v57  ;;  %v1062_v39 = vsub.f32 1.5, %v1061_v9 }
 0x15e   : > { %v1043_v3 = vmul.f32 %v11411_v25, %v1042_v61  ;;  %v934_v7 = vmul.f32 %v11466_v62, %v11466_v62  ;;  %vm1075_vm0 = vweird.f32 %v10697_v59 }
 0x15f   : > { %v932_v16 = vmul.f32 %v11472_v2, %v11472_v2  ;;  %v1232_v11 = vpack.c.bf16 %v1217_v5, %v1216_v15  ;;  %v1070_v13 = vmul.f32 %v10697_v59, %v1069_v0  ;;  %vm1076_vm4 = vmor %vm1074_vm15, %vm1075_vm0  ;;  %v1063_v24 = vmul.f32 %v11460_v50, %v1062_v39 }
 0x160   : > { %v1047_v12 = vsel %vm11477_vm13, %v11411_v25, %v1043_v3  ;;  %v974_v17 = vsel %vm834_vm1, %v934_v7, 0.0 }
 0x161   : > { %v968_v14 = vsel %vm834_vm1, %v932_v16, 0.0  ;;  %v876_v18 = vpop.xlane.xlu0 %875  ;;  %10250 = vmatmul.msk.bf16.vlgmr.msra.gmra.mxu0 %vm834_vm1, %v1232_v11  ;;  %975 = vadd.xlane.f32.xlu1 %v974_v17  ;;  %v1180_v29 = vmul.f32 %v1047_v12, %v11313_v58  ;;  %v1071_v8 = vmul.f32 0.5, %v1070_v13  ;;  %v1067_v63 = vsel %vm1066_vm5, %v11460_v50, %v1063_v24 }
 0x162   : > { %v903_v19 = vmul.f32 %v11287_v36, %v876_v18  ;;  %969 = vadd.xlane.f32.xlu2 %v968_v14  ;;  %v1182_v48 = vmul.f32 %v1067_v63, %v11305_v54 }
 0x163   : > { %v1199_v55 = vmul.f32 %v11434_v31, %v1180_v29  ;;  %v1072_v34 = vsub.f32 1.5, %v1071_v8 }
 0x164   : > { %v11506_v25 = vsub.f32 %v11355_v20, %v903_v19  ;;  %v1200_v20 = vmul.f32 %v11434_v31, %v1181_v32  ;;  %v1201_v52 = vmul.f32 %v11434_v31, %v1182_v48 }
 0x165   : > { %v1218_v51 = vadd.f32 %v11458_v49, %v1199_v55  ;;  %v1073_v40 = vmul.f32 %v10697_v59, %v1072_v34 }
 0x166   : > { %v935_v30 = vmul.f32 %v11506_v25, %v11506_v25  ;;  %v1219_v43 = vadd.f32 %v11458_v49, %v1200_v20  ;;  %v1220_v61 = vadd.f32 %v11458_v49, %v1201_v52 }
 0x167   : > { %v1077_v46 = vsel %vm1076_vm4, %v10697_v59, %v1073_v40  ;;  %v992_v59 = vmul.f32 %v11447_v42, %v11287_v36 }
 0x168   : > { %v977_v33 = vsel %vm834_vm1, %v935_v30, 0.0  ;;  %v1233_v45 = vpack.c.bf16 %v1219_v43, %v1218_v51  ;;  %v1183_v47 = vmul.f32 %v1077_v46, %v11324_v1 }
 0x169   : > { %v879_v35 = vpop.xlane.xlu0 %878  ;;  %v1008_v3 = vadd.f32 1e-05, %v992_v59 }
 0x16a   : > { %v904_v41 = vmul.f32 %v11287_v36, %v879_v35  ;;  %978 = vadd.xlane.f32.xlu2 %v977_v33  ;;  %v1202_v53 = vmul.f32 %v11434_v31, %v1183_v47 }
 0x16b   : > { %10698 = vrsqrt.f32 %v1008_v3  ;;  %vm1084_vm6 = vweird.f32 %v1008_v3 }
 0x16c   : > { %v11518_v58 = vsub.f32 %v11359_v22, %v904_v41  ;;  %v1221_v57 = vadd.f32 %v11458_v49, %v1202_v53 }
 0x16e   : > { %v936_v44 = vmul.f32 %v11518_v58, %v11518_v58  ;;  %v1234_v0 = vpack.c.bf16 %v1221_v57, %v1220_v61 }
 0x170   : > { %v980_v22 = vsel %vm834_vm1, %v936_v44, 0.0 }
 0x171   : > { %981 = vadd.xlane.f32.xlu0 %v980_v22  ;;  %10251 = vmatmul.msk.bf16.gmra.mxu0 %vm834_vm1, %v1233_v45  ;;  %v10699_v50 = vpop.eup %10698 }
 0x172   : > { %v1079_v1 = vmul.f32 %v10699_v50, %v1008_v3  ;;  %vm1085_vm7 = vweird.f32 %v10699_v50 }
 0x173   : > { %vm11541_vm8 = vmor %vm1084_vm6, %vm1085_vm7 }
 0x174   : > { %v1080_v54 = vmul.f32 %v10699_v50, %v1079_v1 }
 0x176   : > { %v1081_v37 = vmul.f32 0.5, %v1080_v54 }
 0x178   : > { %v1082_v6 = vsub.f32 1.5, %v1081_v37 }
 0x17a   : > { %v1083_v42 = vmul.f32 %v10699_v50, %v1082_v6 }
 0x17c   : > { %v1087_v18 = vsel %vm11541_vm8, %v10699_v50, %v1083_v42 }
 0x17d   : > { %v1184_v55 = vmul.f32 %v1087_v18, %v11337_v10 }
 0x17f   : > { %v1203_v44 = vmul.f32 %v11434_v31, %v1184_v55 }
 0x181   : > { %10252 = vmatmul.msk.bf16.gmra.mxu0 %vm834_vm1, %v1234_v0  ;;  %v1222_v48 = vadd.f32 %v11458_v49, %v1203_v44 }
 0x1bc   : > { %v961_v4 = vpop.xlane.xlu1 %960 }
 0x1bd   : > { %v993_v15 = vmul.f32 %v961_v4, %v11287_v36 }
 0x1bf   : > { %v1009_v5 = vadd.f32 1e-05, %v993_v15 }
 0x1c1   : > { %10700 = vrsqrt.f32 %v1009_v5  ;;  %vm1094_vm10 = vweird.f32 %v1009_v5 }
 0x1c4   : > { %v964_v16 = vpop.xlane.xlu1 %963 }
 0x1c5   : > { %v994_v60 = vmul.f32 %v964_v16, %v11287_v36 }
 0x1c7   : > { %v10701_v7 = vpop.eup %10700  ;;  %v1010_v12 = vadd.f32 1e-05, %v994_v60 }
 0x1c8   : > { %v1089_v11 = vmul.f32 %v10701_v7, %v1009_v5  ;;  %vm1095_vm9 = vweird.f32 %v10701_v7 }
 0x1c9   : > { %10702 = vrsqrt.f32 %v1010_v12  ;;  %vm1096_vm11 = vmor %vm1094_vm10, %vm1095_vm9  ;;  %vm1104_vm13 = vweird.f32 %v1010_v12 }
 0x1ca   : > { %v1090_v14 = vmul.f32 %v10701_v7, %v1089_v11 }
 0x1cc   : > { %v1091_v17 = vmul.f32 0.5, %v1090_v14  ;;  %v973_v19 = vpop.xlane.xlu0 %972  ;;  %v882_v29 = vpop.xlane.xlu1 %881 }
 0x1cd   : > { %v967_v26 = vpop.xlane.xlu2 %966  ;;  %v997_v8 = vmul.f32 %v973_v19, %v11287_v36  ;;  %v905_v32 = vmul.f32 %v11287_v36, %v882_v29 }
 0x1ce   : > { %v1092_v21 = vsub.f32 1.5, %v1091_v17  ;;  %v995_v30 = vmul.f32 %v967_v26, %v11287_v36 }
 0x1cf   : > { %v11550_v33 = vadd.f32 1e-05, %v997_v8  ;;  %v10703_v34 = vpop.eup %10702  ;;  %v11554_v41 = vsub.f32 %v11423_v28, %v905_v32 }
 0x1d0   : > { %v1093_v9 = vmul.f32 %v10701_v7, %v1092_v21  ;;  %v1011_v35 = vadd.f32 1e-05, %v995_v30  ;;  %v1099_v39 = vmul.f32 %v10703_v34, %v1010_v12  ;;  %vm1105_vm12 = vweird.f32 %v10703_v34 }
 0x1d1   : > { %10704 = vrsqrt.f32 %v11550_v33  ;;  %v937_v51 = vmul.f32 %v11554_v41, %v11554_v41  ;;  %vm1106_vm0 = vmor %vm1104_vm13, %vm1105_vm12  ;;  %vm1134_vm5 = vweird.f32 %v11550_v33 }
 0x1d2   : > { %v1097_v20 = vsel %vm1096_vm11, %v10701_v7, %v1093_v9  ;;  %10706 = vrsqrt.f32 %v1011_v35  ;;  %v1100_v40 = vmul.f32 %v10703_v34, %v1099_v39  ;;  %vm1114_vm14 = vweird.f32 %v1011_v35 }
 0x1d3   : > { %v1185_v43 = vmul.f32 %v1097_v20, %v11372_v38  ;;  %v983_v10 = vsel %vm834_vm1, %v937_v51, 0.0 }
 0x1d4   : > { %v1101_v24 = vmul.f32 0.5, %v1100_v40  ;;  %984 = vadd.xlane.f32.xlu1 %v983_v10  ;;  %v976_v46 = vpop.xlane.xlu1 %975 }
 0x1d5   : > { %v970_v45 = vpop.xlane.xlu2 %969  ;;  %v1204_v28 = vmul.f32 %v11434_v31, %v1185_v43  ;;  %v998_v61 = vmul.f32 %v976_v46, %v11287_v36 }
 0x1d6   : > { %v996_v22 = vmul.f32 %v970_v45, %v11287_v36  ;;  %v1102_v47 = vsub.f32 1.5, %v1101_v24 }
 0x1d7   : > { %v11564_v63 = vpop.eup %10704  ;;  %v1223_v53 = vadd.f32 %v11458_v49, %v1204_v28  ;;  %v11572_v4 = vadd.f32 1e-05, %v998_v61 }
 0x1d8   : > { %v10707_v38 = vpop.eup %10706  ;;  %v1012_v52 = vadd.f32 1e-05, %v996_v22  ;;  %v1103_v59 = vmul.f32 %v10703_v34, %v1102_v47  ;;  %v1129_v50 = vmul.f32 %v11564_v63, %v11550_v33  ;;  %vm1135_vm6 = vweird.f32 %v11564_v63  ;;  %v11592_v33 = vld [vmem:[%s17723_s28] ss:$0 sm:$0xff] }
 0x1d9   : > { %v1109_v57 = vmul.f32 %v10707_v38, %v1011_v35  ;;  %v1235_v0 = vpack.c.bf16 %v1223_v53, %v1222_v48  ;;  %vm1115_vm15 = vweird.f32 %v10707_v38  ;;  %vm1136_vm8 = vmor %vm1134_vm5, %vm1135_vm6  ;;  %vm1144_vm11 = vweird.f32 %v11572_v4 }
 0x1da   : > { %10708 = vrsqrt.f32 %v1012_v52  ;;  %v1107_v37 = vsel %vm1106_vm0, %v10703_v34, %v1103_v59  ;;  %v1130_v16 = vmul.f32 %v11564_v63, %v1129_v50  ;;  %vm1116_vm2 = vmor %vm1114_vm14, %vm1115_vm15  ;;  %vm1124_vm3 = vweird.f32 %v1012_v52 }
 0x1db   : > { %v1110_v3 = vmul.f32 %v10707_v38, %v1109_v57  ;;  %10253 = vmatmul.msk.bf16.gmra.mxu0 %vm834_vm1, %v1235_v0  ;;  %10710 = vrsqrt.f32 %v11572_v4  ;;  %v1186_v12 = vmul.f32 %v1107_v37, %v11383_v56  ;;  %vm1398_vm6 = vcmask 1047556  }
 0x1dc   : > { %v1131_v14 = vmul.f32 0.5, %v1130_v16 }
 0x1dd   : > { %v1111_v1 = vmul.f32 0.5, %v1110_v3  ;;  %v979_v54 = vpop.xlane.xlu2 %978  ;;  %v1205_v26 = vmul.f32 %v11434_v31, %v1186_v12 }
 0x1de   : > { %v999_v15 = vmul.f32 %v979_v54, %v11287_v36  ;;  %v1293_v5 = vpop.f32.mrf.mxu0  ;;  %v1132_v8 = vsub.f32 1.5, %v1131_v14 }
 0x1df   : > { %v1112_v6 = vsub.f32 1.5, %v1111_v1  ;;  %v11601_v22 = vadd.f32 %v11592_v33, %v1293_v5 }
 0x1e0   : > { %v10709_v7 = vpop.eup %10708  ;;  %v1015_v60 = vadd.f32 1e-05, %v999_v15  ;;  %v1133_v35 = vmul.f32 %v11564_v63, %v1132_v8 }
 0x1e1   : > { %v1113_v11 = vmul.f32 %v10707_v38, %v1112_v6  ;;  %v1119_v42 = vmul.f32 %v10709_v7, %v1012_v52  ;;  %v10711_v29 = vpop.eup %10710  ;;  %vm1125_vm4 = vweird.f32 %v10709_v7 }
 0x1e2   : > { %10712 = vrsqrt.f32 %v1015_v60  ;;  %vm1126_vm7 = vmor %vm1124_vm3, %vm1125_vm4  ;;  %v1139_v20 = vmul.f32 %v10711_v29, %v11572_v4  ;;  %v1137_v44 = vsel %vm1136_vm8, %v11564_v63, %v1133_v35  ;;  %vm1154_vm9 = vweird.f32 %v1015_v60 }
 0x1e3   : > { %v1117_v13 = vsel %vm1116_vm2, %v10707_v38, %v1113_v11  ;;  %v1120_v17 = vmul.f32 %v10709_v7, %v1119_v42  ;;  %v1189_v46 = vmul.f32 %v1137_v44, %v11407_v23  ;;  %vm1145_vm12 = vweird.f32 %v10711_v29 }
 0x1e4   : > { %v1187_v19 = vmul.f32 %v1117_v13, %v11421_v27  ;;  %v1224_v27 = vadd.f32 %v11458_v49, %v1205_v26  ;;  %v1140_v10 = vmul.f32 %v10711_v29, %v1139_v20  ;;  %vm1146_vm14 = vmor %vm1144_vm11, %vm1145_vm12  ;;  %v982_v13 = vpop.xlane.xlu0 %981 }
 0x1e5   : > { %v1121_v18 = vmul.f32 0.5, %v1120_v17  ;;  %v1208_v38 = vmul.f32 %v11434_v31, %v1189_v46  ;;  %v1000_v14 = vmul.f32 %v982_v13, %v11287_v36 }
 0x1e6   : > { %v1295_v21 = vpop.f32.mrf.mxu0  ;;  %v1206_v32 = vmul.f32 %v11434_v31, %v1187_v19  ;;  %v1141_v47 = vmul.f32 0.5, %v1140_v10 }
 0x1e7   : > { %v1122_v30 = vsub.f32 1.5, %v1121_v18  ;;  %v11597_v24 = vadd.f32 %v11592_v33, %v1295_v21  ;;  %v1227_v61 = vadd.f32 %v11458_v49, %v1208_v38  ;;  %v1016_v17 = vadd.f32 1e-05, %v1000_v14 }
 0x1e8   : > { %v10713_v9 = vpop.eup %10712  ;;  %v1225_v34 = vadd.f32 %v11458_v49, %v1206_v32  ;;  %v1142_v52 = vsub.f32 1.5, %v1141_v47 }
 0x1e9   : > { %v1123_v56 = vmul.f32 %v10709_v7, %v1122_v30  ;;  %v1149_v55 = vmul.f32 %v10713_v9, %v1015_v60  ;;  %v11607_v53 = vpack.i.bf16 %v11597_v24, %v11601_v22  ;;  %vm1155_vm10 = vweird.f32 %v10713_v9 }
 0x1ea   : > { %v1236_v39 = vpack.c.bf16 %v1225_v34, %v1224_v27  ;;  %vm1156_vm13 = vmor %vm1154_vm9, %vm1155_vm10  ;;  %v1143_v0 = vmul.f32 %v10711_v29, %v1142_v52  ;;  %10714 = vrsqrt.f32 %v1016_v17  ;;  %vm1164_vm15 = vweird.f32 %v1016_v17 }
 0x1eb   : > { %v1127_v51 = vsel %vm1126_vm7, %v10709_v7, %v1123_v56  ;;  %v1150_v40 = vmul.f32 %v10713_v9, %v1149_v55  ;;  %17724 = vst [vmem:[#allocation15_spill] sm:$0xff] %v11607_v53  ;;  %vm6086_vm7 = vcmask 130048  }
 0x1ec   : > { %10254 = vmatmul.msk.bf16.gmra.mxu0 %vm834_vm1, %v1236_v39  ;;  %v1188_v45 = vmul.f32 %v1127_v51, %v11472_v2  ;;  %v1147_v50 = vsel %vm1146_vm14, %v10711_v29, %v1143_v0 }
 0x1ed   : > { %v1151_v28 = vmul.f32 0.5, %v1150_v40  ;;  %v1190_v4 = vmul.f32 %v1147_v50, %v11466_v62 }
 0x1ee   : > { %v1298_v43 = vpop.f32.mrf.mxu0  ;;  %v1207_v48 = vmul.f32 %v11434_v31, %v1188_v45 }
 0x1ef   : > { %v1152_v63 = vsub.f32 1.5, %v1151_v28  ;;  %v11619_v15 = vadd.f32 %v11592_v33, %v1298_v43  ;;  %v1209_v16 = vmul.f32 %v11434_v31, %v1190_v4 }
 0x1f0   : > { %v1226_v57 = vadd.f32 %v11458_v49, %v1207_v48  ;;  %v10715_v18 = vpop.eup %10714 }
 0x1f1   : > { %v1153_v23 = vmul.f32 %v10713_v9, %v1152_v63  ;;  %v1228_v60 = vadd.f32 %v11458_v49, %v1209_v16  ;;  %v1159_v19 = vmul.f32 %v10715_v18, %v1016_v17  ;;  %vm1165_vm0 = vweird.f32 %v10715_v18 }
 0x1f2   : > { %v1237_v59 = vpack.c.bf16 %v1227_v61, %v1226_v57  ;;  %vm1166_vm2 = vmor %vm1164_vm15, %vm1165_vm0 }
 0x1f3   : > { %v1157_v3 = vsel %vm1156_vm13, %v10713_v9, %v1153_v23  ;;  %v1160_v21 = vmul.f32 %v10715_v18, %v1159_v19 }
 0x1f4   : > { %v1191_v54 = vmul.f32 %v1157_v3, %v11506_v25 }
 0x1f5   : > { %v1161_v30 = vmul.f32 0.5, %v1160_v21 }
 0x1f6   : > { %v1300_v2 = vpop.f32.mrf.mxu0  ;;  %v1210_v6 = vmul.f32 %v11434_v31, %v1191_v54 }
 0x1f7   : > { %v11615_v1 = vadd.f32 %v11592_v33, %v1300_v2  ;;  %v1162_v32 = vsub.f32 1.5, %v1161_v30 }
 0x1f8   : > { %v1229_v7 = vadd.f32 %v11458_v49, %v1210_v6 }
 0x1f9   : > { %v11624_v37 = vpack.i.bf16 %v11615_v1, %v11619_v15  ;;  %v1163_v56 = vmul.f32 %v10715_v18, %v1162_v32 }
 0x1fa   : > { %v1238_v25 = vpack.c.bf16 %v1229_v7, %v1228_v60 }
 0x1fb   : > { %v1167_v34 = vsel %vm1166_vm2, %v10715_v18, %v1163_v56 }
 0x1fc   : > { %10255 = vmatmul.msk.bf16.gmra.mxu0 %vm834_vm1, %v1237_v59  ;;  %v1192_v51 = vmul.f32 %v1167_v34, %v11518_v58 }
 0x1fe   : > { %v1303_v5 = vpop.f32.mrf.mxu0  ;;  %v1211_v10 = vmul.f32 %v11434_v31, %v1192_v51 }
 0x1ff   : > { %v11635_v62 = vadd.f32 %v11592_v33, %v1303_v5 }
 0x200   : > { %v1230_v46 = vadd.f32 %v11458_v49, %v1211_v10 }
 0x206   : > { %v1305_v11 = vpop.f32.mrf.mxu0 }
 0x207   : > { %v11632_v42 = vadd.f32 %v11592_v33, %v1305_v11 }
 0x209   : > { %v11639_v12 = vpack.i.bf16 %v11632_v42, %v11635_v62 }
 0x20c   : > { %10256 = vmatmul.msk.bf16.gmra.mxu0 %vm834_vm1, %v1238_v25  ;;  %v11050_v25 = vmov 1983009808  }
 0x20d   : > { %v1401_v13 = vunpack.c.l.s4 %v11050_v25 }
 0x20f   : > { %v11700_v17 = vunpack.c.0.s8 %v1401_v13 }
 0x247   : > { %v985_v26 = vpop.xlane.xlu1 %984 }
 0x248   : > { %v1001_v29 = vmul.f32 %v985_v26, %v11287_v36 }
 0x24a   : > { %v1017_v8 = vadd.f32 1e-05, %v1001_v29 }
 0x24c   : > { %10716 = vrsqrt.f32 %v1017_v8  ;;  %vm1174_vm4 = vweird.f32 %v1017_v8 }
 0x252   : > { %v10717_v9 = vpop.eup %10716 }
 0x253   : > { %v1169_v55 = vmul.f32 %v10717_v9, %v1017_v8  ;;  %vm1175_vm3 = vweird.f32 %v10717_v9 }
 0x254   : > { %vm1176_vm5 = vmor %vm1174_vm4, %vm1175_vm3 }
 0x255   : > { %v1170_v27 = vmul.f32 %v10717_v9, %v1169_v55 }
 0x257   : > { %v1171_v35 = vmul.f32 0.5, %v1170_v27 }
 0x258   : > { %v1308_v20 = vpop.f32.mrf.mxu0 }
 0x259   : > { %v1172_v39 = vsub.f32 1.5, %v1171_v35  ;;  %v11654_v38 = vadd.f32 %v11592_v33, %v1308_v20 }
 0x25b   : > { %v1173_v40 = vmul.f32 %v10717_v9, %v1172_v39 }
 0x25d   : > { %v1177_v43 = vsel %vm1176_vm5, %v10717_v9, %v1173_v40 }
 0x25e   : > { %v1193_v44 = vmul.f32 %v1177_v43, %v11554_v41 }
 0x260   : > { %v1310_v45 = vpop.f32.mrf.mxu0  ;;  %v1212_v28 = vmul.f32 %v11434_v31, %v1193_v44 }
 0x261   : > { %v11651_v58 = vadd.f32 %v11592_v33, %v1310_v45 }
 0x262   : > { %v1231_v47 = vadd.f32 %v11458_v49, %v1212_v28 }
 0x263   : > { %v11658_v41 = vpack.i.bf16 %v11651_v58, %v11654_v38 }
 0x264   : > { %v1239_v48 = vpack.c.bf16 %v1231_v47, %v1230_v46 }
 0x265   : > { %17725 = vst [vmem:[#allocation16_spill] sm:$0xff] %v11658_v41 }
 0x266   : > { %10257 = vmatmul.msk.bf16.gmra.mxu0 %vm834_vm1, %v1239_v48 }
 0x269   : > { %v1313_v63 = vpop.f32.mrf.mxu0 }
 0x26a   : > { %v11664_v49 = vadd.f32 %v11592_v33, %v1313_v63 }
 0x271   : > { %v1315_v52 = vpop.f32.mrf.mxu0 }
 0x272   : > { %v11661_v31 = vadd.f32 %v11592_v33, %v1315_v52 }
 0x274   : > { %v11668_v57 = vpack.i.bf16 %v11661_v31, %v11664_v49 }
 0x279   : > { %v1318_v2 = vpop.f32.mrf.mxu0 }
 0x27a   : > { %v1319_v61 = vadd.f32 %v11592_v33, %v1318_v2 }
 0x27c   : > { %v1918_v18 = vrot.slane %v1319_v61, 4 }
 0x27e   : > { %v1919_v29 = vsel %vm1398_vm6, 0.0, %v1918_v18 }
 0x27f   : > { %v1927_v35 = vperm.slane %v1919_v29, %v11700_v17 }
 0x281   : > { %v1320_v23 = vpop.f32.mrf.mxu0 }
 0x282   : > { %v1321_v0 = vadd.f32 %v11592_v33, %v1320_v23  ;;  %v1952_v23 = vrot.slane %v1927_v35, 4 }
 0x284   : > { %v11672_v59 = vpack.i.bf16 %v1321_v0, %v1319_v61  ;;  %v1970_v14 = vrot.slane %v1321_v0, 4  ;;  %v1975_v19 = vperm.slane %v1321_v0, %v11700_v17 }
 0x286   : > { %17726 = vst [vmem:[#allocation17_spill] sm:$0xff] %v11672_v59  ;;  %10447 = vrot.lane.b32.xlu1 %v11672_v59, %s11048_s30  ;;  %v1971_v21 = vsel %vm1398_vm6, 0.0, %v1970_v14  ;;  %v1992_v9 = vrot.slane %v1975_v19, 4 }
 0x287   : > { %v1979_v32 = vperm.slane %v1971_v21, %v11700_v17 }
 0x289   : > { %v1323_v3 = vpop.f32.mrf.mxu0  ;;  %v2004_v44 = vrot.slane %v1979_v32, 4 }
 0x28a   : > { %v11676_v54 = vadd.f32 %v11592_v33, %v1323_v3 }
 0x28c   : > { %v2027_v13 = vperm.slane %v11676_v54, %v11700_v17 }
 0x291   : > { %v1325_v50 = vpop.f32.mrf.mxu0 }
 0x292   : > { %v1326_v4 = vadd.f32 %v11592_v33, %v1325_v50 }
 0x294   : > { %v11680_v5 = vpack.i.bf16 %v1326_v4, %v11676_v54  ;;  %v2074_v0 = vrot.slane %v1326_v4, 4 }
 0x296   : > { %10442 = vrot.lane.b32.xlu0 %v11680_v5, %s11048_s30  ;;  %v2075_v25 = vsel %vm1398_vm6, 0.0, %v2074_v0 }
 0x29e   : > { %10457 = vrot.lane.b32.xlu0 %v11658_v41, %s11048_s30 }
 0x2a6   : > { %10462 = vrot.lane.b32.xlu0 %v11639_v12, %s11048_s30 }
 0x2ae   : > { %10487 = vrot.lane.b32.xlu0 %v11624_v37, %s11048_s30 }
 0x2b6   : > { %10502 = vrot.lane.b32.xlu0 %v11607_v53, %s11048_s30 }
 0x2be   : > { %10517 = vrot.lane.b32.xlu0 %v11658_v41, %s11049_s15 }
 0x2e3   : > { %v1328_v6 = vpop.f32.mrf.mxu0 }
 0x2e4   : > { %v11690_v7 = vadd.f32 %v11592_v33, %v1328_v6  ;;  %v2022_v6 = vrot.slane %v11676_v54, 4  ;;  %v2044_v54 = vrot.slane %v2027_v13, 4 }
 0x2e6   : > { %v2023_v18 = vsel %vm1398_vm6, 0.0, %v2022_v6 }
 0x2eb   : > { %v1330_v16 = vpop.f32.mrf.mxu0 }
 0x2ec   : > { %v11693_v60 = vadd.f32 %v11592_v33, %v1330_v16  ;;  %v1923_v33 = vperm.slane %v1319_v61, %v11700_v17  ;;  %v2079_v16 = vperm.slane %v1326_v4, %v11700_v17 }
 0x2ee   : > { %v11697_v11 = vpack.i.bf16 %v11693_v60, %v11690_v7  ;;  %v1940_v20 = vrot.slane %v1923_v33, 4  ;;  %v2096_v29 = vrot.slane %v2079_v16, 4 }
 0x2f0   : > { %10437 = vrot.lane.b32.xlu2 %v11697_v11, %s11048_s30 }
 0x2f8   : > { %10452 = vrot.lane.b32.xlu2 %v11668_v57, %s11048_s30  ;;  %v11706_v26 = vpop.permute.xlu1 %10447 }
 0x2f9   : > { %v10450_v8 = vunpack.i.h.bf16 %v11706_v26  ;;  %v10449_v30 = vunpack.i.l.bf16 %v11706_v26 }
 0x2fb   : > { %v1980_v56 = vrot.slane %v10450_v8, 4  ;;  %v1985_v55 = vperm.slane %v10450_v8, %v11700_v17  ;;  %v1928_v27 = vrot.slane %v10449_v30, 4  ;;  %v1933_v34 = vperm.slane %v10449_v30, %v11700_v17 }
 0x2fd   : > { %v1981_v39 = vsel %vm1398_vm6, 0.0, %v1980_v56  ;;  %v1990_v51 = vrot.slane %v1985_v55, 4  ;;  %v11717_v40 = vsel %vm1398_vm6, %v1985_v55, %v1992_v9  ;;  %v1929_v43 = vsel %vm1398_vm6, 0.0, %v1928_v27 }
 0x2fe   : > { %v1989_v10 = vperm.slane %v1981_v39, %v11700_v17  ;;  %v1937_v45 = vperm.slane %v1929_v43, %v11700_v17  ;;  %v1938_v28 = vrot.slane %v1933_v34, 4  ;;  %v11726_v47 = vsel %vm1398_vm6, %v1933_v34, %v1940_v20 }
 0x2ff   : > { %v11723_v46 = vsel %vm1398_vm6, %v1990_v51, %v1975_v19  ;;  %v2031_v9 = vperm.slane %v2023_v18, %v11700_v17  ;;  %v1715_v18 = vperm.slane %v11654_v38, %v11700_v17 }
 0x300   : > { %10467 = vrot.lane.b32.xlu2 %v11697_v11, %s11049_s15  ;;  %v2002_v48 = vrot.slane %v1989_v10, 4  ;;  %v11731_v63 = vsel %vm1398_vm6, %v1989_v10, %v2004_v44  ;;  %v11734_v52 = vsel %vm1398_vm6, %v1938_v28, %v1923_v33  ;;  %v1950_v2 = vrot.slane %v1937_v45, 4 }
 0x301   : > { %v11743_v50 = vsel %vm1398_vm6, %v1937_v45, %v1952_v23  ;;  %v2083_v33 = vperm.slane %v2075_v25, %v11700_v17  ;;  %v2056_v23 = vrot.slane %v2031_v9, 4 }
 0x302   : > { %v11737_v61 = vsel %vm1398_vm6, %v2002_v48, %v1979_v32  ;;  %v11740_v3 = vsel %vm1398_vm6, %v1950_v2, %v1927_v35 }
 0x303   : > { %v2108_v35 = vrot.slane %v2083_v33, 4 }
 0x308   : > { %10472 = vrot.lane.b32.xlu2 %v11680_v5, %s11049_s15  ;;  %v11752_v14 = vpop.permute.xlu0 %10442 }
 0x309   : > { %v10445_v19 = vunpack.i.h.bf16 %v11752_v14  ;;  %v10444_v21 = vunpack.i.l.bf16 %v11752_v14 }
 0x30b   : > { %v2084_v4 = vrot.slane %v10445_v19, 4  ;;  %v2089_v8 = vperm.slane %v10445_v19, %v11700_v17  ;;  %v2032_v30 = vrot.slane %v10444_v21, 4  ;;  %v2037_v32 = vperm.slane %v10444_v21, %v11700_v17 }
 0x30d   : > { %v2085_v56 = vsel %vm1398_vm6, 0.0, %v2084_v4  ;;  %v2094_v55 = vrot.slane %v2089_v8, 4  ;;  %v11763_v27 = vsel %vm1398_vm6, %v2089_v8, %v2096_v29  ;;  %v2033_v34 = vsel %vm1398_vm6, 0.0, %v2032_v30 }
 0x30e   : > { %v2093_v20 = vperm.slane %v2085_v56, %v11700_v17  ;;  %v2041_v39 = vperm.slane %v2033_v34, %v11700_v17  ;;  %v2042_v51 = vrot.slane %v2037_v32, 4  ;;  %v11772_v44 = vsel %vm1398_vm6, %v2037_v32, %v2044_v54 }
 0x30f   : > { %v11769_v43 = vsel %vm1398_vm6, %v2094_v55, %v2079_v16  ;;  %v1710_v16 = vrot.slane %v11654_v38, 4  ;;  %v1658_v4 = vrot.slane %v11632_v42, 4  ;;  %v1732_v8 = vrot.slane %v1715_v18, 4 }
 0x310   : > { %10492 = vrot.lane.b32.xlu2 %v11672_v59, %s11049_s15  ;;  %v2106_v10 = vrot.slane %v2093_v20, 4  ;;  %v11777_v45 = vsel %vm1398_vm6, %v2093_v20, %v2108_v35  ;;  %v11779_v28 = vpop.permute.xlu0 %10457  ;;  %v11782_v48 = vsel %vm1398_vm6, %v2042_v51, %v2027_v13  ;;  %v2054_v2 = vrot.slane %v2041_v39, 4 }
 0x311   : > { %v11792_v25 = vsel %vm1398_vm6, %v2041_v39, %v2056_v23  ;;  %v10459_v19 = vunpack.i.l.bf16 %v11779_v28  ;;  %v1711_v13 = vsel %vm1398_vm6, 0.0, %v1710_v16  ;;  %v1659_v55 = vsel %vm1398_vm6, 0.0, %v1658_v4 }
 0x312   : > { %v11785_v0 = vsel %vm1398_vm6, %v2106_v10, %v2083_v33  ;;  %v11788_v6 = vsel %vm1398_vm6, %v2054_v2, %v2031_v9  ;;  %v1719_v30 = vperm.slane %v1711_v13, %v11700_v17  ;;  %v1606_v51 = vrot.slane %v11635_v62, 4 }
 0x313   : > { %v1720_v33 = vrot.slane %v10459_v19, 4  ;;  %v1725_v29 = vperm.slane %v10459_v19, %v11700_v17  ;;  %v1663_v10 = vperm.slane %v11632_v42, %v11700_v17  ;;  %v1667_v23 = vperm.slane %v1659_v55, %v11700_v17 }
 0x314   : > { %v1744_v20 = vrot.slane %v1719_v30, 4  ;;  %v1607_v13 = vsel %vm1398_vm6, 0.0, %v1606_v51  ;;  %v1507_v59 = vperm.slane %v11619_v15, %v11700_v17 }
 0x315   : > { %v1721_v32 = vsel %vm1398_vm6, 0.0, %v1720_v33  ;;  %v1730_v38 = vrot.slane %v1725_v29, 4  ;;  %v11809_v56 = vsel %vm1398_vm6, %v1725_v29, %v1732_v8  ;;  %v1680_v33 = vrot.slane %v1663_v10, 4 }
 0x316   : > { %v1729_v54 = vperm.slane %v1721_v32, %v11700_v17  ;;  %v1692_v4 = vrot.slane %v1667_v23, 4 }
 0x317   : > { %v11813_v34 = vsel %vm1398_vm6, %v1730_v38, %v1715_v18  ;;  %v1611_v18 = vperm.slane %v11635_v62, %v11700_v17  ;;  %v1615_v62 = vperm.slane %v1607_v13, %v11700_v17 }
 0x318   : > { %10507 = vrot.lane.b32.xlu2 %v11668_v57, %s11049_s15  ;;  %v11800_v21 = vpop.permute.xlu0 %10462  ;;  %v1742_v35 = vrot.slane %v1729_v54, 4  ;;  %v11823_v16 = vsel %vm1398_vm6, %v1729_v54, %v1744_v20  ;;  %v1554_v54 = vrot.slane %v11615_v1, 4 }
 0x319   : > { %17727 = vst [vmem:[#allocation18_spill] sm:$0xff] %v11800_v21  ;;  %v10465_v9 = vunpack.i.h.bf16 %v11800_v21  ;;  %v10464_v8 = vunpack.i.l.bf16 %v11800_v21  ;;  %v1628_v20 = vrot.slane %v1611_v18, 4  ;;  %10532 = vrot.lane.b32.xlu0 %v11800_v21, %s11049_s15 }
 0x31a   : > { %v11819_v2 = vsel %vm1398_vm6, %v1742_v35, %v1719_v30 }
 0x31b   : > { %v1668_v39 = vrot.slane %v10465_v9, 4  ;;  %v1673_v29 = vperm.slane %v10465_v9, %v11700_v17  ;;  %v1616_v35 = vrot.slane %v10464_v8, 4  ;;  %v1621_v51 = vperm.slane %v10464_v8, %v11700_v17 }
 0x31c   : > { %v1559_v8 = vperm.slane %v11615_v1, %v11700_v17 }
 0x31d   : > { %v1669_v19 = vsel %vm1398_vm6, 0.0, %v1668_v39  ;;  %v1678_v30 = vrot.slane %v1673_v29, 4  ;;  %v11833_v32 = vsel %vm1398_vm6, %v1673_v29, %v1680_v33  ;;  %v1617_v33 = vsel %vm1398_vm6, 0.0, %v1616_v35 }
 0x31e   : > { %v1677_v42 = vperm.slane %v1669_v19, %v11700_v17  ;;  %v1502_v29 = vrot.slane %v11619_v15, 4  ;;  %v1625_v13 = vperm.slane %v1617_v33, %v11700_v17 }
 0x31f   : > { %v11841_v9 = vsel %vm1398_vm6, %v1678_v30, %v1663_v10  ;;  %v1555_v10 = vsel %vm1398_vm6, 0.0, %v1554_v54  ;;  %v1640_v30 = vrot.slane %v1615_v62, 4 }
 0x320   : > { %v1690_v38 = vrot.slane %v1677_v42, 4  ;;  %v11838_v55 = vsel %vm1398_vm6, %v1677_v42, %v1692_v4  ;;  %v11847_v19 = vpop.permute.xlu0 %10487  ;;  %v1626_v42 = vrot.slane %v1621_v51, 4  ;;  %v11853_v4 = vsel %vm1398_vm6, %v1621_v51, %v1628_v20  ;;  %10522 = vrot.lane.b32.xlu2 %v11779_v28, %s11049_s15 }
 0x321   : > { %17729 = vst [vmem:[#allocation20_spill] sm:$0xff] %v11853_v4  ;;  %v1638_v35 = vrot.slane %v1625_v13, 4  ;;  %v10489_v36 = vunpack.i.l.bf16 %v11847_v19  ;;  %v11864_v33 = vsel %vm1398_vm6, %v1625_v13, %v1640_v30  ;;  %v1503_v20 = vsel %vm1398_vm6, 0.0, %v1502_v29  ;;  %10547 = vrot.lane.b32.xlu0 %v11607_v53, %s11049_s15 }
 0x322   : > { %v11844_v39 = vsel %vm1398_vm6, %v1690_v38, %v1667_v23  ;;  %v10490_v23 = vunpack.i.h.bf16 %v11847_v19  ;;  %v11860_v38 = vsel %vm1398_vm6, %v1626_v42, %v1611_v18  ;;  %17731 = vst [vmem:[#allocation22_spill] sm:$0xff] %v11864_v33  ;;  %v1563_v51 = vperm.slane %v1555_v10, %v11700_v17 }
 0x323   : > { %17728 = vst [vmem:[#allocation19_spill] sm:$0xff] %v11844_v39  ;;  %v11869_v54 = vsel %vm1398_vm6, %v1638_v35, %v1615_v62  ;;  %v1576_v42 = vrot.slane %v1559_v8, 4  ;;  %v1512_v41 = vrot.slane %v10489_v36, 4  ;;  %v1517_v13 = vperm.slane %v10489_v36, %v11700_v17 }
 0x324   : > { %17730 = vst [vmem:[#allocation21_spill] sm:$0xff] %v11860_v38  ;;  %v1564_v1 = vrot.slane %v10490_v23, 4  ;;  %v1569_v18 = vperm.slane %v10490_v23, %v11700_v17  ;;  %v1397_v29 = vrot.slane %v11601_v22, 4  ;;  %v1511_v10 = vperm.slane %v1503_v20, %v11700_v17 }
 0x325   : > { %17732 = vst [vmem:[#allocation23_spill] sm:$0xff] %v11869_v54  ;;  %v1588_v30 = vrot.slane %v1563_v51, 4  ;;  %v1524_v23 = vrot.slane %v1507_v59, 4  ;;  %v1513_v38 = vsel %vm1398_vm6, 0.0, %v1512_v41  ;;  %v1522_v21 = vrot.slane %v1517_v13, 4 }
 0x326   : > { %v1565_v62 = vsel %vm1398_vm6, 0.0, %v1564_v1  ;;  %v1574_v15 = vrot.slane %v1569_v18, 4  ;;  %v11882_v54 = vsel %vm1398_vm6, %v1569_v18, %v1576_v42  ;;  %v1521_v20 = vperm.slane %v1513_v38, %v11700_v17 }
 0x327   : > { %v1573_v35 = vperm.slane %v1565_v62, %v11700_v17  ;;  %v1450_v1 = vrot.slane %v11597_v24, 4  ;;  %v1536_v62 = vrot.slane %v1511_v10, 4  ;;  %v11894_v4 = vsel %vm1398_vm6, %v1522_v21, %v1507_v59 }
 0x328   : > { %v11886_v39 = vsel %vm1398_vm6, %v1574_v15, %v1559_v8  ;;  %v11051_v18 = vmov 1934713408   ;;  %v11900_v8 = vsel %vm1398_vm6, %v1517_v13, %v1524_v23  ;;  %v1534_v15 = vrot.slane %v1521_v20, 4  ;;  %10537 = vrot.lane.b32.xlu2 %v11624_v37, %s11049_s15 }
 0x329   : > { %17733 = vst [vmem:[#allocation24_spill] sm:$0xff] %v11886_v39  ;;  %v1586_v36 = vrot.slane %v1573_v35, 4  ;;  %v11889_v33 = vsel %vm1398_vm6, %v1573_v35, %v1588_v30  ;;  %v1423_v42 = vunpack.c.l.s4 %v11051_v18  ;;  %v1399_v30 = vsel %vm1398_vm6, 0.0, %v1397_v29  ;;  %10567 = vrot.lane.b32.xlu0 %v11752_v14, %s11052_s29  ;;  %v12005_v18 = vpop.permute.xlu0 %10502 }
 0x32a   : > { %v1762_v35 = vrot.slane %v11651_v58, 4  ;;  %v1814_v39 = vrot.slane %v11664_v49, 4  ;;  %v11907_v59 = vsel %vm1398_vm6, %v1534_v15, %v1511_v10  ;;  %v11910_v21 = vsel %vm1398_vm6, %v1521_v20, %v1536_v62  ;;  %17743 = vst [vmem:[#allocation34_spill] sm:$0xff] %v12005_v18 }
 0x32b   : > { %v11897_v41 = vsel %vm1398_vm6, %v1586_v36, %v1563_v51  ;;  %17734 = vst [vmem:[#allocation25_spill] sm:$0xff] %v11907_v59  ;;  %v11916_v51 = vperm.slane %v11601_v22, %v11700_v17  ;;  %v1451_v13 = vsel %vm1398_vm6, 0.0, %v1450_v1  ;;  %v1866_v29 = vrot.slane %v11661_v31, 4 }
 0x32c   : > { %17735 = vst [vmem:[#allocation26_spill] sm:$0xff] %v11910_v21  ;;  %v11921_v23 = vperm.slane %v1399_v30, %v11700_v17  ;;  %v11923_v36 = vunpack.c.0.s8 %v1423_v42  ;;  %v1763_v10 = vsel %vm1398_vm6, 0.0, %v1762_v35  ;;  %v11928_v20 = vperm.slane %v11597_v24, %v11700_v17 }
 0x32d   : > { %17736 = vst [vmem:[#allocation27_spill] sm:$0xff] %v11916_v51  ;;  %v11931_v62 = vperm.slane %v1451_v13, %v11700_v17  ;;  %v11935_v22 = vperm.slane %v11651_v58, %v11700_v17  ;;  %v1815_v1 = vsel %vm1398_vm6, 0.0, %v1814_v39  ;;  %v1867_v42 = vsel %vm1398_vm6, 0.0, %v1866_v29 }
 0x32e   : > { %17737 = vst [vmem:[#allocation28_spill] sm:$0xff] %v11921_v23  ;;  %v2126_v15 = vrot.slane %v11690_v7, 4  ;;  %v2178_v30 = vrot.slane %v11693_v60, 4  ;;  %v11946_v35 = vperm.slane %v1763_v10, %v11700_v17  ;;  %v2001_v58 = vperm.slane %v11717_v40, %v11923_v36 }
 0x32f   : > { %17738 = vst [vmem:[#allocation29_spill] sm:$0xff] %v11931_v62  ;;  %v11952_v39 = vperm.slane %v11664_v49, %v11700_v17  ;;  %v11955_v13 = vperm.slane %v1815_v1, %v11700_v17  ;;  %v11959_v29 = vperm.slane %v11661_v31, %v11700_v17  ;;  %v2013_v24 = vperm.slane %v11731_v63, %v11923_v36 }
 0x330   : > { %v11967_v38 = vperm.slane %v1867_v42, %v11700_v17  ;;  %v2127_v49 = vsel %vm1398_vm6, 0.0, %v2126_v15  ;;  %v2179_v31 = vsel %vm1398_vm6, 0.0, %v2178_v30  ;;  %v11975_v63 = vperm.slane %v11723_v46, %v11923_v36  ;;  %10552 = vrot.lane.b32.xlu2 %v12005_v18, %s11049_s15 }
 0x331   : > { %v1949_v1 = vperm.slane %v11726_v47, %v11923_v36  ;;  %v11982_v42 = vperm.slane %v11690_v7, %v11700_v17  ;;  %v11984_v10 = vrot.slane %v2001_v58, 4  ;;  %v11988_v15 = vperm.slane %v11734_v52, %v11923_v36  ;;  %10577 = vrot.lane.b32.xlu0 %v11706_v26, %s11052_s29 }
 0x332   : > { %17739 = vst [vmem:[#allocation30_spill] sm:$0xff] %v11975_v63  ;;  %v11993_v53 = vrot.slane %v2013_v24, 4  ;;  %v11996_v47 = vperm.slane %v2127_v49, %v11700_v17  ;;  %v2183_v7 = vperm.slane %v11693_v60, %v11700_v17  ;;  %v12001_v58 = vperm.slane %v2179_v31, %v11700_v17 }
 0x333   : > { %17740 = vst [vmem:[#allocation31_spill] sm:$0xff] %v11984_v10  ;;  %v1961_v52 = vperm.slane %v11743_v50, %v11923_v36  ;;  %v12010_v24 = vperm.slane %v11737_v61, %v11923_v36  ;;  %v2014_v49 = vrot.slane %v11975_v63, 4  ;;  %v12013_v30 = vrot.slane %v1949_v1, 4 }
 0x334   : > { %17741 = vst [vmem:[#allocation32_spill] sm:$0xff] %v11988_v15  ;;  %v2148_v60 = vrot.slane %v11982_v42, 4  ;;  %v12020_v50 = vsel %vm1398_vm6, 0.0, %v11984_v10  ;;  %v1962_v31 = vrot.slane %v11988_v15, 4  ;;  %v12025_v46 = vsel %vm1398_vm6, 0.0, %v11993_v53 }
 0x335   : > { %17742 = vst [vmem:[#allocation33_spill] sm:$0xff] %v11993_v53  ;;  %v12029_v61 = vperm.slane %v11740_v3, %v11923_v36  ;;  %v2160_v63 = vrot.slane %v11996_v47, 4  ;;  %v2200_v23 = vrot.slane %v2183_v7, 4  ;;  %v2212_v10 = vrot.slane %v12001_v58, 4 }
 0x336   : > { %17744 = vst [vmem:[#allocation35_spill] sm:$0xff] %v12010_v24  ;;  %v12035_v51 = vrot.slane %v1961_v52, 4  ;;  %v12040_v53 = vsel %vm1398_vm6, 0.0, %v2014_v49  ;;  %v12046_v40 = vsel %vm1398_vm6, 0.0, %v12013_v30  ;;  %v12052_v52 = vsel %vm1398_vm6, 0.0, %v1962_v31 }
 0x337   : > { %17745 = vst [vmem:[#allocation36_spill] sm:$0xff] %v12013_v30  ;;  %v2105_v62 = vperm.slane %v11763_v27, %v11923_v36  ;;  %v12067_v31 = vperm.slane %v11769_v43, %v11923_v36  ;;  %v2117_v27 = vperm.slane %v11777_v45, %v11923_v36  ;;  %v17756_v43 = vunpack.i.h.bf16 %v11779_v28 }
 0x338   : > { %17746 = vst [vmem:[#allocation37_spill] sm:$0xff] %v12020_v50  ;;  %v12061_v50 = vsel %vm1398_vm6, 0.0, %v12035_v51  ;;  %10557 = vrot.lane.b32.xlu2 %v11697_v11, %s11052_s29 }
 0x339   : > { %17747 = vst [vmem:[#allocation38_spill] sm:$0xff] %v12025_v46  ;;  %v17757_v21 = vmov %v17756_v43  ;;  %10602 = vrot.lane.b32.xlu0 %v11639_v12, %s11052_s29 }
 0x33a   : > { %17748 = vst [vmem:[#allocation39_spill] sm:$0xff] %v12029_v61 }
 0x33b   : > { %17749 = vst [vmem:[#allocation40_spill] sm:$0xff] %v12035_v51  ;;  %v12074_v51 = vrot.slane %v2105_v62, 4 }
 0x33c   : > { %17750 = vst [vmem:[#allocation41_spill] sm:$0xff] %v12040_v53 }
 0x33d   : > { %17751 = vst [vmem:[#allocation42_spill] sm:$0xff] %v12046_v40 }
 0x33e   : > { %17752 = vst [vmem:[#allocation43_spill] sm:$0xff] %v12052_v52  ;;  %v1772_v52 = vrot.slane %v17756_v43, 4 }
 0x33f   : > { %17753 = vst [vmem:[#allocation44_spill] sm:$0xff] %v12061_v50 }
 0x340   : > { %17754 = vst [vmem:[#allocation45_spill] sm:$0xff] %v12067_v31  ;;  %10562 = vrot.lane.b32.xlu2 %v11680_v5, %s11052_s29 }
 0x341   : > { %17755 = vst [vmem:[#allocation46_spill] sm:$0xff] %v12074_v51  ;;  %10612 = vrot.lane.b32.xlu0 %v11624_v37, %s11052_s29 }
 0x348   : > { %10582 = vrot.lane.b32.xlu2 %v11668_v57, %s11052_s29 }
 0x349   : > { %10617 = vrot.lane.b32.xlu0 %v11847_v19, %s11052_s29 }
 0x34a   : > { %v12048_v1 = vpop.permute.xlu2 %10437 }
 0x34b   : > { %v10440_v49 = vunpack.i.h.bf16 %v12048_v1  ;;  %v10439_v15 = vunpack.i.l.bf16 %v12048_v1  ;;  %10477 = vrot.lane.b32.xlu1 %v12048_v1, %s11049_s15 }
 0x34d   : > { %v2188_v30 = vrot.slane %v10440_v49, 4  ;;  %v2193_v59 = vperm.slane %v10440_v49, %v11700_v17  ;;  %v2136_v3 = vrot.slane %v10439_v15, 4  ;;  %v2141_v46 = vperm.slane %v10439_v15, %v11700_v17 }
 0x34e   : > { %v1777_v15 = vperm.slane %v17757_v21, %v11700_v17  ;;  %v2118_v21 = vrot.slane %v12067_v31, 4 }
 0x34f   : > { %v2189_v53 = vsel %vm1398_vm6, 0.0, %v2188_v30  ;;  %v2198_v40 = vrot.slane %v2193_v59, 4  ;;  %v12078_v49 = vsel %vm1398_vm6, %v2193_v59, %v2200_v23  ;;  %v2137_v45 = vsel %vm1398_vm6, 0.0, %v2136_v3 }
 0x350   : > { %v2197_v24 = vperm.slane %v2189_v53, %v11700_v17  ;;  %v2146_v61 = vrot.slane %v2141_v46, 4  ;;  %v2145_v59 = vperm.slane %v2137_v45, %v11700_v17  ;;  %v12094_v23 = vsel %vm1398_vm6, %v2141_v46, %v2148_v60 }
 0x351   : > { %v12090_v62 = vsel %vm1398_vm6, %v2198_v40, %v2183_v7  ;;  %v12096_v30 = vrot.slane %v2117_v27, 4  ;;  %v2053_v53 = vperm.slane %v11772_v44, %v11923_v36  ;;  %v12106_v40 = vsel %vm1398_vm6, 0.0, %v12074_v51 }
 0x352   : > { %v2210_v3 = vrot.slane %v2197_v24, 4  ;;  %v12101_v43 = vsel %vm1398_vm6, %v2197_v24, %v2212_v10  ;;  %17759 = vst [vmem:[#allocation48_spill] sm:$0xff] %v12106_v40  ;;  %v12110_v7 = vsel %vm1398_vm6, %v2146_v61, %v11982_v42  ;;  %v2158_v46 = vrot.slane %v2145_v59, 4 }
 0x353   : > { %17758 = vst [vmem:[#allocation47_spill] sm:$0xff] %v12096_v30  ;;  %v12114_v60 = vperm.slane %v11785_v0, %v11923_v36  ;;  %v12118_v44 = vperm.slane %v11782_v48, %v11923_v36  ;;  %v1773_v10 = vsel %vm1398_vm6, 0.0, %v1772_v52  ;;  %v1782_v45 = vrot.slane %v1777_v15, 4  ;;  %10482 = vrot.lane.b32.xlu1 %v11752_v14, %s11049_s15 }
 0x354   : > { %v12123_v24 = vsel %vm1398_vm6, %v2210_v3, %v12001_v58  ;;  %v17762_v42 = vrot.slane %v11935_v22, 4  ;;  %v12131_v0 = vsel %vm1398_vm6, %v2158_v46, %v11996_v47  ;;  %v12135_v48 = vsel %vm1398_vm6, 0.0, %v12096_v30 }
 0x355   : > { %17760 = vst [vmem:[#allocation49_spill] sm:$0xff] %v12114_v60  ;;  %v2065_v52 = vperm.slane %v11792_v25, %v11923_v36  ;;  %v12139_v58 = vrot.slane %v2053_v53, 4  ;;  %v12144_v3 = vsel %vm1398_vm6, %v2145_v59, %v2160_v63  ;;  %v12149_v47 = vsel %vm1398_vm6, 0.0, %v2118_v21 }
 0x356   : > { %17761 = vst [vmem:[#allocation50_spill] sm:$0xff] %v12118_v44  ;;  %v1785_v61 = vsel %vm1398_vm6, %v1777_v15, %v17762_v42  ;;  %v12146_v15 = vpop.permute.xlu2 %10452  ;;  %v12154_v42 = vperm.slane %v11788_v6, %v11923_v36  ;;  %v1781_v25 = vperm.slane %v1773_v10, %v11700_v17  ;;  %v2066_v11 = vrot.slane %v12118_v44, 4 }
 0x357   : > { %17763 = vst [vmem:[#allocation51_spill] sm:$0xff] %v12135_v48  ;;  %v1793_v63 = vperm.slane %v1785_v61, %v11923_v36  ;;  %v1783_v21 = vsel %vm1398_vm6, %v1782_v45, %v11935_v22  ;;  %v10455_v46 = vunpack.i.h.bf16 %v12146_v15  ;;  %v10454_v6 = vunpack.i.l.bf16 %v12146_v15  ;;  %10587 = vrot.lane.b32.xlu2 %v12146_v15, %s11052_s29 }
 0x358   : > { %17764 = vst [vmem:[#allocation52_spill] sm:$0xff] %v12139_v58  ;;  %v12169_v10 = vsel %vm1398_vm6, 0.0, %v12139_v58  ;;  %v12171_v53 = vrot.slane %v2065_v52, 4  ;;  %v17770_v61 = vrot.slane %v11946_v35, 4  ;;  %v12180_v27 = vperm.slane %v1783_v21, %v11923_v36 }
 0x359   : > { %17765 = vst [vmem:[#allocation53_spill] sm:$0xff] %v12144_v3  ;;  %v1876_v45 = vrot.slane %v10455_v46, 4  ;;  %v1881_v37 = vperm.slane %v10455_v46, %v11700_v17  ;;  %v1824_v59 = vrot.slane %v10454_v6, 4  ;;  %v1794_v48 = vrot.slane %v1781_v25, 4 }
 0x35a   : > { %17766 = vst [vmem:[#allocation54_spill] sm:$0xff] %v12149_v47  ;;  %v1797_v22 = vsel %vm1398_vm6, %v1781_v25, %v17770_v61  ;;  %v12182_v30 = vrot.slane %v1793_v63, 4  ;;  %v1829_v52 = vperm.slane %v10454_v6, %v11700_v17  ;;  %v17773_v51 = vrot.slane %v11959_v29, 4 }
 0x35b   : > { %17767 = vst [vmem:[#allocation55_spill] sm:$0xff] %v12154_v42  ;;  %v1877_v40 = vsel %vm1398_vm6, 0.0, %v1876_v45  ;;  %v1886_v47 = vrot.slane %v1881_v37, 4  ;;  %v1825_v61 = vsel %vm1398_vm6, 0.0, %v1824_v59  ;;  %v1805_v46 = vperm.slane %v1797_v22, %v11923_v36  ;;  %10497 = vrot.lane.b32.xlu1 %v11706_v26, %s11049_s15  ;;  %v17808_v42 = vld [vmem:[#allocation23_spill] sm:$0xff] }
 0x35c   : > { %17768 = vst [vmem:[#allocation56_spill] sm:$0xff] %v12169_v10  ;;  %v12189_v31 = vsel %vm1398_vm6, %v1881_v37, %v17773_v51  ;;  %v1885_v25 = vperm.slane %v1877_v40, %v11700_v17  ;;  %v1833_v63 = vperm.slane %v1825_v61, %v11700_v17  ;;  %v1834_v21 = vrot.slane %v1829_v52, 4  ;;  %v17797_v10 = vld [vmem:[#allocation21_spill] sm:$0xff] }
 0x35d   : > { %17769 = vst [vmem:[#allocation57_spill] sm:$0xff] %v12171_v53  ;;  %v1741_v6 = vperm.slane %v11809_v56, %v11923_v36  ;;  %v12201_v45 = vsel %vm1398_vm6, %v1886_v47, %v11959_v29  ;;  %v17774_v51 = vrot.slane %v11952_v39, 4  ;;  %v1795_v5 = vsel %vm1398_vm6, %v1794_v48, %v11946_v35 }
 0x35e   : > { %17771 = vst [vmem:[#allocation58_spill] sm:$0xff] %v12180_v27  ;;  %v1753_v40 = vperm.slane %v11823_v16, %v11923_v36  ;;  %v1898_v22 = vrot.slane %v1885_v25, 4  ;;  %v17775_v37 = vrot.slane %v11967_v38, 4  ;;  %v12219_v29 = vsel %vm1398_vm6, 0.0, %v12171_v53  ;;  %v17795_v53 = vld [vmem:[#allocation19_spill] sm:$0xff] }
 0x35f   : > { %17772 = vst [vmem:[#allocation59_spill] sm:$0xff] %v12182_v30  ;;  %v12206_v59 = vsel %vm1398_vm6, %v1829_v52, %v17774_v51  ;;  %v1806_v47 = vrot.slane %v12180_v27, 4  ;;  %v12226_v35 = vsel %vm1398_vm6, %v1834_v21, %v11952_v39  ;;  %v1846_v16 = vrot.slane %v1833_v63, 4 }
 0x360   : > { %v12215_v56 = vsel %vm1398_vm6, %v1885_v25, %v17775_v37  ;;  %17776 = vst [vmem:[#allocation60_spill] sm:$0xff] %v12219_v29  ;;  %v12230_v48 = vsel %vm1398_vm6, 0.0, %v12182_v30  ;;  %v12232_v52 = vrot.slane %v1805_v46, 4  ;;  %v12236_v61 = vperm.slane %v11813_v34, %v11923_v36  ;;  %v17790_v37 = vld [vmem:[#allocation20_spill] sm:$0xff] }
 0x361   : > { %17777 = vst [vmem:[#allocation61_spill] sm:$0xff] %v12230_v48  ;;  %v12240_v25 = vsel %vm1398_vm6, %v1898_v22, %v11967_v38  ;;  %v12245_v39 = vsel %vm1398_vm6, 0.0, %v2066_v11  ;;  %v12248_v21 = vperm.slane %v1795_v5, %v11923_v36  ;;  %v12250_v51 = vrot.slane %v1741_v6, 4 }
 0x362   : > { %17778 = vst [vmem:[#allocation62_spill] sm:$0xff] %v12232_v52  ;;  %v12254_v46 = vsel %vm1398_vm6, %v1846_v16, %v11955_v13  ;;  %v12256_v34 = vrot.slane %v1753_v40, 4  ;;  %v1689_v38 = vperm.slane %v11833_v32, %v11923_v36  ;;  %v1701_v14 = vperm.slane %v11838_v55, %v11923_v36  ;;  %v17794_v40 = vld [vmem:[#allocation22_spill] sm:$0xff] }
 0x363   : > { %17779 = vst [vmem:[#allocation63_spill] sm:$0xff] %v12236_v61  ;;  %v17784_v11 = vrot.slane %v11955_v13, 4  ;;  %v12272_v16 = vsel %vm1398_vm6, 0.0, %v1806_v47  ;;  %v12276_v32 = vsel %vm1398_vm6, 0.0, %v12232_v52  ;;  %v12280_v55 = vperm.slane %v11819_v2, %v11923_v36  ;;  %10512 = vrot.lane.b32.xlu1 %v12146_v15, %s11049_s15 }
 0x364   : > { %17780 = vst [vmem:[#allocation64_spill] sm:$0xff] %v12245_v39  ;;  %v1754_v13 = vrot.slane %v12236_v61, 4  ;;  %v12292_v47 = vperm.slane %v11841_v9, %v11923_v36  ;;  %v1637_v5 = vperm.slane %v17790_v37, %v11923_v36  ;;  %v12298_v2 = vsel %vm1398_vm6, 0.0, %v12256_v34 }
 0x365   : > { %17781 = vst [vmem:[#allocation65_spill] sm:$0xff] %v12248_v21  ;;  %v12265_v22 = vsel %vm1398_vm6, %v1833_v63, %v17784_v11  ;;  %v12288_v11 = vsel %vm1398_vm6, 0.0, %v12250_v51  ;;  %v12300_v6 = vrot.slane %v1689_v38, 4  ;;  %v12302_v57 = vrot.slane %v1701_v14, 4 }
 0x366   : > { %17782 = vst [vmem:[#allocation66_spill] sm:$0xff] %v12250_v51  ;;  %v1649_v63 = vperm.slane %v17794_v40, %v11923_v36  ;;  %v12309_v9 = vperm.slane %v17795_v53, %v11923_v36  ;;  %v12313_v37 = vperm.slane %v17797_v10, %v11923_v36  ;;  %v1585_v39 = vperm.slane %v11882_v54, %v11923_v36 }
 0x367   : > { %17783 = vst [vmem:[#allocation67_spill] sm:$0xff] %v12256_v34  ;;  %v12318_v38 = vsel %vm1398_vm6, 0.0, %v1754_v13  ;;  %v17800_v40 = vunpack.i.h.bf16 %v12005_v18  ;;  %v1702_v10 = vrot.slane %v12292_v47, 4  ;;  %v12328_v58 = vrot.slane %v1637_v5, 4  ;;  %v17805_v5 = vld [vmem:[#allocation24_spill] sm:$0xff]  ;;  %v12415_v34 = vpop.permute.xlu0 %10517 }
 0x368   : > { %17785 = vst [vmem:[#allocation68_spill] sm:$0xff] %v12272_v16  ;;  %v12332_v54 = vsel %vm1398_vm6, 0.0, %v12300_v6  ;;  %v12336_v13 = vsel %vm1398_vm6, 0.0, %v12302_v57  ;;  %v1597_v26 = vperm.slane %v11889_v33, %v11923_v36  ;;  %v1650_v29 = vrot.slane %v12313_v37, 4 }
 0x369   : > { %17786 = vst [vmem:[#allocation69_spill] sm:$0xff] %v12276_v32  ;;  %v1460_v60 = vrot.slane %v17800_v40, 4  ;;  %v12338_v40 = vrot.slane %v1649_v63, 4  ;;  %v12346_v14 = vperm.slane %v17805_v5, %v11923_v36  ;;  %v12348_v44 = vrot.slane %v1585_v39, 4 }
 0x36a   : > { %17787 = vst [vmem:[#allocation70_spill] sm:$0xff] %v12280_v55  ;;  %v12352_v50 = vperm.slane %v17808_v42, %v11923_v36  ;;  %v17810_v32 = vunpack.i.h.bf16 %v12005_v18  ;;  %v17811_v53 = vunpack.i.l.bf16 %v12005_v18  ;;  %v12363_v5 = vsel %vm1398_vm6, 0.0, %v1702_v10  ;;  %v12380_v10 = vpop.permute.xlu2 %10467 }
 0x36b   : > { %17788 = vst [vmem:[#allocation71_spill] sm:$0xff] %v12288_v11  ;;  %v1461_v63 = vsel %vm1398_vm6, 0.0, %v1460_v60  ;;  %v12369_v60 = vsel %vm1398_vm6, 0.0, %v12328_v58  ;;  %v12375_v48 = vrot.slane %v1597_v26, 4  ;;  %v12383_v39 = vsel %vm1398_vm6, 0.0, %v1650_v29  ;;  %10527 = vrot.lane.b32.xlu1 %v11639_v12, %s11049_s15 }
 0x36c   : > { %17789 = vst [vmem:[#allocation72_spill] sm:$0xff] %v12292_v47  ;;  %v1465_v33 = vperm.slane %v17810_v32, %v11700_v17  ;;  %v1408_v52 = vrot.slane %v17811_v53, 4  ;;  %v12373_v32 = vsel %vm1398_vm6, 0.0, %v12338_v40  ;;  %v1413_v16 = vperm.slane %v17811_v53, %v11700_v17 }
 0x36d   : > { %17791 = vst [vmem:[#allocation20_spill] sm:$0xff] %v12298_v2  ;;  %v1598_v42 = vrot.slane %v12346_v14, 4  ;;  %v12388_v30 = vsel %vm1398_vm6, 0.0, %v12348_v44  ;;  %v1469_v27 = vperm.slane %v1461_v63, %v11700_v17  ;;  %v1533_v2 = vperm.slane %v11900_v8, %v11923_v36 }
 0x36e   : > { %17792 = vst [vmem:[#allocation73_spill] sm:$0xff] %v12300_v6  ;;  %v1470_v18 = vrot.slane %v1465_v33, 4  ;;  %v1409_v53 = vsel %vm1398_vm6, 0.0, %v1408_v52  ;;  %v12401_v11 = vperm.slane %v11897_v41, %v11923_v36  ;;  %v17819_v63 = vrot.slane %v11928_v20, 4  ;;  %v17826_v52 = vld [vmem:[#allocation25_spill] sm:$0xff] }
 0x36f   : > { %17793 = vst [vmem:[#allocation74_spill] sm:$0xff] %v12302_v57  ;;  %v12408_v8 = vsel %vm1398_vm6, 0.0, %v12375_v48  ;;  %v12413_v15 = vperm.slane %v11894_v4, %v11923_v36  ;;  %v1418_v29 = vrot.slane %v1413_v16, 4  ;;  %v12418_v41 = vsel %vm1398_vm6, 0.0, %v1598_v42  ;;  %v17829_v57 = vld [vmem:[#allocation16_spill] sm:$0xff] }
 0x370   : > { %17796 = vst [vmem:[#allocation22_spill] sm:$0xff] %v12309_v9  ;;  %v1473_v26 = vsel %vm1398_vm6, %v1465_v33, %v17819_v63  ;;  %v17824_v33 = vld [vmem:[#allocation29_spill] sm:$0xff]  ;;  %v1417_v21 = vperm.slane %v1409_v53, %v11700_v17  ;;  %v12428_v55 = vperm.slane %v17826_v52, %v11923_v36  ;;  %v12430_v4 = vrot.slane %v1533_v2, 4  ;;  %10592 = vrot.lane.b32.xlu2 %v17829_v57, %s11052_s29 }
 0x371   : > { %17798 = vst [vmem:[#allocation19_spill] sm:$0xff] %v12313_v37  ;;  %v17825_v63 = vrot.slane %v17824_v33, 4  ;;  %v1481_v42 = vperm.slane %v1473_v26, %v11923_v36  ;;  %v10520_v53 = vunpack.i.h.bf16 %v12415_v34  ;;  %v1546_v52 = vrot.slane %v12413_v15, 4 }
 0x372   : > { %17799 = vst [vmem:[#allocation21_spill] sm:$0xff] %v12318_v38  ;;  %v17823_v38 = vld [vmem:[#allocation26_spill] sm:$0xff]  ;;  %v10519_v47 = vunpack.i.l.bf16 %v12415_v34  ;;  %v2157_v37 = vperm.slane %v12094_v23, %v11923_v36  ;;  %v12597_v23 = vperm.slane %v12131_v0, %v11923_v36 }
 0x373   : > { %17801 = vst [vmem:[#allocation75_spill] sm:$0xff] %v12328_v58  ;;  %v1545_v51 = vperm.slane %v17823_v38, %v11923_v36  ;;  %v1485_v61 = vsel %vm1398_vm6, %v1469_v27, %v17825_v63  ;;  %v17834_v63 = vld [vmem:[#allocation28_spill] sm:$0xff]  ;;  %10542 = vrot.lane.b32.xlu1 %v11847_v19, %s11049_s15 }
 0x374   : > { %17802 = vst [vmem:[#allocation76_spill] sm:$0xff] %v12332_v54  ;;  %v1482_v54 = vrot.slane %v1469_v27, 4  ;;  %v1493_v2 = vperm.slane %v1485_v61, %v11923_v36  ;;  %v17835_v27 = vrot.slane %v17834_v63, 4  ;;  %v12458_v61 = vsel %vm1398_vm6, 0.0, %v12430_v4 }
 0x375   : > { %17803 = vst [vmem:[#allocation77_spill] sm:$0xff] %v12336_v13  ;;  %v1471_v13 = vsel %vm1398_vm6, %v1470_v18, %v11928_v20  ;;  %v12447_v26 = vrot.slane %v1545_v51, 4  ;;  %v12463_v51 = vpop.permute.xlu2 %10472 }
 0x376   : > { %17804 = vst [vmem:[#allocation78_spill] sm:$0xff] %v12338_v40  ;;  %v12450_v57 = vperm.slane %v1471_v13, %v11923_v36  ;;  %v1433_v38 = vsel %vm1398_vm6, %v1417_v21, %v17835_v27  ;;  %v1483_v13 = vsel %vm1398_vm6, %v1482_v54, %v17824_v33  ;;  %v3330_v27 = vrot.slane %v10520_v53, 4 }
 0x377   : > { %17806 = vst [vmem:[#allocation24_spill] sm:$0xff] %v12346_v14  ;;  %v12486_v33 = vperm.slane %v1483_v13, %v11923_v36  ;;  %v12503_v40 = vperm.slane %v10520_v53, %v11700_v17  ;;  %v10475_v0 = vunpack.i.h.bf16 %v12463_v51 }
 0x378   : > { %17807 = vst [vmem:[#allocation79_spill] sm:$0xff] %v12348_v44  ;;  %v1494_v54 = vrot.slane %v12450_v57, 4  ;;  %10597 = vrot.lane.b32.xlu2 %v11779_v28, %s11052_s29  ;;  %v3331_v13 = vsel %vm1398_vm6, 0.0, %v3330_v27  ;;  %v12519_v27 = vperm.slane %v12090_v62, %v11923_v36 }
 0x379   : > { %17809 = vst [vmem:[#allocation23_spill] sm:$0xff] %v12352_v50 }
 0x37a   : > { %17812 = vst [vmem:[#allocation80_spill] sm:$0xff] %v12363_v5  ;;  %v17830_v5 = vld [vmem:[#allocation27_spill] sm:$0xff]  ;;  %v12522_v53 = vsel %vm1398_vm6, 0.0, %v1494_v54  ;;  %v2221_v54 = vperm.slane %v12101_v43, %v11923_v36  ;;  %v1897_v43 = vperm.slane %v12189_v31, %v11923_v36  ;;  %v12574_v31 = vperm.slane %v12123_v24, %v11923_v36 }
 0x37b   : > { %17813 = vst [vmem:[#allocation81_spill] sm:$0xff] %v12369_v60  ;;  %v1419_v6 = vsel %vm1398_vm6, %v1418_v29, %v17830_v5  ;;  %v17831_v20 = vrot.slane %v17830_v5, 4  ;;  %v12461_v5 = vrot.slane %v1481_v42, 4  ;;  %v12476_v42 = vrot.slane %v1493_v2, 4 }
 0x37c   : > { %17814 = vst [vmem:[#allocation82_spill] sm:$0xff] %v12373_v32  ;;  %v12474_v32 = vsel %vm1398_vm6, 0.0, %v1546_v52  ;;  %v12481_v29 = vsel %vm1398_vm6, 0.0, %v12447_v26  ;;  %v2222_v60 = vrot.slane %v12519_v27, 4  ;;  %v12576_v58 = vrot.slane %v2221_v54, 4 }
 0x37d   : > { %17815 = vst [vmem:[#allocation83_spill] sm:$0xff] %v12375_v48  ;;  %v1421_v18 = vsel %vm1398_vm6, %v1413_v16, %v17831_v20  ;;  %v1430_v16 = vrot.slane %v1417_v21, 4  ;;  %v12470_v20 = vperm.slane %v1419_v6, %v11923_v36  ;;  %v1441_v21 = vperm.slane %v1433_v38, %v11923_v36 }
 0x37e   : > { %17816 = vst [vmem:[#allocation84_spill] sm:$0xff] %v12383_v39  ;;  %v1429_v34 = vperm.slane %v1421_v18, %v11923_v36  ;;  %v3278_v6 = vrot.slane %v10519_v47, 4  ;;  %v12490_v52 = vsel %vm1398_vm6, 0.0, %v12461_v5  ;;  %v2209_v38 = vperm.slane %v12078_v49, %v11923_v36 }
 0x37f   : > { %17817 = vst [vmem:[#allocation85_spill] sm:$0xff] %v12388_v30  ;;  %v1431_v2 = vsel %vm1398_vm6, %v1430_v16, %v17834_v63  ;;  %v1442_v18 = vrot.slane %v12470_v20, 4  ;;  %v12508_v63 = vsel %vm1398_vm6, 0.0, %v12476_v42  ;;  %v12510_v16 = vrot.slane %v1441_v21, 4 }
 0x380   : > { %17818 = vst [vmem:[#allocation86_spill] sm:$0xff] %v12401_v11  ;;  %v12499_v12 = vrot.slane %v1429_v34, 4  ;;  %v12514_v28 = vperm.slane %v1431_v2, %v11923_v36  ;;  %v3279_v34 = vsel %vm1398_vm6, 0.0, %v3278_v6  ;;  %v12526_v39 = vperm.slane %v3331_v13, %v11700_v17  ;;  %v12552_v2 = vpop.permute.xlu2 %10492  ;;  %10627 = vrot.lane.b32.xlu2 %v12048_v1, %s11052_s29 }
 0x381   : > { %17820 = vst [vmem:[#allocation87_spill] sm:$0xff] %v12408_v8  ;;  %v12528_v21 = vrot.slane %v2209_v38, 4  ;;  %v12534_v6 = vsel %vm1398_vm6, 0.0, %v1442_v18  ;;  %v12544_v13 = vsel %vm1398_vm6, 0.0, %v12510_v16  ;;  %v12547_v38 = vperm.slane %v10519_v47, %v11700_v17 }
 0x382   : > { %17821 = vst [vmem:[#allocation88_spill] sm:$0xff] %v12413_v15  ;;  %v12538_v62 = vsel %vm1398_vm6, 0.0, %v12499_v12  ;;  %v12550_v19 = vperm.slane %v3279_v34, %v11700_v17  ;;  %v12567_v34 = vperm.slane %v12110_v7, %v11923_v36  ;;  %v12584_v7 = vperm.slane %v12201_v45, %v11923_v36 }
 0x383   : > { %17822 = vst [vmem:[#allocation89_spill] sm:$0xff] %v12418_v41  ;;  %v12563_v47 = vsel %vm1398_vm6, 0.0, %v12528_v21  ;;  %v10470_v1 = vunpack.i.h.bf16 %v12380_v10  ;;  %v12588_v18 = vsel %vm1398_vm6, 0.0, %v2222_v60  ;;  %v1909_v54 = vperm.slane %v12215_v56, %v11923_v36  ;;  %v17862_v60 = vld [vmem:[#allocation17_spill] sm:$0xff] }
 0x384   : > { %17827 = vst [vmem:[#allocation26_spill] sm:$0xff] %v12428_v55  ;;  %v1845_v45 = vperm.slane %v12206_v59, %v11923_v36  ;;  %v10469_v49 = vunpack.i.l.bf16 %v12380_v10  ;;  %10572 = vrot.lane.b32.xlu1 %v17862_v60, %s11052_s29  ;;  %v12608_v56 = vsel %vm1398_vm6, 0.0, %v12576_v58  ;;  %v1910_v59 = vrot.slane %v12584_v7, 4 }
 0x385   : > { %17828 = vst [vmem:[#allocation29_spill] sm:$0xff] %v12430_v4  ;;  %v1857_v10 = vperm.slane %v12265_v22, %v11923_v36  ;;  %v12622_v24 = vrot.slane %v1909_v54, 4  ;;  %v12644_v3 = vperm.slane %v10470_v1, %v11700_v17 }
 0x386   : > { %17832 = vst [vmem:[#allocation25_spill] sm:$0xff] %v12447_v26  ;;  %v12634_v22 = vrot.slane %v1845_v45, 4 }
 0x387   : > { %17833 = vst [vmem:[#allocation16_spill] sm:$0xff] %v12450_v57  ;;  %v12650_v45 = vrot.slane %v1857_v10, 4 }
 0x388   : > { %17836 = vst [vmem:[#allocation27_spill] sm:$0xff] %v12458_v61  ;;  %v12666_v10 = vsel %vm1398_vm6, 0.0, %v12634_v22 }
 0x389   : > { %17837 = vst [vmem:[#allocation28_spill] sm:$0xff] %v12461_v5 }
 0x38a   : > { %17838 = vst [vmem:[#allocation90_spill] sm:$0xff] %v12470_v20 }
 0x38b   : > { %17839 = vst [vmem:[#allocation91_spill] sm:$0xff] %v12474_v32 }
 0x38c   : > { %17840 = vst [vmem:[#allocation92_spill] sm:$0xff] %v12476_v42 }
 0x38d   : > { %17841 = vst [vmem:[#allocation93_spill] sm:$0xff] %v12481_v29 }
 0x38e   : > { %17842 = vst [vmem:[#allocation94_spill] sm:$0xff] %v12486_v33 }
 0x38f   : > { %17843 = vst [vmem:[#allocation95_spill] sm:$0xff] %v12490_v52 }
 0x390   : > { %17844 = vst [vmem:[#allocation96_spill] sm:$0xff] %v12499_v12 }
 0x391   : > { %17845 = vst [vmem:[#allocation97_spill] sm:$0xff] %v12508_v63 }
 0x392   : > { %17846 = vst [vmem:[#allocation98_spill] sm:$0xff] %v12510_v16 }
 0x393   : > { %17847 = vst [vmem:[#allocation99_spill] sm:$0xff] %v12514_v28 }
 0x394   : > { %17848 = vst [vmem:[#allocation100_spill] sm:$0xff] %v12519_v27  ;;  %v12593_v27 = vrot.slane %v1897_v43, 4  ;;  %v12610_v43 = vrot.slane %v2157_v37, 4  ;;  %v12626_v37 = vperm.slane %v12226_v35, %v11923_v36 }
 0x395   : > { %17849 = vst [vmem:[#allocation101_spill] sm:$0xff] %v12522_v53 }
 0x396   : > { %17850 = vst [vmem:[#allocation102_spill] sm:$0xff] %v12528_v21  ;;  %v12620_v60 = vsel %vm1398_vm6, 0.0, %v12593_v27  ;;  %v12640_v54 = vsel %vm1398_vm6, 0.0, %v12610_v43  ;;  %v12647_v21 = vsel %vm1398_vm6, 0.0, %v1910_v59  ;;  %v12662_v59 = vperm.slane %v12254_v46, %v11923_v36 }
 0x397   : > { %17851 = vst [vmem:[#allocation103_spill] sm:$0xff] %v12534_v6  ;;  %v12679_v46 = vperm.slane %v10475_v0, %v11700_v17 }
 0x398   : > { %17852 = vst [vmem:[#allocation104_spill] sm:$0xff] %v12538_v62 }
 0x399   : > { %17853 = vst [vmem:[#allocation105_spill] sm:$0xff] %v12544_v13 }
 0x39a   : > { %17854 = vst [vmem:[#allocation106_spill] sm:$0xff] %v12563_v47  ;;  %v3746_v47 = vrot.slane %v10470_v1, 4  ;;  %v10495_v1 = vunpack.i.h.bf16 %v12552_v2 }
 0x39b   : > { %17855 = vst [vmem:[#allocation107_spill] sm:$0xff] %v12567_v34  ;;  %v12636_v34 = vpop.permute.xlu2 %10507 }
 0x39c   : > { %17856 = vst [vmem:[#allocation108_spill] sm:$0xff] %v12574_v31  ;;  %v3694_v31 = vrot.slane %v10469_v49, 4 }
 0x39d   : > { %17857 = vst [vmem:[#allocation109_spill] sm:$0xff] %v12576_v58  ;;  %v10474_v58 = vunpack.i.l.bf16 %v12463_v51  ;;  %v3642_v51 = vrot.slane %v10475_v0, 4 }
 0x39e   : > { %17858 = vst [vmem:[#allocation110_spill] sm:$0xff] %v12584_v7 }
 0x39f   : > { %17859 = vst [vmem:[#allocation111_spill] sm:$0xff] %v12588_v18  ;;  %v12632_v18 = vperm.slane %v12240_v25, %v11923_v36  ;;  %v3590_v35 = vrot.slane %v10474_v58, 4  ;;  %v17876_v25 = vld [vmem:[#allocation18_spill] sm:$0xff] }
 0x3a0   : > { %17860 = vst [vmem:[#allocation112_spill] sm:$0xff] %v12593_v27  ;;  %v12655_v27 = vsel %vm1398_vm6, 0.0, %v12622_v24  ;;  %10607 = vrot.lane.b32.xlu1 %v17876_v25, %s11052_s29 }
 0x3a1   : > { %17861 = vst [vmem:[#allocation113_spill] sm:$0xff] %v12597_v23  ;;  %v3643_v23 = vsel %vm1398_vm6, 0.0, %v3642_v51  ;;  %v3591_v0 = vsel %vm1398_vm6, 0.0, %v3590_v35  ;;  %v3538_v51 = vrot.slane %v10495_v1, 4 }
 0x3a2   : > { %17863 = vst [vmem:[#allocation17_spill] sm:$0xff] %v12608_v56  ;;  %v3747_v56 = vsel %vm1398_vm6, 0.0, %v3746_v47  ;;  %v3695_v47 = vsel %vm1398_vm6, 0.0, %v3694_v31  ;;  %v12687_v31 = vperm.slane %v10474_v58, %v11700_v17  ;;  %v12701_v58 = vperm.slane %v3643_v23, %v11700_v17 }
 0x3a3   : > { %17864 = vst [vmem:[#allocation114_spill] sm:$0xff] %v12610_v43  ;;  %v1858_v43 = vrot.slane %v12626_v37, 4  ;;  %v12708_v35 = vperm.slane %v3591_v0, %v11700_v17  ;;  %v10510_v0 = vunpack.i.h.bf16 %v12636_v34 }
 0x3a4   : > { %17865 = vst [vmem:[#allocation115_spill] sm:$0xff] %v12620_v60  ;;  %v10509_v60 = vunpack.i.l.bf16 %v12636_v34 }
 0x3a5   : > { %17866 = vst [vmem:[#allocation116_spill] sm:$0xff] %v12622_v24  ;;  %v12675_v24 = vperm.slane %v10469_v49, %v11700_v17  ;;  %v12691_v25 = vsel %vm1398_vm6, 0.0, %v1858_v43  ;;  %v12694_v49 = vperm.slane %v3695_v47, %v11700_v17  ;;  %v3434_v50 = vrot.slane %v10510_v0, 4 }
 0x3a6   : > { %17867 = vst [vmem:[#allocation117_spill] sm:$0xff] %v12626_v37  ;;  %v12767_v30 = vperm.slane %v10509_v60, %v11700_v17 }
 0x3a7   : > { %17868 = vst [vmem:[#allocation118_spill] sm:$0xff] %v12632_v18 }
 0x3a8   : > { %17869 = vst [vmem:[#allocation119_spill] sm:$0xff] %v12634_v22 }
 0x3a9   : > { %17870 = vst [vmem:[#allocation120_spill] sm:$0xff] %v12640_v54  ;;  %v12672_v54 = vperm.slane %v3747_v56, %v11700_v17  ;;  %v10494_v56 = vunpack.i.l.bf16 %v12552_v2  ;;  %v3539_v2 = vsel %vm1398_vm6, 0.0, %v3538_v51 }
 0x3aa   : > { %17871 = vst [vmem:[#allocation121_spill] sm:$0xff] %v12647_v21  ;;  %v12684_v21 = vsel %vm1398_vm6, 0.0, %v12650_v45 }
 0x3ab   : > { %17872 = vst [vmem:[#allocation122_spill] sm:$0xff] %v12650_v45  ;;  %v3486_v7 = vrot.slane %v10494_v56, 4  ;;  %v12718_v47 = vperm.slane %v10494_v56, %v11700_v17  ;;  %v12728_v45 = vperm.slane %v3539_v2, %v11700_v17  ;;  %v3382_v56 = vrot.slane %v10509_v60, 4 }
 0x3ac   : > { %17873 = vst [vmem:[#allocation123_spill] sm:$0xff] %v12655_v27  ;;  %v12712_v27 = vperm.slane %v10495_v1, %v11700_v17  ;;  %v17879_v1 = vld [vmem:[#allocation15_spill] sm:$0xff] }
 0x3ad   : > { %17874 = vst [vmem:[#allocation124_spill] sm:$0xff] %v12662_v59  ;;  %10622 = vrot.lane.b32.xlu1 %v17879_v1, %s11052_s29  ;;  %v3487_v37 = vsel %vm1398_vm6, 0.0, %v3486_v7  ;;  %v17880_v1 = vrot.slane %v12503_v40, 4 }
 0x3ae   : > { %17875 = vst [vmem:[#allocation125_spill] sm:$0xff] %v12666_v10  ;;  %v10523_v10 = vpop.permute.xlu2 %10522 }
 0x3af   : > { %17877 = vst [vmem:[#allocation18_spill] sm:$0xff] %v12684_v21  ;;  %v10525_v21 = vunpack.i.h.bf16 %v10523_v10  ;;  %v10524_v43 = vunpack.i.l.bf16 %v10523_v10 }
 0x3b0   : > { %17878 = vst [vmem:[#allocation126_spill] sm:$0xff] %v12691_v25 }
 0x3b1   : > { %v3340_v25 = vrot.slane %v10525_v21, 4  ;;  %v3345_v22 = vperm.slane %v10525_v21, %v11700_v17  ;;  %v3288_v23 = vrot.slane %v10524_v43, 4  ;;  %v3293_v51 = vperm.slane %v10524_v43, %v11700_v17 }
 0x3b3   : > { %v3341_v34 = vsel %vm1398_vm6, 0.0, %v3340_v25  ;;  %v3350_v18 = vrot.slane %v3345_v22, 4  ;;  %v3353_v59 = vsel %vm1398_vm6, %v3345_v22, %v17880_v1  ;;  %v3289_v21 = vsel %vm1398_vm6, 0.0, %v3288_v23 }
 0x3b4   : > { %v3349_v43 = vperm.slane %v3341_v34, %v11700_v17  ;;  %v3361_v10 = vperm.slane %v3353_v59, %v11923_v36  ;;  %v3297_v2 = vperm.slane %v3289_v21, %v11700_v17  ;;  %v3298_v9 = vrot.slane %v3293_v51, 4 }
 0x3b5   : > { %v3351_v7 = vsel %vm1398_vm6, %v3350_v18, %v12503_v40  ;;  %v17881_v25 = vrot.slane %v12547_v38, 4  ;;  %v17882_v23 = vrot.slane %v12526_v39, 4  ;;  %v12750_v21 = vperm.slane %v3487_v37, %v11700_v17 }
 0x3b6   : > { %v3357_v22 = vperm.slane %v3351_v7, %v11923_v36  ;;  %v3362_v1 = vrot.slane %v3349_v43, 4  ;;  %v3376_v59 = vrot.slane %v3361_v10, 4  ;;  %v10538_v48 = vpop.permute.xlu2 %10537  ;;  %v3310_v18 = vrot.slane %v3297_v2, 4 }
 0x3b7   : > { %v3301_v8 = vsel %vm1398_vm6, %v3293_v51, %v17881_v25  ;;  %v3365_v34 = vsel %vm1398_vm6, %v3349_v43, %v17882_v23  ;;  %v3299_v41 = vsel %vm1398_vm6, %v3298_v9, %v12547_v38  ;;  %v3435_v10 = vsel %vm1398_vm6, 0.0, %v3434_v50 }
 0x3b8   : > { %v3373_v40 = vperm.slane %v3365_v34, %v11923_v36  ;;  %v3363_v51 = vsel %vm1398_vm6, %v3362_v1, %v12526_v39  ;;  %v3374_v25 = vrot.slane %v3357_v22, 4  ;;  %v3377_v7 = vsel %vm1398_vm6, 0.0, %v3376_v59 }
 0x3b9   : > { %v12761_v43 = vperm.slane %v10510_v0, %v11700_v17  ;;  %v3383_v37 = vsel %vm1398_vm6, 0.0, %v3382_v56  ;;  %v3309_v23 = vperm.slane %v3301_v8, %v11923_v36  ;;  %v4069_v39 = vrot.slane %v3377_v7, 4 }
 0x3ba   : > { %v17883_v1 = vrot.slane %v12550_v19, 4  ;;  %v12773_v9 = vperm.slane %v3363_v51, %v11923_v36  ;;  %v3375_v50 = vsel %vm1398_vm6, 0.0, %v3374_v25  ;;  %v3305_v38 = vperm.slane %v3299_v41, %v11923_v36  ;;  %v12790_v41 = vpop.permute.xlu0 %10532 }
 0x3bb   : > { %v3311_v8 = vsel %vm1398_vm6, %v3310_v18, %v12550_v19  ;;  %v12781_v60 = vperm.slane %v3435_v10, %v11700_v17  ;;  %v12784_v56 = vperm.slane %v3383_v37, %v11700_v17  ;;  %v12786_v7 = vrot.slane %v3373_v40, 4 }
 0x3bc   : > { %v3313_v44 = vsel %vm1398_vm6, %v3297_v2, %v17883_v1  ;;  %17884 = vst [vmem:[#allocation15_spill] sm:$0xff] %v12773_v9  ;;  %v3324_v25 = vrot.slane %v3309_v23, 4  ;;  %v10540_v1 = vunpack.i.h.bf16 %v10538_v48  ;;  %v12793_v19 = vsel %vm1398_vm6, %v3376_v59, %v3357_v22 }
 0x3bd   : > { %17885 = vst [vmem:[#allocation127_spill] sm:$0xff] %v12786_v7  ;;  %v3321_v51 = vperm.slane %v3313_v44, %v11923_v36  ;;  %v12796_v18 = vsel %vm1398_vm6, %v4069_v39, %v3375_v50  ;;  %v12799_v10 = vperm.slane %v3311_v8, %v11923_v36  ;;  %v10539_v37 = vunpack.i.l.bf16 %v10538_v48 }
 0x3be   : > { %17886 = vst [vmem:[#allocation128_spill] sm:$0xff] %v12793_v19  ;;  %v10553_v40 = vpop.permute.xlu2 %10552  ;;  %v3378_v2 = vrot.slane %v12773_v9, 4  ;;  %v3322_v44 = vrot.slane %v3305_v38, 4  ;;  %v3325_v23 = vsel %vm1398_vm6, 0.0, %v3324_v25  ;;  %v12808_v59 = vsel %vm1398_vm6, 0.0, %v12786_v7 }
 0x3bf   : > { %17887 = vst [vmem:[#allocation129_spill] sm:$0xff] %v12796_v18  ;;  %v3122_v39 = vrot.slane %v10540_v1, 4  ;;  %v12814_v8 = vrot.slane %v3321_v51, 4  ;;  %v3070_v0 = vrot.slane %v10539_v37, 4  ;;  %v3326_v14 = vrot.slane %v12799_v10, 4 }
 0x3c0   : > { %17888 = vst [vmem:[#allocation130_spill] sm:$0xff] %v12799_v10  ;;  %v4031_v29 = vrot.slane %v3325_v23, 4  ;;  %v10555_v34 = vunpack.i.h.bf16 %v10553_v40  ;;  %v10535_v22 = vunpack.i.h.bf16 %v12790_v41  ;;  %v12819_v26 = vsel %vm1398_vm6, 0.0, %v3378_v2 }
 0x3c1   : > { %17889 = vst [vmem:[#allocation131_spill] sm:$0xff] %v12808_v59  ;;  %v3323_v32 = vsel %vm1398_vm6, 0.0, %v3322_v44  ;;  %v10554_v48 = vunpack.i.l.bf16 %v10553_v40  ;;  %v12824_v4 = vsel %vm1398_vm6, %v3324_v25, %v3305_v38  ;;  %v3123_v51 = vsel %vm1398_vm6, 0.0, %v3122_v39 }
 0x3c2   : > { %17890 = vst [vmem:[#allocation132_spill] sm:$0xff] %v12814_v8  ;;  %v3071_v50 = vsel %vm1398_vm6, 0.0, %v3070_v0  ;;  %v3028_v15 = vrot.slane %v10555_v34, 4  ;;  %v12830_v23 = vsel %vm1398_vm6, 0.0, %v12814_v8  ;;  %v12833_v2 = vperm.slane %v10540_v1, %v11700_v17 }
 0x3c3   : > { %17891 = vst [vmem:[#allocation133_spill] sm:$0xff] %v12819_v26  ;;  %v12836_v61 = vperm.slane %v10539_v37, %v11700_v17  ;;  %v2976_v44 = vrot.slane %v10554_v48, 4  ;;  %v12839_v40 = vsel %vm1398_vm6, 0.0, %v3326_v14  ;;  %v12842_v38 = vsel %vm1398_vm6, %v4031_v29, %v3323_v32  ;;  %v10548_v14 = vpop.permute.xlu0 %10547 }
 0x3c4   : > { %17892 = vst [vmem:[#allocation134_spill] sm:$0xff] %v12824_v4  ;;  %v3236_v25 = vrot.slane %v10535_v22, 4  ;;  %v10534_v0 = vunpack.i.l.bf16 %v12790_v41  ;;  %v12848_v11 = vperm.slane %v3123_v51, %v11700_v17  ;;  %v12851_v1 = vperm.slane %v3071_v50, %v11700_v17 }
 0x3c5   : > { %17893 = vst [vmem:[#allocation135_spill] sm:$0xff] %v12830_v23  ;;  %v3029_v37 = vsel %vm1398_vm6, 0.0, %v3028_v15  ;;  %v3033_v32 = vperm.slane %v10555_v34, %v11700_v17  ;;  %v2977_v29 = vsel %vm1398_vm6, 0.0, %v2976_v44  ;;  %v2981_v41 = vperm.slane %v10554_v48, %v11700_v17 }
 0x3c6   : > { %17894 = vst [vmem:[#allocation136_spill] sm:$0xff] %v12836_v61  ;;  %v10558_v55 = vpop.permute.xlu2 %10557  ;;  %v3184_v42 = vrot.slane %v10534_v0, 4  ;;  %v3037_v15 = vperm.slane %v3029_v37, %v11700_v17  ;;  %v3237_v52 = vsel %vm1398_vm6, 0.0, %v3236_v25  ;;  %v10550_v63 = vunpack.i.h.bf16 %v10548_v14 }
 0x3c7   : > { %17895 = vst [vmem:[#allocation137_spill] sm:$0xff] %v12839_v40  ;;  %v10560_v53 = vunpack.i.h.bf16 %v10558_v55  ;;  %v2985_v48 = vperm.slane %v2977_v29, %v11700_v17  ;;  %v12868_v5 = vperm.slane %v10535_v22, %v11700_v17  ;;  %v3038_v39 = vrot.slane %v3033_v32, 4 }
 0x3c8   : > { %17896 = vst [vmem:[#allocation138_spill] sm:$0xff] %v12842_v38  ;;  %v2986_v51 = vrot.slane %v2981_v41, 4  ;;  %v3018_v57 = vrot.slane %v10550_v63, 4  ;;  %v3023_v50 = vperm.slane %v10550_v63, %v11700_v17  ;;  %v12872_v37 = vperm.slane %v3237_v52, %v11700_v17 }
 0x3c9   : > { %17897 = vst [vmem:[#allocation139_spill] sm:$0xff] %v12851_v1  ;;  %v3185_v25 = vsel %vm1398_vm6, 0.0, %v3184_v42  ;;  %v10559_v13 = vunpack.i.l.bf16 %v10558_v55  ;;  %v10549_v16 = vunpack.i.l.bf16 %v10548_v14  ;;  %v3050_v34 = vrot.slane %v3037_v15, 4 }
 0x3ca   : > { %v12876_v44 = vperm.slane %v10534_v0, %v11700_v17  ;;  %v5314_v29 = vrot.slane %v10560_v53, 4  ;;  %v3019_v22 = vsel %vm1398_vm6, 0.0, %v3018_v57  ;;  %v2998_v62 = vrot.slane %v2985_v48, 4 }
 0x3cb   : > { %v3027_v6 = vperm.slane %v3019_v22, %v11700_v17  ;;  %v3040_v12 = vrot.slane %v3023_v50, 4  ;;  %v2966_v20 = vrot.slane %v10549_v16, 4  ;;  %v12881_v63 = vperm.slane %v3185_v25, %v11700_v17 }
 0x3cc   : > { %v12884_v52 = vperm.slane %v10560_v53, %v11700_v17  ;;  %v2971_v55 = vperm.slane %v10549_v16, %v11700_v17  ;;  %v3039_v42 = vsel %vm1398_vm6, %v3038_v39, %v3023_v50  ;;  %v5262_v0 = vrot.slane %v10559_v13, 4 }
 0x3cd   : > { %v3052_v14 = vrot.slane %v3027_v6, 4  ;;  %v2967_v33 = vsel %vm1398_vm6, 0.0, %v2966_v20  ;;  %v3041_v57 = vsel %vm1398_vm6, %v3033_v32, %v3040_v12  ;;  %v5315_v22 = vsel %vm1398_vm6, 0.0, %v5314_v29 }
 0x3ce   : > { %v2975_v28 = vperm.slane %v2967_v33, %v11700_v17  ;;  %v2987_v25 = vsel %vm1398_vm6, %v2986_v51, %v2971_v55  ;;  %v2988_v19 = vrot.slane %v2971_v55, 4  ;;  %v3049_v4 = vperm.slane %v3041_v57, %v11923_v36  ;;  %v10563_v57 = vpop.permute.xlu2 %10562  ;;  %v10568_v51 = vpop.permute.xlu0 %10567 }
 0x3cf   : > { %v2993_v53 = vperm.slane %v2987_v25, %v11923_v36  ;;  %v3051_v16 = vsel %vm1398_vm6, %v3050_v34, %v3027_v6  ;;  %v3053_v39 = vsel %vm1398_vm6, %v3037_v15, %v3052_v14  ;;  %v3045_v32 = vperm.slane %v3039_v42, %v11923_v36 }
 0x3d0   : > { %v2989_v50 = vsel %vm1398_vm6, %v2981_v41, %v2988_v19  ;;  %v2999_v20 = vsel %vm1398_vm6, %v2998_v62, %v2975_v28  ;;  %v3000_v12 = vrot.slane %v2975_v28, 4  ;;  %v12903_v29 = vperm.slane %v10559_v13, %v11700_v17 }
 0x3d1   : > { %v2997_v55 = vperm.slane %v2989_v50, %v11923_v36  ;;  %v3064_v62 = vrot.slane %v3049_v4, 4  ;;  %v12910_v28 = vperm.slane %v5315_v22, %v11700_v17  ;;  %v5263_v41 = vsel %vm1398_vm6, 0.0, %v5262_v0 }
 0x3d2   : > { %v3001_v19 = vsel %vm1398_vm6, %v2985_v48, %v3000_v12  ;;  %v3010_v34 = vrot.slane %v2993_v53, 4  ;;  %v3062_v14 = vrot.slane %v3045_v32, 4  ;;  %v10565_v50 = vunpack.i.h.bf16 %v10563_v57 }
 0x3d3   : > { %v3012_v42 = vrot.slane %v2997_v55, 4  ;;  %v3065_v25 = vsel %vm1398_vm6, 0.0, %v3064_v62  ;;  %v12918_v48 = vperm.slane %v3051_v16, %v11923_v36  ;;  %v12924_v0 = vperm.slane %v5263_v41, %v11700_v17 }
 0x3d4   : > { %v12927_v22 = vperm.slane %v2999_v20, %v11923_v36  ;;  %v12930_v55 = vsel %vm1398_vm6, %v3064_v62, %v3045_v32  ;;  %v3011_v13 = vsel %vm1398_vm6, 0.0, %v3010_v34  ;;  %v3061_v16 = vperm.slane %v3053_v39, %v11923_v36 }
 0x3d5   : > { %v3013_v15 = vsel %vm1398_vm6, 0.0, %v3012_v42  ;;  %17898 = vst [vmem:[#allocation140_spill] sm:$0xff] %v12918_v48  ;;  %v12921_v4 = vsel %vm1398_vm6, %v3012_v42, %v2993_v53  ;;  %v3841_v6 = vrot.slane %v3065_v25, 4  ;;  %v3063_v53 = vsel %vm1398_vm6, 0.0, %v3062_v14 }
 0x3d6   : > { %17899 = vst [vmem:[#allocation141_spill] sm:$0xff] %v12921_v4  ;;  %v3803_v12 = vrot.slane %v3013_v15, 4  ;;  %v5210_v42 = vrot.slane %v10565_v50, 4  ;;  %v5215_v20 = vperm.slane %v10565_v50, %v11700_v17  ;;  %v3066_v15 = vrot.slane %v12918_v48, 4 }
 0x3d7   : > { %17900 = vst [vmem:[#allocation142_spill] sm:$0xff] %v12927_v22  ;;  %v12942_v32 = vsel %vm1398_vm6, %v3841_v6, %v3063_v53  ;;  %v10564_v62 = vunpack.i.l.bf16 %v10563_v57  ;;  %v10570_v33 = vunpack.i.h.bf16 %v10568_v51  ;;  %v3009_v34 = vperm.slane %v3001_v19, %v11923_v36 }
 0x3d8   : > { %17901 = vst [vmem:[#allocation143_spill] sm:$0xff] %v12930_v55  ;;  %v12937_v41 = vsel %vm1398_vm6, %v3803_v12, %v3011_v13  ;;  %v3014_v39 = vrot.slane %v12927_v22, 4  ;;  %v5211_v25 = vsel %vm1398_vm6, 0.0, %v5210_v42  ;;  %v10569_v14 = vunpack.i.l.bf16 %v10568_v51 }
 0x3d9   : > { %v12947_v18 = vrot.slane %v3061_v16, 4  ;;  %v5219_v13 = vperm.slane %v5211_v25, %v11700_v17  ;;  %v5158_v12 = vrot.slane %v10564_v62, 4  ;;  %v5163_v50 = vperm.slane %v10564_v62, %v11700_v17 }
 0x3da   : > { %v5232_v48 = vrot.slane %v5215_v20, 4  ;;  %v5220_v59 = vrot.slane %v10570_v33, 4  ;;  %v5225_v6 = vperm.slane %v10570_v33, %v11700_v17  ;;  %v5168_v57 = vrot.slane %v10569_v14, 4 }
 0x3db   : > { %17902 = vst [vmem:[#allocation144_spill] sm:$0xff] %v12947_v18  ;;  %v5244_v53 = vrot.slane %v5219_v13, 4  ;;  %v5159_v19 = vsel %vm1398_vm6, 0.0, %v5158_v12  ;;  %v5180_v26 = vrot.slane %v5163_v50, 4  ;;  %v5173_v22 = vperm.slane %v10569_v14, %v11700_v17 }
 0x3dc   : > { %v5167_v51 = vperm.slane %v5159_v19, %v11700_v17  ;;  %v5221_v16 = vsel %vm1398_vm6, 0.0, %v5220_v59  ;;  %v5230_v42 = vrot.slane %v5225_v6, 4  ;;  %v5233_v25 = vsel %vm1398_vm6, %v5225_v6, %v5232_v48 }
 0x3dd   : > { %v5229_v62 = vperm.slane %v5221_v16, %v11700_v17  ;;  %v5241_v7 = vperm.slane %v5233_v25, %v11923_v36  ;;  %v5169_v33 = vsel %vm1398_vm6, 0.0, %v5168_v57  ;;  %v5178_v9 = vrot.slane %v5173_v22, 4 }
 0x3de   : > { %v12961_v12 = vrot.slane %v3009_v34, 4  ;;  %v5231_v14 = vsel %vm1398_vm6, %v5230_v42, %v5215_v20  ;;  %v5181_v19 = vsel %vm1398_vm6, %v5173_v22, %v5180_v26  ;;  %v12966_v59 = vsel %vm1398_vm6, 0.0, %v3066_v15  ;;  %v10583_v42 = vpop.permute.xlu2 %10582 }
 0x3df   : > { %17904 = vst [vmem:[#allocation146_spill] sm:$0xff] %v12966_v59  ;;  %v5242_v23 = vrot.slane %v5229_v62, 4  ;;  %v5245_v48 = vsel %vm1398_vm6, %v5229_v62, %v5244_v53  ;;  %v5177_v6 = vperm.slane %v5169_v33, %v11700_v17  ;;  %v12971_v16 = vsel %vm1398_vm6, 0.0, %v3014_v39  ;;  %v12982_v53 = vpop.permute.xlu0 %10577 }
 0x3e0   : > { %17903 = vst [vmem:[#allocation145_spill] sm:$0xff] %v12961_v12  ;;  %v5237_v57 = vperm.slane %v5231_v14, %v11923_v36  ;;  %v5256_v25 = vrot.slane %v5241_v7, 4  ;;  %v5179_v34 = vsel %vm1398_vm6, %v5178_v9, %v5163_v50  ;;  %v12977_v20 = vsel %vm1398_vm6, 0.0, %v12947_v18 }
 0x3e1   : > { %17905 = vst [vmem:[#allocation147_spill] sm:$0xff] %v12971_v16  ;;  %v5192_v22 = vrot.slane %v5167_v51, 4  ;;  %v5189_v15 = vperm.slane %v5181_v19, %v11923_v36  ;;  %v12986_v39 = vsel %vm1398_vm6, 0.0, %v12961_v12  ;;  %v5243_v9 = vsel %vm1398_vm6, %v5242_v23, %v5219_v13 }
 0x3e2   : > { %17906 = vst [vmem:[#allocation148_spill] sm:$0xff] %v12977_v20  ;;  %v5253_v50 = vperm.slane %v5245_v48, %v11923_v36  ;;  %v3808_v62 = vperm.slane %v12937_v41, %v11700_v17  ;;  %v3846_v33 = vperm.slane %v12942_v32, %v11700_v17  ;;  %v5185_v14 = vperm.slane %v5179_v34, %v11923_v36 }
 0x3e3   : > { %17907 = vst [vmem:[#allocation149_spill] sm:$0xff] %v12986_v39  ;;  %v5193_v19 = vsel %vm1398_vm6, %v5177_v6, %v5192_v22  ;;  %v5254_v38 = vrot.slane %v5237_v57, 4  ;;  %v5257_v7 = vsel %vm1398_vm6, 0.0, %v5256_v25  ;;  %v5190_v55 = vrot.slane %v5177_v6, 4 }
 0x3e4   : > { %v13001_v23 = vperm.slane %v5243_v9, %v11923_v36  ;;  %v13004_v13 = vsel %vm1398_vm6, %v5256_v25, %v5237_v57  ;;  %v5201_v41 = vperm.slane %v5193_v19, %v11923_v36  ;;  %v5204_v48 = vrot.slane %v5189_v15, 4 }
 0x3e5   : > { %17909 = vst [vmem:[#allocation151_spill] sm:$0xff] %v13004_v13  ;;  %v13007_v32 = vrot.slane %v5253_v50, 4  ;;  %v10585_v34 = vunpack.i.h.bf16 %v10583_v42  ;;  %v10584_v59 = vunpack.i.l.bf16 %v10583_v42  ;;  %v10580_v22 = vunpack.i.h.bf16 %v12982_v53 }
 0x3e6   : > { %17908 = vst [vmem:[#allocation150_spill] sm:$0xff] %v13001_v23  ;;  %v13011_v20 = vrot.slane %v3808_v62, 4  ;;  %v13013_v6 = vrot.slane %v3846_v33, 4  ;;  %v5202_v9 = vrot.slane %v5185_v14, 4  ;;  %v5191_v18 = vsel %vm1398_vm6, %v5190_v55, %v5167_v51  ;;  %v10588_v51 = vpop.permute.xlu2 %10587 }
 0x3e7   : > { %17910 = vst [vmem:[#allocation152_spill] sm:$0xff] %v13007_v32  ;;  %v5205_v57 = vsel %vm1398_vm6, 0.0, %v5204_v48  ;;  %v13017_v25 = vrot.slane %v5201_v41, 4  ;;  %v5002_v15 = vrot.slane %v10585_v34, 4  ;;  %v5865_v42 = vrot.slane %v5257_v7, 4 }
 0x3e8   : > { %17911 = vst [vmem:[#allocation153_spill] sm:$0xff] %v13011_v20  ;;  %v4950_v19 = vrot.slane %v10584_v59, 4  ;;  %v5116_v4 = vrot.slane %v10580_v22, 4  ;;  %v5255_v26 = vsel %vm1398_vm6, 0.0, %v5254_v38  ;;  %v13025_v33 = vsel %vm1398_vm6, 0.0, %v13007_v32  ;;  %v10603_v20 = vpop.permute.xlu0 %10602 }
 0x3e9   : > { %17912 = vst [vmem:[#allocation154_spill] sm:$0xff] %v13013_v6  ;;  %v5003_v55 = vsel %vm1398_vm6, 0.0, %v5002_v15  ;;  %v13029_v41 = vperm.slane %v5191_v18, %v11923_v36  ;;  %v5203_v6 = vsel %vm1398_vm6, 0.0, %v5202_v9  ;;  %v5827_v50 = vrot.slane %v5205_v57, 4 }
 0x3ea   : > { %17913 = vst [vmem:[#allocation155_spill] sm:$0xff] %v13017_v25  ;;  %v4951_v7 = vsel %vm1398_vm6, 0.0, %v4950_v19  ;;  %v13035_v38 = vsel %vm1398_vm6, 0.0, %v13017_v25  ;;  %v13038_v62 = vsel %vm1398_vm6, %v5204_v48, %v5185_v14  ;;  %v5007_v39 = vperm.slane %v10585_v34, %v11700_v17 }
 0x3eb   : > { %17914 = vst [vmem:[#allocation156_spill] sm:$0xff] %v13025_v33  ;;  %v5117_v15 = vsel %vm1398_vm6, 0.0, %v5116_v4  ;;  %v5011_v18 = vperm.slane %v5003_v55, %v11700_v17  ;;  %v4955_v16 = vperm.slane %v10584_v59, %v11700_v17  ;;  %v10579_v9 = vunpack.i.l.bf16 %v12982_v53 }
 0x3ec   : > { %17915 = vst [vmem:[#allocation157_spill] sm:$0xff] %v13029_v41  ;;  %v10590_v57 = vunpack.i.h.bf16 %v10588_v51  ;;  %v13046_v19 = vsel %vm1398_vm6, %v5865_v42, %v5255_v26  ;;  %v4959_v40 = vperm.slane %v4951_v7, %v11700_v17  ;;  %v13051_v14 = vperm.slane %v10580_v22, %v11700_v17 }
 0x3ed   : > { %17916 = vst [vmem:[#allocation158_spill] sm:$0xff] %v13035_v38  ;;  %v13057_v59 = vsel %vm1398_vm6, %v5827_v50, %v5203_v6  ;;  %v13060_v53 = vperm.slane %v5117_v15, %v11700_v17  ;;  %v10605_v34 = vunpack.i.h.bf16 %v10603_v20  ;;  %v5024_v7 = vrot.slane %v5007_v39, 4 }
 0x3ee   : > { %17917 = vst [vmem:[#allocation159_spill] sm:$0xff] %v13038_v62  ;;  %v5012_v42 = vrot.slane %v10590_v57, 4  ;;  %v5017_v55 = vperm.slane %v10590_v57, %v11700_v17  ;;  %v5036_v22 = vrot.slane %v5011_v18, 4  ;;  %v4972_v12 = vrot.slane %v4955_v16, 4 }
 0x3ef   : > { %17918 = vst [vmem:[#allocation160_spill] sm:$0xff] %v13046_v19  ;;  %v5064_v8 = vrot.slane %v10579_v9, 4  ;;  %v4984_v48 = vrot.slane %v4959_v40, 4  ;;  %v10604_v4 = vunpack.i.l.bf16 %v10603_v20  ;;  %v13068_v15 = vperm.slane %v10579_v9, %v11700_v17 }
 0x3f0   : > { %17919 = vst [vmem:[#allocation161_spill] sm:$0xff] %v13051_v14  ;;  %v5013_v6 = vsel %vm1398_vm6, 0.0, %v5012_v42  ;;  %v5022_v13 = vrot.slane %v5017_v55, 4  ;;  %v4794_v62 = vrot.slane %v10605_v34, 4  ;;  %v13072_v57 = vperm.slane %v10605_v34, %v11700_v17 }
 0x3f1   : > { %17920 = vst [vmem:[#allocation162_spill] sm:$0xff] %v13057_v59  ;;  %v5021_v26 = vperm.slane %v5013_v6, %v11700_v17  ;;  %v10589_v33 = vunpack.i.l.bf16 %v10588_v51  ;;  %v5025_v32 = vsel %vm1398_vm6, %v5017_v55, %v5024_v7  ;;  %v5065_v10 = vsel %vm1398_vm6, 0.0, %v5064_v8 }
 0x3f2   : > { %17921 = vst [vmem:[#allocation163_spill] sm:$0xff] %v13060_v53  ;;  %v5023_v42 = vsel %vm1398_vm6, %v5022_v13, %v5007_v39  ;;  %v5033_v50 = vperm.slane %v5025_v32, %v11923_v36  ;;  %v13078_v53 = vpop.permute.xlu0 %10612  ;;  %v4742_v19 = vrot.slane %v10604_v4, 4  ;;  %v13084_v51 = vperm.slane %v10604_v4, %v11700_v17 }
 0x3f3   : > { %17922 = vst [vmem:[#allocation164_spill] sm:$0xff] %v13068_v15  ;;  %v5034_v20 = vrot.slane %v5021_v26, 4  ;;  %v4960_v9 = vrot.slane %v10589_v33, 4  ;;  %v4965_v6 = vperm.slane %v10589_v33, %v11700_v17  ;;  %v5029_v14 = vperm.slane %v5023_v42, %v11923_v36 }
 0x3f4   : > { %17923 = vst [vmem:[#allocation165_spill] sm:$0xff] %v13072_v57  ;;  %v5037_v34 = vsel %vm1398_vm6, %v5021_v26, %v5036_v22  ;;  %v5048_v55 = vrot.slane %v5033_v50, 4  ;;  %v10615_v7 = vunpack.i.h.bf16 %v13078_v53  ;;  %v13091_v33 = vperm.slane %v5065_v10, %v11700_v17 }
 0x3f5   : > { %17924 = vst [vmem:[#allocation166_spill] sm:$0xff] %v13084_v51  ;;  %v5035_v8 = vsel %vm1398_vm6, %v5034_v20, %v5011_v18  ;;  %v4961_v39 = vsel %vm1398_vm6, 0.0, %v4960_v9  ;;  %v4970_v13 = vrot.slane %v4965_v6, 4  ;;  %v4973_v32 = vsel %vm1398_vm6, %v4965_v6, %v4972_v12 }
 0x3f6   : > { %17925 = vst [vmem:[#allocation167_spill] sm:$0xff] %v13091_v33  ;;  %v4969_v26 = vperm.slane %v4961_v39, %v11700_v17  ;;  %v4981_v4 = vperm.slane %v4973_v32, %v11923_v36  ;;  %v4795_v22 = vsel %vm1398_vm6, 0.0, %v4794_v62  ;;  %v5046_v50 = vrot.slane %v5029_v14, 4 }
 0x3f7   : > { %v4971_v18 = vsel %vm1398_vm6, %v4970_v13, %v4955_v16  ;;  %v13099_v20 = vsel %vm1398_vm6, %v5048_v55, %v5029_v14  ;;  %v4743_v42 = vsel %vm1398_vm6, 0.0, %v4742_v19  ;;  %v5045_v39 = vperm.slane %v5037_v34, %v11923_v36 }
 0x3f8   : > { %17926 = vst [vmem:[#allocation168_spill] sm:$0xff] %v13099_v20  ;;  %v4977_v12 = vperm.slane %v4971_v18, %v11923_v36  ;;  %v4982_v9 = vrot.slane %v4969_v26, 4  ;;  %v4985_v10 = vsel %vm1398_vm6, %v4969_v26, %v4984_v48  ;;  %v4996_v6 = vrot.slane %v4981_v4, 4 }
 0x3f9   : > { %v5049_v32 = vsel %vm1398_vm6, 0.0, %v5048_v55  ;;  %v4690_v15 = vrot.slane %v10615_v7, 4  ;;  %v13112_v18 = vperm.slane %v4795_v22, %v11700_v17  ;;  %v4993_v48 = vperm.slane %v4985_v10, %v11923_v36 }
 0x3fa   : > { %v4983_v62 = vsel %vm1398_vm6, %v4982_v9, %v4959_v40  ;;  %v4994_v16 = vrot.slane %v4977_v12, 4  ;;  %v4997_v13 = vsel %vm1398_vm6, 0.0, %v4996_v6  ;;  %v13109_v14 = vsel %vm1398_vm6, %v4996_v6, %v4977_v12  ;;  %v10593_v9 = vpop.permute.xlu2 %10592  ;;  %v10618_v38 = vpop.permute.xlu0 %10617 }
 0x3fb   : > { %17927 = vst [vmem:[#allocation169_spill] sm:$0xff] %v13109_v14  ;;  %v5047_v19 = vsel %vm1398_vm6, 0.0, %v5046_v50  ;;  %v5675_v26 = vrot.slane %v4997_v13, 4  ;;  %v13118_v55 = vperm.slane %v4743_v42, %v11700_v17  ;;  %v5713_v4 = vrot.slane %v5049_v32, 4 }
 0x3fc   : > { %17928 = vst [vmem:[#allocation170_spill] sm:$0xff] %v13112_v18  ;;  %v4995_v40 = vsel %vm1398_vm6, 0.0, %v4994_v16  ;;  %v13122_v12 = vperm.slane %v5035_v8, %v11923_v36  ;;  %v13124_v22 = vrot.slane %v5045_v39, 4  ;;  %v4691_v50 = vsel %vm1398_vm6, 0.0, %v4690_v15 }
 0x3fd   : > { %17929 = vst [vmem:[#allocation171_spill] sm:$0xff] %v13118_v55  ;;  %v13127_v10 = vsel %vm1398_vm6, %v5675_v26, %v4995_v40  ;;  %v13133_v13 = vsel %vm1398_vm6, %v5713_v4, %v5047_v19  ;;  %v10614_v32 = vunpack.i.l.bf16 %v13078_v53  ;;  %v13137_v8 = vrot.slane %v4993_v48, 4 }
 0x3fe   : > { %17930 = vst [vmem:[#allocation172_spill] sm:$0xff] %v13122_v12  ;;  %v10595_v39 = vunpack.i.h.bf16 %v10593_v9  ;;  %v10620_v34 = vunpack.i.h.bf16 %v10618_v38  ;;  %v4695_v40 = vperm.slane %v10615_v7, %v11700_v17  ;;  %v4699_v15 = vperm.slane %v4691_v50, %v11700_v17 }
 0x3ff   : > { %17931 = vst [vmem:[#allocation173_spill] sm:$0xff] %v13124_v22  ;;  %v4638_v6 = vrot.slane %v10614_v32, 4  ;;  %v13145_v19 = vsel %vm1398_vm6, 0.0, %v13124_v22  ;;  %v10594_v53 = vunpack.i.l.bf16 %v10593_v9  ;;  %v10619_v4 = vunpack.i.l.bf16 %v10618_v38 }
 0x400   : > { %17932 = vst [vmem:[#allocation174_spill] sm:$0xff] %v13127_v10  ;;  %v4643_v16 = vperm.slane %v10614_v32, %v11700_v17  ;;  %v4705_v26 = vperm.slane %v10620_v34, %v11700_v17  ;;  %v13151_v7 = vperm.slane %v4983_v62, %v11923_v36  ;;  %v13155_v50 = vsel %vm1398_vm6, 0.0, %v13137_v8 }
 0x401   : > { %17933 = vst [vmem:[#allocation175_spill] sm:$0xff] %v13133_v13  ;;  %v4639_v48 = vsel %vm1398_vm6, 0.0, %v4638_v6  ;;  %v4700_v13 = vrot.slane %v10620_v34, 4  ;;  %v4898_v22 = vrot.slane %v10595_v39, 4  ;;  %v4712_v9 = vrot.slane %v4695_v40, 4 }
 0x402   : > { %17934 = vst [vmem:[#allocation176_spill] sm:$0xff] %v13137_v8  ;;  %v4724_v38 = vrot.slane %v4699_v15, 4  ;;  %v4647_v6 = vperm.slane %v4639_v48, %v11700_v17  ;;  %v4846_v10 = vrot.slane %v10594_v53, 4  ;;  %v4710_v12 = vrot.slane %v4705_v26, 4 }
 0x403   : > { %17935 = vst [vmem:[#allocation177_spill] sm:$0xff] %v13145_v19  ;;  %v4701_v32 = vsel %vm1398_vm6, 0.0, %v4700_v13  ;;  %v4648_v62 = vrot.slane %v10619_v4, 4  ;;  %v4660_v55 = vrot.slane %v4643_v16, 4  ;;  %v13163_v51 = vperm.slane %v10595_v39, %v11700_v17 }
 0x404   : > { %17936 = vst [vmem:[#allocation178_spill] sm:$0xff] %v13151_v7  ;;  %v4709_v34 = vperm.slane %v4701_v32, %v11700_v17  ;;  %v4653_v8 = vperm.slane %v10619_v4, %v11700_v17  ;;  %v4713_v42 = vsel %vm1398_vm6, %v4705_v26, %v4712_v9  ;;  %v4899_v20 = vsel %vm1398_vm6, 0.0, %v4898_v22 }
 0x405   : > { %17937 = vst [vmem:[#allocation179_spill] sm:$0xff] %v13155_v50  ;;  %v4649_v48 = vsel %vm1398_vm6, 0.0, %v4648_v62  ;;  %v4711_v13 = vsel %vm1398_vm6, %v4710_v12, %v4695_v40  ;;  %v4672_v57 = vrot.slane %v4647_v6, 4  ;;  %v4847_v39 = vsel %vm1398_vm6, 0.0, %v4846_v10 }
 0x406   : > { %v4722_v18 = vrot.slane %v4709_v34, 4  ;;  %v4657_v32 = vperm.slane %v4649_v48, %v11700_v17  ;;  %v4658_v33 = vrot.slane %v4653_v8, 4  ;;  %v4661_v25 = vsel %vm1398_vm6, %v4653_v8, %v4660_v55  ;;  %v10478_v48 = vpop.permute.xlu1 %10477 }
 0x407   : > { %v4669_v59 = vperm.slane %v4661_v25, %v11923_v36  ;;  %v4717_v4 = vperm.slane %v4711_v13, %v11923_v36  ;;  %v4721_v26 = vperm.slane %v4713_v42, %v11923_v36  ;;  %v4725_v12 = vsel %vm1398_vm6, %v4709_v34, %v4724_v38 }
 0x408   : > { %v4659_v22 = vsel %vm1398_vm6, %v4658_v33, %v4643_v16  ;;  %v4670_v9 = vrot.slane %v4657_v32, 4  ;;  %v4673_v62 = vsel %vm1398_vm6, %v4657_v32, %v4672_v57  ;;  %v13180_v40 = vperm.slane %v10594_v53, %v11700_v17 }
 0x409   : > { %v4665_v55 = vperm.slane %v4659_v22, %v11923_v36  ;;  %v4684_v8 = vrot.slane %v4669_v59, 4  ;;  %v4723_v10 = vsel %vm1398_vm6, %v4722_v18, %v4699_v15  ;;  %v13185_v25 = vperm.slane %v4899_v20, %v11700_v17  ;;  %v13206_v22 = vpop.permute.xlu2 %10597 }
 0x40a   : > { %v13188_v42 = vperm.slane %v4847_v39, %v11700_v17  ;;  %v4671_v33 = vsel %vm1398_vm6, %v4670_v9, %v4647_v6  ;;  %v4681_v57 = vperm.slane %v4673_v62, %v11923_v36  ;;  %v4733_v38 = vperm.slane %v4725_v12, %v11923_v36 }
 0x40b   : > { %v4736_v59 = vrot.slane %v4721_v26, 4  ;;  %v13199_v15 = vperm.slane %v4723_v10, %v11923_v36  ;;  %v4734_v34 = vrot.slane %v4717_v4, 4  ;;  %v13203_v13 = vperm.slane %v4671_v33, %v11923_v36 }
 0x40c   : > { %v4682_v32 = vrot.slane %v4665_v55, 4  ;;  %v4685_v39 = vsel %vm1398_vm6, 0.0, %v4684_v8  ;;  %v13211_v12 = vrot.slane %v4681_v57, 4  ;;  %v13214_v53 = vrot.slane %v4733_v38, 4 }
 0x40d   : > { %17938 = vst [vmem:[#allocation180_spill] sm:$0xff] %v13199_v15  ;;  %v4737_v10 = vsel %vm1398_vm6, 0.0, %v4736_v59  ;;  %v13217_v33 = vsel %vm1398_vm6, %v4684_v8, %v4665_v55  ;;  %v10480_v16 = vunpack.i.h.bf16 %v10478_v48  ;;  %v4735_v20 = vsel %vm1398_vm6, 0.0, %v4734_v34 }
 0x40e   : > { %17939 = vst [vmem:[#allocation181_spill] sm:$0xff] %v13203_v13  ;;  %v5447_v6 = vrot.slane %v4685_v39, 4  ;;  %v10479_v26 = vunpack.i.l.bf16 %v10478_v48  ;;  %v4683_v9 = vsel %vm1398_vm6, 0.0, %v4682_v32  ;;  %v13226_v38 = vsel %vm1398_vm6, 0.0, %v13211_v12 }
 0x40f   : > { %17940 = vst [vmem:[#allocation182_spill] sm:$0xff] %v13211_v12  ;;  %v3756_v57 = vrot.slane %v10480_v16, 4  ;;  %v3761_v19 = vperm.slane %v10480_v16, %v11700_v17  ;;  %v10600_v34 = vunpack.i.h.bf16 %v13206_v22  ;;  %v13233_v48 = vsel %vm1398_vm6, 0.0, %v13214_v53 }
 0x410   : > { %17941 = vst [vmem:[#allocation183_spill] sm:$0xff] %v13214_v53  ;;  %v3704_v8 = vrot.slane %v10479_v26, 4  ;;  %v17945_v18 = vrot.slane %v12644_v3, 4  ;;  %v13244_v15 = vsel %vm1398_vm6, %v4736_v59, %v4717_v4  ;;  %v10599_v13 = vunpack.i.l.bf16 %v13206_v22 }
 0x411   : > { %17942 = vst [vmem:[#allocation184_spill] sm:$0xff] %v13217_v33  ;;  %v3757_v32 = vsel %vm1398_vm6, 0.0, %v3756_v57  ;;  %v3766_v39 = vrot.slane %v3761_v19, 4  ;;  %v3709_v33 = vperm.slane %v10479_v26, %v11700_v17  ;;  %v13255_v26 = vsel %vm1398_vm6, %v5447_v6, %v4683_v9 }
 0x412   : > { %17943 = vst [vmem:[#allocation185_spill] sm:$0xff] %v13226_v38  ;;  %v3769_v16 = vsel %vm1398_vm6, %v3761_v19, %v17945_v18  ;;  %v3765_v62 = vperm.slane %v3757_v32, %v11700_v17  ;;  %v3705_v55 = vsel %vm1398_vm6, 0.0, %v3704_v8  ;;  %v17947_v32 = vrot.slane %v12672_v54, 4 }
 0x413   : > { %17944 = vst [vmem:[#allocation186_spill] sm:$0xff] %v13233_v48  ;;  %v3777_v12 = vperm.slane %v3769_v16, %v11923_v36  ;;  %v3767_v53 = vsel %vm1398_vm6, %v3766_v39, %v12644_v3  ;;  %v3713_v57 = vperm.slane %v3705_v55, %v11700_v17  ;;  %v4908_v8 = vrot.slane %v10600_v34, 4  ;;  %v13258_v3 = vpop.permute.xlu2 %10627 }
 0x414   : > { %17946 = vst [vmem:[#allocation187_spill] sm:$0xff] %v13244_v15  ;;  %v3773_v19 = vperm.slane %v3767_v53, %v11923_v36  ;;  %v3778_v18 = vrot.slane %v3765_v62, 4  ;;  %v3781_v16 = vsel %vm1398_vm6, %v3765_v62, %v17947_v32  ;;  %v5485_v4 = vrot.slane %v4737_v10, 4 }
 0x415   : > { %17948 = vst [vmem:[#allocation188_spill] sm:$0xff] %v13255_v26  ;;  %v3789_v59 = vperm.slane %v3781_v16, %v11923_v36  ;;  %v3792_v14 = vrot.slane %v3777_v12, 4  ;;  %v3714_v22 = vrot.slane %v3709_v33, 4  ;;  %v4913_v39 = vperm.slane %v10600_v34, %v11700_v17 }
 0x416   : > { %v3779_v62 = vsel %vm1398_vm6, %v3778_v18, %v12672_v54  ;;  %v17949_v6 = vrot.slane %v12675_v24, 4  ;;  %v3726_v10 = vrot.slane %v3713_v57, 4  ;;  %v4856_v32 = vrot.slane %v10599_v13, 4 }
 0x417   : > { %v3790_v16 = vrot.slane %v3773_v19, 4  ;;  %v4909_v55 = vsel %vm1398_vm6, 0.0, %v4908_v8  ;;  %v13273_v53 = vsel %vm1398_vm6, %v5485_v4, %v4735_v20  ;;  %v3793_v34 = vsel %vm1398_vm6, 0.0, %v3792_v14 }
 0x418   : > { %v3717_v9 = vsel %vm1398_vm6, %v3709_v33, %v17949_v6  ;;  %17950 = vst [vmem:[#allocation189_spill] sm:$0xff] %v13273_v53  ;;  %v13276_v15 = vrot.slane %v3789_v59, 4  ;;  %v13279_v54 = vsel %vm1398_vm6, %v3792_v14, %v3773_v19  ;;  %v13282_v33 = vperm.slane %v3779_v62, %v11923_v36 }
 0x419   : > { %v3715_v18 = vsel %vm1398_vm6, %v3714_v22, %v12675_v24  ;;  %v3725_v8 = vperm.slane %v3717_v9, %v11923_v36  ;;  %v3727_v20 = vsel %vm1398_vm6, %v3726_v10, %v12694_v49  ;;  %v4917_v4 = vperm.slane %v4909_v55, %v11700_v17 }
 0x41a   : > { %v4918_v59 = vrot.slane %v4913_v39, 4  ;;  %v4857_v12 = vsel %vm1398_vm6, 0.0, %v4856_v32  ;;  %v3791_v14 = vsel %vm1398_vm6, 0.0, %v3790_v16  ;;  %v4373_v62 = vrot.slane %v3793_v34, 4 }
 0x41b   : > { %v17951_v24 = vrot.slane %v12694_v49, 4  ;;  %v13300_v9 = vsel %vm1398_vm6, 0.0, %v13276_v15  ;;  %v3721_v10 = vperm.slane %v3715_v18, %v11923_v36  ;;  %v4930_v55 = vrot.slane %v4917_v4, 4 }
 0x41c   : > { %v4861_v6 = vperm.slane %v10599_v13, %v11700_v17  ;;  %v13305_v32 = vperm.slane %v3727_v20, %v11923_v36  ;;  %v4865_v16 = vperm.slane %v4857_v12, %v11700_v17  ;;  %v4919_v34 = vsel %vm1398_vm6, %v4918_v59, %v13163_v51 }
 0x41d   : > { %v3729_v22 = vsel %vm1398_vm6, %v3713_v57, %v17951_v24  ;;  %v17952_v49 = vrot.slane %v13163_v51, 4  ;;  %v3740_v19 = vrot.slane %v3725_v8, 4  ;;  %v17953_v18 = vrot.slane %v13180_v40, 4 }
 0x41e   : > { %v3737_v24 = vperm.slane %v3729_v22, %v11923_v36  ;;  %v4866_v38 = vrot.slane %v4861_v6, 4  ;;  %v4878_v48 = vrot.slane %v4865_v16, 4  ;;  %v17954_v12 = vrot.slane %v13188_v42, 4 }
 0x41f   : > { %v4921_v57 = vsel %vm1398_vm6, %v4913_v39, %v17952_v49  ;;  %v4869_v13 = vsel %vm1398_vm6, %v4861_v6, %v17953_v18  ;;  %v4925_v59 = vperm.slane %v4919_v34, %v11923_v36  ;;  %v3738_v51 = vrot.slane %v3721_v10, 4 }
 0x420   : > { %v4877_v20 = vperm.slane %v4869_v13, %v11923_v36  ;;  %v4881_v53 = vsel %vm1398_vm6, %v4865_v16, %v17954_v12  ;;  %v4867_v39 = vsel %vm1398_vm6, %v4866_v38, %v13180_v40  ;;  %v4929_v8 = vperm.slane %v4921_v57, %v11923_v36 }
 0x421   : > { %v4931_v22 = vsel %vm1398_vm6, %v4930_v55, %v13185_v25  ;;  %v4873_v6 = vperm.slane %v4867_v39, %v11923_v36  ;;  %v4879_v49 = vsel %vm1398_vm6, %v4878_v48, %v13188_v42  ;;  %v17955_v13 = vrot.slane %v13185_v25, 4 }
 0x422   : > { %v4892_v18 = vrot.slane %v4877_v20, 4  ;;  %v13335_v12 = vsel %vm1398_vm6, %v4373_v62, %v3791_v14  ;;  %v3741_v40 = vsel %vm1398_vm6, 0.0, %v3740_v19  ;;  %v13339_v38 = vsel %vm1398_vm6, %v3740_v19, %v3721_v10 }
 0x423   : > { %v4933_v16 = vsel %vm1398_vm6, %v4917_v4, %v17955_v13  ;;  %v4890_v55 = vrot.slane %v4873_v6, 4  ;;  %v4942_v39 = vrot.slane %v4925_v59, 4  ;;  %v4944_v42 = vrot.slane %v4929_v8, 4 }
 0x424   : > { %v4893_v57 = vsel %vm1398_vm6, 0.0, %v4892_v18  ;;  %v3739_v25 = vsel %vm1398_vm6, 0.0, %v3738_v51  ;;  %v13345_v20 = vrot.slane %v3737_v24, 4  ;;  %v13352_v10 = vsel %vm1398_vm6, %v4892_v18, %v4873_v6 }
 0x425   : > { %v4891_v62 = vsel %vm1398_vm6, 0.0, %v4890_v55  ;;  %v4945_v19 = vsel %vm1398_vm6, 0.0, %v4944_v42  ;;  %17956 = vst [vmem:[#allocation190_spill] sm:$0xff] %v13352_v10  ;;  %v4335_v13 = vrot.slane %v3741_v40, 4  ;;  %v4889_v8 = vperm.slane %v4881_v53, %v11923_v36 }
 0x426   : > { %v4943_v48 = vsel %vm1398_vm6, 0.0, %v4942_v39  ;;  %v5599_v51 = vrot.slane %v4893_v57, 4  ;;  %v4941_v34 = vperm.slane %v4933_v16, %v11923_v36  ;;  %v13358_v24 = vsel %vm1398_vm6, %v4944_v42, %v4925_v59 }
 0x427   : > { %17957 = vst [vmem:[#allocation191_spill] sm:$0xff] %v13358_v24  ;;  %v5637_v4 = vrot.slane %v4945_v19, 4  ;;  %v17958_v14 = vunpack.i.h.bf16 %v13258_v3  ;;  %v13364_v26 = vsel %vm1398_vm6, 0.0, %v13345_v20  ;;  %v17961_v16 = vunpack.i.l.bf16 %v13258_v3 }
 0x428   : > { %v13367_v6 = vsel %vm1398_vm6, %v5599_v51, %v4891_v62  ;;  %v13375_v59 = vperm.slane %v4879_v49, %v11923_v36  ;;  %v13384_v62 = vrot.slane %v4889_v8, 4  ;;  %v17976_v41 = vrot.slane %v12687_v31, 4 }
 0x429   : > { %v5324_v55 = vrot.slane %v17958_v14, 4  ;;  %17959 = vst [vmem:[#allocation192_spill] sm:$0xff] %v13367_v6  ;;  %v17960_v53 = vmov %v17958_v14  ;;  %v5272_v40 = vrot.slane %v17961_v16, 4  ;;  %v13378_v57 = vsel %vm1398_vm6, %v5637_v4, %v4943_v48 }
 0x42a   : > { %v5329_v18 = vperm.slane %v17960_v53, %v11700_v17  ;;  %17962 = vst [vmem:[#allocation193_spill] sm:$0xff] %v13375_v59  ;;  %v17964_v42 = vmov %v17961_v16  ;;  %v10483_v16 = vpop.permute.xlu1 %10482  ;;  %v13388_v6 = vrot.slane %v4941_v34, 4  ;;  %v17967_v4 = vrot.slane %v12903_v29, 4 }
 0x42b   : > { %17963 = vst [vmem:[#allocation194_spill] sm:$0xff] %v13378_v57  ;;  %v5325_v39 = vsel %vm1398_vm6, 0.0, %v5324_v55  ;;  %v5277_v14 = vperm.slane %v17964_v42, %v11700_v17  ;;  %v5273_v53 = vsel %vm1398_vm6, 0.0, %v5272_v40  ;;  %v10484_v24 = vunpack.i.l.bf16 %v10483_v16 }
 0x42c   : > { %17965 = vst [vmem:[#allocation195_spill] sm:$0xff] %v13384_v62  ;;  %v5333_v19 = vperm.slane %v5325_v39, %v11700_v17  ;;  %v5334_v51 = vrot.slane %v5329_v18, 4  ;;  %v5281_v49 = vperm.slane %v5273_v53, %v11700_v17  ;;  %v17968_v39 = vrot.slane %v12884_v52, 4 }
 0x42d   : > { %17966 = vst [vmem:[#allocation196_spill] sm:$0xff] %v13388_v6  ;;  %v5282_v48 = vrot.slane %v5277_v14, 4  ;;  %v5285_v55 = vsel %vm1398_vm6, %v5277_v14, %v17967_v4  ;;  %v17969_v53 = vrot.slane %v12924_v0, 4  ;;  %v3600_v10 = vrot.slane %v10484_v24, 4 }
 0x42e   : > { %v5346_v57 = vrot.slane %v5333_v19, 4  ;;  %v5293_v3 = vperm.slane %v5285_v55, %v11923_v36  ;;  %v5335_v8 = vsel %vm1398_vm6, %v5334_v51, %v12884_v52  ;;  %v5337_v40 = vsel %vm1398_vm6, %v5329_v18, %v17968_v39 }
 0x42f   : > { %v5283_v34 = vsel %vm1398_vm6, %v5282_v48, %v12903_v29  ;;  %v5294_v42 = vrot.slane %v5281_v49, 4  ;;  %v5297_v50 = vsel %vm1398_vm6, %v5281_v49, %v17969_v53  ;;  %v5341_v14 = vperm.slane %v5335_v8, %v11923_v36 }
 0x430   : > { %v5289_v4 = vperm.slane %v5283_v34, %v11923_v36  ;;  %v5305_v55 = vperm.slane %v5297_v50, %v11923_v36  ;;  %v5347_v51 = vsel %vm1398_vm6, %v5346_v57, %v12910_v28  ;;  %v17970_v52 = vrot.slane %v12910_v28, 4 }
 0x431   : > { %v13414_v29 = vsel %vm1398_vm6, %v4335_v13, %v3739_v25  ;;  %v13418_v48 = vsel %vm1398_vm6, 0.0, %v13384_v62  ;;  %v13421_v49 = vperm.slane %v4931_v22, %v11923_v36  ;;  %v5295_v50 = vsel %vm1398_vm6, %v5294_v42, %v12924_v0 }
 0x432   : > { %v5349_v18 = vsel %vm1398_vm6, %v5333_v19, %v17970_v52  ;;  %17971 = vst [vmem:[#allocation197_spill] sm:$0xff] %v13418_v48  ;;  %v13427_v57 = vsel %vm1398_vm6, 0.0, %v13388_v6  ;;  %v5308_v28 = vrot.slane %v5293_v3, 4  ;;  %v5345_v19 = vperm.slane %v5337_v40, %v11923_v36  ;;  %v13450_v6 = vpop.permute.xlu1 %10497 }
 0x433   : > { %17972 = vst [vmem:[#allocation198_spill] sm:$0xff] %v13421_v49  ;;  %v5358_v8 = vrot.slane %v5341_v14, 4  ;;  %v13432_v13 = vperm.slane %v5347_v51, %v11923_v36  ;;  %v5357_v39 = vperm.slane %v5349_v18, %v11923_v36  ;;  %v10485_v22 = vunpack.i.h.bf16 %v10483_v16 }
 0x434   : > { %17973 = vst [vmem:[#allocation199_spill] sm:$0xff] %v13427_v57  ;;  %v13437_v0 = vperm.slane %v5295_v50, %v11923_v36  ;;  %v5306_v42 = vrot.slane %v5289_v4, 4  ;;  %v13439_v53 = vrot.slane %v5305_v55, 4  ;;  %v5309_v34 = vsel %vm1398_vm6, 0.0, %v5308_v28 }
 0x435   : > { %v5359_v50 = vsel %vm1398_vm6, 0.0, %v5358_v8  ;;  %v5360_v25 = vrot.slane %v5345_v19, 4  ;;  %v13453_v3 = vrot.slane %v5357_v39, 4  ;;  %v3652_v62 = vrot.slane %v10485_v22, 4 }
 0x436   : > { %v3657_v40 = vperm.slane %v10485_v22, %v11700_v17  ;;  %v5307_v52 = vsel %vm1398_vm6, 0.0, %v5306_v42  ;;  %v13460_v18 = vsel %vm1398_vm6, 0.0, %v13439_v53  ;;  %v17974_v57 = vrot.slane %v12679_v46, 4 }
 0x437   : > { %v3653_v19 = vsel %vm1398_vm6, 0.0, %v3652_v62  ;;  %v10500_v55 = vunpack.i.h.bf16 %v13450_v6  ;;  %v3605_v51 = vperm.slane %v10484_v24, %v11700_v17  ;;  %v5361_v48 = vsel %vm1398_vm6, 0.0, %v5360_v25 }
 0x438   : > { %v3662_v8 = vrot.slane %v3657_v40, 4  ;;  %v3665_v39 = vsel %vm1398_vm6, %v3657_v40, %v17974_v57  ;;  %v3661_v22 = vperm.slane %v3653_v19, %v11700_v17  ;;  %v13473_v16 = vsel %vm1398_vm6, 0.0, %v13453_v3 }
 0x439   : > { %v3673_v42 = vperm.slane %v3665_v39, %v11923_v36  ;;  %v13476_v62 = vsel %vm1398_vm6, %v5308_v28, %v5289_v4  ;;  %v17975_v39 = vrot.slane %v12701_v58, 4  ;;  %v5903_v59 = vrot.slane %v5309_v34, 4 }
 0x43a   : > { %v3663_v57 = vsel %vm1398_vm6, %v3662_v8, %v12679_v46  ;;  %v3674_v19 = vrot.slane %v3661_v22, 4  ;;  %v3601_v7 = vsel %vm1398_vm6, 0.0, %v3600_v10  ;;  %v3610_v23 = vrot.slane %v3605_v51, 4 }
 0x43b   : > { %v3669_v40 = vperm.slane %v3663_v57, %v11923_v36  ;;  %v3677_v49 = vsel %vm1398_vm6, %v3661_v22, %v17975_v39  ;;  %v3688_v24 = vrot.slane %v3673_v42, 4  ;;  %v3613_v4 = vsel %vm1398_vm6, %v3605_v51, %v17976_v41 }
 0x43c   : > { %v13492_v8 = vsel %vm1398_vm6, %v5360_v25, %v5341_v14  ;;  %v3548_v57 = vrot.slane %v10500_v55, 4  ;;  %v3685_v22 = vperm.slane %v3677_v49, %v11923_v36  ;;  %v3553_v10 = vperm.slane %v10500_v55, %v11700_v17 }
 0x43d   : > { %v3686_v42 = vrot.slane %v3669_v40, 4  ;;  %v3689_v34 = vsel %vm1398_vm6, 0.0, %v3688_v24  ;;  %v3675_v39 = vsel %vm1398_vm6, %v3674_v19, %v12701_v58  ;;  %v3609_v41 = vperm.slane %v3601_v7, %v11700_v17 }
 0x43e   : > { %v3611_v51 = vsel %vm1398_vm6, %v3610_v23, %v12687_v31  ;;  %v3621_v28 = vperm.slane %v3613_v4, %v11923_v36  ;;  %v13504_v14 = vsel %vm1398_vm6, %v5903_v59, %v5307_v52  ;;  %v5941_v25 = vrot.slane %v5361_v48, 4 }
 0x43f   : > { %v10499_v46 = vunpack.i.l.bf16 %v13450_v6  ;;  %v4297_v1 = vrot.slane %v3689_v34, 4  ;;  %v3617_v55 = vperm.slane %v3611_v51, %v11923_v36  ;;  %v3622_v61 = vrot.slane %v3609_v41, 4  ;;  %v13522_v34 = vpop.permute.xlu1 %10512 }
 0x440   : > { %v17977_v58 = vrot.slane %v12708_v35, 4  ;;  %v13513_v31 = vperm.slane %v3675_v39, %v11923_v36  ;;  %v3687_v23 = vsel %vm1398_vm6, 0.0, %v3686_v42  ;;  %v13516_v59 = vrot.slane %v3685_v22, 4 }
 0x441   : > { %v3636_v48 = vrot.slane %v3621_v28, 4  ;;  %v3549_v19 = vsel %vm1398_vm6, 0.0, %v3548_v57  ;;  %v3558_v4 = vrot.slane %v3553_v10, 4  ;;  %v13528_v39 = vsel %vm1398_vm6, %v3688_v24, %v3669_v40 }
 0x442   : > { %v3625_v7 = vsel %vm1398_vm6, %v3609_v41, %v17977_v58  ;;  %17978 = vst [vmem:[#allocation200_spill] sm:$0xff] %v13513_v31  ;;  %v13525_v41 = vsel %vm1398_vm6, %v5941_v25, %v5359_v50  ;;  %v3623_v22 = vsel %vm1398_vm6, %v3622_v61, %v12708_v35  ;;  %v3496_v28 = vrot.slane %v10499_v46, 4 }
 0x443   : > { %17979 = vst [vmem:[#allocation201_spill] sm:$0xff] %v13516_v59  ;;  %v3633_v6 = vperm.slane %v3625_v7, %v11923_v36  ;;  %v13533_v42 = vsel %vm1398_vm6, %v4297_v1, %v3687_v23  ;;  %v3634_v51 = vrot.slane %v3617_v55, 4  ;;  %v3637_v58 = vsel %vm1398_vm6, 0.0, %v3636_v48 }
 0x444   : > { %17980 = vst [vmem:[#allocation202_spill] sm:$0xff] %v13528_v39  ;;  %v3557_v57 = vperm.slane %v3549_v19, %v11700_v17  ;;  %v3690_v7 = vrot.slane %v13513_v31, 4  ;;  %v13540_v50 = vsel %vm1398_vm6, 0.0, %v13516_v59  ;;  %v17983_v40 = vrot.slane %v12712_v27, 4 }
 0x445   : > { %17981 = vst [vmem:[#allocation203_spill] sm:$0xff] %v13533_v42  ;;  %v10515_v61 = vunpack.i.h.bf16 %v13522_v34  ;;  %v13549_v1 = vperm.slane %v3623_v22, %v11923_v36  ;;  %v13551_v25 = vrot.slane %v3633_v6, 4  ;;  %v3559_v23 = vsel %vm1398_vm6, %v3558_v4, %v12712_v27 }
 0x446   : > { %17982 = vst [vmem:[#allocation204_spill] sm:$0xff] %v13540_v50  ;;  %v3561_v24 = vsel %vm1398_vm6, %v3553_v10, %v17983_v40  ;;  %v13558_v52 = vsel %vm1398_vm6, %v3636_v48, %v3617_v55  ;;  %v4259_v10 = vrot.slane %v3637_v58, 4  ;;  %v3570_v40 = vrot.slane %v3557_v57, 4 }
 0x447   : > { %v3635_v35 = vsel %vm1398_vm6, 0.0, %v3634_v51  ;;  %v3569_v22 = vperm.slane %v3561_v24, %v11923_v36  ;;  %v3497_v6 = vsel %vm1398_vm6, 0.0, %v3496_v28  ;;  %v13565_v39 = vsel %vm1398_vm6, 0.0, %v3690_v7 }
 0x448   : > { %17984 = vst [vmem:[#allocation205_spill] sm:$0xff] %v13565_v39  ;;  %v3565_v27 = vperm.slane %v3559_v23, %v11923_v36  ;;  %v3501_v4 = vperm.slane %v10499_v46, %v11700_v17  ;;  %v3505_v55 = vperm.slane %v3497_v6, %v11700_v17  ;;  %v3638_v48 = vrot.slane %v13549_v1, 4 }
 0x449   : > { %v13573_v58 = vsel %vm1398_vm6, 0.0, %v13551_v25  ;;  %v17985_v28 = vrot.slane %v12728_v45, 4  ;;  %v13581_v24 = vsel %vm1398_vm6, %v4259_v10, %v3635_v35  ;;  %v3571_v46 = vsel %vm1398_vm6, %v3570_v40, %v12728_v45 }
 0x44a   : > { %v3506_v23 = vrot.slane %v3501_v4, 4  ;;  %v3444_v6 = vrot.slane %v10515_v61, 4  ;;  %v3584_v19 = vrot.slane %v3569_v22, 4  ;;  %v17986_v49 = vrot.slane %v12718_v47, 4 }
 0x44b   : > { %v3573_v7 = vsel %vm1398_vm6, %v3557_v57, %v17985_v28  ;;  %v3518_v50 = vrot.slane %v3505_v55, 4  ;;  %v17987_v51 = vrot.slane %v12750_v21, 4  ;;  %v3582_v10 = vrot.slane %v3565_v27, 4 }
 0x44c   : > { %v3509_v42 = vsel %vm1398_vm6, %v3501_v4, %v17986_v49  ;;  %v3581_v35 = vperm.slane %v3573_v7, %v11923_v36  ;;  %v3507_v45 = vsel %vm1398_vm6, %v3506_v23, %v12718_v47  ;;  %v13596_v40 = vsel %vm1398_vm6, 0.0, %v3638_v48 }
 0x44d   : > { %v3521_v39 = vsel %vm1398_vm6, %v3505_v55, %v17987_v51  ;;  %v13601_v49 = vperm.slane %v3571_v46, %v11923_v36  ;;  %v3517_v4 = vperm.slane %v3509_v42, %v11923_v36  ;;  %v3513_v55 = vperm.slane %v3507_v45, %v11923_v36 }
 0x44e   : > { %v3529_v51 = vperm.slane %v3521_v39, %v11923_v36  ;;  %v3445_v28 = vsel %vm1398_vm6, 0.0, %v3444_v6  ;;  %v3449_v7 = vperm.slane %v10515_v61, %v11700_v17  ;;  %v3585_v47 = vsel %vm1398_vm6, 0.0, %v3584_v19 }
 0x44f   : > { %17988 = vst [vmem:[#allocation206_spill] sm:$0xff] %v13601_v49  ;;  %v3519_v48 = vsel %vm1398_vm6, %v3518_v50, %v12750_v21  ;;  %v3532_v23 = vrot.slane %v3517_v4, 4  ;;  %v3453_v22 = vperm.slane %v3445_v28, %v11700_v17  ;;  %v3583_v46 = vsel %vm1398_vm6, 0.0, %v3582_v10 }
 0x450   : > { %v13613_v57 = vrot.slane %v3581_v35, 4  ;;  %v3454_v42 = vrot.slane %v3449_v7, 4  ;;  %v17990_v45 = vrot.slane %v12761_v43, 4  ;;  %v3586_v6 = vrot.slane %v13601_v49, 4 }
 0x451   : > { %v13620_v61 = vsel %vm1398_vm6, %v3584_v19, %v3565_v27  ;;  %v10514_v21 = vunpack.i.l.bf16 %v13522_v34  ;;  %v4221_v50 = vrot.slane %v3585_v47, 4  ;;  %v13625_v4 = vperm.slane %v3519_v48, %v11923_v36 }
 0x452   : > { %17989 = vst [vmem:[#allocation207_spill] sm:$0xff] %v13613_v57  ;;  %v3457_v39 = vsel %vm1398_vm6, %v3449_v7, %v17990_v45  ;;  %v3530_v35 = vrot.slane %v3513_v55, 4  ;;  %v13627_v10 = vrot.slane %v3529_v51, 4  ;;  %v3533_v28 = vsel %vm1398_vm6, 0.0, %v3532_v23 }
 0x453   : > { %17991 = vst [vmem:[#allocation208_spill] sm:$0xff] %v13620_v61  ;;  %v3465_v59 = vperm.slane %v3457_v39, %v11923_v36  ;;  %v3455_v7 = vsel %vm1398_vm6, %v3454_v42, %v12761_v43  ;;  %v3466_v45 = vrot.slane %v3453_v22, 4  ;;  %v17992_v19 = vrot.slane %v12781_v60, 4 }
 0x454   : > { %v13637_v34 = vsel %vm1398_vm6, 0.0, %v13613_v57  ;;  %v3461_v51 = vperm.slane %v3455_v7, %v11923_v36  ;;  %v3392_v42 = vrot.slane %v10514_v21, 4  ;;  %v3397_v49 = vperm.slane %v10514_v21, %v11700_v17 }
 0x455   : > { %v3469_v27 = vsel %vm1398_vm6, %v3453_v22, %v17992_v19  ;;  %v3480_v48 = vrot.slane %v3465_v59, 4  ;;  %v3467_v39 = vsel %vm1398_vm6, %v3466_v45, %v12781_v60  ;;  %v13647_v22 = vsel %vm1398_vm6, %v4221_v50, %v3583_v46 }
 0x456   : > { %v3477_v43 = vperm.slane %v3469_v27, %v11923_v36  ;;  %v3531_v19 = vsel %vm1398_vm6, 0.0, %v3530_v35  ;;  %v3534_v57 = vrot.slane %v13625_v4, 4  ;;  %v4183_v31 = vrot.slane %v3533_v28, 4 }
 0x457   : > { %v13653_v7 = vsel %vm1398_vm6, 0.0, %v13627_v10  ;;  %v13656_v59 = vsel %vm1398_vm6, %v3532_v23, %v3513_v55  ;;  %v3393_v60 = vsel %vm1398_vm6, 0.0, %v3392_v42  ;;  %v3402_v45 = vrot.slane %v3397_v49, 4 }
 0x458   : > { %v13660_v21 = vsel %vm1398_vm6, 0.0, %v3586_v6  ;;  %v13663_v46 = vperm.slane %v3467_v39, %v11923_v36  ;;  %v3478_v50 = vrot.slane %v3461_v51, 4  ;;  %v3481_v35 = vsel %vm1398_vm6, 0.0, %v3480_v48 }
 0x459   : > { %v13669_v47 = vrot.slane %v3477_v43, 4  ;;  %v3401_v55 = vperm.slane %v3393_v60, %v11700_v17  ;;  %v13673_v23 = vsel %vm1398_vm6, 0.0, %v3534_v57  ;;  %v13678_v39 = vsel %vm1398_vm6, %v4183_v31, %v3531_v19 }
 0x45a   : > { %v13682_v61 = vsel %vm1398_vm6, %v3480_v48, %v3461_v51  ;;  %v4145_v28 = vrot.slane %v3481_v35, 4  ;;  %v3403_v43 = vsel %vm1398_vm6, %v3402_v45, %v12767_v30  ;;  %v17995_v60 = vrot.slane %v13305_v32, 4 }
 0x45b   : > { %17993 = vst [vmem:[#allocation209_spill] sm:$0xff] %v13669_v47  ;;  %v3479_v27 = vsel %vm1398_vm6, 0.0, %v3478_v50  ;;  %v3482_v6 = vrot.slane %v13663_v46, 4  ;;  %v17996_v31 = vrot.slane %v12767_v30, 4  ;;  %v4340_v51 = vperm.slane %v13414_v29, %v11700_v17 }
 0x45c   : > { %17994 = vst [vmem:[#allocation210_spill] sm:$0xff] %v13682_v61  ;;  %v3743_v57 = vsel %vm1398_vm6, 0.0, %v17995_v60  ;;  %v13700_v45 = vsel %vm1398_vm6, 0.0, %v13669_v47  ;;  %v17998_v35 = vrot.slane %v12784_v56, 4  ;;  %v17999_v60 = vrot.slane %v13364_v26, 4 }
 0x45d   : > { %v3405_v19 = vsel %vm1398_vm6, %v3397_v49, %v17996_v31  ;;  %17997 = vst [vmem:[#allocation211_spill] sm:$0xff] %v13700_v45  ;;  %v13711_v29 = vperm.slane %v3403_v43, %v11923_v36  ;;  %v3414_v31 = vrot.slane %v3401_v55, 4  ;;  %v4341_v48 = vsel %vm1398_vm6, %v13345_v20, %v13305_v32 }
 0x45e   : > { %v3417_v50 = vsel %vm1398_vm6, %v3401_v55, %v17998_v35  ;;  %v4347_v30 = vsel %vm1398_vm6, %v17999_v60, %v3743_v57  ;;  %v13717_v42 = vsel %vm1398_vm6, %v4145_v28, %v3479_v27  ;;  %v3413_v35 = vperm.slane %v3405_v19, %v11923_v36 }
 0x45f   : > { %18000 = vst [vmem:[#allocation212_spill] sm:$0xff] %v13717_v42  ;;  %v4351_v26 = vperm.slane %v4347_v30, %v11700_v17  ;;  %v4352_v47 = vrot.slane %v4340_v51, 4  ;;  %v13722_v57 = vsel %vm1398_vm6, 0.0, %v3482_v6  ;;  %v3425_v43 = vperm.slane %v3417_v50, %v11923_v36 }
 0x460   : > { %18001 = vst [vmem:[#allocation213_spill] sm:$0xff] %v13722_v57  ;;  %v18002_v55 = vrot.slane %v13282_v33, 4  ;;  %v4345_v32 = vperm.slane %v4341_v48, %v11700_v17  ;;  %v18003_v20 = vperm.slane %v13339_v38, %v11700_v17  ;;  %v4378_v6 = vperm.slane %v13335_v12, %v11700_v17  ;;  %v10528_v48 = vpop.permute.xlu1 %10527 }
 0x461   : > { %v4358_v27 = vrot.slane %v4351_v26, 4  ;;  %v3415_v51 = vsel %vm1398_vm6, %v3414_v31, %v12784_v56  ;;  %v3426_v50 = vrot.slane %v13711_v29, 4  ;;  %v18004_v12 = vrot.slane %v13300_v9, 4 }
 0x462   : > { %v3795_v49 = vsel %vm1398_vm6, 0.0, %v18002_v55  ;;  %v4353_v28 = vsel %vm1398_vm6, %v4352_v47, %v18003_v20  ;;  %v3428_v55 = vrot.slane %v3413_v35, 4  ;;  %v4379_v47 = vsel %vm1398_vm6, %v13276_v15, %v13282_v33 }
 0x463   : > { %v13742_v30 = vperm.slane %v4353_v28, %v11923_v36  ;;  %v4359_v38 = vsel %vm1398_vm6, %v4358_v27, %v4345_v32  ;;  %v4385_v26 = vsel %vm1398_vm6, %v18004_v12, %v3795_v49  ;;  %v4390_v28 = vrot.slane %v4378_v6, 4 }
 0x464   : > { %v13752_v20 = vperm.slane %v4359_v38, %v11923_v36  ;;  %v4389_v31 = vperm.slane %v4385_v26, %v11700_v17  ;;  %v13757_v35 = vperm.slane %v3415_v51, %v11923_v36  ;;  %v13759_v32 = vrot.slane %v3425_v43, 4 }
 0x465   : > { %v4366_v56 = vrot.slane %v13742_v30, 4  ;;  %v10530_v27 = vunpack.i.h.bf16 %v10528_v48  ;;  %v10529_v19 = vunpack.i.l.bf16 %v10528_v48  ;;  %v4383_v33 = vperm.slane %v4379_v47, %v11700_v17 }
 0x466   : > { %v18005_v9 = vperm.slane %v13279_v54, %v11700_v17  ;;  %v4396_v38 = vrot.slane %v4389_v31, 4  ;;  %v3429_v48 = vsel %vm1398_vm6, 0.0, %v3428_v55  ;;  %v13775_v26 = vsel %vm1398_vm6, %v3428_v55, %v13711_v29 }
 0x467   : > { %v4367_v15 = vsel %vm1398_vm6, %v13752_v20, %v4366_v56  ;;  %v3226_v12 = vrot.slane %v10530_v27, 4  ;;  %v3231_v43 = vperm.slane %v10530_v27, %v11700_v17  ;;  %v3174_v56 = vrot.slane %v10529_v19, 4 }
 0x468   : > { %v4391_v49 = vsel %vm1398_vm6, %v4390_v28, %v18005_v9  ;;  %v4436_v51 = vpack.c.bf16 %v4367_v15, %v4367_v15  ;;  %v4397_v47 = vsel %vm1398_vm6, %v4396_v38, %v4383_v33  ;;  %v3179_v15 = vperm.slane %v10529_v19, %v11700_v17 }
 0x469   : > { %v13769_v6 = vperm.slane %v4391_v49, %v11923_v36  ;;  %v4401_v54 = vperm.slane %v4397_v47, %v11923_v36  ;;  %v3227_v28 = vsel %vm1398_vm6, 0.0, %v3226_v12  ;;  %v3430_v9 = vrot.slane %v13757_v35, 4 }
 0x46a   : > { %v3235_v27 = vperm.slane %v3227_v28, %v11700_v17  ;;  %v18006_v49 = vrot.slane %v12868_v5, 4  ;;  %v3248_v55 = vrot.slane %v3231_v43, 4  ;;  %v13789_v33 = vsel %vm1398_vm6, 0.0, %v13759_v32 }
 0x46b   : > { %v4404_v31 = vrot.slane %v13769_v6, 4  ;;  %v4107_v38 = vrot.slane %v3429_v48, 4  ;;  %v6254_v60 = vunpack.c.l.b16 %v4436_v51  ;;  %v18007_v61 = vrot.slane %v12872_v37, 4 }
 0x46c   : > { %v3247_v29 = vsel %vm1398_vm6, %v18006_v49, %v3231_v43  ;;  %v3249_v19 = vsel %vm1398_vm6, %v12868_v5, %v3248_v55  ;;  %v3175_v42 = vsel %vm1398_vm6, 0.0, %v3174_v56  ;;  %v3260_v45 = vrot.slane %v3235_v27, 4 }
 0x46d   : > { %v4405_v47 = vsel %vm1398_vm6, %v4401_v54, %v4404_v31  ;;  %v3259_v28 = vsel %vm1398_vm6, %v18007_v61, %v3235_v27  ;;  %v3253_v43 = vperm.slane %v3247_v29, %v11923_v36  ;;  %v3257_v49 = vperm.slane %v3249_v19, %v11923_v36 }
 0x46e   : > { %v4437_v12 = vpack.c.bf16 %v4405_v47, %v4405_v47  ;;  %v3196_v57 = vrot.slane %v3179_v15, 4  ;;  %v3427_v48 = vsel %vm1398_vm6, 0.0, %v3426_v50  ;;  %v4364_v5 = vrot.slane %v13752_v20, 4  ;;  %v18037_v50 = vld [vmem:[#allocation157_spill] sm:$0xff] }
 0x46f   : > { %v13805_v55 = vperm.slane %v3259_v28, %v11923_v36  ;;  %v3272_v61 = vrot.slane %v3257_v49, 4  ;;  %v3183_v56 = vperm.slane %v3175_v42, %v11700_v17  ;;  %v18008_v29 = vrot.slane %v12876_v44, 4 }
 0x470   : > { %v6255_v31 = vunpack.c.l.b16 %v4437_v12  ;;  %v13812_v27 = vsel %vm1398_vm6, 0.0, %v3430_v9  ;;  %v3197_v12 = vsel %vm1398_vm6, %v12876_v44, %v3196_v57  ;;  %v13818_v20 = vsel %vm1398_vm6, %v4107_v38, %v3427_v48 }
 0x471   : > { %v3195_v47 = vsel %vm1398_vm6, %v18008_v29, %v3179_v15  ;;  %v3261_v42 = vsel %vm1398_vm6, %v12872_v37, %v3260_v45  ;;  %v3270_v28 = vrot.slane %v3253_v43, 4  ;;  %v3273_v15 = vsel %vm1398_vm6, 0.0, %v3272_v61 }
 0x472   : > { %v6263_v19 = vpack.c.b16 %v6255_v31, %v6254_v60  ;;  %v13825_v9 = vperm.slane %v3195_v47, %v11923_v36  ;;  %v3205_v60 = vperm.slane %v3197_v12, %v11923_v36  ;;  %v3274_v44 = vrot.slane %v13805_v55, 4 }
 0x473   : > { %v18009_v57 = vrot.slane %v12881_v63, 4  ;;  %v3208_v48 = vrot.slane %v3183_v56, 4  ;;  %v4365_v37 = vsel %vm1398_vm6, %v4364_v5, %v13742_v30  ;;  %v3269_v31 = vperm.slane %v3261_v42, %v11923_v36 }
 0x474   : > { %v6310_v49 = vsel %vm6086_vm7, %v6263_v19, 0  ;;  %v13837_v29 = vrot.slane %v3205_v60, 4  ;;  %v18010_v47 = vrot.slane %v13437_v0, 4  ;;  %v3271_v12 = vsel %vm1398_vm6, 0.0, %v3270_v28 }
 0x475   : > { %6312 = vmatpush.bf16.xpose.msra.mxu2 %v6310_v49  ;;  %v3207_v38 = vsel %vm1398_vm6, %v18009_v57, %v3183_v56  ;;  %v13844_v49 = vsel %vm1398_vm6, %v3272_v61, %v3253_v43  ;;  %v3993_v56 = vrot.slane %v3273_v15, 4  ;;  %v4402_v57 = vrot.slane %v4401_v54, 4 }
 0x476   : > { %v5311_v19 = vsel %vm1398_vm6, 0.0, %v18010_v47  ;;  %18011 = vst [vmem:[#allocation214_spill] sm:$0xff] %v13844_v49  ;;  %v13847_v30 = vperm.slane %v3207_v38, %v11923_v36  ;;  %v3218_v5 = vrot.slane %v13825_v9, 4  ;;  %v3221_v42 = vsel %vm1398_vm6, 0.0, %v13837_v29 }
 0x477   : > { %v4420_v60 = vpack.c.bf16 %v4365_v37, %v4365_v37  ;;  %v13853_v51 = vsel %vm1398_vm6, 0.0, %v3274_v44  ;;  %v3209_v28 = vsel %vm1398_vm6, %v12881_v63, %v3208_v48  ;;  %v3955_v47 = vrot.slane %v3221_v42, 4 }
 0x478   : > { %18012 = vst [vmem:[#allocation215_spill] sm:$0xff] %v13853_v51  ;;  %v4403_v43 = vsel %vm1398_vm6, %v4402_v57, %v13769_v6  ;;  %v13859_v54 = vrot.slane %v3269_v31, 4  ;;  %v13864_v45 = vsel %vm1398_vm6, %v3993_v56, %v3271_v12  ;;  %v18013_v44 = vrot.slane %v13432_v13, 4 }
 0x479   : > { %v4421_v15 = vpack.c.bf16 %v4403_v43, %v4403_v43  ;;  %v6076_v38 = vunpack.c.l.b16 %v4420_v60  ;;  %v5908_v63 = vperm.slane %v13504_v14, %v11700_v17  ;;  %v5909_v6 = vsel %vm1398_vm6, %v13439_v53, %v13437_v0 }
 0x47a   : > { %v5363_v37 = vsel %vm1398_vm6, 0.0, %v18013_v44  ;;  %v3217_v48 = vperm.slane %v3209_v28, %v11923_v36  ;;  %v3219_v31 = vsel %vm1398_vm6, 0.0, %v3218_v5  ;;  %v18014_v42 = vrot.slane %v13460_v18, 4  ;;  %v10543_v44 = vpop.permute.xlu1 %10542 }
 0x47b   : > { %v6077_v57 = vunpack.c.l.b16 %v4421_v15  ;;  %v13880_v56 = vsel %vm1398_vm6, %v3955_v47, %v3219_v31  ;;  %v5920_v43 = vrot.slane %v5908_v63, 4  ;;  %v5946_v14 = vperm.slane %v13525_v41, %v11700_v17 }
 0x47c   : > { %v5915_v12 = vsel %vm1398_vm6, %v18014_v42, %v5311_v19  ;;  %v5913_v53 = vperm.slane %v5909_v6, %v11700_v17  ;;  %v5947_v5 = vsel %vm1398_vm6, %v13453_v3, %v13432_v13  ;;  %v18015_v18 = vrot.slane %v13473_v16, 4 }
 0x47d   : > { %v5919_v60 = vperm.slane %v5915_v12, %v11700_v17  ;;  %v6085_v0 = vpack.c.b16 %v6077_v57, %v6076_v38  ;;  %v18016_v28 = vperm.slane %v13476_v62, %v11700_v17  ;;  %v5958_v63 = vrot.slane %v5946_v14, 4 }
 0x47e   : > { %v5953_v19 = vsel %vm1398_vm6, %v18015_v18, %v5363_v37  ;;  %v10545_v31 = vunpack.i.h.bf16 %v10543_v44  ;;  %v10544_v13 = vunpack.i.l.bf16 %v10543_v44  ;;  %v5951_v16 = vperm.slane %v5947_v5, %v11700_v17 }
 0x47f   : > { %v5921_v47 = vsel %vm1398_vm6, %v5920_v43, %v18016_v28  ;;  %v5926_v15 = vrot.slane %v5919_v60, 4  ;;  %v5957_v41 = vperm.slane %v5953_v19, %v11700_v17  ;;  %v6133_v38 = vsel %vm6086_vm7, %v6085_v0, 0 }
 0x480   : > { %v13899_v6 = vperm.slane %v5921_v47, %v11923_v36  ;;  %6135 = vmatpush.bf16.xpose.msra.mxu1 %v6133_v38  ;;  %v18017_v62 = vperm.slane %v13492_v8, %v11700_v17  ;;  %v3132_v43 = vrot.slane %v10545_v31, 4  ;;  %v3137_v44 = vperm.slane %v10545_v31, %v11700_v17 }
 0x481   : > { %v5927_v3 = vsel %vm1398_vm6, %v5926_v15, %v5913_v53  ;;  %v5964_v57 = vrot.slane %v5957_v41, 4  ;;  %v3080_v0 = vrot.slane %v10544_v13, 4  ;;  %v3085_v53 = vperm.slane %v10544_v13, %v11700_v17 }
 0x482   : > { %v5959_v37 = vsel %vm1398_vm6, %v5958_v63, %v18017_v62  ;;  %v13908_v42 = vperm.slane %v5927_v3, %v11923_v36  ;;  %v5934_v12 = vrot.slane %v13899_v6, 4  ;;  %v3133_v19 = vsel %vm1398_vm6, 0.0, %v3132_v43 }
 0x483   : > { %v13912_v60 = vperm.slane %v5959_v37, %v11923_v36  ;;  %v5965_v14 = vsel %vm1398_vm6, %v5964_v57, %v5951_v16  ;;  %v3141_v47 = vperm.slane %v3133_v19, %v11700_v17  ;;  %v3142_v15 = vrot.slane %v3137_v44, 4 }
 0x484   : > { %v5935_v8 = vsel %vm1398_vm6, %v13908_v42, %v5934_v12  ;;  %v13920_v5 = vperm.slane %v5965_v14, %v11923_v36  ;;  %v18018_v41 = vrot.slane %v12833_v2, 4  ;;  %v3081_v13 = vsel %vm1398_vm6, 0.0, %v3080_v0 }
 0x485   : > { %v5972_v18 = vrot.slane %v13912_v60, 4  ;;  %v6004_v28 = vpack.c.bf16 %v5935_v8, %v5935_v8  ;;  %v3090_v3 = vrot.slane %v3085_v53, 4  ;;  %v3143_v37 = vsel %vm1398_vm6, %v3142_v15, %v12833_v2 }
 0x486   : > { %v3145_v63 = vsel %vm1398_vm6, %v3137_v44, %v18018_v41  ;;  %v3154_v57 = vrot.slane %v3141_v47, 4  ;;  %v13934_v12 = vrot.slane %v3217_v48, 4  ;;  %v3149_v43 = vperm.slane %v3143_v37, %v11923_v36  ;;  %v18020_v41 = vld [vmem:[#allocation136_spill] sm:$0xff] }
 0x487   : > { %v5973_v38 = vsel %vm1398_vm6, %v13920_v5, %v5972_v18  ;;  %v3153_v31 = vperm.slane %v3145_v63, %v11923_v36  ;;  %v6936_v62 = vunpack.c.l.b16 %v6004_v28  ;;  %v18019_v14 = vrot.slane %v12848_v11, 4 }
 0x488   : > { %v6005_v16 = vpack.c.bf16 %v5973_v38, %v5973_v38  ;;  %v3222_v18 = vrot.slane %v13847_v30, 4  ;;  %v3089_v0 = vperm.slane %v3081_v13, %v11700_v17  ;;  %v3091_v28 = vsel %vm1398_vm6, %v3090_v3, %v18020_v41 }
 0x489   : > { %v3157_v44 = vsel %vm1398_vm6, %v3141_v47, %v18019_v14  ;;  %v3168_v8 = vrot.slane %v3153_v31, 4  ;;  %v13946_v2 = vsel %vm1398_vm6, 0.0, %v13859_v54  ;;  %v3998_v48 = vperm.slane %v13864_v45, %v11700_v17 }
 0x48a   : > { %v6937_v19 = vunpack.c.l.b16 %v6005_v16  ;;  %18021 = vst [vmem:[#allocation136_spill] sm:$0xff] %v13946_v2  ;;  %v3960_v15 = vperm.slane %v13880_v56, %v11700_v17  ;;  %v3165_v47 = vperm.slane %v3157_v44, %v11923_v36  ;;  %v3155_v38 = vsel %vm1398_vm6, %v3154_v57, %v12848_v11 }
 0x48b   : > { %v3166_v31 = vrot.slane %v3149_v43, 4  ;;  %v3169_v13 = vsel %vm1398_vm6, 0.0, %v3168_v8  ;;  %v13958_v3 = vsel %vm1398_vm6, 0.0, %v13934_v12  ;;  %v13963_v45 = vsel %vm1398_vm6, %v13837_v29, %v13825_v9 }
 0x48c   : > { %v6945_v63 = vpack.c.b16 %v6937_v19, %v6936_v62  ;;  %v18022_v56 = vrot.slane %v18020_v41, 4  ;;  %v13969_v62 = vperm.slane %v3091_v28, %v11923_v36  ;;  %v13973_v37 = vsel %vm1398_vm6, 0.0, %v3222_v18 }
 0x48d   : > { %v3102_v14 = vrot.slane %v3089_v0, 4  ;;  %v13976_v44 = vrot.slane %v3998_v48, 4  ;;  %v13979_v9 = vperm.slane %v3155_v38, %v11923_v36  ;;  %v13981_v29 = vrot.slane %v3165_v47, 4 }
 0x48e   : > { %v3093_v16 = vsel %vm1398_vm6, %v3085_v53, %v18022_v56  ;;  %6954 = vmatpush.bf16.msrb.mxu0 %v6945_v63  ;;  %v3917_v53 = vrot.slane %v3169_v13, 4  ;;  %v13986_v28 = vrot.slane %v3960_v15, 4  ;;  %v3167_v18 = vsel %vm1398_vm6, 0.0, %v3166_v31  ;;  %v18025_v63 = vld [vmem:[#allocation139_spill] sm:$0xff] }
 0x48f   : > { %v3101_v57 = vperm.slane %v3093_v16, %v11923_v36  ;;  %18023 = vst [vmem:[#allocation216_spill] sm:$0xff] %v13976_v44  ;;  %v18026_v56 = vrot.slane %v18025_v63, 4  ;;  %v3114_v38 = vrot.slane %v13969_v62, 4  ;;  %v18027_v47 = vrot.slane %v13573_v58, 4  ;;  %v18041_v44 = vld [vmem:[#allocation202_spill] sm:$0xff] }
 0x490   : > { %18024 = vst [vmem:[#allocation217_spill] sm:$0xff] %v13981_v29  ;;  %v18028_v16 = vperm.slane %v13581_v24, %v11700_v17  ;;  %v14003_v15 = vsel %vm1398_vm6, %v3168_v8, %v3149_v43  ;;  %v3103_v31 = vsel %vm1398_vm6, %v3102_v14, %v18025_v63  ;;  %v14018_v24 = vsel %vm1398_vm6, %v3917_v53, %v3167_v18  ;;  %v18039_v8 = vld [vmem:[#allocation150_spill] sm:$0xff] }
 0x491   : > { %v13992_v48 = vsel %vm1398_vm6, %v3089_v0, %v18026_v56  ;;  %v4271_v13 = vsel %vm1398_vm6, %v18027_v47, %v13596_v40  ;;  %v14007_v11 = vrot.slane %v3101_v57, 4  ;;  %v4265_v0 = vsel %vm1398_vm6, %v13551_v25, %v13549_v1  ;;  %v18030_v1 = vld [vmem:[#allocation200_spill] sm:$0xff]  ;;  %v18031_v25 = vld [vmem:[#allocation201_spill] sm:$0xff] }
 0x492   : > { %v4276_v61 = vrot.slane %v18028_v16, 4  ;;  %v14015_v40 = vsel %vm1398_vm6, 0.0, %v13981_v29  ;;  %v4275_v43 = vperm.slane %v4271_v13, %v11700_v17  ;;  %v18029_v57 = vperm.slane %v13558_v52, %v11700_v17  ;;  %v18032_v56 = vld [vmem:[#allocation205_spill] sm:$0xff]  ;;  %v18033_v47 = vld [vmem:[#allocation204_spill] sm:$0xff] }
 0x493   : > { %v4303_v63 = vsel %vm1398_vm6, %v18031_v25, %v18030_v1  ;;  %v18034_v16 = vrot.slane %v18033_v47, 4  ;;  %v14035_v18 = vperm.slane %v3103_v31, %v11923_v36  ;;  %v14038_v13 = vsel %vm1398_vm6, 0.0, %v3114_v38  ;;  %v18035_v47 = vld [vmem:[#allocation203_spill] sm:$0xff] }
 0x494   : > { %v4277_v14 = vsel %vm1398_vm6, %v4276_v61, %v18029_v57  ;;  %v4269_v19 = vperm.slane %v4265_v0, %v11700_v17  ;;  %v14044_v61 = vsel %vm1398_vm6, 0.0, %v14007_v11  ;;  %v4282_v57 = vrot.slane %v4275_v43, 4 }
 0x495   : > { %v4309_v53 = vsel %vm1398_vm6, %v18034_v16, %v18032_v56  ;;  %v4281_v52 = vperm.slane %v4277_v14, %v11923_v36  ;;  %v4307_v1 = vperm.slane %v4303_v63, %v11700_v17  ;;  %v18036_v31 = vperm.slane %v18035_v47, %v11700_v17 }
 0x496   : > { %v4313_v25 = vperm.slane %v4309_v53, %v11700_v17  ;;  %v5932_v38 = vrot.slane %v13908_v42, 4  ;;  %v5970_v0 = vrot.slane %v13920_v5, 4  ;;  %v4283_v14 = vsel %vm1398_vm6, %v4282_v57, %v4269_v19 }
 0x497   : > { %v4290_v56 = vrot.slane %v4281_v52, 4  ;;  %v4314_v16 = vrot.slane %v18036_v31, 4  ;;  %v18038_v58 = vrot.slane %v18037_v50, 4  ;;  %v18040_v63 = vrot.slane %v18039_v8, 4 }
 0x498   : > { %v4320_v41 = vrot.slane %v4313_v25, 4  ;;  %v4287_v29 = vperm.slane %v4283_v14, %v11923_v36  ;;  %v18042_v47 = vperm.slane %v18041_v44, %v11700_v17  ;;  %v5933_v5 = vsel %vm1398_vm6, %v5932_v38, %v13899_v6  ;;  %v18043_v44 = vld [vmem:[#allocation162_spill] sm:$0xff] }
 0x499   : > { %v5207_v43 = vsel %vm1398_vm6, 0.0, %v18038_v58  ;;  %v5259_v53 = vsel %vm1398_vm6, 0.0, %v18040_v63  ;;  %v5971_v19 = vsel %vm1398_vm6, %v5970_v0, %v13912_v60  ;;  %v5988_v25 = vpack.c.bf16 %v5933_v5, %v5933_v5 }
 0x49a   : > { %v4315_v42 = vsel %vm1398_vm6, %v4314_v16, %v18042_v47  ;;  %v4321_v58 = vsel %vm1398_vm6, %v4320_v41, %v4307_v1  ;;  %v5989_v31 = vpack.c.bf16 %v5971_v19, %v5971_v19  ;;  %v4291_v63 = vsel %vm1398_vm6, %v4287_v29, %v4290_v56  ;;  %v18045_v1 = vld [vmem:[#allocation158_spill] sm:$0xff] }
 0x49b   : > { %v4319_v57 = vperm.slane %v4315_v42, %v11923_v36  ;;  %v4325_v14 = vperm.slane %v4321_v58, %v11923_v36  ;;  %v4288_v49 = vrot.slane %v4287_v29, 4  ;;  %v5832_v16 = vperm.slane %v18043_v44, %v11700_v17  ;;  %v18044_v42 = vld [vmem:[#allocation155_spill] sm:$0xff] }
 0x49c   : > { %v4434_v2 = vpack.c.bf16 %v4291_v63, %v4291_v63  ;;  %v6791_v6 = vunpack.c.l.b16 %v5988_v25  ;;  %v6792_v38 = vunpack.c.l.b16 %v5989_v31  ;;  %v5833_v41 = vsel %vm1398_vm6, %v18044_v42, %v18037_v50  ;;  %v18047_v42 = vld [vmem:[#allocation160_spill] sm:$0xff] }
 0x49d   : > { %v4328_v47 = vrot.slane %v4319_v57, 4  ;;  %v4289_v60 = vsel %vm1398_vm6, %v4288_v49, %v4281_v52  ;;  %v4326_v0 = vrot.slane %v4325_v14, 4  ;;  %v18046_v5 = vrot.slane %v18045_v1, 4 }
 0x49e   : > { %v6252_v19 = vunpack.c.l.b16 %v4434_v2  ;;  %v6800_v58 = vpack.c.b16 %v6792_v38, %v6791_v6  ;;  %v4418_v44 = vpack.c.bf16 %v4289_v60, %v4289_v60  ;;  %v5837_v31 = vperm.slane %v5833_v41, %v11700_v17  ;;  %v18048_v2 = vld [vmem:[#allocation152_spill] sm:$0xff]  ;;  %v10573_v38 = vpop.permute.xlu1 %10572 }
 0x49f   : > { %v5839_v56 = vsel %vm1398_vm6, %v18046_v5, %v5207_v43  ;;  %v4329_v29 = vsel %vm1398_vm6, %v4325_v14, %v4328_v47  ;;  %v4327_v25 = vsel %vm1398_vm6, %v4326_v0, %v4319_v57  ;;  %v5844_v50 = vrot.slane %v5832_v16, 4  ;;  %v18049_v47 = vld [vmem:[#allocation156_spill] sm:$0xff]  ;;  %v18051_v0 = vld [vmem:[#allocation159_spill] sm:$0xff] }
 0x4a0   : > { %v4435_v51 = vpack.c.bf16 %v4329_v29, %v4329_v29  ;;  %v5843_v49 = vperm.slane %v5839_v56, %v11700_v17  ;;  %6809 = vmatpush.bf16.msra.mxu3 %v6800_v58  ;;  %v4419_v52 = vpack.c.bf16 %v4327_v25, %v4327_v25  ;;  %v6074_v63 = vunpack.c.l.b16 %v4418_v44 }
 0x4a1   : > { %v5870_v1 = vperm.slane %v18047_v42, %v11700_v17  ;;  %v5871_v14 = vsel %vm1398_vm6, %v18048_v2, %v18039_v8  ;;  %v18050_v6 = vrot.slane %v18049_v47, 4  ;;  %v18052_v41 = vperm.slane %v18051_v0, %v11700_v17  ;;  %v18053_v47 = vld [vmem:[#allocation151_spill] sm:$0xff] }
 0x4a2   : > { %v6253_v43 = vunpack.c.l.b16 %v4435_v51  ;;  %v5850_v5 = vrot.slane %v5843_v49, 4  ;;  %v6075_v60 = vunpack.c.l.b16 %v4419_v52  ;;  %v5875_v56 = vperm.slane %v5871_v14, %v11700_v17 }
 0x4a3   : > { %v5877_v57 = vsel %vm1398_vm6, %v18050_v6, %v5259_v53  ;;  %v5845_v16 = vsel %vm1398_vm6, %v5844_v50, %v18052_v41  ;;  %v5882_v44 = vrot.slane %v5870_v1, 4  ;;  %v10575_v52 = vunpack.i.h.bf16 %v10573_v38 }
 0x4a4   : > { %v5881_v51 = vperm.slane %v5877_v57, %v11700_v17  ;;  %v6262_v29 = vpack.c.b16 %v6253_v43, %v6252_v19  ;;  %v5849_v58 = vperm.slane %v5845_v16, %v11923_v36  ;;  %v5851_v8 = vsel %vm1398_vm6, %v5850_v5, %v5837_v31 }
 0x4a5   : > { %v6084_v25 = vpack.c.b16 %v6075_v60, %v6074_v63  ;;  %v5855_v53 = vperm.slane %v5851_v8, %v11923_v36  ;;  %v18054_v50 = vperm.slane %v18053_v47, %v11700_v17  ;;  %v10574_v6 = vunpack.i.l.bf16 %v10573_v38 }
 0x4a6   : > { %v5888_v49 = vrot.slane %v5881_v51, 4  ;;  %v6307_v42 = vsel %vm6086_vm7, %v6262_v29, 0  ;;  %v5858_v2 = vrot.slane %v5849_v58, 4  ;;  %v5106_v57 = vrot.slane %v10575_v52, 4 }
 0x4a7   : > { %v5883_v14 = vsel %vm1398_vm6, %v5882_v44, %v18054_v50  ;;  %6313 = vmatpush.bf16.xpose.msra.mxu2 %v6307_v42  ;;  %v6130_v19 = vsel %vm6086_vm7, %v6084_v25, 0  ;;  %v5856_v1 = vrot.slane %v5855_v53, 4  ;;  %v5111_v60 = vperm.slane %v10575_v52, %v11700_v17 }
 0x4a8   : > { %v5887_v31 = vperm.slane %v5883_v14, %v11923_v36  ;;  %v5889_v63 = vsel %vm1398_vm6, %v5888_v49, %v5875_v56  ;;  %6136 = vmatpush.bf16.xpose.msra.mxu1 %v6130_v19  ;;  %v5859_v43 = vsel %vm1398_vm6, %v5855_v53, %v5858_v2  ;;  %v18055_v0 = vperm.slane %v13992_v48, %v11923_v36  ;;  %v18056_v49 = vld [vmem:[#allocation161_spill] sm:$0xff] }
 0x4a9   : > { %v5893_v5 = vperm.slane %v5889_v63, %v11923_v36  ;;  %v6002_v16 = vpack.c.bf16 %v5859_v43, %v5859_v43  ;;  %v5857_v51 = vsel %vm1398_vm6, %v5856_v1, %v5849_v58  ;;  %v5107_v8 = vsel %vm1398_vm6, 0.0, %v5106_v57  ;;  %v18058_v63 = vld [vmem:[#allocation163_spill] sm:$0xff] }
 0x4aa   : > { %v14117_v38 = vrot.slane %v18055_v0, 4  ;;  %v5896_v41 = vrot.slane %v5887_v31, 4  ;;  %v5986_v56 = vpack.c.bf16 %v5857_v51, %v5857_v51  ;;  %v5054_v44 = vrot.slane %v10574_v6, 4 }
 0x4ab   : > { %v5894_v29 = vrot.slane %v5893_v5, 4  ;;  %v5115_v53 = vperm.slane %v5107_v8, %v11700_v17  ;;  %v18057_v52 = vrot.slane %v18056_v49, 4  ;;  %v5128_v48 = vrot.slane %v5111_v60, 4 }
 0x4ac   : > { %v5897_v25 = vsel %vm1398_vm6, %v5893_v5, %v5896_v41  ;;  %v6934_v47 = vunpack.c.l.b16 %v6002_v16  ;;  %v6789_v14 = vunpack.c.l.b16 %v5986_v56  ;;  %v18059_v1 = vrot.slane %v18058_v63, 4 }
 0x4ad   : > { %v5127_v42 = vsel %vm1398_vm6, %v18057_v52, %v5111_v60  ;;  %v6003_v2 = vpack.c.bf16 %v5897_v25, %v5897_v25  ;;  %v5895_v50 = vsel %vm1398_vm6, %v5894_v29, %v5887_v31  ;;  %v5129_v19 = vsel %vm1398_vm6, %v18056_v49, %v5128_v48 }
 0x4ae   : > { %v5987_v58 = vpack.c.bf16 %v5895_v50, %v5895_v50  ;;  %v5139_v43 = vsel %vm1398_vm6, %v18059_v1, %v5115_v53  ;;  %v5140_v5 = vrot.slane %v5115_v53, 4  ;;  %v3879_v57 = vrot.slane %v14044_v61, 4 }
 0x4af   : > { %v6935_v0 = vunpack.c.l.b16 %v6003_v2  ;;  %v5133_v41 = vperm.slane %v5127_v42, %v11923_v36  ;;  %v5137_v60 = vperm.slane %v5129_v19, %v11923_v36  ;;  %v14138_v51 = vperm.slane %v5139_v43, %v11923_v36 }
 0x4b0   : > { %v6790_v16 = vunpack.c.l.b16 %v5987_v58  ;;  %v5141_v31 = vsel %vm1398_vm6, %v18058_v63, %v5140_v5  ;;  %v5059_v29 = vperm.slane %v10574_v6, %v11700_v17  ;;  %v5055_v61 = vsel %vm1398_vm6, 0.0, %v5054_v44  ;;  %v18076_v5 = vld [vmem:[#allocation165_spill] sm:$0xff] }
 0x4b1   : > { %v6944_v56 = vpack.c.b16 %v6935_v0, %v6934_v47  ;;  %v5149_v8 = vperm.slane %v5141_v31, %v11923_v36  ;;  %v5152_v25 = vrot.slane %v5137_v60, 4  ;;  %v3118_v53 = vrot.slane %v14035_v18, 4  ;;  %v18061_v60 = vld [vmem:[#allocation164_spill] sm:$0xff] }
 0x4b2   : > { %v14146_v49 = vsel %vm1398_vm6, 0.0, %v14117_v38  ;;  %v14151_v52 = vsel %vm1398_vm6, %v14007_v11, %v13969_v62  ;;  %v6799_v42 = vpack.c.b16 %v6790_v16, %v6789_v14  ;;  %v5150_v6 = vrot.slane %v5133_v41, 4 }
 0x4b3   : > { %6955 = vmatpush.bf16.msrb.mxu0 %v6944_v56  ;;  %v5153_v48 = vsel %vm1398_vm6, 0.0, %v5152_v25  ;;  %v14154_v2 = vrot.slane %v5149_v8, 4  ;;  %v5076_v47 = vrot.slane %v5059_v29, 4  ;;  %v18060_v44 = vrot.slane %v13979_v9, 4 }
 0x4b4   : > { %6810 = vmatpush.bf16.msra.mxu3 %v6799_v42  ;;  %v5789_v19 = vrot.slane %v5153_v48, 4  ;;  %v5063_v62 = vperm.slane %v5055_v61, %v11700_v17  ;;  %v14169_v63 = vsel %vm1398_vm6, %v3879_v57, %v14038_v13  ;;  %v5154_v1 = vrot.slane %v14138_v51, 4  ;;  %v18065_v42 = vld [vmem:[#allocation167_spill] sm:$0xff] }
 0x4b5   : > { %v14159_v50 = vsel %vm1398_vm6, 0.0, %v18060_v44  ;;  %v14173_v43 = vsel %vm1398_vm6, 0.0, %v3118_v53  ;;  %v5077_v16 = vsel %vm1398_vm6, %v18061_v60, %v5076_v47  ;;  %v5151_v31 = vsel %vm1398_vm6, 0.0, %v5150_v6 }
 0x4b6   : > { %v14183_v56 = vsel %vm1398_vm6, 0.0, %v14154_v2  ;;  %v14186_v13 = vsel %vm1398_vm6, %v5152_v25, %v5133_v41  ;;  %v18063_v57 = vrot.slane %v18061_v60, 4  ;;  %v14194_v53 = vsel %vm1398_vm6, %v5789_v19, %v5151_v31 }
 0x4b7   : > { %18062 = vst [vmem:[#allocation139_spill] sm:$0xff] %v14186_v13  ;;  %v18066_v48 = vrot.slane %v18065_v42, 4  ;;  %v5088_v47 = vrot.slane %v5063_v62, 4  ;;  %v14200_v44 = vsel %vm1398_vm6, 0.0, %v5154_v1  ;;  %v5085_v41 = vperm.slane %v5077_v16, %v11923_v36 }
 0x4b8   : > { %v5075_v8 = vsel %vm1398_vm6, %v18063_v57, %v5059_v29  ;;  %18064 = vst [vmem:[#allocation200_spill] sm:$0xff] %v14194_v53  ;;  %v18067_v25 = vrot.slane %v13653_v7, 4  ;;  %v18068_v60 = vperm.slane %v13678_v39, %v11700_v17  ;;  %v4189_v1 = vsel %vm1398_vm6, %v13627_v10, %v13625_v4  ;;  %v18070_v4 = vld [vmem:[#allocation206_spill] sm:$0xff]  ;;  %v18071_v10 = vld [vmem:[#allocation207_spill] sm:$0xff] }
 0x4b9   : > { %v5087_v6 = vsel %vm1398_vm6, %v18066_v48, %v5063_v62  ;;  %v5081_v62 = vperm.slane %v5075_v8, %v11923_v36  ;;  %v18069_v16 = vperm.slane %v13656_v59, %v11700_v17  ;;  %v5089_v8 = vsel %vm1398_vm6, %v18065_v42, %v5088_v47 }
 0x4ba   : > { %v4195_v29 = vsel %vm1398_vm6, %v18067_v25, %v13673_v23  ;;  %v4200_v19 = vrot.slane %v18068_v60, 4  ;;  %v14220_v23 = vperm.slane %v5087_v6, %v11923_v36  ;;  %v10608_v25 = vpop.permute.xlu1 %10607  ;;  %v4227_v31 = vsel %vm1398_vm6, %v18071_v10, %v18070_v4 }
 0x4bb   : > { %v4199_v39 = vperm.slane %v4195_v29, %v11700_v17  ;;  %v18072_v6 = vrot.slane %v13637_v34, 4  ;;  %v5100_v7 = vrot.slane %v5085_v41, 4  ;;  %v4193_v59 = vperm.slane %v4189_v1, %v11700_v17  ;;  %v18074_v41 = vld [vmem:[#allocation208_spill] sm:$0xff] }
 0x4bc   : > { %v4201_v48 = vsel %vm1398_vm6, %v4200_v19, %v18069_v16  ;;  %v5098_v16 = vrot.slane %v5081_v62, 4  ;;  %v18073_v42 = vperm.slane %v13647_v22, %v11700_v17  ;;  %v4231_v10 = vperm.slane %v4227_v31, %v11700_v17 }
 0x4bd   : > { %v4205_v60 = vperm.slane %v4201_v48, %v11923_v36  ;;  %v4233_v29 = vsel %vm1398_vm6, %v18072_v6, %v13660_v21  ;;  %v4206_v57 = vrot.slane %v4199_v39, 4  ;;  %v10610_v48 = vunpack.i.h.bf16 %v10608_v25 }
 0x4be   : > { %v4237_v19 = vperm.slane %v4233_v29, %v11700_v17  ;;  %v4238_v47 = vrot.slane %v18073_v42, 4  ;;  %v10609_v11 = vunpack.i.l.bf16 %v10608_v25  ;;  %v18075_v1 = vperm.slane %v18074_v41, %v11700_v17 }
 0x4bf   : > { %v4214_v58 = vrot.slane %v4205_v60, 4  ;;  %v4207_v4 = vsel %vm1398_vm6, %v4206_v57, %v4193_v59  ;;  %v4804_v6 = vrot.slane %v10610_v48, 4  ;;  %v4809_v29 = vperm.slane %v10610_v48, %v11700_v17 }
 0x4c0   : > { %v4244_v34 = vrot.slane %v4237_v19, 4  ;;  %v4211_v21 = vperm.slane %v4207_v4, %v11923_v36  ;;  %v4239_v39 = vsel %vm1398_vm6, %v4238_v47, %v18075_v1  ;;  %v5097_v22 = vperm.slane %v5089_v8, %v11923_v36 }
 0x4c1   : > { %v5101_v42 = vsel %vm1398_vm6, 0.0, %v5100_v7  ;;  %v4243_v57 = vperm.slane %v4239_v39, %v11923_v36  ;;  %v4805_v4 = vsel %vm1398_vm6, 0.0, %v4804_v6  ;;  %v4814_v48 = vrot.slane %v4809_v29, 4 }
 0x4c2   : > { %v4245_v31 = vsel %vm1398_vm6, %v4244_v34, %v4231_v10  ;;  %v4215_v25 = vsel %vm1398_vm6, %v4211_v21, %v4214_v58  ;;  %v4212_v19 = vrot.slane %v4211_v21, 4  ;;  %v4813_v1 = vperm.slane %v4805_v4, %v11700_v17 }
 0x4c3   : > { %v4249_v59 = vperm.slane %v4245_v31, %v11923_v36  ;;  %v4252_v41 = vrot.slane %v4243_v57, 4  ;;  %v4432_v47 = vpack.c.bf16 %v4215_v25, %v4215_v25  ;;  %v18077_v61 = vrot.slane %v18076_v5, 4 }
 0x4c4   : > { %v4213_v8 = vsel %vm1398_vm6, %v4212_v19, %v4205_v60  ;;  %v4752_v10 = vrot.slane %v10609_v11, 4  ;;  %v14262_v34 = vrot.slane %v5097_v22, 4  ;;  %v4757_v6 = vperm.slane %v10609_v11, %v11700_v17 }
 0x4c5   : > { %v4250_v14 = vrot.slane %v4249_v59, 4  ;;  %v4817_v39 = vsel %vm1398_vm6, %v4809_v29, %v18077_v61  ;;  %v4253_v58 = vsel %vm1398_vm6, %v4249_v59, %v4252_v41  ;;  %v4416_v21 = vpack.c.bf16 %v4213_v8, %v4213_v8  ;;  %v18078_v8 = vld [vmem:[#allocation170_spill] sm:$0xff] }
 0x4c6   : > { %v4433_v31 = vpack.c.bf16 %v4253_v58, %v4253_v58  ;;  %v6250_v25 = vunpack.c.l.b16 %v4432_v47  ;;  %v4815_v60 = vsel %vm1398_vm6, %v4814_v48, %v18076_v5  ;;  %v4825_v13 = vperm.slane %v4817_v39, %v11923_v36 }
 0x4c7   : > { %v4251_v4 = vsel %vm1398_vm6, %v4250_v14, %v4243_v57  ;;  %v6072_v0 = vunpack.c.l.b16 %v4416_v21  ;;  %v4826_v61 = vrot.slane %v4813_v1, 4  ;;  %v5102_v29 = vrot.slane %v14220_v23, 4  ;;  %v18099_v21 = vld [vmem:[#allocation135_spill] sm:$0xff] }
 0x4c8   : > { %v4417_v19 = vpack.c.bf16 %v4251_v4, %v4251_v4  ;;  %v5751_v22 = vrot.slane %v5101_v42, 4  ;;  %v6251_v53 = vunpack.c.l.b16 %v4433_v31  ;;  %v4753_v59 = vsel %vm1398_vm6, 0.0, %v4752_v10 }
 0x4c9   : > { %v5099_v11 = vsel %vm1398_vm6, 0.0, %v5098_v16  ;;  %v14274_v41 = vsel %vm1398_vm6, %v5100_v7, %v5081_v62  ;;  %v4762_v57 = vrot.slane %v4757_v6, 4  ;;  %v14278_v5 = vsel %vm1398_vm6, 0.0, %v14262_v34 }
 0x4ca   : > { %v6073_v14 = vunpack.c.l.b16 %v4417_v19  ;;  %v6261_v47 = vpack.c.b16 %v6251_v53, %v6250_v25  ;;  %v4821_v48 = vperm.slane %v4815_v60, %v11923_v36  ;;  %v18079_v39 = vrot.slane %v18078_v8, 4  ;;  %v18080_v25 = vld [vmem:[#allocation166_spill] sm:$0xff] }
 0x4cb   : > { %v4827_v16 = vsel %vm1398_vm6, %v4826_v61, %v18078_v8  ;;  %v4840_v10 = vrot.slane %v4825_v13, 4  ;;  %v4761_v62 = vperm.slane %v4753_v59, %v11700_v17  ;;  %v14288_v7 = vsel %vm1398_vm6, 0.0, %v5102_v29 }
 0x4cc   : > { %v4829_v42 = vsel %vm1398_vm6, %v4813_v1, %v18079_v39  ;;  %v6083_v58 = vpack.c.b16 %v6073_v14, %v6072_v0  ;;  %v14293_v53 = vsel %vm1398_vm6, %v5751_v22, %v5099_v11  ;;  %v6304_v31 = vsel %vm6086_vm7, %v6261_v47, 0  ;;  %v18082_v11 = vld [vmem:[#allocation171_spill] sm:$0xff] }
 0x4cd   : > { %6314 = vmatpush.bf16.xpose.msra.mxu2 %v6304_v31  ;;  %v4763_v13 = vsel %vm1398_vm6, %v4762_v57, %v18080_v25  ;;  %v18081_v4 = vrot.slane %v18080_v25, 4  ;;  %v14304_v19 = vperm.slane %v4827_v16, %v11923_v36  ;;  %v4837_v61 = vperm.slane %v4829_v42, %v11923_v36  ;;  %v18104_v1 = vld [vmem:[#allocation127_spill] sm:$0xff] }
 0x4ce   : > { %v6127_v0 = vsel %vm6086_vm7, %v6083_v58, 0  ;;  %v4838_v29 = vrot.slane %v4821_v48, 4  ;;  %v4841_v59 = vsel %vm1398_vm6, 0.0, %v4840_v10  ;;  %v18083_v14 = vrot.slane %v18082_v11, 4 }
 0x4cf   : > { %v4765_v60 = vsel %vm1398_vm6, %v4757_v6, %v18081_v4  ;;  %6137 = vmatpush.bf16.xpose.msra.mxu1 %v6127_v0  ;;  %v18084_v57 = vrot.slane %v13789_v33, 4  ;;  %v18085_v8 = vperm.slane %v13818_v20, %v11700_v17  ;;  %v14322_v58 = vsel %vm1398_vm6, %v4840_v10, %v4821_v48 }
 0x4d0   : > { %v4773_v22 = vperm.slane %v4765_v60, %v11923_v36  ;;  %v4777_v47 = vsel %vm1398_vm6, %v4761_v62, %v18083_v14  ;;  %18086 = vst [vmem:[#allocation201_spill] sm:$0xff] %v14322_v58  ;;  %v4769_v16 = vperm.slane %v4763_v13, %v11923_v36  ;;  %v4113_v31 = vsel %vm1398_vm6, %v13759_v32, %v13757_v35  ;;  %v18088_v14 = vld [vmem:[#allocation209_spill] sm:$0xff]  ;;  %v18094_v13 = vld [vmem:[#allocation210_spill] sm:$0xff] }
 0x4d1   : > { %v4119_v6 = vsel %vm1398_vm6, %v18084_v57, %v13812_v27  ;;  %v4124_v39 = vrot.slane %v18085_v8, 4  ;;  %v4774_v0 = vrot.slane %v4761_v62, 4  ;;  %v18087_v20 = vperm.slane %v13775_v26, %v11700_v17  ;;  %v18090_v57 = vld [vmem:[#allocation211_spill] sm:$0xff] }
 0x4d2   : > { %v4788_v33 = vrot.slane %v4773_v22, 4  ;;  %v4123_v27 = vperm.slane %v4119_v6, %v11700_v17  ;;  %v4839_v4 = vsel %vm1398_vm6, 0.0, %v4838_v29  ;;  %v14334_v60 = vrot.slane %v4837_v61, 4  ;;  %v18089_v61 = vld [vmem:[#allocation213_spill] sm:$0xff] }
 0x4d3   : > { %v4125_v25 = vsel %vm1398_vm6, %v4124_v39, %v18087_v20  ;;  %v5561_v48 = vrot.slane %v4841_v59, 4  ;;  %v4785_v10 = vperm.slane %v4777_v47, %v11923_v36  ;;  %v4117_v32 = vperm.slane %v4113_v31, %v11700_v17 }
 0x4d4   : > { %v4129_v62 = vperm.slane %v4125_v25, %v11923_v36  ;;  %v4786_v22 = vrot.slane %v4769_v16, 4  ;;  %v4130_v26 = vrot.slane %v4123_v27, 4  ;;  %v4151_v29 = vsel %vm1398_vm6, %v18088_v14, %v13663_v46  ;;  %v18092_v25 = vld [vmem:[#allocation212_spill] sm:$0xff] }
 0x4d5   : > { %v18091_v59 = vrot.slane %v18090_v57, 4  ;;  %v4775_v6 = vsel %vm1398_vm6, %v4774_v0, %v18082_v11  ;;  %v4789_v8 = vsel %vm1398_vm6, 0.0, %v4788_v33  ;;  %v14355_v27 = vsel %vm1398_vm6, 0.0, %v14334_v60 }
 0x4d6   : > { %v4138_v39 = vrot.slane %v4129_v62, 4  ;;  %v14357_v20 = vrot.slane %v4785_v10, 4  ;;  %v4131_v46 = vsel %vm1398_vm6, %v4130_v26, %v4117_v32  ;;  %v18093_v14 = vperm.slane %v18092_v25, %v11700_v17 }
 0x4d7   : > { %v4157_v47 = vsel %vm1398_vm6, %v18091_v59, %v18089_v61  ;;  %v14364_v57 = vsel %vm1398_vm6, %v5561_v48, %v4839_v4  ;;  %v4135_v11 = vperm.slane %v4131_v46, %v11923_v36  ;;  %v4155_v0 = vperm.slane %v4151_v29, %v11700_v17 }
 0x4d8   : > { %v4161_v31 = vperm.slane %v4157_v47, %v11700_v17  ;;  %v4162_v61 = vrot.slane %v18093_v14, 4  ;;  %v14369_v47 = vperm.slane %v4775_v6, %v11923_v36  ;;  %v4787_v10 = vsel %vm1398_vm6, 0.0, %v4786_v22  ;;  %v18096_v14 = vld [vmem:[#allocation130_spill] sm:$0xff] }
 0x4d9   : > { %v5523_v35 = vrot.slane %v4789_v8, 4  ;;  %v18095_v32 = vperm.slane %v18094_v13, %v11700_v17  ;;  %v4139_v25 = vsel %vm1398_vm6, %v4135_v11, %v4138_v39  ;;  %v4136_v46 = vrot.slane %v4135_v11, 4 }
 0x4da   : > { %v4168_v59 = vrot.slane %v4161_v31, 4  ;;  %v14381_v29 = vsel %vm1398_vm6, 0.0, %v14357_v20  ;;  %v14384_v6 = vsel %vm1398_vm6, %v4788_v33, %v4769_v16  ;;  %v4430_v8 = vpack.c.bf16 %v4139_v25, %v4139_v25 }
 0x4db   : > { %v4163_v26 = vsel %vm1398_vm6, %v4162_v61, %v18095_v32  ;;  %v4137_v39 = vsel %vm1398_vm6, %v4136_v46, %v4129_v62  ;;  %v18097_v61 = vld [vmem:[#allocation132_spill] sm:$0xff]  ;;  %v18100_v16 = vrot.slane %v18099_v21, 4 }
 0x4dc   : > { %v4167_v4 = vperm.slane %v4163_v26, %v11923_v36  ;;  %v4169_v48 = vsel %vm1398_vm6, %v4168_v59, %v4155_v0  ;;  %v4037_v0 = vsel %vm1398_vm6, %v18097_v61, %v18096_v14  ;;  %v4414_v32 = vpack.c.bf16 %v4137_v39, %v4137_v39  ;;  %v18098_v26 = vld [vmem:[#allocation137_spill] sm:$0xff] }
 0x4dd   : > { %v4173_v22 = vperm.slane %v4169_v48, %v11923_v36  ;;  %v4043_v33 = vsel %vm1398_vm6, %v18100_v16, %v18098_v26  ;;  %v14400_v48 = vsel %vm1398_vm6, %v5523_v35, %v4787_v10  ;;  %v6248_v61 = vunpack.c.l.b16 %v4430_v8  ;;  %v18101_v16 = vld [vmem:[#allocation138_spill] sm:$0xff]  ;;  %v18103_v10 = vld [vmem:[#allocation15_spill] sm:$0xff] }
 0x4de   : > { %v4176_v31 = vrot.slane %v4167_v4, 4  ;;  %v4041_v39 = vperm.slane %v4037_v0, %v11700_v17  ;;  %v6070_v21 = vunpack.c.l.b16 %v4414_v32  ;;  %v4047_v26 = vperm.slane %v4043_v33, %v11700_v17  ;;  %v18110_v33 = vld [vmem:[#allocation134_spill] sm:$0xff] }
 0x4df   : > { %v4174_v59 = vrot.slane %v4173_v22, 4  ;;  %v18102_v25 = vperm.slane %v18101_v16, %v11700_v17  ;;  %v4075_v62 = vsel %vm1398_vm6, %v18104_v1, %v18103_v10 }
 0x4e0   : > { %v4177_v46 = vsel %vm1398_vm6, %v4173_v22, %v4176_v31  ;;  %v18105_v22 = vld [vmem:[#allocation133_spill] sm:$0xff]  ;;  %v18106_v31 = vld [vmem:[#allocation131_spill] sm:$0xff]  ;;  %v4079_v16 = vperm.slane %v4075_v62, %v11700_v17 }
 0x4e1   : > { %v4431_v14 = vpack.c.bf16 %v4177_v46, %v4177_v46  ;;  %v4175_v13 = vsel %vm1398_vm6, %v4174_v59, %v4167_v4  ;;  %v4048_v42 = vrot.slane %v18102_v25, 4  ;;  %v18107_v8 = vrot.slane %v18106_v31, 4  ;;  %v18108_v59 = vld [vmem:[#allocation129_spill] sm:$0xff]  ;;  %v18112_v31 = vld [vmem:[#allocation128_spill] sm:$0xff] }
 0x4e2   : > { %v4415_v11 = vpack.c.bf16 %v4175_v13, %v4175_v13  ;;  %v18109_v13 = vperm.slane %v18108_v59, %v11700_v17  ;;  %v18111_v46 = vperm.slane %v18110_v33, %v11700_v17 }
 0x4e3   : > { %v6249_v35 = vunpack.c.l.b16 %v4431_v14  ;;  %v4081_v4 = vsel %vm1398_vm6, %v18107_v8, %v18105_v22  ;;  %v4054_v14 = vrot.slane %v4047_v26, 4  ;;  %v18113_v22 = vperm.slane %v18112_v31, %v11700_v17 }
 0x4e4   : > { %v4086_v0 = vrot.slane %v18109_v13, 4  ;;  %v6071_v32 = vunpack.c.l.b16 %v4415_v11  ;;  %v4049_v25 = vsel %vm1398_vm6, %v4048_v42, %v18111_v46  ;;  %v4085_v10 = vperm.slane %v4081_v4, %v11700_v17 }
 0x4e5   : > { %v6260_v58 = vpack.c.b16 %v6249_v35, %v6248_v61  ;;  %v4053_v1 = vperm.slane %v4049_v25, %v11923_v36  ;;  %v4055_v11 = vsel %vm1398_vm6, %v4054_v14, %v4041_v39  ;;  %v3961_v42 = vsel %vm1398_vm6, %v13934_v12, %v13847_v30 }
 0x4e6   : > { %v4087_v8 = vsel %vm1398_vm6, %v4086_v0, %v18113_v22  ;;  %v6082_v59 = vpack.c.b16 %v6071_v32, %v6070_v21  ;;  %v4059_v61 = vperm.slane %v4055_v11, %v11923_v36  ;;  %v4092_v35 = vrot.slane %v4085_v10, 4 }
 0x4e7   : > { %v4091_v13 = vperm.slane %v4087_v8, %v11923_v36  ;;  %v6301_v62 = vsel %vm6086_vm7, %v6260_v58, 0  ;;  %v4062_v26 = vrot.slane %v4053_v1, 4  ;;  %v3965_v21 = vperm.slane %v3961_v42, %v11700_v17 }
 0x4e8   : > { %6315 = vmatpush.bf16.xpose.msra.mxu2 %v6301_v62  ;;  %v6124_v4 = vsel %vm6086_vm7, %v6082_v59, 0  ;;  %v18114_v39 = vrot.slane %v13958_v3, 4  ;;  %v4093_v12 = vsel %vm1398_vm6, %v4092_v35, %v4079_v16  ;;  %v4060_v58 = vrot.slane %v4059_v61, 4 }
 0x4e9   : > { %v4100_v33 = vrot.slane %v4091_v13, 4  ;;  %6138 = vmatpush.bf16.xpose.msra.mxu1 %v6124_v4  ;;  %v4063_v30 = vsel %vm1398_vm6, %v4059_v61, %v4062_v26  ;;  %v4097_v46 = vperm.slane %v4093_v12, %v11923_v36  ;;  %v18115_v14 = vperm.slane %v13963_v45, %v11700_v17  ;;  %v18116_v61 = vld [vmem:[#allocation215_spill] sm:$0xff]  ;;  %v18117_v26 = vld [vmem:[#allocation136_spill] sm:$0xff] }
 0x4ea   : > { %v3967_v0 = vsel %vm1398_vm6, %v18114_v39, %v13973_v37  ;;  %v4428_v25 = vpack.c.bf16 %v4063_v30, %v4063_v30  ;;  %v3999_v3 = vsel %vm1398_vm6, %v13859_v54, %v13805_v55  ;;  %v4061_v37 = vsel %vm1398_vm6, %v4060_v58, %v4053_v1  ;;  %v18119_v30 = vld [vmem:[#allocation214_spill] sm:$0xff]  ;;  %v18121_v58 = vld [vmem:[#allocation216_spill] sm:$0xff] }
 0x4eb   : > { %v3971_v32 = vperm.slane %v3967_v0, %v11700_v17  ;;  %v3973_v10 = vsel %vm1398_vm6, %v13986_v28, %v18115_v14  ;;  %v4003_v22 = vperm.slane %v3999_v3, %v11700_v17  ;;  %v4101_v8 = vsel %vm1398_vm6, %v4097_v46, %v4100_v33 }
 0x4ec   : > { %v3977_v16 = vperm.slane %v3973_v10, %v11923_v36  ;;  %v6246_v59 = vunpack.c.l.b16 %v4428_v25  ;;  %v4098_v11 = vrot.slane %v4097_v46, 4  ;;  %v4412_v42 = vpack.c.bf16 %v4061_v37, %v4061_v37 }
 0x4ed   : > { %v3978_v31 = vrot.slane %v3971_v32, 4  ;;  %v4429_v45 = vpack.c.bf16 %v4101_v8, %v4101_v8  ;;  %v18118_v35 = vrot.slane %v18117_v26, 4  ;;  %v18120_v12 = vperm.slane %v18119_v30, %v11700_v17 }
 0x4ee   : > { %v3986_v28 = vrot.slane %v3977_v16, 4  ;;  %v4099_v54 = vsel %vm1398_vm6, %v4098_v11, %v4091_v13  ;;  %v6068_v1 = vunpack.c.l.b16 %v4412_v42  ;;  %v3885_v32 = vsel %vm1398_vm6, %v14117_v38, %v14035_v18 }
 0x4ef   : > { %v3979_v62 = vsel %vm1398_vm6, %v3978_v31, %v3965_v21  ;;  %v4005_v55 = vsel %vm1398_vm6, %v18118_v35, %v18116_v61  ;;  %v6247_v33 = vunpack.c.l.b16 %v4429_v45  ;;  %v4413_v0 = vpack.c.bf16 %v4099_v54, %v4099_v54 }
 0x4f0   : > { %v3983_v4 = vperm.slane %v3979_v62, %v11923_v36  ;;  %v4009_v39 = vperm.slane %v4005_v55, %v11700_v17  ;;  %v4011_v21 = vsel %vm1398_vm6, %v18121_v58, %v18120_v12  ;;  %v3889_v31 = vperm.slane %v3885_v32, %v11700_v17 }
 0x4f1   : > { %v4015_v13 = vperm.slane %v4011_v21, %v11923_v36  ;;  %v6259_v10 = vpack.c.b16 %v6247_v33, %v6246_v59  ;;  %v6069_v3 = vunpack.c.l.b16 %v4413_v0  ;;  %v18122_v45 = vrot.slane %v14146_v49, 4 }
 0x4f2   : > { %v3987_v46 = vsel %vm1398_vm6, %v3983_v4, %v3986_v28  ;;  %v4016_v25 = vrot.slane %v4009_v39, 4  ;;  %v3984_v14 = vrot.slane %v3983_v4, 4  ;;  %v18125_v33 = vperm.slane %v14151_v52, %v11700_v17 }
 0x4f3   : > { %v4426_v37 = vpack.c.bf16 %v3987_v46, %v3987_v46  ;;  %v4024_v11 = vrot.slane %v4015_v13, 4  ;;  %v3891_v18 = vsel %vm1398_vm6, %v18122_v45, %v14173_v43  ;;  %v6298_v38 = vsel %vm6086_vm7, %v6259_v10, 0 }
 0x4f4   : > { %v4017_v8 = vsel %vm1398_vm6, %v4016_v25, %v4003_v22  ;;  %v3985_v42 = vsel %vm1398_vm6, %v3984_v14, %v3977_v16  ;;  %v6081_v62 = vpack.c.b16 %v6069_v3, %v6068_v1  ;;  %6316 = vmatpush.bf16.xpose.msra.mxu2 %v6298_v38  ;;  %v3895_v26 = vperm.slane %v3891_v18, %v11700_v17  ;;  %v18124_v16 = vld [vmem:[#allocation217_spill] sm:$0xff] }
 0x4f5   : > { %v4021_v28 = vperm.slane %v4017_v8, %v11923_v36  ;;  %v6244_v59 = vunpack.c.l.b16 %v4426_v37  ;;  %v4410_v61 = vpack.c.bf16 %v3985_v42, %v3985_v42  ;;  %v18123_v22 = vperm.slane %v14169_v63, %v11700_v17 }
 0x4f6   : > { %v3923_v49 = vsel %vm1398_vm6, %v18124_v16, %v13979_v9  ;;  %v6121_v43 = vsel %vm6086_vm7, %v6081_v62, 0  ;;  %v3902_v0 = vrot.slane %v3895_v26, 4  ;;  %v18126_v12 = vrot.slane %v14015_v40, 4 }
 0x4f7   : > { %v3896_v35 = vrot.slane %v18123_v22, 4  ;;  %v4025_v55 = vsel %vm1398_vm6, %v4021_v28, %v4024_v11  ;;  %v4022_v54 = vrot.slane %v4021_v28, 4  ;;  %v3927_v1 = vperm.slane %v3923_v49, %v11700_v17  ;;  %6139 = vmatpush.bf16.xpose.msra.mxu1 %v6121_v43 }
 0x4f8   : > { %v4427_v4 = vpack.c.bf16 %v4025_v55, %v4025_v55  ;;  %v6066_v39 = vunpack.c.l.b16 %v4410_v61  ;;  %v3929_v58 = vsel %vm1398_vm6, %v18126_v12, %v14159_v50  ;;  %v18127_v21 = vperm.slane %v14018_v24, %v11700_v17 }
 0x4f9   : > { %v3897_v63 = vsel %vm1398_vm6, %v3896_v35, %v18125_v33  ;;  %v4023_v30 = vsel %vm1398_vm6, %v4022_v54, %v4015_v13  ;;  %v3903_v52 = vsel %vm1398_vm6, %v3902_v0, %v3889_v31  ;;  %v3933_v14 = vperm.slane %v3929_v58, %v11700_v17  ;;  %v18133_v33 = vld [vmem:[#allocation200_spill] sm:$0xff] }
 0x4fa   : > { %v3901_v9 = vperm.slane %v3897_v63, %v11923_v36  ;;  %v3934_v32 = vrot.slane %v18127_v21, 4  ;;  %v6245_v46 = vunpack.c.l.b16 %v4427_v4  ;;  %v4411_v25 = vpack.c.bf16 %v4023_v30, %v4023_v30 }
 0x4fb   : > { %v3907_v10 = vperm.slane %v3903_v52, %v11923_v36  ;;  %v18128_v3 = vperm.slane %v14003_v15, %v11700_v17  ;;  %v5757_v50 = vsel %vm1398_vm6, %v14262_v34, %v14220_v23  ;;  %v3940_v11 = vrot.slane %v3933_v14, 4 }
 0x4fc   : > { %v3910_v13 = vrot.slane %v3901_v9, 4  ;;  %v6258_v24 = vpack.c.b16 %v6245_v46, %v6244_v59  ;;  %v6067_v37 = vunpack.c.l.b16 %v4411_v25  ;;  %v5761_v42 = vperm.slane %v5757_v50, %v11700_v17 }
 0x4fd   : > { %v3935_v40 = vsel %vm1398_vm6, %v3934_v32, %v18128_v3  ;;  %v18129_v45 = vrot.slane %v14278_v5, 4  ;;  %v18130_v18 = vperm.slane %v14293_v53, %v11700_v17  ;;  %v3941_v62 = vsel %vm1398_vm6, %v3940_v11, %v3927_v1  ;;  %v18137_v32 = vld [vmem:[#allocation139_spill] sm:$0xff]  ;;  %v18139_v3 = vld [vmem:[#allocation172_spill] sm:$0xff] }
 0x4fe   : > { %v3939_v8 = vperm.slane %v3935_v40, %v11923_v36  ;;  %v3911_v31 = vsel %vm1398_vm6, %v3907_v10, %v3910_v13  ;;  %v6295_v23 = vsel %vm6086_vm7, %v6258_v24, 0  ;;  %v6080_v34 = vpack.c.b16 %v6067_v37, %v6066_v39 }
 0x4ff   : > { %v5763_v15 = vsel %vm1398_vm6, %v18129_v45, %v14288_v7  ;;  %v5768_v38 = vrot.slane %v18130_v18, 4  ;;  %6317 = vmatpush.bf16.xpose.msra.mxu2 %v6295_v23  ;;  %v3945_v59 = vperm.slane %v3941_v62, %v11923_v36  ;;  %v4424_v61 = vpack.c.bf16 %v3911_v31, %v3911_v31 }
 0x500   : > { %v3948_v28 = vrot.slane %v3939_v8, 4  ;;  %v5767_v26 = vperm.slane %v5763_v15, %v11700_v17  ;;  %v18131_v5 = vperm.slane %v14274_v41, %v11700_v17  ;;  %v6118_v53 = vsel %vm6086_vm7, %v6080_v34, 0 }
 0x501   : > { %v5795_v35 = vsel %vm1398_vm6, %v14154_v2, %v14138_v51  ;;  %v18132_v16 = vrot.slane %v14183_v56, 4  ;;  %6140 = vmatpush.bf16.xpose.msra.mxu1 %v6118_v53  ;;  %v6242_v55 = vunpack.c.l.b16 %v4424_v61  ;;  %v18134_v63 = vperm.slane %v18133_v33, %v11700_v17 }
 0x502   : > { %v5769_v7 = vsel %vm1398_vm6, %v5768_v38, %v18131_v5  ;;  %v3949_v43 = vsel %vm1398_vm6, %v3945_v59, %v3948_v28  ;;  %v5774_v41 = vrot.slane %v5767_v26, 4  ;;  %v5799_v54 = vperm.slane %v5795_v35, %v11700_v17  ;;  %v18143_v35 = vld [vmem:[#allocation179_spill] sm:$0xff] }
 0x503   : > { %v5773_v22 = vperm.slane %v5769_v7, %v11923_v36  ;;  %v5801_v49 = vsel %vm1398_vm6, %v18132_v16, %v14200_v44  ;;  %v4425_v1 = vpack.c.bf16 %v3949_v43, %v3949_v43  ;;  %v5806_v51 = vrot.slane %v18134_v63, 4  ;;  %v18135_v44 = vld [vmem:[#allocation178_spill] sm:$0xff]  ;;  %v18142_v7 = vld [vmem:[#allocation176_spill] sm:$0xff] }
 0x504   : > { %v5805_v39 = vperm.slane %v5801_v49, %v11700_v17  ;;  %v5775_v2 = vsel %vm1398_vm6, %v5774_v41, %v5761_v42  ;;  %v3908_v56 = vrot.slane %v3907_v10, 4  ;;  %v3946_v0 = vrot.slane %v3945_v59, 4 }
 0x505   : > { %v5782_v4 = vrot.slane %v5773_v22, 4  ;;  %v18136_v30 = vrot.slane %v18135_v44, 4  ;;  %v6243_v58 = vunpack.c.l.b16 %v4425_v1  ;;  %v5779_v21 = vperm.slane %v5775_v2, %v11923_v36 }
 0x506   : > { %v18138_v46 = vperm.slane %v18137_v32, %v11700_v17  ;;  %v5812_v52 = vrot.slane %v5805_v39, 4  ;;  %v3909_v13 = vsel %vm1398_vm6, %v3908_v56, %v3901_v9  ;;  %v3947_v10 = vsel %vm1398_vm6, %v3946_v0, %v3939_v8  ;;  %v18141_v8 = vld [vmem:[#allocation174_spill] sm:$0xff]  ;;  %v18146_v56 = vld [vmem:[#allocation173_spill] sm:$0xff] }
 0x507   : > { %v4999_v12 = vsel %vm1398_vm6, 0.0, %v18136_v30  ;;  %v18140_v40 = vrot.slane %v18139_v3, 4  ;;  %v6257_v24 = vpack.c.b16 %v6243_v58, %v6242_v55  ;;  %v5783_v37 = vsel %vm1398_vm6, %v5779_v21, %v5782_v4 }
 0x508   : > { %v5807_v25 = vsel %vm1398_vm6, %v5806_v51, %v18138_v46  ;;  %v5813_v11 = vsel %vm1398_vm6, %v5812_v52, %v5799_v54  ;;  %v4408_v31 = vpack.c.bf16 %v3909_v13, %v3909_v13  ;;  %v6000_v15 = vpack.c.bf16 %v5783_v37, %v5783_v37  ;;  %v18145_v51 = vld [vmem:[#allocation175_spill] sm:$0xff]  ;;  %v18149_v52 = vld [vmem:[#allocation177_spill] sm:$0xff]  ;;  %v18151_v37 = vld [vmem:[#allocation142_spill] sm:$0xff] }
 0x509   : > { %v5811_v14 = vperm.slane %v5807_v25, %v11923_v36  ;;  %v5051_v50 = vsel %vm1398_vm6, 0.0, %v18140_v40  ;;  %v5817_v42 = vperm.slane %v5813_v11, %v11923_v36  ;;  %v4409_v18 = vpack.c.bf16 %v3947_v10, %v3947_v10  ;;  %v18152_v11 = vld [vmem:[#allocation145_spill] sm:$0xff] }
 0x50a   : > { %v6292_v38 = vsel %vm6086_vm7, %v6257_v24, 0  ;;  %v6064_v9 = vunpack.c.l.b16 %v4408_v31  ;;  %v5780_v23 = vrot.slane %v5779_v21, 4  ;;  %v5680_v34 = vperm.slane %v18141_v8, %v11700_v17  ;;  %v18155_v8 = vld [vmem:[#allocation147_spill] sm:$0xff] }
 0x50b   : > { %v5820_v45 = vrot.slane %v5811_v14, 4  ;;  %6318 = vmatpush.bf16.xpose.msra.mxu2 %v6292_v38  ;;  %v6932_v28 = vunpack.c.l.b16 %v6000_v15  ;;  %v6065_v59 = vunpack.c.l.b16 %v4409_v18  ;;  %v5818_v61 = vrot.slane %v5817_v42, 4  ;;  %v18153_v15 = vld [vmem:[#allocation168_spill] sm:$0xff] }
 0x50c   : > { %v5781_v5 = vsel %vm1398_vm6, %v5780_v23, %v5773_v22  ;;  %v5681_v53 = vsel %vm1398_vm6, %v18142_v7, %v18135_v44  ;;  %v18144_v16 = vrot.slane %v18143_v35, 4  ;;  %v5692_v33 = vrot.slane %v5680_v34, 4  ;;  %v18156_v34 = vld [vmem:[#allocation149_spill] sm:$0xff] }
 0x50d   : > { %v5821_v62 = vsel %vm1398_vm6, %v5817_v42, %v5820_v45  ;;  %v6079_v43 = vpack.c.b16 %v6065_v59, %v6064_v9  ;;  %v5819_v55 = vsel %vm1398_vm6, %v5818_v61, %v5811_v14  ;;  %v5984_v41 = vpack.c.bf16 %v5781_v5, %v5781_v5  ;;  %v18158_v59 = vld [vmem:[#allocation141_spill] sm:$0xff] }
 0x50e   : > { %v6001_v26 = vpack.c.bf16 %v5821_v62, %v5821_v62  ;;  %v5687_v49 = vsel %vm1398_vm6, %v18144_v16, %v4999_v12  ;;  %v5685_v54 = vperm.slane %v5681_v53, %v11700_v17  ;;  %v5985_v4 = vpack.c.bf16 %v5819_v55, %v5819_v55  ;;  %v18147_v12 = vld [vmem:[#allocation169_spill] sm:$0xff] }
 0x50f   : > { %v5691_v39 = vperm.slane %v5687_v49, %v11700_v17  ;;  %v6115_v22 = vsel %vm6086_vm7, %v6079_v43, 0  ;;  %v6787_v63 = vunpack.c.l.b16 %v5984_v41  ;;  %v5718_v2 = vperm.slane %v18145_v51, %v11700_v17  ;;  %v18161_v41 = vld [vmem:[#allocation140_spill] sm:$0xff] }
 0x510   : > { %v6933_v1 = vunpack.c.l.b16 %v6001_v26  ;;  %v5719_v0 = vsel %vm1398_vm6, %v18146_v56, %v18139_v3  ;;  %6141 = vmatpush.bf16.xpose.msra.mxu1 %v6115_v22  ;;  %v6788_v30 = vunpack.c.l.b16 %v5985_v4  ;;  %v18148_v58 = vperm.slane %v18147_v12, %v11700_v17  ;;  %v18160_v26 = vld [vmem:[#allocation153_spill] sm:$0xff]  ;;  %v18163_v56 = vld [vmem:[#allocation146_spill] sm:$0xff] }
 0x511   : > { %v5698_v32 = vrot.slane %v5691_v39, 4  ;;  %v5723_v25 = vperm.slane %v5719_v0, %v11700_v17  ;;  %v18150_v14 = vrot.slane %v18149_v52, 4  ;;  %v5730_v10 = vrot.slane %v5718_v2, 4  ;;  %v18164_v0 = vld [vmem:[#allocation148_spill] sm:$0xff] }
 0x512   : > { %v6943_v44 = vpack.c.b16 %v6933_v1, %v6932_v28  ;;  %v5693_v21 = vsel %vm1398_vm6, %v5692_v33, %v18148_v58  ;;  %v6798_v3 = vpack.c.b16 %v6788_v30, %v6787_v63  ;;  %v3809_v31 = vsel %vm1398_vm6, %v18152_v11, %v18151_v37  ;;  %v18169_v11 = vld [vmem:[#allocation193_spill] sm:$0xff] }
 0x513   : > { %v5697_v46 = vperm.slane %v5693_v21, %v11923_v36  ;;  %v5725_v13 = vsel %vm1398_vm6, %v18150_v14, %v5051_v50  ;;  %v5699_v40 = vsel %vm1398_vm6, %v5698_v32, %v5685_v54  ;;  %v18154_v18 = vperm.slane %v18153_v15, %v11700_v17  ;;  %v18162_v54 = vld [vmem:[#allocation144_spill] sm:$0xff]  ;;  %v18166_v14 = vld [vmem:[#allocation143_spill] sm:$0xff] }
 0x514   : > { %6956 = vmatpush.bf16.msrb.mxu0 %v6943_v44  ;;  %v5729_v24 = vperm.slane %v5725_v13, %v11700_v17  ;;  %v5703_v42 = vperm.slane %v5699_v40, %v11923_v36  ;;  %v3813_v50 = vperm.slane %v3809_v31, %v11700_v17  ;;  %6811 = vmatpush.bf16.msra.mxu3 %v6798_v3  ;;  %v18157_v62 = vrot.slane %v18156_v34, 4 }
 0x515   : > { %v5706_v45 = vrot.slane %v5697_v46, 4  ;;  %v5731_v38 = vsel %vm1398_vm6, %v5730_v10, %v18154_v18  ;;  %v18159_v61 = vperm.slane %v18158_v59, %v11700_v17  ;;  %v3847_v1 = vsel %vm1398_vm6, %v18162_v54, %v18161_v41  ;;  %v18168_v10 = vld [vmem:[#allocation154_spill] sm:$0xff] }
 0x516   : > { %v5735_v9 = vperm.slane %v5731_v38, %v11923_v36  ;;  %v5736_v23 = vrot.slane %v5729_v24, 4  ;;  %v3815_v28 = vsel %vm1398_vm6, %v18157_v62, %v18155_v8  ;;  %v5704_v53 = vrot.slane %v5703_v42, 4  ;;  %v18171_v38 = vld [vmem:[#allocation198_spill] sm:$0xff] }
 0x517   : > { %v3821_v5 = vsel %vm1398_vm6, %v18160_v26, %v18159_v61  ;;  %v5707_v7 = vsel %vm1398_vm6, %v5703_v42, %v5706_v45  ;;  %v3819_v35 = vperm.slane %v3815_v28, %v11700_v17  ;;  %v3851_v2 = vperm.slane %v3847_v1, %v11700_v17 }
 0x518   : > { %v14624_v16 = vperm.slane %v3821_v5, %v11923_v36  ;;  %v5737_v49 = vsel %vm1398_vm6, %v5736_v23, %v5723_v25  ;;  %v5744_v43 = vrot.slane %v5735_v9, 4  ;;  %v5998_v55 = vpack.c.bf16 %v5707_v7, %v5707_v7  ;;  %v18174_v5 = vld [vmem:[#allocation195_spill] sm:$0xff] }
 0x519   : > { %v5741_v4 = vperm.slane %v5737_v49, %v11923_v36  ;;  %v5705_v39 = vsel %vm1398_vm6, %v5704_v53, %v5697_v46  ;;  %v3826_v33 = vrot.slane %v3819_v35, 4  ;;  %v18165_v44 = vrot.slane %v18164_v0, 4  ;;  %v18175_v49 = vld [vmem:[#allocation197_spill] sm:$0xff] }
 0x51a   : > { %v3834_v22 = vrot.slane %v14624_v16, 4  ;;  %v6930_v63 = vunpack.c.l.b16 %v5998_v55  ;;  %v5982_v51 = vpack.c.bf16 %v5705_v39, %v5705_v39  ;;  %v18167_v13 = vperm.slane %v18166_v14, %v11700_v17  ;;  %v18177_v39 = vld [vmem:[#allocation194_spill] sm:$0xff] }
 0x51b   : > { %v3853_v30 = vsel %vm1398_vm6, %v18165_v44, %v18163_v56  ;;  %v5745_v12 = vsel %vm1398_vm6, %v5741_v4, %v5744_v43  ;;  %v5742_v58 = vrot.slane %v5741_v4, 4  ;;  %v3827_v21 = vsel %vm1398_vm6, %v3826_v33, %v3813_v50  ;;  %v18180_v56 = vld [vmem:[#allocation196_spill] sm:$0xff]  ;;  %v18181_v44 = vld [vmem:[#allocation199_spill] sm:$0xff] }
 0x51c   : > { %v3857_v32 = vperm.slane %v3853_v30, %v11700_v17  ;;  %v5999_v46 = vpack.c.bf16 %v5745_v12, %v5745_v12  ;;  %v6785_v25 = vunpack.c.l.b16 %v5982_v51  ;;  %v3831_v52 = vperm.slane %v3827_v21, %v11923_v36 }
 0x51d   : > { %v3859_v3 = vsel %vm1398_vm6, %v18168_v10, %v18167_v13  ;;  %v5743_v40 = vsel %vm1398_vm6, %v5742_v58, %v5735_v9  ;;  %v18170_v31 = vrot.slane %v18169_v11, 4  ;;  %v18172_v50 = vrot.slane %v18171_v38, 4  ;;  %v18173_v9 = vld [vmem:[#allocation192_spill] sm:$0xff] }
 0x51e   : > { %v3863_v24 = vperm.slane %v3859_v3, %v11923_v36  ;;  %v3864_v37 = vrot.slane %v3857_v32, 4  ;;  %v6931_v45 = vunpack.c.l.b16 %v5999_v46  ;;  %v5983_v15 = vpack.c.bf16 %v5743_v40, %v5743_v40 }
 0x51f   : > { %v4895_v42 = vsel %vm1398_vm6, 0.0, %v18170_v31  ;;  %v3835_v18 = vsel %vm1398_vm6, %v3831_v52, %v3834_v22  ;;  %v4947_v23 = vsel %vm1398_vm6, 0.0, %v18172_v50  ;;  %v5604_v28 = vperm.slane %v18173_v9, %v11700_v17 }
 0x520   : > { %v3865_v8 = vsel %vm1398_vm6, %v3864_v37, %v3851_v2  ;;  %v3872_v34 = vrot.slane %v3863_v24, 4  ;;  %v4422_v62 = vpack.c.bf16 %v3835_v18, %v3835_v18  ;;  %v6942_v59 = vpack.c.b16 %v6931_v45, %v6930_v63  ;;  %v18178_v63 = vld [vmem:[#allocation190_spill] sm:$0xff] }
 0x521   : > { %v6786_v61 = vunpack.c.l.b16 %v5983_v15  ;;  %v3869_v26 = vperm.slane %v3865_v8, %v11923_v36  ;;  %v5605_v7 = vsel %vm1398_vm6, %v18174_v5, %v18169_v11  ;;  %v18176_v43 = vrot.slane %v18175_v49, 4  ;;  %v18184_v15 = vld [vmem:[#allocation191_spill] sm:$0xff] }
 0x522   : > { %v6240_v53 = vunpack.c.l.b16 %v4422_v62  ;;  %v5609_v35 = vperm.slane %v5605_v7, %v11700_v17  ;;  %v5616_v41 = vrot.slane %v5604_v28, 4  ;;  %6957 = vmatpush.bf16.msrb.mxu0 %v6942_v59  ;;  %v5642_v33 = vperm.slane %v18177_v39, %v11700_v17 }
 0x523   : > { %v5611_v55 = vsel %vm1398_vm6, %v18176_v43, %v4895_v42  ;;  %v6797_v54 = vpack.c.b16 %v6786_v61, %v6785_v25  ;;  %v3873_v1 = vsel %vm1398_vm6, %v3869_v26, %v3872_v34  ;;  %v18179_v51 = vperm.slane %v18178_v63, %v11700_v17 }
 0x524   : > { %v5615_v4 = vperm.slane %v5611_v55, %v11700_v17  ;;  %v4423_v22 = vpack.c.bf16 %v3873_v1, %v3873_v1  ;;  %v5643_v0 = vsel %vm1398_vm6, %v18180_v56, %v18171_v38  ;;  %v18182_v30 = vrot.slane %v18181_v44, 4 }
 0x525   : > { %v5617_v2 = vsel %vm1398_vm6, %v5616_v41, %v18179_v51  ;;  %6812 = vmatpush.bf16.msra.mxu3 %v6797_v54  ;;  %v5647_v32 = vperm.slane %v5643_v0, %v11700_v17  ;;  %v5654_v14 = vrot.slane %v5642_v33, 4  ;;  %v3832_v13 = vrot.slane %v3831_v52, 4 }
 0x526   : > { %v5649_v12 = vsel %vm1398_vm6, %v18182_v30, %v4947_v23  ;;  %v5621_v58 = vperm.slane %v5617_v2, %v11923_v36  ;;  %v5622_v21 = vrot.slane %v5615_v4, 4  ;;  %v6241_v25 = vunpack.c.l.b16 %v4423_v22 }
 0x527   : > { %v5653_v46 = vperm.slane %v5649_v12, %v11700_v17  ;;  %v3870_v10 = vrot.slane %v3869_v26, 4  ;;  %v18183_v11 = vrot.slane %v14369_v47, 4  ;;  %v18185_v18 = vperm.slane %v18184_v15, %v11700_v17 }
 0x528   : > { %v5623_v3 = vsel %vm1398_vm6, %v5622_v21, %v5609_v35  ;;  %v5630_v40 = vrot.slane %v5621_v58, 4  ;;  %v6256_v42 = vpack.c.b16 %v6241_v25, %v6240_v53  ;;  %v3833_v52 = vsel %vm1398_vm6, %v3832_v13, %v14624_v16 }
 0x529   : > { %v5660_v37 = vrot.slane %v5653_v46, 4  ;;  %v4791_v31 = vsel %vm1398_vm6, 0.0, %v18183_v11  ;;  %v5627_v45 = vperm.slane %v5623_v3, %v11923_v36  ;;  %v5655_v38 = vsel %vm1398_vm6, %v5654_v14, %v18185_v18  ;;  %v18190_v3 = vld [vmem:[#allocation99_spill] sm:$0xff]  ;;  %v18192_v11 = vld [vmem:[#allocation94_spill] sm:$0xff] }
 0x52a   : > { %v5659_v50 = vperm.slane %v5655_v38, %v11923_v36  ;;  %v3871_v8 = vsel %vm1398_vm6, %v3870_v10, %v3863_v24  ;;  %v4406_v34 = vpack.c.bf16 %v3833_v52, %v3833_v52  ;;  %v6289_v62 = vsel %vm6086_vm7, %v6256_v42, 0  ;;  %v18196_v38 = vld [vmem:[#allocation90_spill] sm:$0xff]  ;;  %v18197_v52 = vld [vmem:[#allocation96_spill] sm:$0xff] }
 0x52b   : > { %v5661_v23 = vsel %vm1398_vm6, %v5660_v37, %v5647_v32  ;;  %v5631_v9 = vsel %vm1398_vm6, %v5627_v45, %v5630_v40  ;;  %v4407_v59 = vpack.c.bf16 %v3871_v8, %v3871_v8  ;;  %6319 = vmatpush.bf16.xpose.msra.mxu2 %v6289_v62  ;;  %v5628_v7 = vrot.slane %v5627_v45, 4  ;;  %v18194_v45 = vld [vmem:[#allocation201_spill] sm:$0xff]  ;;  %v18199_v8 = vld [vmem:[#allocation104_spill] sm:$0xff] }
 0x52c   : > { %v5665_v28 = vperm.slane %v5661_v23, %v11923_v36  ;;  %v5668_v61 = vrot.slane %v5659_v50, 4  ;;  %v5996_v26 = vpack.c.bf16 %v5631_v9, %v5631_v9  ;;  %v6062_v5 = vunpack.c.l.b16 %v4406_v34  ;;  %v18198_v23 = vld [vmem:[#allocation103_spill] sm:$0xff] }
 0x52d   : > { %v6063_v16 = vunpack.c.l.b16 %v4407_v59  ;;  %v18186_v35 = vrot.slane %v14304_v19, 4  ;;  %v5528_v24 = vperm.slane %v14400_v48, %v11700_v17  ;;  %v5629_v41 = vsel %vm1398_vm6, %v5628_v7, %v5621_v58 }
 0x52e   : > { %v5666_v53 = vrot.slane %v5665_v28, 4  ;;  %v5669_v43 = vsel %vm1398_vm6, %v5665_v28, %v5668_v61  ;;  %v6928_v55 = vunpack.c.l.b16 %v5996_v26  ;;  %v5529_v54 = vsel %vm1398_vm6, %v14357_v20, %v14369_v47 }
 0x52f   : > { %v4843_v49 = vsel %vm1398_vm6, 0.0, %v18186_v35  ;;  %v5997_v1 = vpack.c.bf16 %v5669_v43, %v5669_v43  ;;  %v6078_v4 = vpack.c.b16 %v6063_v16, %v6062_v5  ;;  %v5980_v33 = vpack.c.bf16 %v5629_v41, %v5629_v41  ;;  %v18201_v5 = vld [vmem:[#allocation98_spill] sm:$0xff]  ;;  %v18202_v16 = vld [vmem:[#allocation105_spill] sm:$0xff] }
 0x530   : > { %v5667_v39 = vsel %vm1398_vm6, %v5666_v53, %v5659_v50  ;;  %v5533_v63 = vperm.slane %v5529_v54, %v11700_v17  ;;  %v18187_v51 = vrot.slane %v14381_v29, 4  ;;  %v5540_v2 = vrot.slane %v5528_v24, 4  ;;  %v18205_v24 = vld [vmem:[#allocation28_spill] sm:$0xff] }
 0x531   : > { %v5981_v22 = vpack.c.bf16 %v5667_v39, %v5667_v39  ;;  %v6929_v56 = vunpack.c.l.b16 %v5997_v1  ;;  %v6112_v0 = vsel %vm6086_vm7, %v6078_v4, 0  ;;  %v6783_v44 = vunpack.c.l.b16 %v5980_v33 }
 0x532   : > { %v5535_v48 = vsel %vm1398_vm6, %v18187_v51, %v4791_v31  ;;  %6142 = vmatpush.bf16.xpose.msra.mxu1 %v6112_v0  ;;  %v18188_v47 = vperm.slane %v14384_v6, %v11700_v17  ;;  %v5566_v58 = vperm.slane %v14364_v57, %v11700_v17  ;;  %v5567_v29 = vsel %vm1398_vm6, %v14334_v60, %v14304_v19  ;;  %v18206_v51 = vld [vmem:[#allocation101_spill] sm:$0xff]  ;;  %v18209_v0 = vld [vmem:[#allocation92_spill] sm:$0xff] }
 0x533   : > { %v5539_v30 = vperm.slane %v5535_v48, %v11700_v17  ;;  %v6784_v20 = vunpack.c.l.b16 %v5981_v22  ;;  %v6941_v21 = vpack.c.b16 %v6929_v56, %v6928_v55  ;;  %v5571_v25 = vperm.slane %v5567_v29, %v11700_v17  ;;  %v18207_v48 = vld [vmem:[#allocation95_spill] sm:$0xff] }
 0x534   : > { %v5541_v12 = vsel %vm1398_vm6, %v5540_v2, %v18188_v47  ;;  %v18189_v13 = vrot.slane %v14355_v27, 4  ;;  %v5578_v10 = vrot.slane %v5566_v58, 4  ;;  %v18191_v40 = vrot.slane %v18190_v3, 4 }
 0x535   : > { %v5545_v32 = vperm.slane %v5541_v12, %v11923_v36  ;;  %v5546_v46 = vrot.slane %v5539_v30, 4  ;;  %v6796_v14 = vpack.c.b16 %v6784_v20, %v6783_v44  ;;  %6958 = vmatpush.bf16.msrb.mxu0 %v6941_v21  ;;  %v18193_v31 = vrot.slane %v18192_v11, 4  ;;  %v18210_v30 = vld [vmem:[#allocation97_spill] sm:$0xff] }
 0x536   : > { %v5573_v6 = vsel %vm1398_vm6, %v18189_v13, %v4843_v49  ;;  %v1447_v57 = vsel %vm1398_vm6, 0.0, %v18191_v40  ;;  %v18195_v15 = vperm.slane %v18194_v45, %v11700_v17  ;;  %v2230_v50 = vsel %vm1398_vm6, %v18197_v52, %v18196_v38  ;;  %v18204_v49 = vld [vmem:[#allocation16_spill] sm:$0xff]  ;;  %v18212_v45 = vld [vmem:[#allocation181_spill] sm:$0xff] }
 0x537   : > { %v5547_v37 = vsel %vm1398_vm6, %v5546_v46, %v5533_v63  ;;  %v5554_v19 = vrot.slane %v5545_v32, 4  ;;  %v5577_v60 = vperm.slane %v5573_v6, %v11700_v17  ;;  %v1499_v42 = vsel %vm1398_vm6, 0.0, %v18193_v31  ;;  %6813 = vmatpush.bf16.msra.mxu3 %v6796_v14 }
 0x538   : > { %v5551_v27 = vperm.slane %v5547_v37, %v11923_v36  ;;  %v5579_v18 = vsel %vm1398_vm6, %v5578_v10, %v18195_v15  ;;  %v18200_v34 = vrot.slane %v18199_v8, 4  ;;  %v2234_v59 = vperm.slane %v2230_v50, %v11700_v17 }
 0x539   : > { %v5583_v9 = vperm.slane %v5579_v18, %v11923_v36  ;;  %v5584_v28 = vrot.slane %v5577_v60, 4  ;;  %v2241_v7 = vsel %vm1398_vm6, %v18201_v5, %v18190_v3  ;;  %v18203_v53 = vrot.slane %v18202_v16, 4 }
 0x53a   : > { %v2236_v62 = vsel %vm1398_vm6, %v18200_v34, %v18198_v23  ;;  %v5555_v26 = vsel %vm1398_vm6, %v5551_v27, %v5554_v19  ;;  %v2268_v43 = vsel %vm1398_vm6, %v18205_v24, %v18204_v49  ;;  %v2245_v1 = vperm.slane %v2241_v7, %v11700_v17 }
 0x53b   : > { %v2240_v61 = vperm.slane %v2236_v62, %v11700_v17  ;;  %v2247_v35 = vsel %vm1398_vm6, %v18203_v53, %v1447_v57  ;;  %v5585_v55 = vsel %vm1398_vm6, %v5584_v28, %v5571_v25  ;;  %v5592_v41 = vrot.slane %v5583_v9, 4 }
 0x53c   : > { %v5994_v54 = vpack.c.bf16 %v5555_v26, %v5555_v26  ;;  %v5589_v4 = vperm.slane %v5585_v55, %v11923_v36  ;;  %v2251_v39 = vperm.slane %v2247_v35, %v11700_v17  ;;  %v2272_v22 = vperm.slane %v2268_v43, %v11700_v17  ;;  %v18216_v26 = vld [vmem:[#allocation188_spill] sm:$0xff]  ;;  %v18217_v43 = vld [vmem:[#allocation182_spill] sm:$0xff] }
 0x53d   : > { %v2252_v33 = vrot.slane %v2240_v61, 4  ;;  %v18208_v2 = vrot.slane %v18207_v48, 4  ;;  %v2279_v44 = vsel %vm1398_vm6, %v18209_v0, %v18192_v11  ;;  %v18211_v20 = vrot.slane %v18210_v30, 4 }
 0x53e   : > { %v6926_v63 = vunpack.c.l.b16 %v5994_v54  ;;  %v5593_v12 = vsel %vm1398_vm6, %v5589_v4, %v5592_v41  ;;  %v2258_v29 = vrot.slane %v2251_v39, 4  ;;  %v2283_v14 = vperm.slane %v2279_v44, %v11700_v17  ;;  %v18218_v41 = vld [vmem:[#allocation185_spill] sm:$0xff] }
 0x53f   : > { %v2274_v56 = vsel %vm1398_vm6, %v18208_v2, %v18206_v51  ;;  %v2285_v47 = vsel %vm1398_vm6, %v18211_v20, %v1499_v42  ;;  %v2253_v58 = vsel %vm1398_vm6, %v2252_v33, %v2234_v59  ;;  %v5995_v46 = vpack.c.bf16 %v5593_v12, %v5593_v12  ;;  %v18220_v44 = vld [vmem:[#allocation189_spill] sm:$0xff]  ;;  %v18221_v20 = vld [vmem:[#allocation183_spill] sm:$0xff] }
 0x540   : > { %v2278_v21 = vperm.slane %v2274_v56, %v11700_v17  ;;  %v2257_v25 = vperm.slane %v2253_v58, %v11923_v36  ;;  %v2289_v13 = vperm.slane %v2285_v47, %v11700_v17  ;;  %v2259_v6 = vsel %vm1398_vm6, %v2258_v29, %v2245_v1  ;;  %v18222_v58 = vld [vmem:[#allocation184_spill] sm:$0xff] }
 0x541   : > { %v5552_v3 = vrot.slane %v5551_v27, 4  ;;  %v5590_v40 = vrot.slane %v5589_v4, 4  ;;  %v6927_v57 = vunpack.c.l.b16 %v5995_v46  ;;  %v2263_v37 = vperm.slane %v2259_v6, %v11923_v36  ;;  %v18224_v6 = vld [vmem:[#allocation186_spill] sm:$0xff] }
 0x542   : > { %v2290_v10 = vrot.slane %v2278_v21, 4  ;;  %v2266_v19 = vrot.slane %v2257_v25, 4  ;;  %v2296_v60 = vrot.slane %v2289_v13, 4  ;;  %v18213_v15 = vrot.slane %v18212_v45, 4 }
 0x543   : > { %v5553_v31 = vsel %vm1398_vm6, %v5552_v3, %v5545_v32  ;;  %v5591_v42 = vsel %vm1398_vm6, %v5590_v40, %v5583_v9  ;;  %v6940_v38 = vpack.c.b16 %v6927_v57, %v6926_v63  ;;  %v2264_v28 = vrot.slane %v2263_v37, 4  ;;  %v18214_v9 = vld [vmem:[#allocation180_spill] sm:$0xff] }
 0x544   : > { %v2291_v11 = vsel %vm1398_vm6, %v2290_v10, %v2272_v22  ;;  %v4687_v18 = vsel %vm1398_vm6, 0.0, %v18213_v15  ;;  %v2267_v52 = vsel %vm1398_vm6, %v2263_v37, %v2266_v19  ;;  %v2297_v50 = vsel %vm1398_vm6, %v2296_v60, %v2283_v14  ;;  %v18226_v60 = vld [vmem:[#allocation26_spill] sm:$0xff]  ;;  %v18228_v15 = vld [vmem:[#allocation187_spill] sm:$0xff] }
 0x545   : > { %v2295_v27 = vperm.slane %v2291_v11, %v11923_v36  ;;  %v2301_v23 = vperm.slane %v2297_v50, %v11923_v36  ;;  %v2854_v8 = vpack.c.bf16 %v2267_v52, %v2267_v52  ;;  %v5978_v34 = vpack.c.bf16 %v5553_v31, %v5553_v31  ;;  %6959 = vmatpush.bf16.msrb.mxu0 %v6940_v38  ;;  %v18230_v52 = vld [vmem:[#allocation86_spill] sm:$0xff] }
 0x546   : > { %v5979_v62 = vpack.c.bf16 %v5591_v42, %v5591_v42  ;;  %v18215_v59 = vrot.slane %v18214_v9, 4  ;;  %v5452_v5 = vperm.slane %v18216_v26, %v11700_v17  ;;  %v2265_v24 = vsel %vm1398_vm6, %v2264_v28, %v2257_v25  ;;  %v18234_v28 = vld [vmem:[#allocation91_spill] sm:$0xff] }
 0x547   : > { %v2304_v32 = vrot.slane %v2295_v27, 4  ;;  %v6200_v7 = vunpack.c.l.b16 %v2854_v8  ;;  %v6781_v16 = vunpack.c.l.b16 %v5978_v34  ;;  %v2302_v35 = vrot.slane %v2301_v23, 4  ;;  %v18232_v34 = vld [vmem:[#allocation88_spill] sm:$0xff] }
 0x548   : > { %v4739_v61 = vsel %vm1398_vm6, 0.0, %v18215_v59  ;;  %v6782_v53 = vunpack.c.l.b16 %v5979_v62  ;;  %v5453_v55 = vsel %vm1398_vm6, %v18217_v43, %v18212_v45  ;;  %v18219_v54 = vrot.slane %v18218_v41, 4  ;;  %v18233_v62 = vld [vmem:[#allocation29_spill] sm:$0xff] }
 0x549   : > { %v2305_v49 = vsel %vm1398_vm6, %v2301_v23, %v2304_v32  ;;  %v2303_v33 = vsel %vm1398_vm6, %v2302_v35, %v2295_v27  ;;  %v2838_v22 = vpack.c.bf16 %v2265_v24, %v2265_v24  ;;  %v5457_v51 = vperm.slane %v5453_v55, %v11700_v17  ;;  %v18237_v24 = vld [vmem:[#allocation25_spill] sm:$0xff] }
 0x54a   : > { %v5459_v1 = vsel %vm1398_vm6, %v18219_v54, %v4687_v18  ;;  %v2855_v4 = vpack.c.bf16 %v2305_v49, %v2305_v49  ;;  %v6795_v39 = vpack.c.b16 %v6782_v53, %v6781_v16  ;;  %v2839_v63 = vpack.c.bf16 %v2303_v33, %v2303_v33 }
 0x54b   : > { %v5463_v48 = vperm.slane %v5459_v1, %v11700_v17  ;;  %v5464_v2 = vrot.slane %v5452_v5, 4  ;;  %v6022_v0 = vunpack.c.l.b16 %v2838_v22  ;;  %v5490_v30 = vperm.slane %v18220_v44, %v11700_v17  ;;  %v18238_v1 = vld [vmem:[#allocation93_spill] sm:$0xff] }
 0x54c   : > { %v6201_v56 = vunpack.c.l.b16 %v2855_v4  ;;  %6814 = vmatpush.bf16.msra.mxu3 %v6795_v39  ;;  %v5491_v47 = vsel %vm1398_vm6, %v18221_v20, %v18214_v9  ;;  %v6023_v12 = vunpack.c.l.b16 %v2839_v63  ;;  %v18223_v29 = vperm.slane %v18222_v58, %v11700_v17  ;;  %v18235_v9 = vld [vmem:[#allocation27_spill] sm:$0xff]  ;;  %v18243_v20 = vld [vmem:[#allocation85_spill] sm:$0xff] }
 0x54d   : > { %v5470_v46 = vrot.slane %v5463_v48, 4  ;;  %v5495_v25 = vperm.slane %v5491_v47, %v11700_v17  ;;  %v18225_v10 = vrot.slane %v18224_v6, 4  ;;  %v5502_v40 = vrot.slane %v5490_v30, 4  ;;  %v18242_v30 = vld [vmem:[#allocation89_spill] sm:$0xff] }
 0x54e   : > { %v5465_v21 = vsel %vm1398_vm6, %v5464_v2, %v18223_v29  ;;  %v6216_v14 = vpack.c.b16 %v6201_v56, %v6200_v7  ;;  %v6038_v57 = vpack.c.b16 %v6023_v12, %v6022_v0  ;;  %v18227_v11 = vrot.slane %v18226_v60, 4  ;;  %v18240_v56 = vld [vmem:[#allocation24_spill] sm:$0xff]  ;;  %v18241_v0 = vld [vmem:[#allocation79_spill] sm:$0xff] }
 0x54f   : > { %v5469_v13 = vperm.slane %v5465_v21, %v11923_v36  ;;  %v5497_v3 = vsel %vm1398_vm6, %v18225_v10, %v4739_v61  ;;  %v5471_v37 = vsel %vm1398_vm6, %v5470_v46, %v5457_v51  ;;  %v18229_v18 = vperm.slane %v18228_v15, %v11700_v17 }
 0x550   : > { %v5501_v19 = vperm.slane %v5497_v3, %v11700_v17  ;;  %v1551_v31 = vsel %vm1398_vm6, 0.0, %v18227_v11  ;;  %10266 = vmatmul.msk.bf16.vlgmr.msra.gmra.mxu2 %vm6086_vm7, %v6216_v14  ;;  %v5475_v42 = vperm.slane %v5471_v37, %v11923_v36  ;;  %v18231_v27 = vrot.slane %v18230_v52, 4  ;;  %10258 = vmatmul.msk.bf16.vlgmr.msra.gmra.mxu1 %vm6086_vm7, %v6038_v57  ;;  %v18245_v57 = vld [vmem:[#allocation83_spill] sm:$0xff] }
 0x551   : > { %v5478_v45 = vrot.slane %v5469_v13, 4  ;;  %v5503_v38 = vsel %vm1398_vm6, %v5502_v40, %v18229_v18  ;;  %v2306_v32 = vsel %vm1398_vm6, %v18233_v62, %v18232_v34  ;;  %v18236_v59 = vrot.slane %v18235_v9, 4  ;;  %v18248_v34 = vld [vmem:[#allocation23_spill] sm:$0xff] }
 0x552   : > { %v1603_v50 = vsel %vm1398_vm6, 0.0, %v18231_v27  ;;  %v5507_v23 = vperm.slane %v5503_v38, %v11923_v36  ;;  %v5508_v8 = vrot.slane %v5501_v19, 4  ;;  %v5476_v5 = vrot.slane %v5475_v42, 4 }
 0x553   : > { %v2312_v61 = vsel %vm1398_vm6, %v18236_v59, %v18234_v28  ;;  %v5479_v26 = vsel %vm1398_vm6, %v5475_v42, %v5478_v45  ;;  %v2310_v7 = vperm.slane %v2306_v32, %v11700_v17  ;;  %v2317_v43 = vsel %vm1398_vm6, %v18237_v24, %v18226_v60  ;;  %v18250_v32 = vld [vmem:[#allocation22_spill] sm:$0xff]  ;;  %v18255_v24 = vld [vmem:[#allocation81_spill] sm:$0xff] }
 0x554   : > { %v2316_v16 = vperm.slane %v2312_v61, %v11700_v17  ;;  %v5509_v53 = vsel %vm1398_vm6, %v5508_v8, %v5495_v25  ;;  %v5516_v35 = vrot.slane %v5507_v23, 4  ;;  %v5992_v49 = vpack.c.bf16 %v5479_v26, %v5479_v26 }
 0x555   : > { %v5513_v55 = vperm.slane %v5509_v53, %v11923_v36  ;;  %v5477_v41 = vsel %vm1398_vm6, %v5476_v5, %v5469_v13  ;;  %v2321_v54 = vperm.slane %v2317_v43, %v11700_v17  ;;  %v18239_v4 = vrot.slane %v18238_v1, 4  ;;  %v18253_v53 = vld [vmem:[#allocation75_spill] sm:$0xff] }
 0x556   : > { %v6924_v33 = vunpack.c.l.b16 %v5992_v49  ;;  %v5976_v22 = vpack.c.bf16 %v5477_v41, %v5477_v41  ;;  %v2328_v51 = vrot.slane %v2316_v16, 4  ;;  %v2344_v44 = vsel %vm1398_vm6, %v18241_v0, %v18240_v56  ;;  %v18252_v16 = vld [vmem:[#allocation19_spill] sm:$0xff]  ;;  %v18254_v49 = vld [vmem:[#allocation84_spill] sm:$0xff]  ;;  %v18258_v56 = vld [vmem:[#allocation82_spill] sm:$0xff] }
 0x557   : > { %v2323_v39 = vsel %vm1398_vm6, %v18239_v4, %v1551_v31  ;;  %v5517_v48 = vsel %vm1398_vm6, %v5513_v55, %v5516_v35  ;;  %v5514_v2 = vrot.slane %v5513_v55, 4  ;;  %v18244_v47 = vrot.slane %v18243_v20, 4  ;;  %v18246_v31 = vld [vmem:[#allocation87_spill] sm:$0xff]  ;;  %v18261_v20 = vld [vmem:[#allocation73_spill] sm:$0xff] }
 0x558   : > { %v2327_v63 = vperm.slane %v2323_v39, %v11700_v17  ;;  %v5993_v58 = vpack.c.bf16 %v5517_v48, %v5517_v48  ;;  %v6779_v29 = vunpack.c.l.b16 %v5976_v22  ;;  %v2329_v21 = vsel %vm1398_vm6, %v2328_v51, %v2310_v7 }
 0x559   : > { %v2350_v12 = vsel %vm1398_vm6, %v18244_v47, %v18242_v30  ;;  %v5515_v25 = vsel %vm1398_vm6, %v5514_v2, %v5507_v23  ;;  %v2333_v14 = vperm.slane %v2329_v21, %v11923_v36  ;;  %v2348_v13 = vperm.slane %v2344_v44, %v11700_v17  ;;  %v18260_v30 = vld [vmem:[#allocation72_spill] sm:$0xff] }
 0x55a   : > { %v2334_v46 = vrot.slane %v2327_v63, 4  ;;  %v2354_v6 = vperm.slane %v2350_v12, %v11700_v17  ;;  %v6925_v10 = vunpack.c.l.b16 %v5993_v58  ;;  %v5977_v3 = vpack.c.bf16 %v5515_v25, %v5515_v25  ;;  %v18257_v63 = vld [vmem:[#allocation78_spill] sm:$0xff] }
 0x55b   : > { %v2355_v37 = vsel %vm1398_vm6, %v18245_v57, %v18230_v52  ;;  %v2342_v60 = vrot.slane %v2333_v14, 4  ;;  %v18247_v42 = vrot.slane %v18246_v31, 4  ;;  %v18249_v62 = vrot.slane %v18248_v34, 4 }
 0x55c   : > { %v2335_v40 = vsel %vm1398_vm6, %v2334_v46, %v2321_v54  ;;  %v2359_v11 = vperm.slane %v2355_v37, %v11700_v17  ;;  %v6939_v15 = vpack.c.b16 %v6925_v10, %v6924_v33  ;;  %v6780_v18 = vunpack.c.l.b16 %v5977_v3  ;;  %v18265_v3 = vld [vmem:[#allocation74_spill] sm:$0xff] }
 0x55d   : > { %v2339_v19 = vperm.slane %v2335_v40, %v11923_v36  ;;  %v2361_v45 = vsel %vm1398_vm6, %v18247_v42, %v1603_v50  ;;  %v2366_v27 = vrot.slane %v2354_v6, 4  ;;  %v1655_v52 = vsel %vm1398_vm6, 0.0, %v18249_v62 }
 0x55e   : > { %v2365_v38 = vperm.slane %v2361_v45, %v11700_v17  ;;  %v18251_v28 = vrot.slane %v18250_v32, 4  ;;  %6960 = vmatpush.bf16.msrb.mxu0 %v6939_v15  ;;  %v6794_v59 = vpack.c.b16 %v6780_v18, %v6779_v29  ;;  %v2382_v35 = vsel %vm1398_vm6, %v18253_v53, %v18252_v16  ;;  %v18266_v18 = vld [vmem:[#allocation77_spill] sm:$0xff]  ;;  %v18272_v16 = vld [vmem:[#allocation63_spill] sm:$0xff] }
 0x55f   : > { %v2343_v23 = vsel %vm1398_vm6, %v2339_v19, %v2342_v60  ;;  %v2340_v8 = vrot.slane %v2339_v19, 4  ;;  %v2367_v50 = vsel %vm1398_vm6, %v2366_v27, %v2348_v13  ;;  %v18256_v43 = vrot.slane %v18255_v24, 4  ;;  %v18263_v13 = vld [vmem:[#allocation76_spill] sm:$0xff] }
 0x560   : > { %v1707_v9 = vsel %vm1398_vm6, 0.0, %v18251_v28  ;;  %v2372_v61 = vrot.slane %v2365_v38, 4  ;;  %v2856_v26 = vpack.c.bf16 %v2343_v23, %v2343_v23  ;;  %v2371_v5 = vperm.slane %v2367_v50, %v11923_v36  ;;  %6815 = vmatpush.bf16.msra.mxu3 %v6794_v59 }
 0x561   : > { %v2341_v7 = vsel %vm1398_vm6, %v2340_v8, %v2333_v14  ;;  %v2388_v55 = vsel %vm1398_vm6, %v18256_v43, %v18254_v49  ;;  %v2386_v4 = vperm.slane %v2382_v35, %v11700_v17  ;;  %v2393_v51 = vsel %vm1398_vm6, %v18257_v63, %v18248_v34  ;;  %v18262_v14 = vld [vmem:[#allocation80_spill] sm:$0xff]  ;;  %v18268_v8 = vld [vmem:[#allocation70_spill] sm:$0xff] }
 0x562   : > { %v2373_v41 = vsel %vm1398_vm6, %v2372_v61, %v2359_v11  ;;  %v6202_v54 = vunpack.c.l.b16 %v2856_v26  ;;  %v2840_v1 = vpack.c.bf16 %v2341_v7, %v2341_v7  ;;  %v2380_v33 = vrot.slane %v2371_v5, 4  ;;  %v18270_v26 = vld [vmem:[#allocation65_spill] sm:$0xff] }
 0x563   : > { %v2377_v39 = vperm.slane %v2373_v41, %v11923_v36  ;;  %v2392_v22 = vperm.slane %v2388_v55, %v11700_v17  ;;  %v2397_v2 = vperm.slane %v2393_v51, %v11700_v17  ;;  %v18259_v0 = vrot.slane %v18258_v56, 4 }
 0x564   : > { %v6024_v48 = vunpack.c.l.b16 %v2840_v1  ;;  %v2420_v47 = vsel %vm1398_vm6, %v18261_v20, %v18260_v30  ;;  %v18264_v6 = vrot.slane %v18263_v13, 4  ;;  %v2431_v40 = vsel %vm1398_vm6, %v18265_v3, %v18250_v32  ;;  %v18274_v1 = vld [vmem:[#allocation21_spill] sm:$0xff] }
 0x565   : > { %v2399_v44 = vsel %vm1398_vm6, %v18259_v0, %v1655_v52  ;;  %v2381_v12 = vsel %vm1398_vm6, %v2377_v39, %v2380_v33  ;;  %v2378_v58 = vrot.slane %v2377_v39, 4  ;;  %v2404_v21 = vrot.slane %v2392_v22, 4  ;;  %v18283_v3 = vld [vmem:[#allocation61_spill] sm:$0xff] }
 0x566   : > { %v2403_v29 = vperm.slane %v2399_v44, %v11700_v17  ;;  %v2857_v46 = vpack.c.bf16 %v2381_v12, %v2381_v12  ;;  %v2424_v25 = vperm.slane %v2420_v47, %v11700_v17  ;;  %v2426_v10 = vsel %vm1398_vm6, %v18264_v6, %v18262_v14  ;;  %v18278_v47 = vld [vmem:[#allocation20_spill] sm:$0xff] }
 0x567   : > { %v2379_v57 = vsel %vm1398_vm6, %v2378_v58, %v2371_v5  ;;  %v2405_v37 = vsel %vm1398_vm6, %v2404_v21, %v2386_v4  ;;  %v2430_v60 = vperm.slane %v2426_v10, %v11700_v17  ;;  %v2435_v45 = vperm.slane %v2431_v40, %v11700_v17  ;;  %v18275_v4 = vld [vmem:[#allocation71_spill] sm:$0xff]  ;;  %v18280_v21 = vld [vmem:[#allocation58_spill] sm:$0xff]  ;;  %v18282_v10 = vld [vmem:[#allocation68_spill] sm:$0xff] }
 0x568   : > { %v2410_v19 = vrot.slane %v2403_v29, 4  ;;  %v6203_v11 = vunpack.c.l.b16 %v2857_v46  ;;  %v2841_v31 = vpack.c.bf16 %v2379_v57, %v2379_v57  ;;  %v2409_v42 = vperm.slane %v2405_v37, %v11923_v36  ;;  %v18281_v46 = vld [vmem:[#allocation59_spill] sm:$0xff] }
 0x569   : > { %v18267_v38 = vrot.slane %v18266_v18, 4  ;;  %v2442_v23 = vrot.slane %v2430_v60, 4  ;;  %v18269_v34 = vrot.slane %v18268_v8, 4  ;;  %v18271_v5 = vrot.slane %v18270_v26, 4 }
 0x56a   : > { %v2411_v15 = vsel %vm1398_vm6, %v2410_v19, %v2397_v2  ;;  %v6217_v52 = vpack.c.b16 %v6203_v11, %v6202_v54  ;;  %v6025_v32 = vunpack.c.l.b16 %v2841_v31  ;;  %v2418_v59 = vrot.slane %v2409_v42, 4 }
 0x56b   : > { %v2437_v27 = vsel %vm1398_vm6, %v18267_v38, %v1707_v9  ;;  %v1759_v62 = vsel %vm1398_vm6, 0.0, %v18269_v34  ;;  %v2415_v28 = vperm.slane %v2411_v15, %v11923_v36  ;;  %v2443_v61 = vsel %vm1398_vm6, %v2442_v23, %v2424_v25  ;;  %v18273_v9 = vld [vmem:[#allocation66_spill] sm:$0xff]  ;;  %v18286_v23 = vld [vmem:[#allocation69_spill] sm:$0xff] }
 0x56c   : > { %v2441_v50 = vperm.slane %v2437_v27, %v11700_v17  ;;  %v1811_v7 = vsel %vm1398_vm6, 0.0, %v18271_v5  ;;  %v2458_v53 = vsel %vm1398_vm6, %v18273_v9, %v18272_v16  ;;  %10267 = vmatmul.msk.bf16.gmra.mxu2 %vm6086_vm7, %v6217_v52  ;;  %v6039_v35 = vpack.c.b16 %v6025_v32, %v6024_v48  ;;  %v18277_v48 = vld [vmem:[#allocation67_spill] sm:$0xff]  ;;  %v18285_v15 = vld [vmem:[#allocation62_spill] sm:$0xff]  ;;  %v18288_v5 = vld [vmem:[#allocation124_spill] sm:$0xff] }
 0x56d   : > { %v2419_v49 = vsel %vm1398_vm6, %v2415_v28, %v2418_v59  ;;  %v2447_v24 = vperm.slane %v2443_v61, %v11923_v36  ;;  %v2416_v43 = vrot.slane %v2415_v28, 4  ;;  %v2462_v54 = vperm.slane %v2458_v53, %v11700_v17 }
 0x56e   : > { %v2448_v55 = vrot.slane %v2441_v50, 4  ;;  %v2858_v41 = vpack.c.bf16 %v2419_v49, %v2419_v49  ;;  %v18276_v39 = vrot.slane %v18275_v4, 4  ;;  %10259 = vmatmul.msk.bf16.gmra.mxu1 %vm6086_vm7, %v6039_v35  ;;  %v2469_v2 = vsel %vm1398_vm6, %v18277_v48, %v18268_v8  ;;  %v18290_v49 = vld [vmem:[#allocation118_spill] sm:$0xff]  ;;  %v18293_v4 = vld [vmem:[#allocation119_spill] sm:$0xff] }
 0x56f   : > { %v2456_v22 = vrot.slane %v2447_v24, 4  ;;  %v2417_v63 = vsel %vm1398_vm6, %v2416_v43, %v2409_v42  ;;  %v2473_v30 = vperm.slane %v2469_v2, %v11700_v17  ;;  %v18279_v12 = vrot.slane %v18278_v47, 4 }
 0x570   : > { %v2464_v33 = vsel %vm1398_vm6, %v18276_v39, %v18274_v1  ;;  %v2449_v56 = vsel %vm1398_vm6, %v2448_v55, %v2435_v45  ;;  %v6204_v0 = vunpack.c.l.b16 %v2858_v41  ;;  %v2842_v44 = vpack.c.bf16 %v2417_v63, %v2417_v63  ;;  %v18292_v1 = vld [vmem:[#allocation117_spill] sm:$0xff] }
 0x571   : > { %v2468_v51 = vperm.slane %v2464_v33, %v11700_v17  ;;  %v2453_v20 = vperm.slane %v2449_v56, %v11923_v36  ;;  %v2475_v58 = vsel %vm1398_vm6, %v18279_v12, %v1759_v62  ;;  %v2496_v25 = vsel %vm1398_vm6, %v18281_v46, %v18280_v21  ;;  %v18294_v56 = vld [vmem:[#allocation126_spill] sm:$0xff] }
 0x572   : > { %v6026_v14 = vunpack.c.l.b16 %v2842_v44  ;;  %v2479_v13 = vperm.slane %v2475_v58, %v11700_v17  ;;  %v2500_v6 = vperm.slane %v2496_v25, %v11700_v17  ;;  %v18284_v40 = vrot.slane %v18283_v3, 4  ;;  %v18298_v25 = vld [vmem:[#allocation18_spill] sm:$0xff] }
 0x573   : > { %v2480_v29 = vrot.slane %v2468_v51, 4  ;;  %v2457_v37 = vsel %vm1398_vm6, %v2453_v20, %v2456_v22  ;;  %v2454_v19 = vrot.slane %v2453_v20, 4  ;;  %v2507_v18 = vsel %vm1398_vm6, %v18285_v15, %v18270_v26  ;;  %v18297_v20 = vld [vmem:[#allocation122_spill] sm:$0xff] }
 0x574   : > { %v2502_v57 = vsel %vm1398_vm6, %v18284_v40, %v18282_v10  ;;  %v2859_v31 = vpack.c.bf16 %v2457_v37, %v2457_v37  ;;  %v2486_v45 = vrot.slane %v2479_v13, 4  ;;  %v2511_v27 = vperm.slane %v2507_v18, %v11700_v17  ;;  %v18301_v10 = vld [vmem:[#allocation112_spill] sm:$0xff]  ;;  %v18302_v40 = vld [vmem:[#allocation121_spill] sm:$0xff] }
 0x575   : > { %v2481_v60 = vsel %vm1398_vm6, %v2480_v29, %v2462_v54  ;;  %v2506_v11 = vperm.slane %v2502_v57, %v11700_v17  ;;  %v2455_v38 = vsel %vm1398_vm6, %v2454_v19, %v2447_v24  ;;  %v18287_v8 = vrot.slane %v18286_v23, 4  ;;  %v18303_v57 = vld [vmem:[#allocation115_spill] sm:$0xff] }
 0x576   : > { %v2485_v42 = vperm.slane %v2481_v60, %v11923_v36  ;;  %v6205_v52 = vunpack.c.l.b16 %v2859_v31  ;;  %v2843_v32 = vpack.c.bf16 %v2455_v38, %v2455_v38  ;;  %v2487_v28 = vsel %vm1398_vm6, %v2486_v45, %v2473_v30 }
 0x577   : > { %v2513_v34 = vsel %vm1398_vm6, %v18287_v8, %v1811_v7  ;;  %v2518_v62 = vrot.slane %v2506_v11, 4  ;;  %v2491_v50 = vperm.slane %v2487_v28, %v11923_v36  ;;  %v18289_v16 = vrot.slane %v18288_v5, 4  ;;  %v18305_v8 = vld [vmem:[#allocation116_spill] sm:$0xff] }
 0x578   : > { %v2494_v59 = vrot.slane %v2485_v42, 4  ;;  %v2517_v61 = vperm.slane %v2513_v34, %v11700_v17  ;;  %v6218_v53 = vpack.c.b16 %v6205_v52, %v6204_v0  ;;  %v6027_v35 = vunpack.c.l.b16 %v2843_v32  ;;  %v18295_v0 = vld [vmem:[#allocation125_spill] sm:$0xff] }
 0x579   : > { %v2519_v26 = vsel %vm1398_vm6, %v2518_v62, %v2500_v6  ;;  %v1863_v9 = vsel %vm1398_vm6, 0.0, %v18289_v16  ;;  %v18291_v24 = vrot.slane %v18290_v49, 4  ;;  %v2492_v54 = vrot.slane %v2491_v50, 4  ;;  %v18300_v6 = vld [vmem:[#allocation110_spill] sm:$0xff]  ;;  %v18306_v62 = vld [vmem:[#allocation123_spill] sm:$0xff] }
 0x57a   : > { %v2523_v7 = vperm.slane %v2519_v26, %v11923_v36  ;;  %v2495_v55 = vsel %vm1398_vm6, %v2491_v50, %v2494_v59  ;;  %v2524_v41 = vrot.slane %v2517_v61, 4  ;;  %v2534_v39 = vsel %vm1398_vm6, %v18293_v4, %v18292_v1  ;;  %v18310_v1 = vld [vmem:[#allocation35_spill] sm:$0xff] }
 0x57b   : > { %v1915_v43 = vsel %vm1398_vm6, 0.0, %v18291_v24  ;;  %v6040_v33 = vpack.c.b16 %v6027_v35, %v6026_v14  ;;  %v2860_v63 = vpack.c.bf16 %v2495_v55, %v2495_v55  ;;  %v2538_v51 = vperm.slane %v2534_v39, %v11700_v17 }
 0x57c   : > { %v2532_v22 = vrot.slane %v2523_v7, 4  ;;  %v2525_v48 = vsel %vm1398_vm6, %v2524_v41, %v2511_v27  ;;  %v2493_v2 = vsel %vm1398_vm6, %v2492_v54, %v2485_v42  ;;  %v18296_v44 = vrot.slane %v18295_v0, 4  ;;  %10268 = vmatmul.msk.bf16.gmra.mxu2 %vm6086_vm7, %v6218_v53 }
 0x57d   : > { %v2545_v47 = vsel %vm1398_vm6, %v18297_v20, %v18288_v5  ;;  %v2529_v12 = vperm.slane %v2525_v48, %v11923_v36  ;;  %v15017_v58 = vunpack.c.l.b16 %v2860_v63  ;;  %v2844_v29 = vpack.c.bf16 %v2493_v2, %v2493_v2  ;;  %v18313_v48 = vld [vmem:[#allocation36_spill] sm:$0xff]  ;;  %v18315_v20 = vld [vmem:[#allocation42_spill] sm:$0xff] }
 0x57e   : > { %v2540_v30 = vsel %vm1398_vm6, %v18296_v44, %v18294_v56  ;;  %v2549_v46 = vperm.slane %v2545_v47, %v11700_v17  ;;  %v18299_v14 = vrot.slane %v18298_v25, 4  ;;  %v2572_v3 = vsel %vm1398_vm6, %v18301_v10, %v18300_v6  ;;  %10260 = vmatmul.msk.bf16.gmra.mxu1 %vm6086_vm7, %v6040_v33  ;;  %v18318_v10 = vld [vmem:[#allocation44_spill] sm:$0xff] }
 0x57f   : > { %v2544_v21 = vperm.slane %v2540_v30, %v11700_v17  ;;  %v18304_v37 = vrot.slane %v18303_v57, 4  ;;  %v2533_v60 = vsel %vm1398_vm6, %v2529_v12, %v2532_v22  ;;  %v2530_v11 = vrot.slane %v2529_v12, 4  ;;  %v18314_v30 = vld [vmem:[#allocation43_spill] sm:$0xff] }
 0x580   : > { %v2551_v13 = vsel %vm1398_vm6, %v18299_v14, %v1863_v9  ;;  %v15033_v31 = vunpack.c.l.b16 %v2844_v29  ;;  %v2861_v45 = vpack.c.bf16 %v2533_v60, %v2533_v60  ;;  %v2576_v18 = vperm.slane %v2572_v3, %v11700_v17 }
 0x581   : > { %v2578_v19 = vsel %vm1398_vm6, %v18304_v37, %v18302_v40  ;;  %v2555_v42 = vperm.slane %v2551_v13, %v11700_v17  ;;  %v2556_v15 = vrot.slane %v2544_v21, 4  ;;  %v2531_v27 = vsel %vm1398_vm6, %v2530_v11, %v2523_v7  ;;  %v18317_v13 = vld [vmem:[#allocation40_spill] sm:$0xff] }
 0x582   : > { %v2582_v38 = vperm.slane %v2578_v19, %v11700_v17  ;;  %v2583_v34 = vsel %vm1398_vm6, %v18305_v8, %v18290_v49  ;;  %v18307_v52 = vrot.slane %v18306_v62, 4  ;;  %v6207_v28 = vunpack.c.l.b16 %v2861_v45  ;;  %v18308_v49 = vld [vmem:[#allocation39_spill] sm:$0xff]  ;;  %v18323_v8 = vld [vmem:[#allocation37_spill] sm:$0xff] }
 0x583   : > { %v2562_v23 = vrot.slane %v2555_v42, 4  ;;  %v2845_v59 = vpack.c.bf16 %v2531_v27, %v2531_v27  ;;  %v2557_v50 = vsel %vm1398_vm6, %v2556_v15, %v2538_v51  ;;  %v2587_v61 = vperm.slane %v2583_v34, %v11700_v17  ;;  %v18312_v51 = vld [vmem:[#allocation32_spill] sm:$0xff] }
 0x584   : > { %v2589_v32 = vsel %vm1398_vm6, %v18307_v52, %v1915_v43  ;;  %v2561_v26 = vperm.slane %v2557_v50, %v11923_v36  ;;  %v2594_v9 = vrot.slane %v2582_v38, 4  ;;  %v6219_v53 = vpack.c.b16 %v6207_v28, %v15017_v58  ;;  %v18321_v38 = vld [vmem:[#allocation31_spill] sm:$0xff]  ;;  %v18325_v52 = vld [vmem:[#allocation33_spill] sm:$0xff] }
 0x585   : > { %v2563_v5 = vsel %vm1398_vm6, %v2562_v23, %v2549_v46  ;;  %v2593_v16 = vperm.slane %v2589_v32, %v11700_v17  ;;  %v6029_v35 = vunpack.c.l.b16 %v2845_v59  ;;  %v18309_v24 = vrot.slane %v18308_v49, 4  ;;  %v18322_v23 = vld [vmem:[#allocation41_spill] sm:$0xff] }
 0x586   : > { %v2567_v7 = vperm.slane %v2563_v5, %v11923_v36  ;;  %v2570_v55 = vrot.slane %v2561_v26, 4  ;;  %v2595_v41 = vsel %vm1398_vm6, %v2594_v9, %v2576_v18  ;;  %v18311_v4 = vrot.slane %v18310_v1, 4  ;;  %v18320_v18 = vld [vmem:[#allocation30_spill] sm:$0xff] }
 0x587   : > { %v1967_v43 = vsel %vm1398_vm6, 0.0, %v18309_v24  ;;  %v2600_v54 = vrot.slane %v2593_v16, 4  ;;  %v6041_v33 = vpack.c.b16 %v6029_v35, %v15033_v31  ;;  %v2599_v22 = vperm.slane %v2595_v41, %v11923_v36 }
 0x588   : > { %v2019_v39 = vsel %vm1398_vm6, 0.0, %v18311_v4  ;;  %v2568_v63 = vrot.slane %v2567_v7, 4  ;;  %v2610_v2 = vsel %vm1398_vm6, %v18313_v48, %v18312_v51  ;;  %v2571_v56 = vsel %vm1398_vm6, %v2567_v7, %v2570_v55  ;;  %v18328_v55 = vld [vmem:[#allocation38_spill] sm:$0xff]  ;;  %v18330_v48 = vld [vmem:[#allocation55_spill] sm:$0xff] }
 0x589   : > { %v2601_v0 = vsel %vm1398_vm6, %v2600_v54, %v2587_v61  ;;  %v2614_v44 = vperm.slane %v2610_v2, %v11700_v17  ;;  %v18316_v47 = vrot.slane %v18315_v20, 4  ;;  %v2608_v29 = vrot.slane %v2599_v22, 4 }
 0x58a   : > { %v2605_v58 = vperm.slane %v2601_v0, %v11923_v36  ;;  %v2862_v21 = vpack.c.bf16 %v2571_v56, %v2571_v56  ;;  %v2569_v46 = vsel %vm1398_vm6, %v2568_v63, %v2561_v26  ;;  %v2621_v6 = vsel %vm1398_vm6, %v18317_v13, %v18308_v49  ;;  %v18326_v26 = vld [vmem:[#allocation53_spill] sm:$0xff]  ;;  %v18332_v0 = vld [vmem:[#allocation50_spill] sm:$0xff] }
 0x58b   : > { %v2616_v12 = vsel %vm1398_vm6, %v18316_v47, %v18314_v30  ;;  %v2846_v25 = vpack.c.bf16 %v2569_v46, %v2569_v46  ;;  %v18319_v3 = vrot.slane %v18318_v10, 4  ;;  %v2625_v60 = vperm.slane %v2621_v6, %v11700_v17 }
 0x58c   : > { %v2620_v14 = vperm.slane %v2616_v12, %v11700_v17  ;;  %v2609_v57 = vsel %vm1398_vm6, %v2605_v58, %v2608_v29  ;;  %v15082_v37 = vunpack.c.l.b16 %v2862_v21  ;;  %v2606_v19 = vrot.slane %v2605_v58, 4  ;;  %10269 = vmatmul.msk.bf16.gmra.mxu2 %vm6086_vm7, %v6219_v53  ;;  %v18334_v29 = vld [vmem:[#allocation49_spill] sm:$0xff] }
 0x58d   : > { %v2627_v40 = vsel %vm1398_vm6, %v18319_v3, %v1967_v43  ;;  %v2863_v11 = vpack.c.bf16 %v2609_v57, %v2609_v57  ;;  %v15085_v31 = vunpack.c.l.b16 %v2846_v25  ;;  %v2648_v27 = vsel %vm1398_vm6, %v18321_v38, %v18320_v18  ;;  %v18336_v25 = vld [vmem:[#allocation64_spill] sm:$0xff]  ;;  %v18339_v57 = vld [vmem:[#allocation57_spill] sm:$0xff] }
 0x58e   : > { %v2631_v42 = vperm.slane %v2627_v40, %v11700_v17  ;;  %v2632_v45 = vrot.slane %v2620_v14, 4  ;;  %v2607_v15 = vsel %vm1398_vm6, %v2606_v19, %v2599_v22  ;;  %v18324_v34 = vrot.slane %v18323_v8, 4  ;;  %10261 = vmatmul.msk.bf16.gmra.mxu1 %vm6086_vm7, %v6041_v33  ;;  %v18337_v14 = vld [vmem:[#allocation56_spill] sm:$0xff] }
 0x58f   : > { %v2659_v32 = vsel %vm1398_vm6, %v18325_v52, %v18310_v1  ;;  %v15099_v28 = vunpack.c.l.b16 %v2863_v11  ;;  %v2847_v59 = vpack.c.bf16 %v2607_v15, %v2607_v15  ;;  %v18327_v5 = vperm.slane %v18326_v26, %v11923_v36  ;;  %v18345_v26 = vld [vmem:[#allocation48_spill] sm:$0xff] }
 0x590   : > { %v2654_v62 = vsel %vm1398_vm6, %v18324_v34, %v18322_v23  ;;  %v2633_v50 = vsel %vm1398_vm6, %v2632_v45, %v2614_v44  ;;  %v2638_v61 = vrot.slane %v2631_v42, 4  ;;  %v2652_v35 = vperm.slane %v2648_v27, %v11700_v17  ;;  %v18333_v44 = vld [vmem:[#allocation52_spill] sm:$0xff]  ;;  %v18342_v27 = vld [vmem:[#allocation45_spill] sm:$0xff]  ;;  %v18343_v23 = vld [vmem:[#allocation46_spill] sm:$0xff] }
 0x591   : > { %v15105_v16 = vrot.slane %v18327_v5, 4  ;;  %v2637_v9 = vperm.slane %v2633_v50, %v11923_v36  ;;  %v2658_v7 = vperm.slane %v2654_v62, %v11700_v17  ;;  %v6220_v49 = vpack.c.b16 %v15099_v28, %v15082_v37  ;;  %v18340_v45 = vld [vmem:[#allocation60_spill] sm:$0xff] }
 0x592   : > { %v15113_v24 = vunpack.c.l.b16 %v2847_v59  ;;  %v2639_v43 = vsel %vm1398_vm6, %v2638_v61, %v2625_v60  ;;  %v18329_v41 = vrot.slane %v18328_v55, 4  ;;  %v2663_v51 = vperm.slane %v2659_v32, %v11700_v17  ;;  %v18344_v61 = vld [vmem:[#allocation54_spill] sm:$0xff] }
 0x593   : > { %v2643_v53 = vperm.slane %v2639_v43, %v11923_v36  ;;  %v2646_v1 = vrot.slane %v2637_v9, 4  ;;  %v2670_v22 = vrot.slane %v2658_v7, 4  ;;  %v18331_v2 = vrot.slane %v18330_v48, 4 }
 0x594   : > { %v2665_v54 = vsel %vm1398_vm6, %v18329_v41, %v2019_v39  ;;  %v6042_v63 = vpack.c.b16 %v15113_v24, %v15085_v31  ;;  %v2686_v39 = vsel %vm1398_vm6, %v18333_v44, %v18332_v0  ;;  %v18335_v21 = vrot.slane %v18334_v29, 4 }
 0x595   : > { %v2669_v4 = vperm.slane %v2665_v54, %v11700_v17  ;;  %v2071_v56 = vsel %vm1398_vm6, 0.0, %v18331_v2  ;;  %v2647_v33 = vsel %vm1398_vm6, %v2643_v53, %v2646_v1  ;;  %v2671_v30 = vsel %vm1398_vm6, %v2670_v22, %v2652_v35  ;;  %v18347_v54 = vld [vmem:[#allocation47_spill] sm:$0xff] }
 0x596   : > { %v2644_v47 = vrot.slane %v2643_v53, 4  ;;  %v2675_v12 = vperm.slane %v2671_v30, %v11923_v36  ;;  %v2864_v58 = vpack.c.bf16 %v2647_v33, %v2647_v33  ;;  %v2123_v46 = vsel %vm1398_vm6, 0.0, %v18335_v21  ;;  %v18348_v1 = vld [vmem:[#allocation51_spill] sm:$0xff] }
 0x597   : > { %v2676_v20 = vrot.slane %v2669_v4, 4  ;;  %v18338_v13 = vrot.slane %v18337_v14, 4  ;;  %v2697_v37 = vsel %vm1398_vm6, %v18339_v57, %v18330_v48  ;;  %v2690_v31 = vperm.slane %v2686_v39, %v11700_v17  ;;  %v18351_v14 = vld [vmem:[#allocation107_spill] sm:$0xff] }
 0x598   : > { %v2645_v3 = vsel %vm1398_vm6, %v2644_v47, %v2637_v9  ;;  %v2684_v60 = vrot.slane %v2675_v12, 4  ;;  %v15149_v42 = vunpack.c.l.b16 %v2864_v58  ;;  %v18341_v15 = vrot.slane %v18340_v45, 4 }
 0x599   : > { %v2692_v6 = vsel %vm1398_vm6, %v18338_v13, %v18336_v25  ;;  %v2677_v10 = vsel %vm1398_vm6, %v2676_v20, %v2663_v51  ;;  %v2848_v11 = vpack.c.bf16 %v2645_v3, %v2645_v3  ;;  %v2724_v8 = vsel %vm1398_vm6, %v18343_v23, %v18342_v27  ;;  %v18350_v20 = vld [vmem:[#allocation120_spill] sm:$0xff]  ;;  %v18357_v27 = vld [vmem:[#allocation114_spill] sm:$0xff] }
 0x59a   : > { %v2696_v40 = vperm.slane %v2692_v6, %v11700_v17  ;;  %v2681_v19 = vperm.slane %v2677_v10, %v11923_v36  ;;  %v2703_v18 = vsel %vm1398_vm6, %v18341_v15, %v2071_v56  ;;  %v2701_v52 = vperm.slane %v2697_v37, %v11700_v17  ;;  %v18355_v15 = vld [vmem:[#allocation108_spill] sm:$0xff] }
 0x59b   : > { %v2707_v32 = vperm.slane %v2703_v18, %v11700_v17  ;;  %v15160_v59 = vunpack.c.l.b16 %v2848_v11  ;;  %v18346_v5 = vrot.slane %v18345_v26, 4  ;;  %v2735_v53 = vsel %vm1398_vm6, %v18347_v54, %v18334_v29  ;;  %v18360_v54 = vld [vmem:[#allocation111_spill] sm:$0xff] }
 0x59c   : > { %v2708_v38 = vrot.slane %v2696_v40, 4  ;;  %v2685_v34 = vsel %vm1398_vm6, %v2681_v19, %v2684_v60  ;;  %v2682_v62 = vrot.slane %v2681_v19, 4  ;;  %v18349_v4 = vrot.slane %v18348_v1, 4  ;;  %10270 = vmatmul.msk.bf16.gmra.mxu2 %vm6086_vm7, %v6220_v49  ;;  %v18353_v19 = vld [vmem:[#allocation113_spill] sm:$0xff] }
 0x59d   : > { %v2865_v28 = vpack.c.bf16 %v2685_v34, %v2685_v34  ;;  %v2730_v9 = vsel %vm1398_vm6, %v18346_v5, %v18344_v61  ;;  %v2714_v24 = vrot.slane %v2707_v32, 4  ;;  %v2728_v2 = vperm.slane %v2724_v8, %v11700_v17  ;;  %v18358_v5 = vld [vmem:[#allocation100_spill] sm:$0xff] }
 0x59e   : > { %v2709_v50 = vsel %vm1398_vm6, %v2708_v38, %v2690_v31  ;;  %v2683_v35 = vsel %vm1398_vm6, %v2682_v62, %v2675_v12  ;;  %v2734_v43 = vperm.slane %v2730_v9, %v11700_v17  ;;  %v2741_v22 = vsel %vm1398_vm6, %v18349_v4, %v2123_v46  ;;  %10262 = vmatmul.msk.bf16.gmra.mxu1 %vm6086_vm7, %v6042_v63  ;;  %v18359_v9 = vld [vmem:[#allocation102_spill] sm:$0xff] }
 0x59f   : > { %v2713_v7 = vperm.slane %v2709_v50, %v11923_v36  ;;  %v15170_v55 = vunpack.c.l.b16 %v2865_v28  ;;  %v2849_v41 = vpack.c.bf16 %v2683_v35, %v2683_v35  ;;  %v2715_v51 = vsel %vm1398_vm6, %v2714_v24, %v2701_v52 }
 0x5a0   : > { %v2745_v56 = vperm.slane %v2741_v22, %v11700_v17  ;;  %v2719_v39 = vperm.slane %v2715_v51, %v11923_v36  ;;  %v2746_v33 = vrot.slane %v2734_v43, 4  ;;  %v2177_v30 = vsel %vm1398_vm6, 0.0, %v15105_v16  ;;  %v18363_v22 = vld [vmem:[#allocation109_spill] sm:$0xff] }
 0x5a1   : > { %v2722_v48 = vrot.slane %v2713_v7, 4  ;;  %v6221_v0 = vpack.c.b16 %v15170_v55, %v15149_v42  ;;  %v15183_v44 = vunpack.c.l.b16 %v2849_v41  ;;  %v2767_v47 = vrot.slane %v18350_v20, 4 }
 0x5a2   : > { %v2739_v12 = vperm.slane %v2735_v53, %v11700_v17  ;;  %v2752_v58 = vrot.slane %v2745_v56, 4  ;;  %v2747_v46 = vsel %vm1398_vm6, %v2746_v33, %v2728_v2  ;;  %v2720_v25 = vrot.slane %v2719_v39, 4  ;;  %v18361_v53 = vld [vmem:[#allocation106_spill] sm:$0xff] }
 0x5a3   : > { %v6043_v29 = vpack.c.b16 %v15183_v44, %v15160_v59  ;;  %v2723_v21 = vsel %vm1398_vm6, %v2719_v39, %v2722_v48  ;;  %v18352_v13 = vrot.slane %v18351_v14, 4  ;;  %v2751_v10 = vperm.slane %v2747_v46, %v11923_v36  ;;  %v18364_v48 = vld [vmem:[#allocation17_spill] sm:$0xff] }
 0x5a4   : > { %v2753_v3 = vsel %vm1398_vm6, %v2752_v58, %v2739_v12  ;;  %v2866_v40 = vpack.c.bf16 %v2723_v21, %v2723_v21  ;;  %v2778_v57 = vrot.slane %v2177_v30, 4  ;;  %v2721_v37 = vsel %vm1398_vm6, %v2720_v25, %v2713_v7 }
 0x5a5   : > { %v2171_v6 = vsel %vm1398_vm6, 0.0, %v18352_v13  ;;  %v2757_v49 = vperm.slane %v2753_v3, %v11923_v36  ;;  %v18354_v60 = vrot.slane %v18353_v19, 4  ;;  %v2760_v31 = vrot.slane %v2751_v10, 4 }
 0x5a6   : > { %v2850_v45 = vpack.c.bf16 %v2721_v37, %v2721_v37  ;;  %v18356_v18 = vrot.slane %v18355_v15, 4  ;;  %v2762_v23 = vsel %vm1398_vm6, %v18357_v27, %v18351_v14  ;;  %v6212_v8 = vunpack.c.l.b16 %v2866_v40 }
 0x5a7   : > { %v2175_v11 = vsel %vm1398_vm6, 0.0, %v18354_v60  ;;  %v2758_v63 = vrot.slane %v2757_v49, 4  ;;  %v2768_v34 = vsel %vm1398_vm6, %v2767_v47, %v2171_v6  ;;  %v2773_v62 = vsel %vm1398_vm6, %v15105_v16, %v18353_v19 }
 0x5a8   : > { %v2227_v38 = vsel %vm1398_vm6, 0.0, %v18356_v18  ;;  %v2761_v52 = vsel %vm1398_vm6, %v2757_v49, %v2760_v31  ;;  %v6034_v32 = vunpack.c.l.b16 %v2850_v45  ;;  %v2766_v28 = vperm.slane %v2762_v23, %v11700_v17 }
 0x5a9   : > { %v2772_v59 = vperm.slane %v2768_v34, %v11700_v17  ;;  %v2867_v50 = vpack.c.bf16 %v2761_v52, %v2761_v52  ;;  %v2759_v61 = vsel %vm1398_vm6, %v2758_v63, %v2751_v10  ;;  %v2779_v26 = vsel %vm1398_vm6, %v2778_v57, %v2175_v11 }
 0x5aa   : > { %v2800_v35 = vsel %vm1398_vm6, %v18359_v9, %v18358_v5  ;;  %v2851_v7 = vpack.c.bf16 %v2759_v61, %v2759_v61  ;;  %v2777_v24 = vperm.slane %v2773_v62, %v11700_v17  ;;  %v2783_v16 = vperm.slane %v2779_v26, %v11700_v17 }
 0x5ab   : > { %v2784_v43 = vrot.slane %v2772_v59, 4  ;;  %v6213_v41 = vunpack.c.l.b16 %v2867_v50  ;;  %v18362_v1 = vrot.slane %v18361_v53, 4  ;;  %v2811_v51 = vsel %vm1398_vm6, %v18363_v22, %v18355_v15 }
 0x5ac   : > { %v18365_v2 = vrot.slane %v18364_v48, 4  ;;  %v6035_v44 = vunpack.c.l.b16 %v2851_v7  ;;  %v2790_v33 = vrot.slane %v2783_v16, 4  ;;  %v2804_v46 = vperm.slane %v2800_v35, %v11700_v17  ;;  %10271 = vmatmul.msk.bf16.gmra.mxu2 %vm6086_vm7, %v6221_v0 }
 0x5ad   : > { %v2806_v4 = vsel %vm1398_vm6, %v18362_v1, %v18360_v54  ;;  %v2785_v39 = vsel %vm1398_vm6, %v2784_v43, %v2766_v28  ;;  %v6222_v20 = vpack.c.b16 %v6213_v41, %v6212_v8  ;;  %v2815_v6 = vperm.slane %v2811_v51, %v11700_v17 }
 0x5ae   : > { %v2817_v56 = vsel %vm1398_vm6, %v18365_v2, %v2227_v38  ;;  %v2810_v30 = vperm.slane %v2806_v4, %v11700_v17  ;;  %v2789_v47 = vperm.slane %v2785_v39, %v11923_v36  ;;  %v6044_v58 = vpack.c.b16 %v6035_v44, %v6034_v32  ;;  %10263 = vmatmul.msk.bf16.gmra.mxu1 %vm6086_vm7, %v6043_v29 }
 0x5af   : > { %v2821_v12 = vperm.slane %v2817_v56, %v11700_v17  ;;  %v2791_v21 = vsel %vm1398_vm6, %v2790_v33, %v2777_v24  ;;  %v762_v29 = vlaneseq  ;;  %v798_v32 = vstv %s797_s14 }
 0x5b0   : > { %v2822_v25 = vrot.slane %v2810_v30, 4  ;;  %v2795_v14 = vperm.slane %v2791_v21, %v11923_v36  ;;  %v2798_v13 = vrot.slane %v2789_v47, 4  ;;  %v11053_v50 = vmov -1e+09  }
 0x5b1   : > { %v2828_v10 = vrot.slane %v2821_v12, 4  ;;  %v15260_v62 = vshrl.u32 %v762_v29, 7  ;;  %v15262_v52 = vand.u32 127, %v762_v29 }
 0x5b2   : > { %v2823_v3 = vsel %vm1398_vm6, %v2822_v25, %v2804_v46  ;;  %v2799_v40 = vsel %vm1398_vm6, %v2795_v14, %v2798_v13  ;;  %v2796_v11 = vrot.slane %v2795_v14, 4 }
 0x5b3   : > { %v2827_v57 = vperm.slane %v2823_v3, %v11923_v36  ;;  %v2829_v49 = vsel %vm1398_vm6, %v2828_v10, %v2815_v6  ;;  %v2868_v19 = vpack.c.bf16 %v2799_v40, %v2799_v40  ;;  %vm781_vm8 = vcmp.le.s32.totalorder %v15262_v52, %v15260_v62 }
 0x5b4   : > { %v2833_v37 = vperm.slane %v2829_v49, %v11923_v36  ;;  %v2797_v15 = vsel %vm1398_vm6, %v2796_v11, %v2789_v47  ;;  %vm15267_vm9 = vcmp.lt.s32.totalorder %v15262_v52, %v798_v32  ;;  %v764_v59 = vadd.s32 8, %v15260_v62 }
 0x5b5   : > { %v2836_v60 = vrot.slane %v2827_v57, 4  ;;  %v6214_v38 = vunpack.c.l.b16 %v2868_v19  ;;  %v2852_v23 = vpack.c.bf16 %v2797_v15, %v2797_v15  ;;  %vm800_vm10 = vmand %vm781_vm8, %vm15267_vm9  ;;  %v765_v54 = vadd.s32 16, %v15260_v62 }
 0x5b6   : > { %v2834_v31 = vrot.slane %v2833_v37, 4  ;;  %v816_v61 = vsel %vm800_vm10, 0.0, %v11053_v50  ;;  %vm782_vm11 = vcmp.le.s32.totalorder %v15262_v52, %v764_v59  ;;  %v766_v4 = vadd.s32 24, %v15260_v62 }
 0x5b7   : > { %v2837_v45 = vsel %vm1398_vm6, %v2833_v37, %v2836_v60  ;;  %v6036_v42 = vunpack.c.l.b16 %v2852_v23  ;;  %vm801_vm12 = vmand %vm782_vm11, %vm15267_vm9  ;;  %vm783_vm13 = vcmp.le.s32.totalorder %v15262_v52, %v765_v54  ;;  %v767_v48 = vadd.s32 32, %v15260_v62  ;;  %v18369_v60 = vld [vmem:[#allocation34_spill] sm:$0xff] }
 0x5b8   : > { %v2869_v18 = vpack.c.bf16 %v2837_v45, %v2837_v45  ;;  %v2835_v27 = vsel %vm1398_vm6, %v2834_v31, %v2827_v57  ;;  %v817_v7 = vsel %vm801_vm12, 0.0, %v11053_v50  ;;  %vm802_vm14 = vmand %vm783_vm13, %vm15267_vm9  ;;  %vm784_vm15 = vcmp.le.s32.totalorder %v15262_v52, %v766_v4 }
 0x5b9   : > { %v2853_v8 = vpack.c.bf16 %v2835_v27, %v2835_v27  ;;  %v818_v53 = vsel %vm802_vm14, 0.0, %v11053_v50  ;;  %vm803_vm0 = vmand %vm784_vm15, %vm15267_vm9  ;;  %vm785_vm2 = vcmp.le.s32.totalorder %v15262_v52, %v767_v48  ;;  %v768_v33 = vadd.s32 40, %v15260_v62 }
 0x5ba   : > { %v6215_v63 = vunpack.c.l.b16 %v2869_v18  ;;  %v819_v44 = vsel %vm803_vm0, 0.0, %v11053_v50  ;;  %vm804_vm3 = vmand %vm785_vm2, %vm15267_vm9  ;;  %v769_v46 = vadd.s32 48, %v15260_v62  ;;  %v770_v10 = vadd.s32 56, %v15260_v62 }
 0x5bb   : > { %v6037_v55 = vunpack.c.l.b16 %v2853_v8  ;;  %v15319_v47 = vsel %vm804_vm3, 0.0, %v11053_v50  ;;  %vm786_vm4 = vcmp.le.s32.totalorder %v15262_v52, %v768_v33  ;;  %v771_v15 = vadd.s32 64, %v15260_v62 }
 0x5bc   : > { %v6223_v0 = vpack.c.b16 %v6215_v63, %v6214_v38  ;;  %10272 = vmatmul.msk.bf16.gmra.mxu2 %vm6086_vm7, %v6222_v20  ;;  %vm805_vm5 = vmand %vm786_vm4, %vm15267_vm9  ;;  %vm787_vm8 = vcmp.le.s32.totalorder %v15262_v52, %v769_v46  ;;  %vm788_vm11 = vcmp.le.s32.totalorder %v15262_v52, %v770_v10  ;;  %v772_v27 = vadd.s32 72, %v15260_v62 }
 0x5bd   : > { %v6045_v34 = vpack.c.b16 %v6037_v55, %v6036_v42  ;;  %v821_v25 = vsel %vm805_vm5, 0.0, %v11053_v50  ;;  %vm806_vm10 = vmand %vm787_vm8, %vm15267_vm9  ;;  %vm789_vm13 = vcmp.le.s32.totalorder %v15262_v52, %v771_v15 }
 0x5be   : > { %10264 = vmatmul.msk.bf16.gmra.mxu1 %vm6086_vm7, %v6044_v58  ;;  %v822_v40 = vsel %vm806_vm10, 0.0, %v11053_v50  ;;  %vm807_vm12 = vmand %vm788_vm11, %vm15267_vm9  ;;  %vm790_vm15 = vcmp.le.s32.totalorder %v15262_v52, %v772_v27 }
 0x5bf   : > { %v823_v19 = vsel %vm807_vm12, 0.0, %v11053_v50  ;;  %vm808_vm14 = vmand %vm789_vm13, %vm15267_vm9 }
 0x5c0   : > { %v824_v8 = vsel %vm808_vm14, 0.0, %v11053_v50  ;;  %vm809_vm0 = vmand %vm790_vm15, %vm15267_vm9 }
 0x5cc   : > { %10273 = vmatmul.msk.bf16.gmra.mxu2 %vm6086_vm7, %v6223_v0  ;;  %v773_v0 = vadd.s32 80, %v15260_v62 }
 0x5cd   : > { %v6144_v26 = vpop.f32.mrf.mxu1 }
 0x5ce   : > { %10265 = vmatmul.msk.bf16.gmra.mxu1 %vm6086_vm7, %v6045_v34  ;;  %v15278_v5 = vadd.f32 %v6144_v26, %v816_v61  ;;  %v825_v34 = vsel %vm809_vm0, 0.0, %v11053_v50  ;;  %vm791_vm2 = vcmp.le.s32.totalorder %v15262_v52, %v773_v0 }
 0x5cf   : > { %vm810_vm3 = vmand %vm791_vm2, %vm15267_vm9 }
 0x5d0   : > { %6393 = vmax.xlane.f32.xlu1 %v15278_v5 }
 0x5d3   : > { %v6321_v9 = vpop.f32.mrf.mxu2 }
 0x5d4   : > { %v15283_v35 = vadd.f32 %v6321_v9, %v816_v61  ;;  %v15385_v61 = vsel %vm810_vm3, 0.0, %v11053_v50 }
 0x5d5   : > { %v6146_v24 = vpop.f32.mrf.mxu1 }
 0x5d6   : > { %6425 = vmax.xlane.f32.xlu2 %v15283_v35  ;;  %v15287_v16 = vadd.f32 %v6146_v24, %v817_v7  ;;  %v775_v24 = vadd.s32 96, %v15260_v62 }
 0x5d8   : > { %6395 = vmax.xlane.f32.xlu0 %v15287_v16  ;;  %vm793_vm4 = vcmp.le.s32.totalorder %v15262_v52, %v775_v24 }
 0x5d9   : > { %vm812_vm5 = vmand %vm793_vm4, %vm15267_vm9 }
 0x5da   : > { %v828_v4 = vsel %vm812_vm5, 0.0, %v11053_v50 }
 0x5db   : > { %v6323_v43 = vpop.f32.mrf.mxu2 }
 0x5dc   : > { %v15290_v41 = vadd.f32 %v6323_v43, %v817_v7 }
 0x5de   : > { %6427 = vmax.xlane.f32.xlu1 %v15290_v41 }
 0x5eb   : > { %v6149_v1 = vpop.f32.mrf.mxu1 }
 0x5ec   : > { %v15299_v22 = vadd.f32 %v6149_v1, %v818_v53  ;;  %v15402_v1 = vpop.permute.xlu1 %10622 }
 0x5ed   : > { %v10625_v0 = vunpack.i.h.bf16 %v15402_v1 }
 0x5ee   : > { %6397 = vmax.xlane.f32.xlu0 %v15299_v22 }
 0x5ef   : > { %v6326_v51 = vpop.f32.mrf.mxu2  ;;  %v4586_v24 = vrot.slane %v10625_v0, 4 }
 0x5f0   : > { %v15304_v2 = vadd.f32 %v6326_v51, %v818_v53  ;;  %v774_v53 = vadd.s32 88, %v15260_v62 }
 0x5f2   : > { %6429 = vmax.xlane.f32.xlu1 %v15304_v2  ;;  %vm792_vm8 = vcmp.le.s32.totalorder %v15262_v52, %v774_v53 }
 0x5f3   : > { %v6151_v56 = vpop.f32.mrf.mxu1  ;;  %vm811_vm10 = vmand %vm792_vm8, %vm15267_vm9 }
 0x5f4   : > { %v15316_v20 = vadd.f32 %v6151_v56, %v819_v44 }
 0x5f7   : > { %v6328_v39 = vpop.f32.mrf.mxu2 }
 0x5f8   : > { %v15314_v30 = vadd.f32 %v6328_v39, %v819_v44  ;;  %v827_v44 = vsel %vm811_vm10, 0.0, %v11053_v50 }
 0x5fa   : > { %6431 = vmax.xlane.f32.xlu2 %v15314_v30  ;;  %6399 = vmax.xlane.f32.xlu1 %v15316_v20 }
 0x5fb   : > { %v6154_v12 = vpop.f32.mrf.mxu1 }
 0x5fc   : > { %v15325_v58 = vadd.f32 %v6154_v12, %v15319_v47 }
 0x5fe   : > { %6401 = vmax.xlane.f32.xlu0 %v15325_v58 }
 0x5ff   : > { %v6331_v21 = vpop.f32.mrf.mxu2 }
 0x600   : > { %v15395_v54 = vadd.f32 %v6331_v21, %v15319_v47 }
 0x603   : > { %v6156_v14 = vpop.f32.mrf.mxu1 }
 0x604   : > { %v15333_v13 = vadd.f32 %v6156_v14, %v821_v25 }
 0x606   : > { %6403 = vmax.xlane.f32.xlu1 %v15333_v13 }
 0x607   : > { %v6333_v6 = vpop.f32.mrf.mxu2 }
 0x608   : > { %v15339_v3 = vadd.f32 %v6333_v6, %v821_v25 }
 0x60a   : > { %6435 = vmax.xlane.f32.xlu0 %v15339_v3 }
 0x60b   : > { %v6159_v57 = vpop.f32.mrf.mxu1 }
 0x60c   : > { %v15344_v49 = vadd.f32 %v6159_v57, %v822_v40 }
 0x60e   : > { %6405 = vmax.xlane.f32.xlu1 %v15344_v49 }
 0x60f   : > { %v6336_v37 = vpop.f32.mrf.mxu2 }
 0x610   : > { %v15352_v31 = vadd.f32 %v6336_v37, %v822_v40 }
 0x612   : > { %10632 = vrot.lane.b32.xlu2 %v18369_v60, %s11052_s29 }
 0x613   : > { %v6161_v11 = vpop.f32.mrf.mxu1 }
 0x614   : > { %v15354_v45 = vadd.f32 %v6161_v11, %v823_v19 }
 0x616   : > { %6437 = vmax.xlane.f32.xlu1 %v15352_v31  ;;  %6407 = vmax.xlane.f32.xlu0 %v15354_v45 }
 0x617   : > { %v6338_v18 = vpop.f32.mrf.mxu2 }
 0x618   : > { %v15361_v23 = vadd.f32 %v6338_v18, %v823_v19 }
 0x61b   : > { %v6164_v38 = vpop.f32.mrf.mxu1 }
 0x61c   : > { %v15408_v56 = vadd.f32 %v6164_v38, %v824_v8 }
 0x61e   : > { %6439 = vmax.xlane.f32.xlu0 %v15361_v23 }
 0x61f   : > { %v6341_v63 = vpop.f32.mrf.mxu2 }
 0x620   : > { %v15368_v42 = vadd.f32 %v6341_v63, %v824_v8 }
 0x622   : > { %6441 = vmax.xlane.f32.xlu1 %v15368_v42 }
 0x623   : > { %v6166_v55 = vpop.f32.mrf.mxu1 }
 0x624   : > { %v15376_v32 = vadd.f32 %v6166_v55, %v825_v34 }
 0x627   : > { %v6343_v29 = vpop.f32.mrf.mxu2 }
 0x628   : > { %v15378_v59 = vadd.f32 %v6343_v29, %v825_v34 }
 0x62a   : > { %6443 = vmax.xlane.f32.xlu0 %v15378_v59  ;;  %6411 = vmax.xlane.f32.xlu1 %v15376_v32 }
 0x62b   : > { %v6169_v26 = vpop.f32.mrf.mxu1 }
 0x62c   : > { %v15390_v7 = vadd.f32 %v6169_v26, %v15385_v61 }
 0x62f   : > { %v15387_v9 = vpop.f32.mrf.mxu2 }
 0x632   : > { %6413 = vmax.xlane.f32.xlu0 %v15390_v7 }
 0x633   : > { %v6171_v39 = vpop.f32.mrf.mxu1 }
 0x634   : > { %v15415_v12 = vadd.f32 %v6171_v39, %v827_v44 }
 0x637   : > { %v6348_v43 = vpop.f32.mrf.mxu2 }
 0x63b   : > { %6433 = vmax.xlane.f32.xlu2 %v15395_v54  ;;  %v6174_v27 = vpop.f32.mrf.mxu1 }
 0x63c   : > { %v15438_v55 = vadd.f32 %v6174_v27, %v828_v4  ;;  %v776_v27 = vadd.s32 104, %v15260_v62 }
 0x63e   : > { %vm794_vm11 = vcmp.le.s32.totalorder %v15262_v52, %v776_v27 }
 0x63f   : > { %v6351_v51 = vpop.f32.mrf.mxu2  ;;  %vm15494_vm12 = vmand %vm794_vm11, %vm15267_vm9 }
 0x640   : > { %v15406_v48 = vadd.f32 %v6351_v51, %v828_v4 }
 0x643   : > { %6409 = vmax.xlane.f32.xlu2 %v15408_v56  ;;  %v6394_v33 = vpop.xlane.xlu1 %6393 }
 0x644   : > { %v6457_v47 = vsub.f32 %v15278_v5, %v6394_v33  ;;  %v4587_v33 = vsel %vm1398_vm6, 0.0, %v4586_v24 }
 0x646   : > { %v6489_v21 = vmul.f32 1.442695, %v6457_v47  ;;  %v4591_v47 = vperm.slane %v10625_v0, %v11700_v17 }
 0x648   : > { %10718 = vpow2.f32 %v6489_v21 }
 0x649   : > { %v6426_v46 = vpop.xlane.xlu2 %6425 }
 0x64a   : > { %v6473_v25 = vsub.f32 %v15283_v35, %v6426_v46  ;;  %v15430_v35 = vadd.f32 %v6348_v43, %v827_v44 }
 0x64b   : > { %6415 = vmax.xlane.f32.xlu2 %v15415_v12  ;;  %v6396_v6 = vpop.xlane.xlu0 %6395 }
 0x64c   : > { %v6521_v14 = vmul.f32 1.442695, %v6473_v25  ;;  %v6458_v10 = vsub.f32 %v15287_v16, %v6396_v6 }
 0x64e   : > { %v15420_v40 = vpop.eup %10718  ;;  %v6491_v57 = vmul.f32 1.442695, %v6458_v10  ;;  %10720 = vpow2.f32 %v6521_v14  ;;  %v4608_v10 = vrot.slane %v4591_v47, 4 }
 0x64f   : > { %6553 = vadd.xlane.f32.xlu1 %v15420_v40 }
 0x650   : > { %10722 = vpow2.f32 %v6491_v57 }
 0x651   : > { %v6428_v5 = vpop.xlane.xlu1 %6427 }
 0x652   : > { %v6474_v37 = vsub.f32 %v15290_v41, %v6428_v5 }
 0x654   : > { %v6523_v19 = vmul.f32 1.442695, %v6474_v37  ;;  %v15424_v60 = vpop.eup %10720 }
 0x656   : > { %v15426_v11 = vpop.eup %10722  ;;  %10724 = vpow2.f32 %v6523_v19 }
 0x657   : > { %6585 = vadd.xlane.f32.xlu1 %v15424_v60  ;;  %6555 = vadd.xlane.f32.xlu0 %v15426_v11 }
 0x65c   : > { %v15432_v15 = vpop.eup %10724 }
 0x65f   : > { %6447 = vmax.xlane.f32.xlu1 %v15430_v35  ;;  %6587 = vadd.xlane.f32.xlu0 %v15432_v15 }
 0x661   : > { %v6398_v16 = vpop.xlane.xlu0 %6397 }
 0x662   : > { %v6459_v18 = vsub.f32 %v15299_v22, %v6398_v16  ;;  %v10624_v22 = vunpack.i.l.bf16 %v15402_v1 }
 0x664   : > { %v6493_v41 = vmul.f32 1.442695, %v6459_v18  ;;  %v4534_v4 = vrot.slane %v10624_v22, 4  ;;  %v4539_v21 = vperm.slane %v10624_v22, %v11700_v17 }
 0x665   : > { %v6430_v38 = vpop.xlane.xlu1 %6429 }
 0x666   : > { %10726 = vpow2.f32 %v6493_v41  ;;  %v6475_v8 = vsub.f32 %v15304_v2, %v6430_v38  ;;  %v4556_v38 = vrot.slane %v4539_v21, 4 }
 0x667   : > { %6417 = vmax.xlane.f32.xlu1 %v15438_v55 }
 0x668   : > { %v6525_v63 = vmul.f32 1.442695, %v6475_v8 }
 0x66a   : > { %10728 = vpow2.f32 %v6525_v63 }
 0x66c   : > { %v15442_v34 = vpop.eup %10726 }
 0x66d   : > { %v6432_v29 = vpop.xlane.xlu2 %6431  ;;  %v6400_v26 = vpop.xlane.xlu1 %6399  ;;  %6557 = vadd.xlane.f32.xlu0 %v15442_v34 }
 0x66e   : > { %v6476_v43 = vsub.f32 %v15314_v30, %v6432_v29  ;;  %v6460_v2 = vsub.f32 %v15316_v20, %v6400_v26  ;;  %v4535_v30 = vsel %vm1398_vm6, 0.0, %v4534_v4  ;;  %v4595_v20 = vperm.slane %v4587_v33, %v11700_v17 }
 0x66f   : > { %v4543_v57 = vperm.slane %v4535_v30, %v11700_v17 }
 0x670   : > { %v15448_v53 = vpop.eup %10728  ;;  %v6527_v51 = vmul.f32 1.442695, %v6476_v43  ;;  %v6495_v44 = vmul.f32 1.442695, %v6460_v2  ;;  %v4620_v41 = vrot.slane %v4595_v20, 4 }
 0x671   : > { %v6402_v39 = vpop.xlane.xlu0 %6401  ;;  %6589 = vadd.xlane.f32.xlu2 %v15448_v53  ;;  %v4568_v4 = vrot.slane %v4543_v57, 4 }
 0x672   : > { %10730 = vpow2.f32 %v6527_v51  ;;  %v6461_v1 = vsub.f32 %v15325_v58, %v6402_v39 }
 0x673   : > { %10732 = vpow2.f32 %v6495_v44 }
 0x674   : > { %v6497_v46 = vmul.f32 1.442695, %v6461_v1 }
 0x675   : > { %v10633_v25 = vpop.permute.xlu2 %10632 }
 0x676   : > { %v10635_v14 = vunpack.i.h.bf16 %v10633_v25  ;;  %v10634_v6 = vunpack.i.l.bf16 %v10633_v25  ;;  %10734 = vpow2.f32 %v6497_v46 }
 0x678   : > { %v15458_v5 = vpop.eup %10730  ;;  %v4596_v37 = vrot.slane %v10635_v14, 4  ;;  %v4601_v58 = vperm.slane %v10635_v14, %v11700_v17  ;;  %v4544_v19 = vrot.slane %v10634_v6, 4  ;;  %v4549_v16 = vperm.slane %v10634_v6, %v11700_v17 }
 0x679   : > { %v15462_v18 = vpop.eup %10732  ;;  %v15465_v8 = vpop.xlane.xlu1 %6403  ;;  %6591 = vadd.xlane.f32.xlu1 %v15458_v5 }
 0x67a   : > { %v4597_v63 = vsel %vm1398_vm6, 0.0, %v4596_v37  ;;  %v4606_v0 = vrot.slane %v4601_v58, 4  ;;  %v4609_v22 = vsel %vm1398_vm6, %v4601_v58, %v4608_v10  ;;  %v4545_v29 = vsel %vm1398_vm6, 0.0, %v4544_v19  ;;  %6559 = vadd.xlane.f32.xlu2 %v15462_v18 }
 0x67b   : > { %v4605_v26 = vperm.slane %v4597_v63, %v11700_v17  ;;  %v4617_v24 = vperm.slane %v4609_v22, %v11923_v36  ;;  %v4553_v43 = vperm.slane %v4545_v29, %v11700_v17  ;;  %v4554_v2 = vrot.slane %v4549_v16, 4  ;;  %v6353_v29 = vpop.f32.mrf.mxu2 }
 0x67c   : > { %v4607_v51 = vsel %vm1398_vm6, %v4606_v0, %v4591_v47  ;;  %v4557_v44 = vsel %vm1398_vm6, %v4549_v16, %v4556_v38  ;;  %v15482_v6 = vpop.eup %10734  ;;  %v15489_v19 = vadd.f32 %v15387_v9, %v15385_v61 }
 0x67d   : > { %v4613_v39 = vperm.slane %v4607_v51, %v11923_v36  ;;  %v4618_v33 = vrot.slane %v4605_v26, 4  ;;  %v4621_v1 = vsel %vm1398_vm6, %v4605_v26, %v4620_v41  ;;  %v4632_v30 = vrot.slane %v4617_v24, 4  ;;  %v6436_v63 = vpop.xlane.xlu0 %6435 }
 0x67e   : > { %v4629_v46 = vperm.slane %v4621_v1, %v11923_v36  ;;  %v4555_v25 = vsel %vm1398_vm6, %v4554_v2, %v4539_v21  ;;  %v4566_v14 = vrot.slane %v4553_v43, 4  ;;  %v4565_v58 = vperm.slane %v4557_v44, %v11923_v36 }
 0x67f   : > { %v4619_v10 = vsel %vm1398_vm6, %v4618_v33, %v4595_v20  ;;  %v4630_v47 = vrot.slane %v4613_v39, 4  ;;  %v4633_v37 = vsel %vm1398_vm6, 0.0, %v4632_v30  ;;  %v4561_v20 = vperm.slane %v4555_v25, %v11923_v36 }
 0x680   : > { %v4625_v16 = vperm.slane %v4619_v10, %v11923_v36  ;;  %v4636_v41 = vrot.slane %v4629_v46, 4  ;;  %v4567_v38 = vsel %vm1398_vm6, %v4566_v14, %v4543_v57  ;;  %v4569_v27 = vsel %vm1398_vm6, %v4553_v43, %v4568_v4 }
 0x681   : > { %v6406_v0 = vpop.xlane.xlu1 %6405  ;;  %6561 = vadd.xlane.f32.xlu1 %v15482_v6  ;;  %v4631_v61 = vsel %vm1398_vm6, 0.0, %v4630_v47  ;;  %v5409_v9 = vrot.slane %v4633_v37, 4  ;;  %v4573_v22 = vperm.slane %v4567_v38, %v11923_v36  ;;  %v4577_v24 = vperm.slane %v4569_v27, %v11923_v36 }
 0x682   : > { %6445 = vmax.xlane.f32.xlu2 %v15489_v19  ;;  %v4637_v26 = vsel %vm1398_vm6, 0.0, %v4636_v41  ;;  %v4578_v2 = vrot.slane %v4561_v20, 4  ;;  %v4580_v57 = vrot.slane %v4565_v58, 4  ;;  %v15510_v43 = vsel %vm15494_vm12, 0.0, %v11053_v50 }
 0x683   : > { %v4634_v4 = vrot.slane %v4625_v16, 4  ;;  %v4582_v51 = vrot.slane %v4573_v22, 4  ;;  %v6478_v44 = vsub.f32 %v15339_v3, %v6436_v63  ;;  %v5404_v33 = vsel %vm1398_vm6, %v4632_v30, %v4613_v39 }
 0x684   : > { %v4579_v1 = vsel %vm1398_vm6, 0.0, %v4578_v2  ;;  %v4581_v46 = vsel %vm1398_vm6, 0.0, %v4580_v57  ;;  %v4584_v25 = vrot.slane %v4577_v24, 4  ;;  %v15517_v14 = vadd.f32 %v6353_v29, %v15510_v43 }
 0x685   : > { %v5410_v10 = vsel %vm1398_vm6, %v5409_v9, %v4631_v61  ;;  %v5420_v47 = vrot.slane %v4637_v26, 4  ;;  %v5371_v37 = vrot.slane %v4581_v46, 4  ;;  %v5366_v21 = vsel %vm1398_vm6, %v4580_v57, %v4561_v20 }
 0x686   : > { %v4585_v58 = vsel %vm1398_vm6, 0.0, %v4584_v25  ;;  %v6531_v38 = vmul.f32 1.442695, %v6478_v44  ;;  %v4583_v3 = vsel %vm1398_vm6, 0.0, %v4582_v51  ;;  %v5408_v39 = vperm.slane %v5404_v33, %v11700_v17 }
 0x687   : > { %v5372_v30 = vsel %vm1398_vm6, %v5371_v37, %v4579_v1  ;;  %v5382_v27 = vrot.slane %v4585_v58, 4  ;;  %v4635_v63 = vsel %vm1398_vm6, 0.0, %v4634_v4  ;;  %v6463_v29 = vsub.f32 %v15344_v49, %v6406_v0 }
 0x688   : > { %v5376_v61 = vperm.slane %v5372_v30, %v11700_v17  ;;  %v5377_v9 = vsel %vm1398_vm6, %v4584_v25, %v4573_v22  ;;  %v5414_v26 = vperm.slane %v5410_v10, %v11700_v17  ;;  %v5370_v20 = vperm.slane %v5366_v21, %v11700_v17  ;;  %v15537_v22 = vpop.f32.mrf.mxu1 }
 0x689   : > { %v6438_v24 = vpop.xlane.xlu1 %6437  ;;  %v6408_v57 = vpop.xlane.xlu0 %6407  ;;  %v5383_v51 = vsel %vm1398_vm6, %v5382_v27, %v4583_v3  ;;  %v5415_v4 = vsel %vm1398_vm6, %v4636_v41, %v4625_v16  ;;  %10736 = vpow2.f32 %v6531_v38  ;;  %v5421_v44 = vsel %vm1398_vm6, %v5420_v47, %v4635_v63 }
 0x68a   : > { %v6479_v2 = vsub.f32 %v15352_v31, %v6438_v24  ;;  %6451 = vmax.xlane.f32.xlu2 %v15517_v14  ;;  %v5387_v49 = vperm.slane %v5383_v51, %v11700_v17  ;;  %v5388_v0 = vrot.slane %v5376_v61, 4  ;;  %v5381_v1 = vperm.slane %v5377_v9, %v11700_v17 }
 0x68b   : > { %v5425_v31 = vperm.slane %v5421_v44, %v11700_v17  ;;  %v5426_v46 = vrot.slane %v5414_v26, 4  ;;  %v6464_v25 = vsub.f32 %v15354_v45, %v6408_v57  ;;  %v5419_v16 = vperm.slane %v5415_v4, %v11700_v17 }
 0x68c   : > { %v6533_v33 = vmul.f32 1.442695, %v6479_v2  ;;  %v5389_v10 = vsel %vm1398_vm6, %v5388_v0, %v5370_v20  ;;  %v5394_v37 = vrot.slane %v5387_v49, 4  ;;  %v6501_v21 = vmul.f32 1.442695, %v6463_v29 }
 0x68d   : > { %v5393_v41 = vperm.slane %v5389_v10, %v11923_v36  ;;  %v5427_v47 = vsel %vm1398_vm6, %v5426_v46, %v5408_v39  ;;  %v5432_v58 = vrot.slane %v5425_v31, 4  ;;  %v777_v9 = vadd.s32 112, %v15260_v62 }
 0x68e   : > { %10738 = vpow2.f32 %v6533_v33  ;;  %v5395_v38 = vsel %vm1398_vm6, %v5394_v37, %v5381_v1  ;;  %v5431_v3 = vperm.slane %v5427_v47, %v11923_v36  ;;  %v6503_v26 = vmul.f32 1.442695, %v6464_v25 }
 0x68f   : > { %v5399_v30 = vperm.slane %v5395_v38, %v11923_v36  ;;  %v5402_v27 = vrot.slane %v5393_v41, 4  ;;  %v5433_v45 = vsel %vm1398_vm6, %v5432_v58, %v5419_v16  ;;  %v15550_v63 = vpop.eup %10736  ;;  %10740 = vpow2.f32 %v6501_v21 }
 0x690   : > { %v5437_v24 = vperm.slane %v5433_v45, %v11923_v36  ;;  %v5440_v61 = vrot.slane %v5431_v3, 4  ;;  %v6179_v31 = vpop.f32.mrf.mxu1  ;;  %v778_v46 = vadd.s32 120, %v15260_v62  ;;  %10742 = vpow2.f32 %v6503_v26 }
 0x691   : > { %v5403_v39 = vsel %vm1398_vm6, %v5399_v30, %v5402_v27  ;;  %v5400_v29 = vrot.slane %v5399_v30, 4  ;;  %vm795_vm13 = vcmp.le.s32.totalorder %v15262_v52, %v777_v9  ;;  %v6440_v62 = vpop.xlane.xlu0 %6439 }
 0x692   : > { %6595 = vadd.xlane.f32.xlu2 %v15550_v63  ;;  %v5441_v20 = vsel %vm1398_vm6, %v5437_v24, %v5440_v61  ;;  %v5990_v2 = vpack.c.bf16 %v5403_v39, %v5403_v39  ;;  %v5438_v57 = vrot.slane %v5437_v24, 4  ;;  %vm814_vm14 = vmand %vm795_vm13, %vm15267_vm9  ;;  %vm796_vm15 = vcmp.le.s32.totalorder %v15262_v52, %v778_v46  ;;  %v6356_v39 = vpop.f32.mrf.mxu2 }
 0x693   : > { %v5991_v4 = vpack.c.bf16 %v5441_v20, %v5441_v20  ;;  %v5401_v49 = vsel %vm1398_vm6, %v5400_v29, %v5393_v41  ;;  %v830_v38 = vsel %vm814_vm14, 0.0, %v11053_v50  ;;  %vm815_vm0 = vmand %vm796_vm15, %vm15267_vm9 }
 0x694   : > { %v15557_v51 = vpop.eup %10738  ;;  %v6922_v0 = vunpack.c.l.b16 %v5990_v2  ;;  %v5439_v33 = vsel %vm1398_vm6, %v5438_v57, %v5431_v3  ;;  %v5974_v1 = vpack.c.bf16 %v5401_v49, %v5401_v49  ;;  %v15577_v27 = vadd.f32 %v6179_v31, %v830_v38 }
 0x695   : > { %v6442_v44 = vpop.xlane.xlu1 %6441  ;;  %6597 = vadd.xlane.f32.xlu1 %v15557_v51  ;;  %v6923_v25 = vunpack.c.l.b16 %v5991_v4  ;;  %v5975_v10 = vpack.c.bf16 %v5439_v33, %v5439_v33  ;;  %v15564_v58 = vpop.eup %10740  ;;  %v15580_v52 = vsel %vm815_vm0, 0.0, %v11053_v50  ;;  %v15592_v20 = vadd.f32 %v6356_v39, %v830_v38 }
 0x696   : > { %v6777_v37 = vunpack.c.l.b16 %v5974_v1  ;;  %v15570_v21 = vpop.eup %10742  ;;  %v6481_v28 = vsub.f32 %v15368_v42, %v6442_v44 }
 0x697   : > { %v6938_v16 = vpack.c.b16 %v6923_v25, %v6922_v0  ;;  %v6778_v47 = vunpack.c.l.b16 %v5975_v10  ;;  %v15613_v25 = vadd.f32 %v15537_v22, %v15510_v43 }
 0x698   : > { %v6181_v45 = vpop.f32.mrf.mxu1  ;;  %v6537_v26 = vmul.f32 1.442695, %v6481_v28 }
 0x699   : > { %6961 = vmatpush.bf16.msrb.mxu0 %v6938_v16  ;;  %v6793_v41 = vpack.c.b16 %v6778_v47, %v6777_v37  ;;  %v15584_v61 = vadd.f32 %v6181_v45, %v15580_v52 }
 0x69a   : > { %6565 = vadd.xlane.f32.xlu2 %v15564_v58 }
 0x69b   : > { %6816 = vmatpush.bf16.msra.mxu3 %v6793_v41 }
 0x69d   : > { %v6412_v3 = vpop.xlane.xlu1 %6411  ;;  %6567 = vadd.xlane.f32.xlu1 %v15570_v21  ;;  %v6444_v9 = vpop.xlane.xlu0 %6443 }
 0x69e   : > { %v6466_v30 = vsub.f32 %v15376_v32, %v6412_v3  ;;  %v6482_v32 = vsub.f32 %v15378_v59, %v6444_v9  ;;  %v6462_v59 = vsub.f32 %v15333_v13, %v15465_v8 }
 0x6a0   : > { %v6507_v24 = vmul.f32 1.442695, %v6466_v30  ;;  %v6539_v50 = vmul.f32 1.442695, %v6482_v32  ;;  %v6499_v44 = vmul.f32 1.442695, %v6462_v59 }
 0x6a2   : > { %6421 = vmax.xlane.f32.xlu2 %v15577_v27  ;;  %10744 = vpow2.f32 %v6507_v24 }
 0x6a3   : > { %10746 = vpow2.f32 %v6537_v26 }
 0x6a4   : > { %10748 = vpow2.f32 %v6539_v50 }
 0x6a5   : > { %6423 = vmax.xlane.f32.xlu1 %v15584_v61  ;;  %v6414_v13 = vpop.xlane.xlu0 %6413 }
 0x6a8   : > { %v15589_v29 = vpop.eup %10744 }
 0x6a9   : > { %v15596_v57 = vpop.eup %10746 }
 0x6aa   : > { %6571 = vadd.xlane.f32.xlu2 %v15589_v29  ;;  %v15601_v49 = vpop.eup %10748 }
 0x6ad   : > { %6453 = vmax.xlane.f32.xlu1 %v15592_v20 }
 0x6ae   : > { %v6434_v42 = vpop.xlane.xlu2 %6433 }
 0x6af   : > { %v6477_v2 = vsub.f32 %v15395_v54, %v6434_v42 }
 0x6b1   : > { %v6529_v4 = vmul.f32 1.442695, %v6477_v2 }
 0x6b2   : > { %6601 = vadd.xlane.f32.xlu2 %v15596_v57 }
 0x6b3   : > { %10750 = vpow2.f32 %v6529_v4 }
 0x6b4   : > { %10752 = vpow2.f32 %v6499_v44 }
 0x6b5   : > { %6603 = vadd.xlane.f32.xlu1 %v15601_v49 }
 0x6b6   : > { %v6410_v0 = vpop.xlane.xlu2 %6409 }
 0x6b7   : > { %v6465_v43 = vsub.f32 %v15408_v56, %v6410_v0 }
 0x6b9   : > { %v15604_v33 = vpop.eup %10750  ;;  %v6505_v24 = vmul.f32 1.442695, %v6465_v43 }
 0x6ba   : > { %6593 = vadd.xlane.f32.xlu0 %v15604_v33  ;;  %v15608_v31 = vpop.eup %10752 }
 0x6be   : > { %v6416_v54 = vpop.xlane.xlu2 %6415 }
 0x6bf   : > { %v6468_v1 = vsub.f32 %v15415_v12, %v6416_v54  ;;  %v6480_v12 = vsub.f32 %v15361_v23, %v6440_v62  ;;  %v6467_v54 = vsub.f32 %v15390_v7, %v6414_v13 }
 0x6c1   : > { %v6511_v46 = vmul.f32 1.442695, %v6468_v1  ;;  %v6535_v47 = vmul.f32 1.442695, %v6480_v12 }
 0x6c2   : > { %6563 = vadd.xlane.f32.xlu0 %v15608_v31  ;;  %v6554_v8 = vpop.xlane.xlu1 %6553 }
 0x6c3   : > { %10754 = vpow2.f32 %v6511_v46 }
 0x6c4   : > { %10756 = vrcp.f32 %v6554_v8  ;;  %v6358_v8 = vpop.f32.mrf.mxu2 }
 0x6c9   : > { %v15615_v10 = vpop.eup %10754 }
 0x6ca   : > { %6419 = vmax.xlane.f32.xlu0 %v15613_v25  ;;  %6575 = vadd.xlane.f32.xlu2 %v15615_v10  ;;  %v6586_v37 = vpop.xlane.xlu1 %6585  ;;  %v6556_v16 = vpop.xlane.xlu0 %6555 }
 0x6cb   : > { %v10757_v41 = vpop.eup %10756  ;;  %10758 = vrcp.f32 %v6556_v16 }
 0x6cc   : > { %10760 = vrcp.f32 %v6586_v37  ;;  %v6649_v22 = vmul.f32 %v10757_v41, %v15420_v40 }
 0x6cd   : > { %10762 = vpow2.f32 %v6535_v47 }
 0x6ce   : > { %v6681_v62 = vpack.c.bf16 %v6649_v22, %v6649_v22 }
 0x6d0   : > { %v6729_v56 = vunpack.c.l.b16 %v6681_v62 }
 0x6d1   : > { %v10759_v38 = vpop.eup %10758 }
 0x6d2   : > { %6449 = vmax.xlane.f32.xlu0 %v15406_v48  ;;  %v6448_v3 = vpop.xlane.xlu1 %6447  ;;  %v6588_v30 = vpop.xlane.xlu0 %6587  ;;  %v6650_v23 = vmul.f32 %v10759_v38, %v15426_v11 }
 0x6d3   : > { %v10761_v45 = vpop.eup %10760  ;;  %10764 = vrcp.f32 %v6588_v30  ;;  %v6484_v7 = vsub.f32 %v15430_v35, %v6448_v3 }
 0x6d4   : > { %v15624_v28 = vpop.eup %10762  ;;  %v6682_v9 = vpack.c.bf16 %v6650_v23, %v6650_v23  ;;  %v6665_v32 = vmul.f32 %v10761_v45, %v15424_v60  ;;  %10766 = vpow2.f32 %v6505_v24 }
 0x6d5   : > { %v6543_v43 = vmul.f32 1.442695, %v6484_v7 }
 0x6d6   : > { %v6730_v26 = vunpack.c.l.b16 %v6682_v9  ;;  %v6697_v2 = vpack.c.bf16 %v6665_v32, %v6665_v32 }
 0x6d8   : > { %v6745_v39 = vpack.c.b16 %v6730_v26, %v6729_v56  ;;  %v6874_v44 = vunpack.c.l.b16 %v6697_v2 }
 0x6d9   : > { %v10765_v40 = vpop.eup %10764 }
 0x6da   : > { %6599 = vadd.xlane.f32.xlu0 %v15624_v28  ;;  %v6418_v50 = vpop.xlane.xlu1 %6417  ;;  %v6666_v42 = vmul.f32 %v10765_v40, %v15432_v15  ;;  %6817 = vmatmul.bf16.vlgmr.msra.gmra.mxu3 %v6745_v39  ;;  %v15630_v59 = vpop.eup %10766  ;;  %v6509_v15 = vmul.f32 1.442695, %v6467_v54 }
 0x6db   : > { %v6469_v11 = vsub.f32 %v15438_v55, %v6418_v50  ;;  %v15635_v55 = vadd.f32 %v6358_v8, %v15580_v52 }
 0x6dc   : > { %v6698_v4 = vpack.c.bf16 %v6666_v42, %v6666_v42 }
 0x6dd   : > { %v6513_v0 = vmul.f32 1.442695, %v6469_v11 }
 0x6de   : > { %v6875_v60 = vunpack.c.l.b16 %v6698_v4 }
 0x6df   : > { %10768 = vpow2.f32 %v6513_v0 }
 0x6e0   : > { %v6890_v46 = vpack.c.b16 %v6875_v60, %v6874_v44  ;;  %v6558_v12 = vpop.xlane.xlu0 %6557 }
 0x6e2   : > { %6569 = vadd.xlane.f32.xlu0 %v15630_v59  ;;  %6962 = vmatmul.bf16.vlgmr.msrb.gmra.mxu0 %v6890_v46 }
 0x6e4   : > { %v6590_v1 = vpop.xlane.xlu2 %6589 }
 0x6e5   : > { %10770 = vrcp.f32 %v6590_v1  ;;  %v15637_v37 = vpop.eup %10768 }
 0x6e6   : > { %10772 = vrcp.f32 %v6558_v12  ;;  %6577 = vadd.xlane.f32.xlu2 %v15637_v37 }
 0x6e7   : > { %10774 = vpow2.f32 %v6509_v15 }
 0x6ea   : > { %6455 = vmax.xlane.f32.xlu0 %v15635_v55 }
 0x6eb   : > { %v10771_v16 = vpop.eup %10770 }
 0x6ec   : > { %v6592_v13 = vpop.xlane.xlu1 %6591  ;;  %v10773_v41 = vpop.eup %10772  ;;  %v6667_v52 = vmul.f32 %v10771_v16, %v15448_v53 }
 0x6ed   : > { %v6560_v47 = vpop.xlane.xlu2 %6559  ;;  %10776 = vrcp.f32 %v6592_v13  ;;  %v15643_v22 = vpop.eup %10774  ;;  %v6651_v38 = vmul.f32 %v10773_v41, %v15442_v34 }
 0x6ee   : > { %10778 = vrcp.f32 %v6560_v47  ;;  %v6699_v3 = vpack.c.bf16 %v6667_v52, %v6667_v52 }
 0x6ef   : > { %10780 = vpow2.f32 %v6543_v43  ;;  %v6683_v62 = vpack.c.bf16 %v6651_v38, %v6651_v38 }
 0x6f0   : > { %v6876_v26 = vunpack.c.l.b16 %v6699_v3 }
 0x6f1   : > { %v6731_v39 = vunpack.c.l.b16 %v6683_v62 }
 0x6f2   : > { %6573 = vadd.xlane.f32.xlu0 %v15643_v22 }
 0x6f3   : > { %v10777_v30 = vpop.eup %10776 }
 0x6f4   : > { %v10779_v45 = vpop.eup %10778  ;;  %v6668_v35 = vmul.f32 %v10777_v30, %v15458_v5  ;;  %v6562_v11 = vpop.xlane.xlu1 %6561 }
 0x6f5   : > { %v6446_v24 = vpop.xlane.xlu2 %6445  ;;  %v6652_v23 = vmul.f32 %v10779_v45, %v15462_v18  ;;  %v15650_v34 = vpop.eup %10780 }
 0x6f6   : > { %v6483_v9 = vsub.f32 %v15489_v19, %v6446_v24  ;;  %v6700_v32 = vpack.c.bf16 %v6668_v35, %v6668_v35 }
 0x6f7   : > { %v6684_v53 = vpack.c.bf16 %v6652_v23, %v6652_v23 }
 0x6f8   : > { %v6541_v56 = vmul.f32 1.442695, %v6483_v9  ;;  %v6877_v40 = vunpack.c.l.b16 %v6700_v32 }
 0x6f9   : > { %v6732_v50 = vunpack.c.l.b16 %v6684_v53 }
 0x6fa   : > { %10782 = vpow2.f32 %v6541_v56  ;;  %6607 = vadd.xlane.f32.xlu0 %v15650_v34  ;;  %v6891_v5 = vpack.c.b16 %v6877_v40, %v6876_v26 }
 0x6fb   : > { %v6746_v42 = vpack.c.b16 %v6732_v50, %v6731_v39 }
 0x6fc   : > { %6967 = vmatmul.bf16.gmra.mxu0 %v6891_v5 }
 0x6fd   : > { %6822 = vmatmul.bf16.gmra.mxu3 %v6746_v42  ;;  %v6452_v18 = vpop.xlane.xlu2 %6451 }
 0x6fe   : > { %v6486_v2 = vsub.f32 %v15517_v14, %v6452_v18 }
 0x700   : > { %v15654_v19 = vpop.eup %10782  ;;  %v6547_v4 = vmul.f32 1.442695, %v6486_v2 }
 0x701   : > { %6605 = vadd.xlane.f32.xlu1 %v15654_v19 }
 0x702   : > { %10784 = vpow2.f32 %v6547_v4 }
 0x705   : > { %v6596_v12 = vpop.xlane.xlu2 %6595 }
 0x708   : > { %v15657_v0 = vpop.eup %10784  ;;  %v6598_v44 = vpop.xlane.xlu1 %6597 }
 0x709   : > { %6611 = vadd.xlane.f32.xlu2 %v15657_v0 }
 0x70d   : > { %v6566_v47 = vpop.xlane.xlu2 %6565 }
 0x710   : > { %v6568_v60 = vpop.xlane.xlu1 %6567 }
 0x715   : > { %v6422_v9 = vpop.xlane.xlu2 %6421 }
 0x716   : > { %v6471_v56 = vsub.f32 %v15577_v27, %v6422_v9 }
 0x718   : > { %v6424_v54 = vpop.xlane.xlu1 %6423  ;;  %v6517_v50 = vmul.f32 1.442695, %v6471_v56 }
 0x71d   : > { %v6572_v4 = vpop.xlane.xlu2 %6571 }
 0x720   : > { %v6454_v1 = vpop.xlane.xlu1 %6453 }
 0x721   : > { %v6487_v46 = vsub.f32 %v15592_v20, %v6454_v1 }
 0x723   : > { %v6549_v8 = vmul.f32 1.442695, %v6487_v46 }
 0x725   : > { %10786 = vpow2.f32 %v6549_v8 }
 0x726   : > { %10788 = vrcp.f32 %v6596_v12 }
 0x72b   : > { %v15661_v14 = vpop.eup %10786 }
 0x72c   : > { %6613 = vadd.xlane.f32.xlu2 %v15661_v14  ;;  %v10789_v7 = vpop.eup %10788 }
 0x72d   : > { %v6594_v15 = vpop.xlane.xlu0 %6593  ;;  %v6670_v13 = vmul.f32 %v10789_v7, %v15550_v63 }
 0x72e   : > { %10790 = vrcp.f32 %v6594_v15 }
 0x72f   : > { %10792 = vrcp.f32 %v6562_v11  ;;  %v6702_v20 = vpack.c.bf16 %v6670_v13, %v6670_v13  ;;  %v6472_v11 = vsub.f32 %v15584_v61, %v6424_v54  ;;  %v6604_v54 = vpop.xlane.xlu1 %6603  ;;  %v6602_v13 = vpop.xlane.xlu2 %6601 }
 0x731   : > { %v6879_v45 = vunpack.c.l.b16 %v6702_v20 }
 0x734   : > { %v10791_v16 = vpop.eup %10790 }
 0x735   : > { %v6564_v41 = vpop.xlane.xlu0 %6563  ;;  %v6669_v43 = vmul.f32 %v10791_v16, %v15604_v33  ;;  %v10793_v52 = vpop.eup %10792 }
 0x736   : > { %10794 = vrcp.f32 %v6564_v41  ;;  %v6653_v35 = vmul.f32 %v10793_v52, %v15482_v6 }
 0x737   : > { %v6701_v38 = vpack.c.bf16 %v6669_v43, %v6669_v43  ;;  %10796 = vrcp.f32 %v6568_v60 }
 0x738   : > { %v6685_v63 = vpack.c.bf16 %v6653_v35, %v6653_v35  ;;  %10798 = vrcp.f32 %v6566_v47 }
 0x739   : > { %v6878_v30 = vunpack.c.l.b16 %v6701_v38 }
 0x73a   : > { %v6733_v26 = vunpack.c.l.b16 %v6685_v63 }
 0x73b   : > { %v6892_v3 = vpack.c.b16 %v6879_v45, %v6878_v30 }
 0x73c   : > { %v10795_v24 = vpop.eup %10794 }
 0x73d   : > { %6972 = vmatmul.bf16.gmra.mxu0 %v6892_v3  ;;  %v6420_v23 = vpop.xlane.xlu0 %6419  ;;  %v6654_v62 = vmul.f32 %v10795_v24, %v15608_v31  ;;  %v10797_v39 = vpop.eup %10796 }
 0x73e   : > { %v6470_v32 = vsub.f32 %v15613_v25, %v6420_v23  ;;  %v10799_v42 = vpop.eup %10798  ;;  %v6656_v18 = vmul.f32 %v10797_v39, %v15570_v21  ;;  %v6576_v24 = vpop.xlane.xlu2 %6575 }
 0x73f   : > { %v6686_v33 = vpack.c.bf16 %v6654_v62, %v6654_v62  ;;  %v6655_v27 = vmul.f32 %v10799_v42, %v15564_v58 }
 0x740   : > { %v6515_v53 = vmul.f32 1.442695, %v6470_v32  ;;  %v6688_v60 = vpack.c.bf16 %v6656_v18, %v6656_v18 }
 0x741   : > { %v6734_v40 = vunpack.c.l.b16 %v6686_v33  ;;  %v6687_v46 = vpack.c.bf16 %v6655_v27, %v6655_v27 }
 0x742   : > { %10800 = vpow2.f32 %v6515_v53  ;;  %v6736_v12 = vunpack.c.l.b16 %v6688_v60 }
 0x743   : > { %v6747_v6 = vpack.c.b16 %v6734_v40, %v6733_v26  ;;  %10802 = vrcp.f32 %v6598_v44  ;;  %v6735_v58 = vunpack.c.l.b16 %v6687_v46 }
 0x744   : > { %10804 = vpow2.f32 %v6517_v50 }
 0x745   : > { %6827 = vmatmul.bf16.gmra.mxu3 %v6747_v6  ;;  %v6450_v5 = vpop.xlane.xlu0 %6449  ;;  %v6748_v15 = vpack.c.b16 %v6736_v12, %v6735_v58 }
 0x746   : > { %v6485_v31 = vsub.f32 %v15406_v48, %v6450_v5  ;;  %v6519_v48 = vmul.f32 1.442695, %v6472_v11 }
 0x748   : > { %v15672_v2 = vpop.eup %10800  ;;  %v6545_v25 = vmul.f32 1.442695, %v6485_v31 }
 0x749   : > { %6579 = vadd.xlane.f32.xlu1 %v15672_v2  ;;  %v10803_v8 = vpop.eup %10802 }
 0x74a   : > { %10806 = vpow2.f32 %v6545_v25  ;;  %v15677_v21 = vpop.eup %10804  ;;  %v6671_v61 = vmul.f32 %v10803_v8, %v15557_v51 }
 0x74c   : > { %v6703_v41 = vpack.c.bf16 %v6671_v61, %v6671_v61 }
 0x74d   : > { %v6600_v1 = vpop.xlane.xlu0 %6599 }
 0x74e   : > { %10808 = vrcp.f32 %v6600_v1  ;;  %v6880_v51 = vunpack.c.l.b16 %v6703_v41 }
 0x74f   : > { %10810 = vrcp.f32 %v6572_v4 }
 0x750   : > { %v15679_v44 = vpop.eup %10806  ;;  %10812 = vpow2.f32 %v6519_v48 }
 0x751   : > { %6609 = vadd.xlane.f32.xlu0 %v15679_v44  ;;  %6581 = vadd.xlane.f32.xlu1 %v15677_v21  ;;  %10814 = vrcp.f32 %v6604_v54 }
 0x754   : > { %v10809_v7 = vpop.eup %10808 }
 0x755   : > { %6832 = vmatmul.bf16.gmra.mxu3 %v6748_v15  ;;  %v6570_v16 = vpop.xlane.xlu0 %6569  ;;  %v6672_v47 = vmul.f32 %v10809_v7, %v15624_v28  ;;  %v10811_v43 = vpop.eup %10810 }
 0x756   : > { %10816 = vrcp.f32 %v6570_v16  ;;  %v15685_v52 = vpop.eup %10812  ;;  %v6658_v30 = vmul.f32 %v10811_v43, %v15589_v29 }
 0x757   : > { %v6704_v20 = vpack.c.bf16 %v6672_v47, %v6672_v47  ;;  %10818 = vrcp.f32 %v6602_v13  ;;  %v10815_v45 = vpop.eup %10814 }
 0x758   : > { %v6690_v62 = vpack.c.bf16 %v6658_v30, %v6658_v30  ;;  %v6674_v33 = vmul.f32 %v10815_v45, %v15601_v49  ;;  %10820 = vrcp.f32 %v6576_v24 }
 0x759   : > { %6583 = vadd.xlane.f32.xlu0 %v15685_v52  ;;  %v6881_v38 = vunpack.c.l.b16 %v6704_v20 }
 0x75a   : > { %v6738_v26 = vunpack.c.l.b16 %v6690_v62  ;;  %v6706_v5 = vpack.c.bf16 %v6674_v33, %v6674_v33 }
 0x75b   : > { %v6893_v35 = vpack.c.b16 %v6881_v38, %v6880_v51 }
 0x75c   : > { %v10817_v3 = vpop.eup %10816  ;;  %v6883_v46 = vunpack.c.l.b16 %v6706_v5 }
 0x75d   : > { %6977 = vmatmul.bf16.gmra.mxu0 %v6893_v35  ;;  %v6456_v23 = vpop.xlane.xlu0 %6455  ;;  %v6657_v28 = vmul.f32 %v10817_v3, %v15630_v59  ;;  %v10819_v63 = vpop.eup %10818 }
 0x75e   : > { %v6488_v9 = vsub.f32 %v15635_v55, %v6456_v23  ;;  %v6673_v29 = vmul.f32 %v10819_v63, %v15596_v57  ;;  %v6818_v40 = vpop.f32.mrf.mxu3  ;;  %v10821_v27 = vpop.eup %10820 }
 0x75f   : > { %v6689_v32 = vpack.c.bf16 %v6657_v28, %v6657_v28  ;;  %v7003_v39 = vrot.slane %v6818_v40, 4  ;;  %v7008_v50 = vperm.slane %v6818_v40, %v11700_v17  ;;  %v6963_v59 = vpop.f32.mrf.mxu0  ;;  %v6660_v15 = vmul.f32 %v10821_v27, %v15615_v10 }
 0x760   : > { %v6551_v53 = vmul.f32 1.442695, %v6488_v9  ;;  %v7013_v42 = vrot.slane %v6963_v59, 4  ;;  %v7018_v55 = vperm.slane %v6963_v59, %v11700_v17  ;;  %v6705_v25 = vpack.c.bf16 %v6673_v29, %v6673_v29 }
 0x761   : > { %v6737_v56 = vunpack.c.l.b16 %v6689_v32  ;;  %v7004_v49 = vsel %vm1398_vm6, 0.0, %v7003_v39  ;;  %v7025_v18 = vrot.slane %v7008_v50, 4  ;;  %v6692_v45 = vpack.c.bf16 %v6660_v15, %v6660_v15  ;;  %v10366_v32 = vld [vmem:[%s18372_s18 + $0x8] sm:$0xff] }
 0x762   : > { %10822 = vpow2.f32 %v6551_v53  ;;  %v7012_v57 = vperm.slane %v7004_v49, %v11700_v17  ;;  %v7014_v11 = vsel %vm1398_vm6, 0.0, %v7013_v42  ;;  %v7023_v4 = vrot.slane %v7018_v55, 4  ;;  %8581 = vmatpush.bf16.msrb.mxu3 %v10366_v32 }
 0x763   : > { %v6749_v6 = vpack.c.b16 %v6738_v26, %v6737_v56  ;;  %v7022_v60 = vperm.slane %v7014_v11, %v11700_v17  ;;  %v7026_v1 = vsel %vm1398_vm6, %v7018_v55, %v7025_v18  ;;  %v6882_v54 = vunpack.c.l.b16 %v6705_v25 }
 0x764   : > { %v7037_v48 = vrot.slane %v7012_v57, 4  ;;  %v7024_v12 = vsel %vm1398_vm6, %v7023_v4, %v7008_v50  ;;  %v7034_v58 = vperm.slane %v7026_v1, %v11923_v36 }
 0x765   : > { %v6574_v31 = vpop.xlane.xlu0 %6573  ;;  %6837 = vmatmul.bf16.gmra.mxu3 %v6749_v6  ;;  %v7035_v61 = vrot.slane %v7022_v60, 4  ;;  %v7030_v7 = vperm.slane %v7024_v12, %v11923_v36  ;;  %v6894_v47 = vpack.c.b16 %v6883_v46, %v6882_v54  ;;  %v6740_v6 = vunpack.c.l.b16 %v6692_v45 }
 0x766   : > { %10824 = vrcp.f32 %v6574_v31  ;;  %v7049_v13 = vrot.slane %v7034_v58, 4  ;;  %v6820_v16 = vpop.f32.mrf.mxu3  ;;  %v7038_v43 = vsel %vm1398_vm6, %v7022_v60, %v7037_v48 }
 0x767   : > { %v7055_v41 = vrot.slane %v6820_v16, 4  ;;  %v7060_v20 = vperm.slane %v6820_v16, %v11700_v17  ;;  %v7036_v38 = vsel %vm1398_vm6, %v7035_v61, %v7012_v57  ;;  %v7047_v35 = vrot.slane %v7030_v7, 4  ;;  %v6965_v24 = vpop.f32.mrf.mxu0 }
 0x768   : > { %v15700_v8 = vpop.eup %10822  ;;  %v7050_v10 = vsel %vm1398_vm6, 0.0, %v7049_v13  ;;  %v7046_v23 = vperm.slane %v7038_v43, %v11923_v36  ;;  %v7042_v63 = vperm.slane %v7036_v38, %v11923_v36  ;;  %v7065_v53 = vrot.slane %v6965_v24, 4 }
 0x769   : > { %6615 = vadd.xlane.f32.xlu1 %v15700_v8  ;;  %v7056_v3 = vsel %vm1398_vm6, 0.0, %v7055_v41  ;;  %v7077_v62 = vrot.slane %v7060_v20, 4  ;;  %v7840_v33 = vrot.slane %v7050_v10, 4  ;;  %v7070_v56 = vperm.slane %v6965_v24, %v11700_v17 }
 0x76a   : > { %v7064_v28 = vperm.slane %v7056_v3, %v11700_v17  ;;  %v7048_v26 = vsel %vm1398_vm6, 0.0, %v7047_v35  ;;  %v7053_v39 = vrot.slane %v7046_v23, 4  ;;  %v7066_v50 = vsel %vm1398_vm6, 0.0, %v7065_v53 }
 0x76b   : > { %v7075_v59 = vrot.slane %v7070_v56, 4  ;;  %v7078_v5 = vsel %vm1398_vm6, %v7070_v56, %v7077_v62  ;;  %v7051_v55 = vrot.slane %v7042_v63, 4  ;;  %v7074_v49 = vperm.slane %v7066_v50, %v11700_v17 }
 0x76c   : > { %v10825_v51 = vpop.eup %10824  ;;  %v7089_v29 = vrot.slane %v7064_v28, 4  ;;  %v7086_v18 = vperm.slane %v7078_v5, %v11923_v36  ;;  %v7841_v25 = vsel %vm1398_vm6, %v7840_v33, %v7048_v26  ;;  %v7054_v1 = vsel %vm1398_vm6, 0.0, %v7053_v39 }
 0x76d   : > { %v6608_v30 = vpop.xlane.xlu0 %6607  ;;  %6982 = vmatmul.bf16.gmra.mxu0 %v6894_v47  ;;  %v6659_v9 = vmul.f32 %v10825_v51, %v15643_v22  ;;  %v7076_v27 = vsel %vm1398_vm6, %v7075_v59, %v7060_v20  ;;  %v7087_v4 = vrot.slane %v7074_v49, 4  ;;  %v7052_v58 = vsel %vm1398_vm6, 0.0, %v7051_v55 }
 0x76e   : > { %10826 = vrcp.f32 %v6608_v30  ;;  %v7082_v11 = vperm.slane %v7076_v27, %v11923_v36  ;;  %v7090_v60 = vsel %vm1398_vm6, %v7074_v49, %v7089_v29  ;;  %v7101_v48 = vrot.slane %v7086_v18, 4 }
 0x76f   : > { %v6691_v40 = vpack.c.bf16 %v6659_v9, %v6659_v9  ;;  %v7098_v46 = vperm.slane %v7090_v60, %v11923_v36  ;;  %v7835_v61 = vsel %vm1398_vm6, %v7049_v13, %v7030_v7  ;;  %v7088_v54 = vsel %vm1398_vm6, %v7087_v4, %v7064_v28 }
 0x770   : > { %v7099_v15 = vrot.slane %v7082_v11, 4  ;;  %v7845_v16 = vperm.slane %v7841_v25, %v11700_v17  ;;  %v7094_v47 = vperm.slane %v7088_v54, %v11923_v36  ;;  %v7102_v41 = vsel %vm1398_vm6, 0.0, %v7101_v48 }
 0x771   : > { %v6739_v31 = vunpack.c.l.b16 %v6691_v40  ;;  %v7105_v43 = vrot.slane %v7098_v46, 4  ;;  %v7851_v51 = vrot.slane %v7054_v1, 4  ;;  %v7873_v3 = vsel %vm1398_vm6, %v7101_v48, %v7082_v11 }
 0x772   : > { %v7100_v38 = vsel %vm1398_vm6, 0.0, %v7099_v15  ;;  %v7103_v35 = vrot.slane %v7094_v47, 4  ;;  %v7839_v62 = vperm.slane %v7835_v61, %v11700_v17  ;;  %v7846_v33 = vsel %vm1398_vm6, %v7053_v39, %v7042_v63 }
 0x773   : > { %v6750_v57 = vpack.c.b16 %v6740_v6, %v6739_v31  ;;  %v7106_v7 = vsel %vm1398_vm6, 0.0, %v7105_v43  ;;  %v7857_v53 = vrot.slane %v7845_v16, 4  ;;  %v7877_v40 = vperm.slane %v7873_v3, %v11700_v17 }
 0x774   : > { %v10827_v42 = vpop.eup %10826  ;;  %v6606_v22 = vpop.xlane.xlu1 %6605  ;;  %v7889_v56 = vrot.slane %v7106_v7, 4  ;;  %v7104_v29 = vsel %vm1398_vm6, 0.0, %v7103_v35  ;;  %v7852_v50 = vsel %vm1398_vm6, %v7851_v51, %v7052_v58  ;;  %v7850_v54 = vperm.slane %v7846_v33, %v11700_v17 }
 0x775   : > { %10828 = vrcp.f32 %v6606_v22  ;;  %v6676_v12 = vmul.f32 %v10827_v42, %v15650_v34  ;;  %6842 = vmatmul.bf16.gmra.mxu3 %v6750_v57  ;;  %v7878_v34 = vrot.slane %v7102_v41, 4  ;;  %v7856_v55 = vperm.slane %v7852_v50, %v11700_v17 }
 0x776   : > { %v7858_v27 = vsel %vm1398_vm6, %v7857_v53, %v7839_v62  ;;  %v7890_v57 = vsel %vm1398_vm6, %v7889_v56, %v7104_v29 }
 0x777   : > { %v6708_v10 = vpack.c.bf16 %v6676_v12, %v6676_v12  ;;  %v7879_v24 = vsel %vm1398_vm6, %v7878_v34, %v7100_v38  ;;  %v7863_v1 = vrot.slane %v7856_v55, 4  ;;  %v15764_v15 = vperm.slane %v7858_v27, %v11923_v36 }
 0x778   : > { %v7883_v9 = vperm.slane %v7879_v24, %v11700_v17  ;;  %v7894_v16 = vperm.slane %v7890_v57, %v11700_v17 }
 0x779   : > { %v6968_v20 = vpop.f32.mrf.mxu0  ;;  %v6885_v42 = vunpack.c.l.b16 %v6708_v10  ;;  %v7864_v38 = vsel %vm1398_vm6, %v7863_v1, %v7850_v54  ;;  %v7871_v53 = vrot.slane %v15764_v15, 4 }
 0x77a   : > { %v7117_v30 = vrot.slane %v6968_v20, 4  ;;  %v7122_v13 = vperm.slane %v6968_v20, %v11700_v17  ;;  %v7895_v22 = vrot.slane %v7883_v9, 4  ;;  %v7901_v10 = vrot.slane %v7894_v16, 4 }
 0x77b   : > { %v10829_v45 = vpop.eup %10828  ;;  %v15779_v33 = vperm.slane %v7864_v38, %v11923_v36 }
 0x77c   : > { %v7118_v23 = vsel %vm1398_vm6, 0.0, %v7117_v30  ;;  %v6675_v28 = vmul.f32 %v10829_v45, %v15654_v19  ;;  %v7127_v6 = vrot.slane %v7122_v13, 4  ;;  %v7884_v19 = vsel %vm1398_vm6, %v7105_v43, %v7094_v47 }
 0x77d   : > { %v7126_v32 = vperm.slane %v7118_v23, %v11700_v17  ;;  %v7888_v34 = vperm.slane %v7884_v19, %v11700_v17  ;;  %v7896_v30 = vsel %vm1398_vm6, %v7895_v22, %v7877_v40 }
 0x77e   : > { %v6707_v26 = vpack.c.bf16 %v6675_v28, %v6675_v28  ;;  %v15784_v29 = vperm.slane %v7896_v30, %v11923_v36 }
 0x77f   : > { %v7139_v31 = vrot.slane %v7126_v32, 4  ;;  %v7902_v19 = vsel %vm1398_vm6, %v7901_v10, %v7888_v34 }
 0x780   : > { %v6823_v59 = vpop.f32.mrf.mxu3  ;;  %v6884_v5 = vunpack.c.l.b16 %v6707_v26  ;;  %v15798_v27 = vperm.slane %v7902_v19, %v11923_v36 }
 0x781   : > { %v7107_v63 = vrot.slane %v6823_v59, 4  ;;  %v7112_v39 = vperm.slane %v6823_v59, %v11700_v17  ;;  %v6970_v49 = vpop.f32.mrf.mxu0 }
 0x782   : > { %v6895_v18 = vpack.c.b16 %v6885_v42, %v6884_v5  ;;  %v7169_v25 = vrot.slane %v6970_v49, 4  ;;  %v7174_v58 = vperm.slane %v6970_v49, %v11700_v17 }
 0x783   : > { %v7108_v11 = vsel %vm1398_vm6, 0.0, %v7107_v63  ;;  %v7128_v4 = vsel %vm1398_vm6, %v7127_v6, %v7112_v39  ;;  %v7129_v60 = vrot.slane %v7112_v39, 4 }
 0x784   : > { %v7116_v46 = vperm.slane %v7108_v11, %v11700_v17  ;;  %v7134_v48 = vperm.slane %v7128_v4, %v11923_v36  ;;  %6987 = vmatmul.bf16.gmra.mxu0 %v6895_v18  ;;  %v7170_v12 = vsel %vm1398_vm6, 0.0, %v7169_v25  ;;  %v7179_v7 = vrot.slane %v7174_v58, 4 }
 0x785   : > { %v7130_v61 = vsel %vm1398_vm6, %v7122_v13, %v7129_v60  ;;  %v7178_v20 = vperm.slane %v7170_v12, %v11700_v17  ;;  %v7909_v4 = vrot.slane %v15784_v29, 4  ;;  %v7872_v12 = vsel %vm1398_vm6, %v15779_v33, %v7871_v53 }
 0x786   : > { %v7138_v47 = vperm.slane %v7130_v61, %v11923_v36  ;;  %v7140_v41 = vsel %vm1398_vm6, %v7139_v31, %v7116_v46  ;;  %v7141_v43 = vrot.slane %v7116_v46, 4  ;;  %v7151_v51 = vrot.slane %v7134_v48, 4 }
 0x787   : > { %v7146_v3 = vperm.slane %v7140_v41, %v11923_v36  ;;  %v7191_v9 = vrot.slane %v7178_v20, 4  ;;  %v7910_v16 = vsel %vm1398_vm6, %v15798_v27, %v7909_v4 }
 0x788   : > { %v7142_v45 = vsel %vm1398_vm6, %v7126_v32, %v7141_v43  ;;  %v7153_v35 = vrot.slane %v7138_v47, 4  ;;  %v6825_v13 = vpop.f32.mrf.mxu3  ;;  %v7152_v32 = vsel %vm1398_vm6, 0.0, %v7151_v51  ;;  %v10636_v47 = vpack.i.bf16 %v7910_v16, %v7872_v12 }
 0x789   : > { %v7150_v24 = vperm.slane %v7142_v45, %v11923_v36  ;;  %v7159_v23 = vrot.slane %v6825_v13, 4  ;;  %v7164_v28 = vperm.slane %v6825_v13, %v11700_v17  ;;  %v7155_v59 = vrot.slane %v7146_v3, 4 }
 0x78a   : > { %v7154_v62 = vsel %vm1398_vm6, 0.0, %v7153_v35  ;;  %v7911_v57 = vsel %vm1398_vm6, %v7153_v35, %v7134_v48  ;;  %10637 = vrot.lane.b32.xlu0 %v10636_v47, %s11054_s21 }
 0x78b   : > { %v7157_v56 = vrot.slane %v7150_v24, 4  ;;  %v7916_v26 = vrot.slane %v7154_v62, 4  ;;  %v7160_v40 = vsel %vm1398_vm6, 0.0, %v7159_v23  ;;  %v7180_v6 = vsel %vm1398_vm6, %v7179_v7, %v7164_v28 }
 0x78c   : > { %v7181_v50 = vrot.slane %v7164_v28, 4  ;;  %v7168_v55 = vperm.slane %v7160_v40, %v11700_v17  ;;  %v7186_v39 = vperm.slane %v7180_v6, %v11923_v36  ;;  %v7915_v43 = vperm.slane %v7911_v57, %v11700_v17  ;;  %v6578_v57 = vpop.xlane.xlu2 %6577 }
 0x78d   : > { %v7158_v5 = vsel %vm1398_vm6, 0.0, %v7157_v56  ;;  %v7917_v42 = vsel %vm1398_vm6, %v7916_v26, %v7152_v32  ;;  %v7922_v34 = vsel %vm1398_vm6, %v7157_v56, %v7146_v3  ;;  %10830 = vrcp.f32 %v6578_v57 }
 0x78e   : > { %v7921_v22 = vperm.slane %v7917_v42, %v11700_v17  ;;  %v7927_v31 = vrot.slane %v7158_v5, 4  ;;  %v7182_v63 = vsel %vm1398_vm6, %v7174_v58, %v7181_v50  ;;  %v7192_v18 = vsel %vm1398_vm6, %v7191_v9, %v7168_v55 }
 0x78f   : > { %v7190_v49 = vperm.slane %v7182_v63, %v11923_v36  ;;  %v7193_v25 = vrot.slane %v7168_v55, 4  ;;  %v7198_v11 = vperm.slane %v7192_v18, %v11923_v36  ;;  %v7203_v1 = vrot.slane %v7186_v39, 4 }
 0x790   : > { %v7156_v58 = vsel %vm1398_vm6, 0.0, %v7155_v59  ;;  %v7933_v61 = vrot.slane %v7921_v22, 4  ;;  %v7926_v9 = vperm.slane %v7922_v34, %v11700_v17 }
 0x791   : > { %v7194_v60 = vsel %vm1398_vm6, %v7178_v20, %v7193_v25  ;;  %v7205_v46 = vrot.slane %v7190_v49, 4  ;;  %v7928_v41 = vsel %vm1398_vm6, %v7927_v31, %v7156_v58  ;;  %v7207_v20 = vrot.slane %v7198_v11, 4  ;;  %v10365_v25 = vld [vmem:[%s18372_s18] sm:$0xff] }
 0x792   : > { %v7202_v54 = vperm.slane %v7194_v60, %v11923_v36  ;;  %v7204_v30 = vsel %vm1398_vm6, 0.0, %v7203_v1  ;;  %v7932_v35 = vperm.slane %v7928_v41, %v11700_v17  ;;  %v7934_v10 = vsel %vm1398_vm6, %v7933_v61, %v7915_v43  ;;  %8582 = vmatpush.bf16.msrb.mxu3 %v10365_v25 }
 0x793   : > { %v7206_v48 = vsel %vm1398_vm6, 0.0, %v7205_v46  ;;  %v7949_v45 = vsel %vm1398_vm6, %v7205_v46, %v7186_v39  ;;  %v7208_v3 = vsel %vm1398_vm6, 0.0, %v7207_v20  ;;  %v15826_v32 = vperm.slane %v7934_v10, %v11923_v36  ;;  %v10831_v60 = vpop.eup %10830 }
 0x794   : > { %v7209_v51 = vrot.slane %v7202_v54, 4  ;;  %v7954_v38 = vrot.slane %v7206_v48, 4  ;;  %v7939_v28 = vrot.slane %v7932_v35, 4  ;;  %v7953_v62 = vperm.slane %v7949_v45, %v11700_v17  ;;  %v6612_v1 = vpop.xlane.xlu2 %6611 }
 0x795   : > { %v7947_v55 = vrot.slane %v15826_v32, 4  ;;  %v6661_v46 = vmul.f32 %v10831_v60, %v15637_v37 }
 0x796   : > { %v7210_v7 = vsel %vm1398_vm6, 0.0, %v7209_v51  ;;  %v7955_v13 = vsel %vm1398_vm6, %v7954_v38, %v7204_v30  ;;  %v7960_v56 = vsel %vm1398_vm6, %v7209_v51, %v7198_v11  ;;  %v7940_v40 = vsel %vm1398_vm6, %v7939_v28, %v7926_v9 }
 0x797   : > { %v7959_v24 = vperm.slane %v7955_v13, %v11700_v17  ;;  %v7965_v23 = vrot.slane %v7210_v7, 4  ;;  %v7964_v19 = vperm.slane %v7960_v56, %v11700_v17  ;;  %v15838_v42 = vperm.slane %v7940_v40, %v11923_v36 }
 0x798   : > { %v6693_v47 = vpack.c.bf16 %v6661_v46, %v6661_v46 }
 0x799   : > { %v7971_v53 = vrot.slane %v7959_v24, 4  ;;  %v7966_v26 = vsel %vm1398_vm6, %v7965_v23, %v7208_v3  ;;  %v7948_v39 = vsel %vm1398_vm6, %v15838_v42, %v7947_v55 }
 0x79a   : > { %v7970_v6 = vperm.slane %v7966_v26, %v11700_v17  ;;  %v6741_v30 = vunpack.c.l.b16 %v6693_v47 }
 0x79b   : > { %v7972_v50 = vsel %vm1398_vm6, %v7971_v53, %v7953_v62 }
 0x79c   : > { %v15835_v59 = vperm.slane %v7972_v50, %v11923_v36  ;;  %v7977_v5 = vrot.slane %v7970_v6, 4 }
 0x79e   : > { %v7978_v22 = vsel %vm1398_vm6, %v7977_v5, %v7964_v19  ;;  %v7985_v31 = vrot.slane %v15835_v59, 4 }
 0x79f   : > { %v15844_v63 = vperm.slane %v7978_v22, %v11923_v36 }
 0x7a1   : > { %v7986_v49 = vsel %vm1398_vm6, %v15844_v63, %v7985_v31 }
 0x7a2   : > { %v10641_v18 = vpack.i.bf16 %v7986_v49, %v7948_v39 }
 0x7a4   : > { %10642 = vrot.lane.b32.xlu2 %v10641_v18, %s11054_s21  ;;  %v7907_v18 = vrot.slane %v15798_v27, 4 }
 0x7ba   : > { %v6973_v11 = vpop.f32.mrf.mxu0 }
 0x7bb   : > { %v7221_v12 = vrot.slane %v6973_v11, 4  ;;  %v7226_v61 = vperm.slane %v6973_v11, %v11700_v17 }
 0x7bc   : > { %v6580_v4 = vpop.xlane.xlu1 %6579 }
 0x7bd   : > { %10832 = vrcp.f32 %v6580_v4  ;;  %v7222_v41 = vsel %vm1398_vm6, 0.0, %v7221_v12  ;;  %v7231_v34 = vrot.slane %v7226_v61, 4  ;;  %v6614_v12 = vpop.xlane.xlu2 %6613 }
 0x7be   : > { %10834 = vrcp.f32 %v6612_v1  ;;  %v7230_v38 = vperm.slane %v7222_v41, %v11700_v17 }
 0x7c0   : > { %v7243_v9 = vrot.slane %v7230_v38, 4 }
 0x7c2   : > { %v6975_v20 = vpop.f32.mrf.mxu0 }
 0x7c3   : > { %v10833_v58 = vpop.eup %10832  ;;  %v7273_v35 = vrot.slane %v6975_v20, 4  ;;  %v7278_v53 = vperm.slane %v6975_v20, %v11700_v17 }
 0x7c4   : > { %v6610_v54 = vpop.xlane.xlu0 %6609  ;;  %v6582_v16 = vpop.xlane.xlu1 %6581  ;;  %v6662_v48 = vmul.f32 %v10833_v58, %v15672_v2 }
 0x7c5   : > { %10836 = vrcp.f32 %v6610_v54  ;;  %v10835_v43 = vpop.eup %10834  ;;  %v7274_v6 = vsel %vm1398_vm6, 0.0, %v7273_v35  ;;  %v7283_v60 = vrot.slane %v7278_v53, 4 }
 0x7c6   : > { %10838 = vrcp.f32 %v6582_v16  ;;  %v6694_v51 = vpack.c.bf16 %v6662_v48, %v6662_v48  ;;  %v6678_v2 = vmul.f32 %v10835_v43, %v15657_v0  ;;  %v7282_v4 = vperm.slane %v7274_v6, %v11700_v17 }
 0x7c7   : > { %v7945_v16 = vrot.slane %v15838_v42, 4 }
 0x7c8   : > { %v6828_v37 = vpop.f32.mrf.mxu3  ;;  %v6742_v45 = vunpack.c.l.b16 %v6694_v51  ;;  %v6710_v19 = vpack.c.bf16 %v6678_v2, %v6678_v2 }
 0x7c9   : > { %v7211_v7 = vrot.slane %v6828_v37, 4  ;;  %v7216_v13 = vperm.slane %v6828_v37, %v11700_v17  ;;  %v7983_v37 = vrot.slane %v15844_v63, 4 }
 0x7ca   : > { %v6751_v10 = vpack.c.b16 %v6742_v45, %v6741_v30  ;;  %v7295_v30 = vrot.slane %v7282_v4, 4 }
 0x7cb   : > { %v10837_v24 = vpop.eup %10836  ;;  %v7212_v23 = vsel %vm1398_vm6, 0.0, %v7211_v7  ;;  %v7232_v28 = vsel %vm1398_vm6, %v7231_v34, %v7216_v13  ;;  %v7233_v3 = vrot.slane %v7216_v13, 4 }
 0x7cc   : > { %v10839_v62 = vpop.eup %10838  ;;  %v7220_v56 = vperm.slane %v7212_v23, %v11700_v17  ;;  %v6584_v26 = vpop.xlane.xlu0 %6583  ;;  %6847 = vmatmul.bf16.gmra.mxu3 %v6751_v10  ;;  %v6677_v40 = vmul.f32 %v10837_v24, %v15679_v44  ;;  %v7238_v50 = vperm.slane %v7232_v28, %v11923_v36  ;;  %v7869_v44 = vrot.slane %v15779_v33, 4 }
 0x7cd   : > { %v7234_v0 = vsel %vm1398_vm6, %v7226_v61, %v7233_v3  ;;  %10840 = vrcp.f32 %v6584_v26  ;;  %v6663_v49 = vmul.f32 %v10839_v62, %v15677_v21  ;;  %v6887_v21 = vunpack.c.l.b16 %v6710_v19 }
 0x7ce   : > { %v7242_v5 = vperm.slane %v7234_v0, %v11923_v36  ;;  %v7244_v55 = vsel %vm1398_vm6, %v7243_v9, %v7220_v56  ;;  %v7245_v22 = vrot.slane %v7220_v56, 4  ;;  %v6709_v39 = vpack.c.bf16 %v6677_v40, %v6677_v40 }
 0x7cf   : > { %v7250_v31 = vperm.slane %v7244_v55, %v11923_v36  ;;  %v7255_v61 = vrot.slane %v7238_v50, 4  ;;  %v6695_v41 = vpack.c.bf16 %v6663_v49, %v6663_v49  ;;  %10842 = vrcp.f32 %v6614_v12 }
 0x7d0   : > { %v7246_v25 = vsel %vm1398_vm6, %v7230_v38, %v7245_v22  ;;  %v7257_v57 = vrot.slane %v7242_v5, 4  ;;  %v6830_v11 = vpop.f32.mrf.mxu3  ;;  %v6886_v54 = vunpack.c.l.b16 %v6709_v39 }
 0x7d1   : > { %v7263_v1 = vrot.slane %v6830_v11, 4  ;;  %v7268_v46 = vperm.slane %v6830_v11, %v11700_v17  ;;  %v7254_v58 = vperm.slane %v7246_v25, %v11923_v36  ;;  %v7259_v47 = vrot.slane %v7250_v31, 4 }
 0x7d2   : > { %v7258_v48 = vsel %vm1398_vm6, 0.0, %v7257_v57  ;;  %v6896_v34 = vpack.c.b16 %v6887_v21, %v6886_v54  ;;  %v7256_v35 = vsel %vm1398_vm6, 0.0, %v7255_v61  ;;  %v15892_v62 = vsel %vm1398_vm6, %v7257_v57, %v7238_v50 }
 0x7d3   : > { %v10841_v43 = vpop.eup %10840  ;;  %v7264_v20 = vsel %vm1398_vm6, 0.0, %v7263_v1  ;;  %v7284_v51 = vsel %vm1398_vm6, %v7283_v60, %v7268_v46  ;;  %v7285_v38 = vrot.slane %v7268_v46, 4  ;;  %v7261_v7 = vrot.slane %v7254_v58, 4 }
 0x7d4   : > { %v7272_v45 = vperm.slane %v7264_v20, %v11700_v17  ;;  %v7290_v2 = vperm.slane %v7284_v51, %v11923_v36  ;;  %6992 = vmatmul.bf16.gmra.mxu0 %v6896_v34  ;;  %v7992_v10 = vrot.slane %v7258_v48, 4  ;;  %v6664_v28 = vmul.f32 %v10841_v43, %v15685_v52 }
 0x7d5   : > { %v7286_v13 = vsel %vm1398_vm6, %v7278_v53, %v7285_v38  ;;  %v15889_v3 = vsel %vm1398_vm6, 0.0, %v7259_v47  ;;  %v6743_v26 = vunpack.c.l.b16 %v6695_v41  ;;  %v15898_v19 = vsel %vm1398_vm6, 0.0, %v7261_v7  ;;  %v15901_v50 = vpop.eup %10842 }
 0x7d6   : > { %v7294_v24 = vperm.slane %v7286_v13, %v11923_v36  ;;  %v7297_v23 = vrot.slane %v7272_v45, 4  ;;  %v7296_v9 = vsel %vm1398_vm6, %v7295_v30, %v7272_v45  ;;  %v7307_v5 = vrot.slane %v7290_v2, 4 }
 0x7d7   : > { %v6696_v22 = vpack.c.bf16 %v6664_v28, %v6664_v28  ;;  %v7993_v39 = vsel %vm1398_vm6, %v7992_v10, %v7256_v35  ;;  %v15905_v49 = vperm.slane %v7296_v9, %v11923_v36  ;;  %v7991_v11 = vperm.slane %v15892_v62, %v11700_v17 }
 0x7d8   : > { %v6833_v56 = vpop.f32.mrf.mxu3  ;;  %v7298_v53 = vsel %vm1398_vm6, %v7282_v4, %v7297_v23  ;;  %v7309_v40 = vrot.slane %v7294_v24, 4  ;;  %v15912_v4 = vsel %vm1398_vm6, %v7261_v7, %v7250_v31  ;;  %v7997_v54 = vperm.slane %v7993_v39, %v11700_v17 }
 0x7d9   : > { %v7315_v6 = vrot.slane %v6833_v56, 4  ;;  %v7320_v0 = vperm.slane %v6833_v56, %v11700_v17  ;;  %v7306_v52 = vperm.slane %v7298_v53, %v11923_v36  ;;  %v6744_v61 = vunpack.c.l.b16 %v6696_v22 }
 0x7da   : > { %v6978_v55 = vpop.f32.mrf.mxu0  ;;  %v7310_v25 = vsel %vm1398_vm6, 0.0, %v7309_v40  ;;  %v8003_v21 = vrot.slane %v15898_v19, 4  ;;  %v7308_v48 = vsel %vm1398_vm6, 0.0, %v7307_v5  ;;  %v7311_v41 = vrot.slane %v15905_v49, 4 }
 0x7db   : > { %v7316_v57 = vsel %vm1398_vm6, 0.0, %v7315_v6  ;;  %v8030_v60 = vrot.slane %v7310_v25, 4  ;;  %v7337_v1 = vrot.slane %v7320_v0, 4  ;;  %v7325_v12 = vrot.slane %v6978_v55, 4 }
 0x7dc   : > { %v7324_v46 = vperm.slane %v7316_v57, %v11700_v17  ;;  %v7330_v58 = vperm.slane %v6978_v55, %v11700_v17  ;;  %v15919_v47 = vrot.slane %v7306_v52, 4  ;;  %v15923_v31 = vsel %vm1398_vm6, %v7309_v40, %v7290_v2  ;;  %v6616_v5 = vpop.xlane.xlu1 %6615 }
 0x7dd   : > { %v7326_v20 = vsel %vm1398_vm6, 0.0, %v7325_v12  ;;  %v6752_v30 = vpack.c.b16 %v6744_v61, %v6743_v26  ;;  %v8031_v35 = vsel %vm1398_vm6, %v8030_v60, %v7308_v48  ;;  %v15943_v22 = vrot.slane %v7997_v54, 4 }
 0x7de   : > { %v7349_v43 = vrot.slane %v7324_v46, 4  ;;  %v7334_v51 = vperm.slane %v7326_v20, %v11700_v17  ;;  %v7335_v38 = vrot.slane %v7330_v58, 4  ;;  %v7338_v34 = vsel %vm1398_vm6, %v7330_v58, %v7337_v1 }
 0x7df   : > { %v7346_v7 = vperm.slane %v7338_v34, %v11923_v36  ;;  %v15933_v2 = vsel %vm1398_vm6, 0.0, %v15919_v47  ;;  %6852 = vmatmul.bf16.gmra.mxu3 %v6752_v30  ;;  %v8035_v6 = vperm.slane %v8031_v35, %v11700_v17  ;;  %v15946_v39 = vsel %vm1398_vm6, 0.0, %v7311_v41 }
 0x7e0   : > { %v6835_v45 = vpop.f32.mrf.mxu3  ;;  %v7336_v24 = vsel %vm1398_vm6, %v7335_v38, %v7320_v0  ;;  %v7347_v23 = vrot.slane %v7334_v51, 4  ;;  %v7350_v28 = vsel %vm1398_vm6, %v7334_v51, %v7349_v43  ;;  %v8041_v61 = vrot.slane %v15933_v2, 4 }
 0x7e1   : > { %v7367_v13 = vrot.slane %v6835_v45, 4  ;;  %v7372_v10 = vperm.slane %v6835_v45, %v11700_v17  ;;  %v7342_v56 = vperm.slane %v7336_v24, %v11923_v36  ;;  %v7358_v26 = vperm.slane %v7350_v28, %v11923_v36 }
 0x7e2   : > { %v6980_v9 = vpop.f32.mrf.mxu0  ;;  %v7361_v53 = vrot.slane %v7346_v7, 4  ;;  %v7348_v52 = vsel %vm1398_vm6, %v7347_v23, %v7324_v46  ;;  %v8029_v46 = vperm.slane %v15923_v31, %v11700_v17  ;;  %10844 = vrcp.f32 %v6616_v5 }
 0x7e3   : > { %v7368_v40 = vsel %vm1398_vm6, 0.0, %v7367_v13  ;;  %v7377_v0 = vrot.slane %v6980_v9, 4  ;;  %v7359_v25 = vrot.slane %v7342_v56, 4  ;;  %v7389_v57 = vrot.slane %v7372_v10, 4 }
 0x7e4   : > { %v7376_v55 = vperm.slane %v7368_v40, %v11700_v17  ;;  %v15949_v60 = vperm.slane %v7348_v52, %v11923_v36  ;;  %v7362_v1 = vsel %vm1398_vm6, 0.0, %v7361_v53  ;;  %v7365_v12 = vrot.slane %v7358_v26, 4 }
 0x7e5   : > { %v7378_v58 = vsel %vm1398_vm6, 0.0, %v7377_v0  ;;  %v15956_v48 = vrot.slane %v8035_v6, 4  ;;  %v15959_v41 = vsel %vm1398_vm6, %v7361_v53, %v7342_v56  ;;  %v7382_v43 = vperm.slane %v6980_v9, %v11700_v17 }
 0x7e6   : > { %v7401_v54 = vrot.slane %v7376_v55, 4  ;;  %v8002_v51 = vperm.slane %v15912_v4, %v11700_v17  ;;  %v7360_v38 = vsel %vm1398_vm6, 0.0, %v7359_v25  ;;  %v8068_v34 = vrot.slane %v7362_v1, 4 }
 0x7e7   : > { %v7386_v30 = vperm.slane %v7378_v58, %v11700_v17  ;;  %v7363_v35 = vrot.slane %v15949_v60, 4  ;;  %v15968_v7 = vsel %vm1398_vm6, 0.0, %v7365_v12  ;;  %v7387_v13 = vrot.slane %v7382_v43, 4 }
 0x7e8   : > { %v6838_v20 = vpop.f32.mrf.mxu3  ;;  %v7390_v24 = vsel %vm1398_vm6, %v7382_v43, %v7389_v57  ;;  %v8067_v53 = vperm.slane %v15959_v41, %v11700_v17  ;;  %v15979_v5 = vpop.eup %10844  ;;  %v8069_v58 = vsel %vm1398_vm6, %v8068_v34, %v7360_v38  ;;  %v8004_v38 = vsel %vm1398_vm6, %v8003_v21, %v15889_v3 }
 0x7e9   : > { %v7419_v45 = vrot.slane %v6838_v20, 4  ;;  %v7398_v23 = vperm.slane %v7390_v24, %v11923_v36  ;;  %v7399_v28 = vrot.slane %v7386_v30, 4  ;;  %v7402_v9 = vsel %vm1398_vm6, %v7386_v30, %v7401_v54 }
 0x7ea   : > { %v7424_v56 = vperm.slane %v6838_v20, %v11700_v17  ;;  %v6983_v26 = vpop.f32.mrf.mxu0  ;;  %v7388_v40 = vsel %vm1398_vm6, %v7387_v13, %v7372_v10  ;;  %v7410_v6 = vperm.slane %v7402_v9, %v11923_v36  ;;  %v15987_v54 = vsel %vm1398_vm6, %v7365_v12, %v15949_v60 }
 0x7eb   : > { %v7420_v52 = vsel %vm1398_vm6, 0.0, %v7419_v45  ;;  %v7394_v0 = vperm.slane %v7388_v40, %v11923_v36  ;;  %v7400_v25 = vsel %vm1398_vm6, %v7399_v28, %v7376_v55  ;;  %v7413_v57 = vrot.slane %v7398_v23, 4 }
 0x7ec   : > { %v7428_v1 = vperm.slane %v7420_v52, %v11700_v17  ;;  %v7429_v10 = vrot.slane %v6983_v26, 4  ;;  %v7434_v43 = vperm.slane %v6983_v26, %v11700_v17  ;;  %v7406_v20 = vperm.slane %v7400_v25, %v11923_v36 }
 0x7ed   : > { %v7411_v30 = vrot.slane %v7394_v0, 4  ;;  %v7414_v45 = vsel %vm1398_vm6, 0.0, %v7413_v57  ;;  %v7441_v13 = vrot.slane %v7424_v56, 4  ;;  %v8079_v55 = vrot.slane %v15968_v7, 4 }
 0x7ee   : > { %v8106_v24 = vrot.slane %v7414_v45, 4  ;;  %v7453_v23 = vrot.slane %v7428_v1, 4  ;;  %v8073_v60 = vperm.slane %v8069_v58, %v11700_v17  ;;  %v7417_v34 = vrot.slane %v7410_v6, 4 }
 0x7ef   : > { %v7412_v12 = vsel %vm1398_vm6, 0.0, %v7411_v30  ;;  %v7430_v28 = vsel %vm1398_vm6, 0.0, %v7429_v10  ;;  %v16001_v9 = vsel %vm1398_vm6, %v7413_v57, %v7394_v0  ;;  %v7439_v52 = vrot.slane %v7434_v43, 4 }
 0x7f0   : > { %v8107_v26 = vsel %vm1398_vm6, %v8106_v24, %v7412_v12  ;;  %v7438_v40 = vperm.slane %v7430_v28, %v11700_v17  ;;  %v7415_v25 = vrot.slane %v7406_v20, 4  ;;  %v7442_v19 = vsel %vm1398_vm6, %v7434_v43, %v7441_v13  ;;  %v6840_v62 = vpop.f32.mrf.mxu3 }
 0x7f1   : > { %v8008_v3 = vperm.slane %v8004_v38, %v11700_v17  ;;  %v8010_v21 = vsel %vm1398_vm6, %v15943_v22, %v7991_v11  ;;  %v7440_v6 = vsel %vm1398_vm6, %v7439_v52, %v7424_v56  ;;  %v7450_v0 = vperm.slane %v7442_v19, %v11923_v36 }
 0x7f2   : > { %v7451_v57 = vrot.slane %v7438_v40, 4  ;;  %v7454_v58 = vsel %vm1398_vm6, %v7438_v40, %v7453_v23  ;;  %v16016_v10 = vsel %vm1398_vm6, 0.0, %v7417_v34  ;;  %v8111_v43 = vperm.slane %v8107_v26, %v11700_v17 }
 0x7f3   : > { %v7446_v30 = vperm.slane %v7440_v6, %v11923_v36  ;;  %v7462_v45 = vperm.slane %v7454_v58, %v11923_v36  ;;  %v7465_v11 = vrot.slane %v7450_v0, 4  ;;  %v16023_v22 = vperm.slane %v8010_v21, %v11923_v36 }
 0x7f4   : > { %v7452_v13 = vsel %vm1398_vm6, %v7451_v57, %v7428_v1  ;;  %v8015_v56 = vrot.slane %v8008_v3, 4  ;;  %v16026_v24 = vsel %vm1398_vm6, 0.0, %v7363_v35  ;;  %v16028_v23 = vrot.slane %v8073_v60, 4 }
 0x7f5   : > { %v7463_v38 = vrot.slane %v7446_v30, 4  ;;  %v8036_v12 = vsel %vm1398_vm6, %v15919_v47, %v15905_v49  ;;  %v8105_v28 = vperm.slane %v16001_v9, %v11700_v17  ;;  %v16036_v1 = vsel %vm1398_vm6, %v7417_v34, %v7406_v20 }
 0x7f6   : > { %v16039_v26 = vperm.slane %v7452_v13, %v11923_v36  ;;  %v7469_v40 = vrot.slane %v7462_v45, 4  ;;  %v16042_v35 = vsel %vm1398_vm6, 0.0, %v7415_v25  ;;  %v8117_v60 = vrot.slane %v16016_v10, 4 }
 0x7f7   : > { %v16045_v52 = vrot.slane %v8111_v43, 4  ;;  %v16048_v19 = vsel %vm1398_vm6, %v7465_v11, %v7446_v30  ;;  %v7466_v49 = vsel %vm1398_vm6, 0.0, %v7465_v11  ;;  %v8016_v47 = vsel %vm1398_vm6, %v8015_v56, %v8002_v51  ;;  %v6985_v51 = vpop.f32.mrf.mxu0 }
 0x7f8   : > { %v8023_v20 = vrot.slane %v16023_v22, 4  ;;  %v8040_v34 = vperm.slane %v8036_v12, %v11700_v17  ;;  %v7464_v25 = vsel %vm1398_vm6, 0.0, %v7463_v38  ;;  %v8042_v3 = vsel %vm1398_vm6, %v8041_v61, %v15946_v39  ;;  %v6843_v11 = vpop.f32.mrf.mxu3 }
 0x7f9   : > { %v8048_v21 = vsel %vm1398_vm6, %v15956_v48, %v8029_v46  ;;  %v6679_v4 = vmul.f32 %v15901_v50, %v15661_v14  ;;  %v7467_v6 = vrot.slane %v16039_v26, 4  ;;  %v16071_v0 = vsel %vm1398_vm6, 0.0, %v7469_v40 }
 0x7fa   : > { %v8143_v2 = vperm.slane %v16048_v19, %v11700_v17  ;;  %v8046_v39 = vperm.slane %v8042_v3, %v11700_v17  ;;  %v8144_v61 = vrot.slane %v7466_v49, 4  ;;  %v16077_v31 = vperm.slane %v8048_v21, %v11923_v36 }
 0x7fb   : > { %v6680_v46 = vmul.f32 %v15979_v5, %v15700_v8  ;;  %v6711_v48 = vpack.c.bf16 %v6679_v4, %v6679_v4  ;;  %v7471_v50 = vrot.slane %v6840_v62, 4  ;;  %v7476_v57 = vperm.slane %v6840_v62, %v11700_v17 }
 0x7fc   : > { %v8053_v14 = vrot.slane %v8046_v39, 4  ;;  %v7481_v58 = vrot.slane %v6985_v51, 4  ;;  %v16083_v43 = vperm.slane %v8016_v47, %v11923_v36  ;;  %v8061_v30 = vrot.slane %v16077_v31, 4 }
 0x7fd   : > { %v6712_v45 = vpack.c.bf16 %v6680_v46, %v6680_v46  ;;  %v6888_v13 = vunpack.c.l.b16 %v6711_v48  ;;  %v7472_v38 = vsel %vm1398_vm6, 0.0, %v7471_v50  ;;  %v7493_v12 = vrot.slane %v7476_v57, 4 }
 0x7fe   : > { %v8054_v56 = vsel %vm1398_vm6, %v8053_v14, %v8040_v34  ;;  %v7482_v8 = vsel %vm1398_vm6, 0.0, %v7481_v58  ;;  %v7480_v49 = vperm.slane %v7472_v38, %v11700_v17  ;;  %v7486_v47 = vperm.slane %v6985_v51, %v11700_v17  ;;  %v16212_v27 = vpop.permute.xlu2 %10642 }
 0x7ff   : > { %v16090_v5 = vperm.slane %v8054_v56, %v11923_v36  ;;  %v6889_v62 = vunpack.c.l.b16 %v6712_v45  ;;  %v8145_v3 = vsel %vm1398_vm6, %v8144_v61, %v7464_v25  ;;  %v16097_v21 = vsel %vm1398_vm6, %v7469_v40, %v16039_v26 }
 0x800   : > { %v7490_v34 = vperm.slane %v7482_v8, %v11700_v17  ;;  %v7523_v4 = vrot.slane %v6843_v11, 4  ;;  %v8024_v39 = vsel %vm1398_vm6, %v16083_v43, %v8023_v20  ;;  %v7505_v14 = vrot.slane %v7480_v49, 4 }
 0x801   : > { %v8062_v46 = vsel %vm1398_vm6, %v16090_v5, %v8061_v30  ;;  %v6897_v48 = vpack.c.b16 %v6889_v62, %v6888_v13  ;;  %v7491_v58 = vrot.slane %v7486_v47, 4  ;;  %v7494_v51 = vsel %vm1398_vm6, %v7486_v47, %v7493_v12  ;;  %v16116_v38 = vpop.f32.mrf.mxu0 }
 0x802   : > { %v10646_v50 = vpack.i.bf16 %v8062_v46, %v8024_v39  ;;  %v7503_v25 = vrot.slane %v7490_v34, 4  ;;  %v8149_v61 = vperm.slane %v8145_v3, %v11700_v17  ;;  %v7502_v26 = vperm.slane %v7494_v51, %v11923_v36 }
 0x803   : > { %6997 = vmatmul.bf16.gmra.mxu0 %v6897_v48  ;;  %v7506_v40 = vsel %vm1398_vm6, %v7490_v34, %v7505_v14  ;;  %v7524_v45 = vsel %vm1398_vm6, 0.0, %v7523_v4  ;;  %v7492_v20 = vsel %vm1398_vm6, %v7491_v58, %v7476_v57  ;;  %v16114_v56 = vperm.slane %v6843_v11, %v11700_v17 }
 0x804   : > { %10647 = vrot.lane.b32.xlu1 %v10646_v50, %s11054_s21  ;;  %v7504_v30 = vsel %vm1398_vm6, %v7503_v25, %v7480_v49  ;;  %v7514_v13 = vperm.slane %v7506_v40, %v11923_v36  ;;  %v7498_v12 = vperm.slane %v7492_v20, %v11923_v36  ;;  %v7517_v8 = vrot.slane %v7502_v26, 4 }
 0x805   : > { %v16120_v62 = vperm.slane %v7524_v45, %v11700_v17  ;;  %v8080_v57 = vsel %vm1398_vm6, %v8079_v55, %v16026_v24  ;;  %v7510_v49 = vperm.slane %v7504_v30, %v11923_v36  ;;  %v8086_v11 = vsel %vm1398_vm6, %v16028_v23, %v8067_v53 }
 0x806   : > { %v7521_v47 = vrot.slane %v7514_v13, 4  ;;  %v8084_v3 = vperm.slane %v8080_v57, %v11700_v17  ;;  %v16134_v34 = vsel %vm1398_vm6, 0.0, %v7467_v6  ;;  %v8155_v4 = vrot.slane %v16071_v0, 4 }
 0x807   : > { %v7515_v39 = vrot.slane %v7498_v12, 4  ;;  %v7518_v7 = vsel %vm1398_vm6, 0.0, %v7517_v8  ;;  %v16138_v55 = vrot.slane %v8149_v61, 4  ;;  %v16141_v24 = vsel %vm1398_vm6, %v7517_v8, %v7498_v12  ;;  %v10638_v12 = vpop.permute.xlu0 %10637 }
 0x808   : > { %v8182_v46 = vrot.slane %v7518_v7, 4  ;;  %v8078_v41 = vperm.slane %v15987_v54, %v11700_v17  ;;  %v7545_v53 = vrot.slane %v16114_v56, 4  ;;  %v7557_v23 = vrot.slane %v16120_v62, 4  ;;  %v6845_v54 = vpop.f32.mrf.mxu3 }
 0x809   : > { %v7516_v48 = vsel %vm1398_vm6, 0.0, %v7515_v39  ;;  %v16149_v6 = vperm.slane %v8086_v11, %v11923_v36  ;;  %v7519_v14 = vrot.slane %v7510_v49, 4  ;;  %v16152_v50 = vsel %vm1398_vm6, 0.0, %v7521_v47 }
 0x80a   : > { %v8091_v58 = vrot.slane %v8084_v3, 4  ;;  %v8118_v51 = vsel %vm1398_vm6, %v8117_v60, %v16042_v35  ;;  %v8181_v25 = vperm.slane %v16141_v24, %v11700_v17  ;;  %v16161_v61 = vsel %vm1398_vm6, %v7521_v47, %v7510_v49  ;;  %v6990_v49 = vpop.f32.mrf.mxu0 }
 0x80b   : > { %v8122_v26 = vperm.slane %v8118_v51, %v11700_v17  ;;  %v8124_v40 = vsel %vm1398_vm6, %v16045_v52, %v8105_v28  ;;  %v16170_v45 = vsel %vm1398_vm6, %v8182_v46, %v7516_v48  ;;  %v8099_v35 = vrot.slane %v16149_v6, 4 }
 0x80c   : > { %v8092_v10 = vsel %vm1398_vm6, %v8091_v58, %v8078_v41  ;;  %v16175_v60 = vperm.slane %v8124_v40, %v11923_v36  ;;  %v8116_v30 = vperm.slane %v16036_v1, %v11700_v17  ;;  %v7575_v13 = vrot.slane %v6845_v54, 4 }
 0x80d   : > { %v16178_v20 = vperm.slane %v8092_v10, %v11923_v36  ;;  %v8129_v9 = vrot.slane %v8122_v26, 4  ;;  %v16183_v28 = vsel %vm1398_vm6, 0.0, %v7519_v14  ;;  %v8193_v52 = vrot.slane %v16152_v50, 4 }
 0x80e   : > { %v8137_v8 = vrot.slane %v16175_v60, 4  ;;  %v7580_v57 = vperm.slane %v6845_v54, %v11700_v17  ;;  %v8187_v47 = vperm.slane %v16170_v45, %v11700_v17  ;;  %v7576_v1 = vsel %vm1398_vm6, 0.0, %v7575_v13 }
 0x80f   : > { %v8130_v3 = vsel %vm1398_vm6, %v8129_v9, %v8116_v30  ;;  %v7870_v11 = vsel %vm1398_vm6, %v7869_v44, %v15764_v15  ;;  %v8100_v39 = vsel %vm1398_vm6, %v16178_v20, %v8099_v35  ;;  %v7908_v46 = vsel %vm1398_vm6, %v7907_v18, %v15784_v29 }
 0x810   : > { %v16199_v7 = vperm.slane %v8130_v3, %v11923_v36  ;;  %v10640_v41 = vunpack.i.h.bf16 %v10638_v12  ;;  %v10639_v48 = vunpack.i.l.bf16 %v10638_v12  ;;  %v7533_v14 = vrot.slane %v16116_v38, 4 }
 0x811   : > { %v7538_v33 = vperm.slane %v16116_v38, %v11700_v17  ;;  %v7585_v58 = vrot.slane %v6990_v49, 4  ;;  %v7584_v44 = vperm.slane %v7576_v1, %v11700_v17  ;;  %v7597_v51 = vrot.slane %v7580_v57, 4 }
 0x812   : > { %v8138_v15 = vsel %vm1398_vm6, %v16199_v7, %v8137_v8  ;;  %v8508_v54 = vsel %vm6086_vm7, %v7908_v46, %v10640_v41  ;;  %v8507_v29 = vsel %vm6086_vm7, %v7870_v11, %v10639_v48  ;;  %v7534_v18 = vsel %vm1398_vm6, 0.0, %v7533_v14 }
 0x813   : > { %v10651_v26 = vpack.i.bf16 %v8138_v15, %v8100_v39  ;;  %v7543_v40 = vrot.slane %v7538_v33, 4  ;;  %v8523_v45 = vpack.c.bf16 %v8508_v54, %v8507_v29  ;;  %v7542_v38 = vperm.slane %v7534_v18, %v11700_v17 }
 0x814   : > { %v7546_v10 = vsel %vm1398_vm6, %v7538_v33, %v7545_v53  ;;  %v7586_v35 = vsel %vm1398_vm6, 0.0, %v7585_v58  ;;  %v7590_v13 = vperm.slane %v6990_v49, %v11700_v17  ;;  %v10645_v8 = vunpack.i.h.bf16 %v16212_v27 }
 0x815   : > { %10652 = vrot.lane.b32.xlu0 %v10651_v26, %s11054_s21  ;;  %v7544_v30 = vsel %vm1398_vm6, %v7543_v40, %v16114_v56  ;;  %v7554_v9 = vperm.slane %v7546_v10, %v11923_v36  ;;  %v7594_v12 = vperm.slane %v7586_v35, %v11700_v17  ;;  %v7555_v1 = vrot.slane %v7542_v38, 4  ;;  %10282 = vmatmul.msk.bf16.vlgmr.msrb.gmra.mxu3 %vm834_vm1, %v8523_v45 }
 0x816   : > { %v7550_v3 = vperm.slane %v7544_v30, %v11923_v36  ;;  %v7558_v53 = vsel %vm1398_vm6, %v7542_v38, %v7557_v23  ;;  %v7595_v46 = vrot.slane %v7590_v13, 4  ;;  %v7598_v56 = vsel %vm1398_vm6, %v7590_v13, %v7597_v51 }
 0x817   : > { %v7566_v11 = vperm.slane %v7558_v53, %v11923_v36  ;;  %v7569_v39 = vrot.slane %v7554_v9, 4  ;;  %v10644_v41 = vunpack.i.l.bf16 %v16212_v27  ;;  %v7556_v49 = vsel %vm1398_vm6, %v7555_v1, %v16120_v62 }
 0x818   : > { %v7567_v48 = vrot.slane %v7550_v3, 4  ;;  %v7607_v14 = vrot.slane %v7594_v12, 4  ;;  %v7609_v33 = vrot.slane %v7584_v44, 4  ;;  %v7562_v58 = vperm.slane %v7556_v49, %v11923_v36 }
 0x819   : > { %v7570_v23 = vsel %vm1398_vm6, 0.0, %v7569_v39  ;;  %v7573_v15 = vrot.slane %v7566_v11, 4  ;;  %v7596_v29 = vsel %vm1398_vm6, %v7595_v46, %v7580_v57  ;;  %v7606_v51 = vperm.slane %v7598_v56, %v11923_v36 }
 0x81a   : > { %v7568_v54 = vsel %vm1398_vm6, 0.0, %v7567_v48  ;;  %v8220_v26 = vrot.slane %v7570_v23, 4  ;;  %v8199_v18 = vrot.slane %v8187_v47, 4  ;;  %v8215_v40 = vsel %vm1398_vm6, %v7569_v39, %v7550_v3 }
 0x81b   : > { %v7602_v62 = vperm.slane %v7596_v29, %v11923_v36  ;;  %v8154_v45 = vperm.slane %v16097_v21, %v11700_v17  ;;  %v7571_v38 = vrot.slane %v7562_v58, 4  ;;  %v7608_v35 = vsel %vm1398_vm6, %v7607_v14, %v7584_v44 }
 0x81c   : > { %v8221_v10 = vsel %vm1398_vm6, %v8220_v26, %v7568_v54  ;;  %v7610_v30 = vsel %vm1398_vm6, %v7594_v12, %v7609_v33  ;;  %v7574_v9 = vsel %vm1398_vm6, 0.0, %v7573_v15  ;;  %v7614_v47 = vperm.slane %v7608_v35, %v11923_v36 }
 0x81d   : > { %v8225_v57 = vperm.slane %v8221_v10, %v11700_v17  ;;  %v7618_v13 = vperm.slane %v7610_v30, %v11923_v36  ;;  %v7619_v3 = vrot.slane %v7602_v62, 4  ;;  %v7621_v1 = vrot.slane %v7606_v51, 4 }
 0x81e   : > { %v8156_v21 = vsel %vm1398_vm6, %v8155_v4, %v16134_v34  ;;  %v8162_v44 = vsel %vm1398_vm6, %v16138_v55, %v8143_v2  ;;  %v8219_v12 = vperm.slane %v8215_v40, %v11700_v17  ;;  %v7623_v53 = vrot.slane %v7614_v47, 4 }
 0x81f   : > { %v7625_v11 = vrot.slane %v7618_v13, 4  ;;  %v8160_v39 = vperm.slane %v8156_v21, %v11700_v17  ;;  %v8226_v46 = vsel %vm1398_vm6, %v7573_v15, %v7562_v58  ;;  %v7620_v56 = vsel %vm1398_vm6, 0.0, %v7619_v3 }
 0x820   : > { %v7622_v0 = vsel %vm1398_vm6, 0.0, %v7621_v1  ;;  %v8253_v34 = vsel %vm1398_vm6, %v7621_v1, %v7602_v62  ;;  %v7572_v4 = vsel %vm1398_vm6, 0.0, %v7571_v38  ;;  %v8231_v19 = vrot.slane %v7574_v9, 4 }
 0x821   : > { %v8258_v49 = vrot.slane %v7622_v0, 4  ;;  %v16267_v2 = vperm.slane %v8162_v44, %v11923_v36  ;;  %v8237_v55 = vrot.slane %v8225_v57, 4  ;;  %v7624_v48 = vsel %vm1398_vm6, 0.0, %v7623_v53 }
 0x822   : > { %v7626_v14 = vsel %vm1398_vm6, 0.0, %v7625_v11  ;;  %v8167_v33 = vrot.slane %v8160_v39, 4  ;;  %v8257_v58 = vperm.slane %v8253_v34, %v11700_v17  ;;  %v8194_v15 = vsel %vm1398_vm6, %v8193_v52, %v16183_v28 }
 0x823   : > { %v8259_v23 = vsel %vm1398_vm6, %v8258_v49, %v7620_v56  ;;  %v8200_v54 = vsel %vm1398_vm6, %v8199_v18, %v8181_v25  ;;  %v8198_v51 = vperm.slane %v8194_v15, %v11700_v17  ;;  %v8269_v62 = vrot.slane %v7626_v14, 4 }
 0x824   : > { %v8263_v26 = vperm.slane %v8259_v23, %v11700_v17  ;;  %v8168_v29 = vsel %vm1398_vm6, %v8167_v33, %v8154_v45  ;;  %v16285_v40 = vperm.slane %v8200_v54, %v11923_v36  ;;  %v8175_v38 = vrot.slane %v16267_v2, 4 }
 0x825   : > { %v8192_v50 = vperm.slane %v16161_v61, %v11700_v17  ;;  %v7946_v24 = vsel %vm1398_vm6, %v7945_v16, %v15826_v32  ;;  %v8205_v28 = vrot.slane %v8198_v51, 4  ;;  %v7984_v52 = vsel %vm1398_vm6, %v7983_v37, %v15835_v59 }
 0x826   : > { %v8275_v25 = vrot.slane %v8263_v26, 4  ;;  %v8509_v18 = vsel %vm6086_vm7, %v7946_v24, %v10644_v41  ;;  %v8172_v45 = vperm.slane %v8168_v29, %v11923_v36  ;;  %v8213_v10 = vrot.slane %v16285_v40, 4 }
 0x827   : > { %v8510_v61 = vsel %vm6086_vm7, %v7984_v52, %v10645_v8  ;;  %v8232_v42 = vsel %vm1398_vm6, %v8231_v19, %v7572_v4  ;;  %v8206_v32 = vsel %vm1398_vm6, %v8205_v28, %v8192_v50  ;;  %v8238_v63 = vsel %vm1398_vm6, %v8237_v55, %v8219_v12 }
 0x828   : > { %v8524_v16 = vpack.c.bf16 %v8510_v61, %v8509_v18  ;;  %v8236_v35 = vperm.slane %v8232_v42, %v11700_v17  ;;  %v8264_v59 = vsel %vm1398_vm6, %v7625_v11, %v7614_v47  ;;  %v16310_v37 = vperm.slane %v8206_v32, %v11923_v36 }
 0x829   : > { %v16313_v41 = vperm.slane %v8238_v63, %v11923_v36  ;;  %v8270_v27 = vsel %vm1398_vm6, %v8269_v62, %v7624_v48  ;;  %v8230_v8 = vperm.slane %v8226_v46, %v11700_v17  ;;  %v8276_v57 = vsel %vm1398_vm6, %v8275_v25, %v8257_v58 }
 0x82a   : > { %10283 = vmatmul.msk.bf16.gmra.mxu3 %vm834_vm1, %v8524_v16  ;;  %v8243_v30 = vrot.slane %v8236_v35, 4  ;;  %v8274_v9 = vperm.slane %v8270_v27, %v11700_v17  ;;  %v8176_v13 = vsel %vm1398_vm6, %v8172_v45, %v8175_v38  ;;  %v8214_v47 = vsel %vm1398_vm6, %v16310_v37, %v8213_v10 }
 0x82b   : > { %v16324_v3 = vperm.slane %v8276_v57, %v11923_v36  ;;  %v10656_v1 = vpack.i.bf16 %v8214_v47, %v8176_v13  ;;  %v8268_v44 = vperm.slane %v8264_v59, %v11700_v17  ;;  %v8251_v11 = vrot.slane %v16313_v41, 4 }
 0x82c   : > { %v8244_v21 = vsel %vm1398_vm6, %v8243_v30, %v8230_v8  ;;  %v8281_v12 = vrot.slane %v8274_v9, 4  ;;  %v8173_v26 = vrot.slane %v8172_v45, 4 }
 0x82d   : > { %v16329_v53 = vperm.slane %v8244_v21, %v11923_v36  ;;  %v8289_v39 = vrot.slane %v16324_v3, 4  ;;  %10657 = vrot.lane.b32.xlu2 %v10656_v1, %s11054_s21 }
 0x82e   : > { %v8282_v46 = vsel %vm1398_vm6, %v8281_v12, %v8268_v44  ;;  %v16353_v10 = vsel %vm1398_vm6, %v8173_v26, %v16267_v2 }
 0x82f   : > { %v16336_v56 = vperm.slane %v8282_v46, %v11923_v36  ;;  %v8252_v0 = vsel %vm1398_vm6, %v16329_v53, %v8251_v11 }
 0x831   : > { %v8290_v34 = vsel %vm1398_vm6, %v16336_v56, %v8289_v39 }
 0x832   : > { %v10661_v4 = vpack.i.bf16 %v8290_v34, %v8252_v0 }
 0x834   : > { %10662 = vrot.lane.b32.xlu0 %v10661_v4, %s11054_s21 }
 0x84f   : > { %v6848_v19 = vpop.f32.mrf.mxu3 }
 0x850   : > { %v7632_v55 = vperm.slane %v6848_v19, %v11700_v17  ;;  %v7627_v33 = vrot.slane %v6848_v19, 4 }
 0x851   : > { %v6993_v49 = vpop.f32.mrf.mxu0 }
 0x852   : > { %v7649_v58 = vrot.slane %v7632_v55, 4  ;;  %v7642_v23 = vperm.slane %v6993_v49, %v11700_v17  ;;  %v7628_v62 = vsel %vm1398_vm6, 0.0, %v7627_v33  ;;  %v7637_v38 = vrot.slane %v6993_v49, 4 }
 0x853   : > { %v7636_v45 = vperm.slane %v7628_v62, %v11700_v17 }
 0x854   : > { %v7647_v50 = vrot.slane %v7642_v23, 4  ;;  %v7650_v24 = vsel %vm1398_vm6, %v7642_v23, %v7649_v58  ;;  %v7638_v42 = vsel %vm1398_vm6, 0.0, %v7637_v38 }
 0x855   : > { %v7658_v61 = vperm.slane %v7650_v24, %v11923_v36  ;;  %v7661_v27 = vrot.slane %v7636_v45, 4  ;;  %v7646_v2 = vperm.slane %v7638_v42, %v11700_v17 }
 0x856   : > { %v7648_v32 = vsel %vm1398_vm6, %v7647_v50, %v7632_v55  ;;  %v8059_v50 = vrot.slane %v16090_v5, 4 }
 0x857   : > { %v6850_v48 = vpop.f32.mrf.mxu3  ;;  %v7654_v8 = vperm.slane %v7648_v32, %v11923_v36  ;;  %v7673_v30 = vrot.slane %v7658_v61, 4  ;;  %v7662_v1 = vsel %vm1398_vm6, %v7646_v2, %v7661_v27  ;;  %v7659_v12 = vrot.slane %v7646_v2, 4 }
 0x858   : > { %v7684_v14 = vperm.slane %v6850_v48, %v11700_v17  ;;  %v7679_v54 = vrot.slane %v6850_v48, 4  ;;  %v7670_v34 = vperm.slane %v7662_v1, %v11923_v36 }
 0x859   : > { %v6995_v15 = vpop.f32.mrf.mxu0  ;;  %v7671_v21 = vrot.slane %v7654_v8, 4  ;;  %v7674_v44 = vsel %vm1398_vm6, 0.0, %v7673_v30  ;;  %v7660_v49 = vsel %vm1398_vm6, %v7659_v12, %v7636_v45  ;;  %v8291_v45 = vsel %vm1398_vm6, %v7673_v30, %v7654_v8 }
 0x85a   : > { %v7701_v29 = vrot.slane %v7684_v14, 4  ;;  %v7694_v51 = vperm.slane %v6995_v15, %v11700_v17  ;;  %v7680_v25 = vsel %vm1398_vm6, 0.0, %v7679_v54  ;;  %v7689_v28 = vrot.slane %v6995_v15, 4 }
 0x85b   : > { %v7688_v16 = vperm.slane %v7680_v25, %v11700_v17  ;;  %v8296_v4 = vrot.slane %v7674_v44, 4  ;;  %v7672_v19 = vsel %vm1398_vm6, 0.0, %v7671_v21  ;;  %v7677_v58 = vrot.slane %v7670_v34, 4 }
 0x85c   : > { %v7699_v52 = vrot.slane %v7694_v51, 4  ;;  %v7702_v18 = vsel %vm1398_vm6, %v7694_v51, %v7701_v29  ;;  %v7690_v63 = vsel %vm1398_vm6, 0.0, %v7689_v28  ;;  %v7666_v15 = vperm.slane %v7660_v49, %v11923_v36 }
 0x85d   : > { %v7710_v35 = vperm.slane %v7702_v18, %v11923_v36  ;;  %v7713_v9 = vrot.slane %v7688_v16, 4  ;;  %v7698_v57 = vperm.slane %v7690_v63, %v11700_v17  ;;  %v8297_v23 = vsel %vm1398_vm6, %v8296_v4, %v7672_v19 }
 0x85e   : > { %v7700_v59 = vsel %vm1398_vm6, %v7699_v52, %v7684_v14  ;;  %v8021_v51 = vrot.slane %v16083_v43, 4  ;;  %v8301_v62 = vperm.slane %v8297_v23, %v11700_v17  ;;  %v7678_v38 = vsel %vm1398_vm6, 0.0, %v7677_v58 }
 0x85f   : > { %v7706_v13 = vperm.slane %v7700_v59, %v11923_v36  ;;  %v7725_v47 = vrot.slane %v7710_v35, 4  ;;  %v7711_v11 = vrot.slane %v7698_v57, 4  ;;  %v7714_v39 = vsel %vm1398_vm6, %v7698_v57, %v7713_v9 }
 0x860   : > { %v7722_v55 = vperm.slane %v7714_v39, %v11923_v36  ;;  %v7675_v24 = vrot.slane %v7666_v15, 4  ;;  %v8307_v61 = vrot.slane %v7678_v38, 4  ;;  %v8313_v42 = vrot.slane %v8301_v62, 4 }
 0x861   : > { %v7723_v46 = vrot.slane %v7706_v13, 4  ;;  %v7726_v0 = vsel %vm1398_vm6, 0.0, %v7725_v47  ;;  %v7712_v14 = vsel %vm1398_vm6, %v7711_v11, %v7688_v16  ;;  %v8022_v43 = vsel %vm1398_vm6, %v8021_v51, %v16023_v22 }
 0x862   : > { %v8334_v48 = vrot.slane %v7726_v0, 4  ;;  %v7718_v54 = vperm.slane %v7712_v14, %v11923_v36  ;;  %v7729_v26 = vrot.slane %v7722_v55, 4  ;;  %v6853_v28 = vpop.f32.mrf.mxu3  ;;  %v8329_v16 = vsel %vm1398_vm6, %v7725_v47, %v7706_v13 }
 0x863   : > { %v7724_v33 = vsel %vm1398_vm6, 0.0, %v7723_v46  ;;  %v7731_v5 = vrot.slane %v6853_v28, 4  ;;  %v7676_v59 = vsel %vm1398_vm6, 0.0, %v7675_v24  ;;  %v8060_v9 = vsel %vm1398_vm6, %v8059_v50, %v16077_v31 }
 0x864   : > { %v8335_v29 = vsel %vm1398_vm6, %v8334_v48, %v7724_v33  ;;  %v7727_v52 = vrot.slane %v7718_v54, 4  ;;  %v7730_v18 = vsel %vm1398_vm6, 0.0, %v7729_v26  ;;  %v8295_v8 = vperm.slane %v8291_v45, %v11700_v17 }
 0x865   : > { %v8339_v25 = vperm.slane %v8335_v29, %v11700_v17  ;;  %v8345_v27 = vrot.slane %v7730_v18, 4  ;;  %v8302_v13 = vsel %vm1398_vm6, %v7677_v58, %v7666_v15  ;;  %v8333_v47 = vperm.slane %v8329_v16, %v11700_v17 }
 0x866   : > { %v7728_v30 = vsel %vm1398_vm6, 0.0, %v7727_v52  ;;  %v7736_v1 = vperm.slane %v6853_v28, %v11700_v17  ;;  %v8340_v44 = vsel %vm1398_vm6, %v7729_v26, %v7718_v54  ;;  %v7732_v12 = vsel %vm1398_vm6, 0.0, %v7731_v5 }
 0x867   : > { %v8351_v2 = vrot.slane %v8339_v25, 4  ;;  %v8308_v31 = vsel %vm1398_vm6, %v8307_v61, %v7676_v59  ;;  %v8314_v11 = vsel %vm1398_vm6, %v8313_v42, %v8295_v8  ;;  %v8346_v0 = vsel %vm1398_vm6, %v8345_v27, %v7728_v30 }
 0x868   : > { %v8312_v39 = vperm.slane %v8308_v31, %v11700_v17  ;;  %v16408_v46 = vperm.slane %v8314_v11, %v11923_v36  ;;  %v8350_v4 = vperm.slane %v8346_v0, %v11700_v17  ;;  %v7740_v49 = vperm.slane %v7732_v12, %v11700_v17 }
 0x869   : > { %v8352_v34 = vsel %vm1398_vm6, %v8351_v2, %v8333_v47  ;;  %v8306_v55 = vperm.slane %v8302_v13, %v11700_v17  ;;  %v8344_v14 = vperm.slane %v8340_v44, %v11700_v17  ;;  %v7753_v58 = vrot.slane %v7736_v1, 4 }
 0x86a   : > { %v16414_v19 = vperm.slane %v8352_v34, %v11923_v36  ;;  %v8319_v48 = vrot.slane %v8312_v39, 4  ;;  %v8357_v33 = vrot.slane %v8350_v4, 4  ;;  %v6855_v23 = vpop.f32.mrf.mxu3  ;;  %v8327_v26 = vrot.slane %v16408_v46, 4 }
 0x86b   : > { %v8211_v24 = vrot.slane %v16310_v37, 4  ;;  %v7765_v25 = vrot.slane %v7740_v49, 4  ;;  %v7783_v52 = vrot.slane %v6855_v23, 4  ;;  %v8097_v16 = vrot.slane %v16178_v20, 4 }
 0x86c   : > { %v8320_v54 = vsel %vm1398_vm6, %v8319_v48, %v8306_v55  ;;  %v8365_v29 = vrot.slane %v16414_v19, 4  ;;  %v8358_v50 = vsel %vm1398_vm6, %v8357_v33, %v8344_v14  ;;  %v7788_v13 = vperm.slane %v6855_v23, %v11700_v17 }
 0x86d   : > { %v16424_v38 = vperm.slane %v8320_v54, %v11923_v36  ;;  %v16429_v28 = vperm.slane %v8358_v50, %v11923_v36  ;;  %v8212_v8 = vsel %vm1398_vm6, %v8211_v24, %v16285_v40  ;;  %v7784_v30 = vsel %vm1398_vm6, 0.0, %v7783_v52 }
 0x86e   : > { %v7792_v31 = vperm.slane %v7784_v30, %v11700_v17  ;;  %v7805_v33 = vrot.slane %v7788_v13, 4 }
 0x86f   : > { %v8366_v37 = vsel %vm1398_vm6, %v16429_v28, %v8365_v29 }
 0x870   : > { %v7817_v24 = vrot.slane %v7792_v31, 4 }
 0x876   : > { %v10648_v32 = vpop.permute.xlu1 %10647 }
 0x877   : > { %v10650_v35 = vunpack.i.h.bf16 %v10648_v32  ;;  %v10649_v63 = vunpack.i.l.bf16 %v10648_v32 }
 0x879   : > { %v8511_v57 = vsel %vm6086_vm7, %v8022_v43, %v10649_v63  ;;  %v8512_v22 = vsel %vm6086_vm7, %v8060_v9, %v10650_v35  ;;  %v8328_v43 = vsel %vm1398_vm6, %v16424_v38, %v8327_v26  ;;  %v8135_v9 = vrot.slane %v16199_v7, 4 }
 0x87a   : > { %v8525_v21 = vpack.c.bf16 %v8512_v22, %v8511_v57  ;;  %v10666_v63 = vpack.i.bf16 %v8366_v37, %v8328_v43 }
 0x87c   : > { %10284 = vmatmul.msk.bf16.gmra.mxu3 %vm834_vm1, %v8525_v21  ;;  %10667 = vrot.lane.b32.xlu1 %v10666_v63, %s11054_s21 }
 0x880   : > { %v6998_v15 = vpop.f32.mrf.mxu0 }
 0x881   : > { %v7741_v51 = vrot.slane %v6998_v15, 4  ;;  %v7746_v62 = vperm.slane %v6998_v15, %v11700_v17 }
 0x883   : > { %v7742_v18 = vsel %vm1398_vm6, 0.0, %v7741_v51  ;;  %v7751_v45 = vrot.slane %v7746_v62, 4  ;;  %v7754_v61 = vsel %vm1398_vm6, %v7746_v62, %v7753_v58  ;;  %v8098_v62 = vsel %vm1398_vm6, %v8097_v16, %v16149_v6 }
 0x884   : > { %v7750_v42 = vperm.slane %v7742_v18, %v11700_v17  ;;  %v7762_v32 = vperm.slane %v7754_v61, %v11923_v36 }
 0x885   : > { %v7752_v35 = vsel %vm1398_vm6, %v7751_v45, %v7736_v1 }
 0x886   : > { %v7758_v5 = vperm.slane %v7752_v35, %v11923_v36  ;;  %v7763_v59 = vrot.slane %v7750_v42, 4  ;;  %v7766_v27 = vsel %vm1398_vm6, %v7750_v42, %v7765_v25  ;;  %v7777_v2 = vrot.slane %v7762_v32, 4 }
 0x887   : > { %v7774_v57 = vperm.slane %v7766_v27, %v11923_v36  ;;  %v10653_v22 = vpop.permute.xlu0 %10652  ;;  %v10658_v20 = vpop.permute.xlu2 %10657 }
 0x888   : > { %v7764_v47 = vsel %vm1398_vm6, %v7763_v59, %v7740_v49  ;;  %v7775_v1 = vrot.slane %v7758_v5, 4  ;;  %v7778_v21 = vsel %vm1398_vm6, 0.0, %v7777_v2  ;;  %v10660_v44 = vunpack.i.h.bf16 %v10658_v20  ;;  %v7000_v34 = vpop.f32.mrf.mxu0 }
 0x889   : > { %v10659_v7 = vunpack.i.l.bf16 %v10658_v20  ;;  %v7770_v12 = vperm.slane %v7764_v47, %v11923_v36  ;;  %v7781_v40 = vrot.slane %v7774_v57, 4  ;;  %v8372_v39 = vrot.slane %v7778_v21, 4  ;;  %v16497_v47 = vld [vmem:[%s18373_s1] ss:$0 sm:$0xff] }
 0x88a   : > { %v7776_v11 = vsel %vm1398_vm6, 0.0, %v7775_v1  ;;  %v10655_v0 = vunpack.i.h.bf16 %v10653_v22  ;;  %v16460_v49 = vsel %vm6086_vm7, %v8212_v8, %v10660_v44  ;;  %v10654_v54 = vunpack.i.l.bf16 %v10653_v22 }
 0x88b   : > { %v16457_v4 = vsel %vm6086_vm7, %v16353_v10, %v10659_v7  ;;  %v7779_v55 = vrot.slane %v7770_v12, 4  ;;  %v7782_v48 = vsel %vm1398_vm6, 0.0, %v7781_v40  ;;  %v8373_v58 = vsel %vm1398_vm6, %v8372_v39, %v7776_v11 }
 0x88c   : > { %v8527_v14 = vpack.c.bf16 %v16460_v49, %v16457_v4  ;;  %v8383_v23 = vrot.slane %v7782_v48, 4  ;;  %v7793_v26 = vrot.slane %v7000_v34, 4  ;;  %v8136_v10 = vsel %vm1398_vm6, %v8135_v9, %v16175_v60 }
 0x88d   : > { %v7780_v15 = vsel %vm1398_vm6, 0.0, %v7779_v55  ;;  %v8377_v29 = vperm.slane %v8373_v58, %v11700_v17  ;;  %v7798_v51 = vperm.slane %v7000_v34, %v11700_v17  ;;  %v8514_v50 = vsel %vm6086_vm7, %v8136_v10, %v10655_v0 }
 0x88e   : > { %v7794_v25 = vsel %vm1398_vm6, 0.0, %v7793_v26  ;;  %v8513_v52 = vsel %vm6086_vm7, %v8098_v62, %v10654_v54  ;;  %v8384_v18 = vsel %vm1398_vm6, %v8383_v23, %v7780_v15  ;;  %v8367_v32 = vsel %vm1398_vm6, %v7777_v2, %v7758_v5 }
 0x88f   : > { %v7802_v45 = vperm.slane %v7794_v25, %v11700_v17  ;;  %v7803_v61 = vrot.slane %v7798_v51, 4  ;;  %v7806_v60 = vsel %vm1398_vm6, %v7798_v51, %v7805_v33  ;;  %v8526_v42 = vpack.c.bf16 %v8514_v50, %v8513_v52 }
 0x890   : > { %v7814_v43 = vperm.slane %v7806_v60, %v11923_v36  ;;  %v8389_v6 = vrot.slane %v8377_v29, 4  ;;  %v8388_v9 = vperm.slane %v8384_v18, %v11700_v17  ;;  %v8371_v5 = vperm.slane %v8367_v32, %v11700_v17  ;;  %v10942_v29 = vld [vmem:[#allocation2] sm:$0xff] }
 0x891   : > { %v7804_v37 = vsel %vm1398_vm6, %v7803_v61, %v7788_v13  ;;  %v7815_v16 = vrot.slane %v7802_v45, 4  ;;  %v7818_v35 = vsel %vm1398_vm6, %v7802_v45, %v7817_v24  ;;  %10285 = vmatmul.msk.bf16.gmra.mxu3 %vm834_vm1, %v8526_v42  ;;  %v8378_v20 = vsel %vm1398_vm6, %v7781_v40, %v7770_v12 }
 0x892   : > { %v7810_v63 = vperm.slane %v7804_v37, %v11923_v36  ;;  %v7826_v59 = vperm.slane %v7818_v35, %v11923_v36  ;;  %v7829_v27 = vrot.slane %v7814_v43, 4  ;;  %v8390_v1 = vsel %vm1398_vm6, %v8389_v6, %v8371_v5 }
 0x893   : > { %v7816_v2 = vsel %vm1398_vm6, %v7815_v16, %v7792_v31  ;;  %v8395_v31 = vrot.slane %v8388_v9, 4  ;;  %v8382_v55 = vperm.slane %v8378_v20, %v11700_v17  ;;  %v8394_v58 = vperm.slane %v8390_v1, %v11923_v36  ;;  %v10945_v1 = vld [vmem:[#allocation2 + $0x10] sm:$0xff] }
 0x894   : > { %v7822_v8 = vperm.slane %v7816_v2, %v11923_v36  ;;  %v7827_v30 = vrot.slane %v7810_v63, 4  ;;  %v7830_v57 = vsel %vm1398_vm6, 0.0, %v7829_v27  ;;  %v7833_v22 = vrot.slane %v7826_v59, 4 }
 0x895   : > { %v8410_v13 = vrot.slane %v7830_v57, 4  ;;  %v8405_v11 = vsel %vm1398_vm6, %v7829_v27, %v7810_v63  ;;  %v8396_v26 = vsel %vm1398_vm6, %v8395_v31, %v8382_v55  ;;  %v8403_v52 = vrot.slane %v8394_v58, 4  ;;  %v10944_v57 = vld [vmem:[#allocation2 + $0x18] sm:$0xff] }
 0x896   : > { %v7828_v21 = vsel %vm1398_vm6, 0.0, %v7827_v30  ;;  %v7831_v44 = vrot.slane %v7822_v8, 4  ;;  %v7834_v7 = vsel %vm1398_vm6, 0.0, %v7833_v22  ;;  %v8416_v48 = vsel %vm1398_vm6, %v7833_v22, %v7822_v8 }
 0x897   : > { %v8411_v39 = vsel %vm1398_vm6, %v8410_v13, %v7828_v21  ;;  %v8421_v12 = vrot.slane %v7834_v7, 4  ;;  %v8409_v15 = vperm.slane %v8405_v11, %v11700_v17  ;;  %v8420_v62 = vperm.slane %v8416_v48, %v11700_v17 }
 0x898   : > { %v7832_v40 = vsel %vm1398_vm6, 0.0, %v7831_v44  ;;  %v8415_v0 = vperm.slane %v8411_v39, %v11700_v17  ;;  %v8584_v34 = vpop.f32.mrf.mxu3  ;;  %v8400_v25 = vperm.slane %v8396_v26, %v11923_v36  ;;  %v8249_v37 = vrot.slane %v16329_v53, 4 }
 0x899   : > { %v8585_v33 = vadd.f32 %v16497_v47, %v8584_v34  ;;  %v8422_v23 = vsel %vm1398_vm6, %v8421_v12, %v7832_v40  ;;  %v8287_v16 = vrot.slane %v16336_v56, 4  ;;  %v10943_v56 = vld [vmem:[#allocation2 + $0x8] sm:$0xff]  ;;  %v8325_v11 = vrot.slane %v16424_v38, 4 }
 0x89a   : > { %v8427_v54 = vrot.slane %v8415_v0, 4  ;;  %v8426_v10 = vperm.slane %v8422_v23, %v11700_v17  ;;  %v8404_v17 = vsel %vm1398_vm6, %v8400_v25, %v8403_v52  ;;  %v8250_v4 = vsel %vm1398_vm6, %v8249_v37, %v16313_v41 }
 0x89b   : > { %v16514_v51 = vadd.f32 %v10942_v29, %v8585_v33  ;;  %v8288_v49 = vsel %vm1398_vm6, %v8287_v16, %v16324_v3  ;;  %v8401_v53 = vrot.slane %v8400_v25, 4  ;;  %v8363_v39 = vrot.slane %v16429_v28, 4  ;;  %v10947_v25 = vld [vmem:[#allocation2 + $0x28] sm:$0xff] }
 0x89c   : > { %v8428_v50 = vsel %vm1398_vm6, %v8427_v54, %v8409_v15  ;;  %v8433_v24 = vrot.slane %v8426_v10, 4  ;;  %v8326_v34 = vsel %vm1398_vm6, %v8325_v11, %v16408_v46  ;;  %v10946_v10 = vld [vmem:[#allocation2 + $0x20] sm:$0xff] }
 0x89d   : > { %v8432_v18 = vperm.slane %v8428_v50, %v11923_v36  ;;  %v8642_v45 = vsel %vm834_vm1, %v16514_v51, 0.0  ;;  %v8402_v8 = vsel %vm1398_vm6, %v8401_v53, %v8394_v58  ;;  %v8364_v55 = vsel %vm1398_vm6, %v8363_v39, %v16414_v19 }
 0x89e   : > { %v8434_v61 = vsel %vm1398_vm6, %v8433_v24, %v8420_v62  ;;  %8643 = vadd.xlane.f32.xlu0 %v8642_v45 }
 0x89f   : > { %v8438_v60 = vperm.slane %v8434_v61, %v11923_v36  ;;  %v8441_v42 = vrot.slane %v8432_v18, 4  ;;  %v18374_v61 = vld [vmem:[#allocation14_spill] sm:$0xff] }
 0x8a0   : > { %v8586_v6 = vpop.f32.mrf.mxu3 }
 0x8a1   : > { %10286 = vmatmul.msk.bf16.gmra.mxu3 %vm834_vm1, %v8527_v14  ;;  %v8442_v32 = vsel %vm1398_vm6, %v8438_v60, %v8441_v42  ;;  %v8587_v59 = vadd.f32 %v16497_v47, %v8586_v6  ;;  %v8439_v7 = vrot.slane %v8438_v60, 4  ;;  %v10948_v6 = vld [vmem:[#allocation2 + $0x30] sm:$0xff] }
 0x8a2   : > { %v10671_v43 = vpack.i.bf16 %v8442_v32, %v8404_v17 }
 0x8a3   : > { %v16540_v5 = vadd.f32 %v10943_v56, %v8587_v59  ;;  %v8440_v31 = vsel %vm1398_vm6, %v8439_v7, %v8432_v18  ;;  %v10949_v59 = vld [vmem:[#allocation2 + $0x38] sm:$0xff] }
 0x8a4   : > { %10672 = vrot.lane.b32.xlu2 %v10671_v43, %s11054_s21 }
 0x8a5   : > { %v8645_v30 = vsel %vm834_vm1, %v16540_v5, 0.0 }
 0x8a6   : > { %v10663_v35 = vpop.permute.xlu0 %10662  ;;  %8646 = vadd.xlane.f32.xlu1 %v8645_v30 }
 0x8a7   : > { %v10665_v36 = vunpack.i.h.bf16 %v10663_v35  ;;  %v10664_v63 = vunpack.i.l.bf16 %v10663_v35 }
 0x8a9   : > { %v8517_v14 = vsel %vm6086_vm7, %v8250_v4, %v10664_v63  ;;  %v8518_v27 = vsel %vm6086_vm7, %v8288_v49, %v10665_v36 }
 0x8aa   : > { %v8528_v9 = vpack.c.bf16 %v8518_v27, %v8517_v14 }
 0x8ad   : > { %v8589_v2 = vpop.f32.mrf.mxu3 }
 0x8ae   : > { %v8590_v13 = vadd.f32 %v16497_v47, %v8589_v2  ;;  %v10950_v2 = vld [vmem:[#allocation2 + $0x40] sm:$0xff] }
 0x8b0   : > { %v16552_v21 = vadd.f32 %v10945_v1, %v8590_v13 }
 0x8b1   : > { %10287 = vmatmul.msk.bf16.gmra.mxu3 %vm834_vm1, %v8528_v9 }
 0x8b2   : > { %v8648_v44 = vsel %vm834_vm1, %v16552_v21, 0.0 }
 0x8b5   : > { %v8591_v41 = vpop.f32.mrf.mxu3 }
 0x8b6   : > { %v8592_v3 = vadd.f32 %v16497_v47, %v8591_v41 }
 0x8b8   : > { %v16547_v22 = vadd.f32 %v10944_v57, %v8592_v3 }
 0x8ba   : > { %v8651_v20 = vsel %vm834_vm1, %v16547_v22, 0.0 }
 0x8bb   : > { %8652 = vadd.xlane.f32.xlu0 %v8651_v20 }
 0x8cd   : > { %8649 = vadd.xlane.f32.xlu2 %v8648_v44 }
 0x8ee   : > { %v10668_v12 = vpop.permute.xlu1 %10667 }
 0x8ef   : > { %v10670_v40 = vunpack.i.h.bf16 %v10668_v12  ;;  %v10669_v0 = vunpack.i.l.bf16 %v10668_v12 }
 0x8f1   : > { %v8520_v48 = vsel %vm6086_vm7, %v8364_v55, %v10670_v40  ;;  %v8519_v33 = vsel %vm6086_vm7, %v8326_v34, %v10669_v0  ;;  %v10951_v34 = vld [vmem:[#allocation2 + $0x48] sm:$0xff] }
 0x8f2   : > { %v8529_v58 = vpack.c.bf16 %v8520_v48, %v8519_v33 }
 0x8f4   : > { %10288 = vmatmul.msk.bf16.gmra.mxu3 %vm834_vm1, %v8529_v58 }
 0x8fe   : > { %v10673_v23 = vpop.permute.xlu2 %10672 }
 0x8ff   : > { %v8594_v15 = vpop.f32.mrf.mxu3  ;;  %v10675_v38 = vunpack.i.h.bf16 %v10673_v23  ;;  %v10674_v28 = vunpack.i.l.bf16 %v10673_v23  ;;  %v10952_v23 = vld [vmem:[#allocation2 + $0x50] sm:$0xff] }
 0x900   : > { %v8595_v54 = vadd.f32 %v16497_v47, %v8594_v15 }
 0x901   : > { %v8521_v26 = vsel %vm6086_vm7, %v8402_v8, %v10674_v28  ;;  %v8522_v46 = vsel %vm6086_vm7, %v8440_v31, %v10675_v38 }
 0x902   : > { %v16569_v29 = vadd.f32 %v10946_v10, %v8595_v54  ;;  %v8530_v19 = vpack.c.bf16 %v8522_v46, %v8521_v26 }
 0x904   : > { %v8654_v62 = vsel %vm834_vm1, %v16569_v29, 0.0  ;;  %10289 = vmatmul.msk.bf16.gmra.mxu3 %vm834_vm1, %v8530_v19 }
 0x905   : > { %8655 = vadd.xlane.f32.xlu1 %v8654_v62 }
 0x907   : > { %v8596_v50 = vpop.f32.mrf.mxu3 }
 0x908   : > { %v8597_v24 = vadd.f32 %v16497_v47, %v8596_v50 }
 0x90a   : > { %v16574_v52 = vadd.f32 %v10947_v25, %v8597_v24 }
 0x90c   : > { %v8657_v18 = vsel %vm834_vm1, %v16574_v52, 0.0 }
 0x90d   : > { %8658 = vadd.xlane.f32.xlu2 %v8657_v18  ;;  %v10953_v18 = vld [vmem:[#allocation2 + $0x58] sm:$0xff] }
 0x911   : > { %v8644_v45 = vpop.xlane.xlu0 %8643 }
 0x912   : > { %v8690_v60 = vmul.f32 %v8644_v45, %v18374_v61 }
 0x914   : > { %v8599_v42 = vpop.f32.mrf.mxu3  ;;  %v16581_v17 = vsub.f32 %v16514_v51, %v8690_v60 }
 0x915   : > { %v8600_v32 = vadd.f32 %v16497_v47, %v8599_v42 }
 0x916   : > { %v8722_v43 = vmul.f32 %v16581_v17, %v16581_v17 }
 0x917   : > { %v16586_v37 = vadd.f32 %v10948_v6, %v8600_v32 }
 0x918   : > { %v8738_v16 = vsel %vm834_vm1, %v8722_v43, 0.0 }
 0x919   : > { %v8660_v35 = vsel %vm834_vm1, %v16586_v37, 0.0  ;;  %8739 = vadd.xlane.f32.xlu0 %v8738_v16  ;;  %v8647_v14 = vpop.xlane.xlu1 %8646 }
 0x91a   : > { %8661 = vadd.xlane.f32.xlu2 %v8660_v35  ;;  %v8691_v53 = vmul.f32 %v8647_v14, %v18374_v61  ;;  %v10954_v35 = vld [vmem:[#allocation2 + $0x60] sm:$0xff] }
 0x91c   : > { %v8601_v36 = vpop.f32.mrf.mxu3  ;;  %v16599_v56 = vsub.f32 %v16540_v5, %v8691_v53 }
 0x91d   : > { %v8602_v63 = vadd.f32 %v16497_v47, %v8601_v36 }
 0x91e   : > { %v8723_v30 = vmul.f32 %v16599_v56, %v16599_v56 }
 0x91f   : > { %v16592_v4 = vadd.f32 %v10949_v59, %v8602_v63 }
 0x920   : > { %v8741_v3 = vsel %vm834_vm1, %v8723_v30, 0.0 }
 0x921   : > { %v8663_v49 = vsel %vm834_vm1, %v16592_v4, 0.0  ;;  %8742 = vadd.xlane.f32.xlu1 %v8741_v3 }
 0x922   : > { %8664 = vadd.xlane.f32.xlu0 %v8663_v49 }
 0x924   : > { %v8604_v27 = vpop.f32.mrf.mxu3 }
 0x925   : > { %v8605_v9 = vadd.f32 %v16497_v47, %v8604_v27 }
 0x927   : > { %v16601_v8 = vadd.f32 %v10950_v2, %v8605_v9 }
 0x929   : > { %v8666_v41 = vsel %vm834_vm1, %v16601_v8, 0.0 }
 0x92a   : > { %8667 = vadd.xlane.f32.xlu0 %v8666_v41 }
 0x92c   : > { %v8606_v39 = vpop.f32.mrf.mxu3 }
 0x92d   : > { %v8607_v40 = vadd.f32 %v16497_v47, %v8606_v39 }
 0x92e   : > { %v8653_v57 = vpop.xlane.xlu0 %8652 }
 0x92f   : > { %v8693_v20 = vmul.f32 %v8653_v57, %v18374_v61  ;;  %v16623_v55 = vadd.f32 %v10951_v34, %v8607_v40 }
 0x931   : > { %v16610_v13 = vsub.f32 %v16547_v22, %v8693_v20  ;;  %v8669_v58 = vsel %vm834_vm1, %v16623_v55, 0.0 }
 0x933   : > { %v8725_v1 = vmul.f32 %v16610_v13, %v16610_v13 }
 0x934   : > { %v8609_v48 = vpop.f32.mrf.mxu3 }
 0x935   : > { %v8747_v44 = vsel %vm834_vm1, %v8725_v1, 0.0  ;;  %v8610_v33 = vadd.f32 %v16497_v47, %v8609_v48 }
 0x936   : > { %8748 = vadd.xlane.f32.xlu2 %v8747_v44  ;;  %v10955_v44 = vld [vmem:[#allocation2 + $0x68] sm:$0xff] }
 0x937   : > { %v16628_v15 = vadd.f32 %v10952_v23, %v8610_v33  ;;  %v10956_v33 = vld [vmem:[#allocation2 + $0x78] sm:$0xff] }
 0x939   : > { %v8672_v38 = vsel %vm834_vm1, %v16628_v15, 0.0 }
 0x93c   : > { %v8611_v26 = vpop.f32.mrf.mxu3 }
 0x93d   : > { %v8612_v19 = vadd.f32 %v16497_v47, %v8611_v26 }
 0x93f   : > { %v16641_v45 = vadd.f32 %v10953_v18, %v8612_v19  ;;  %v10957_v19 = vld [vmem:[#allocation2 + $0x70] sm:$0xff] }
 0x940   : > { %v8650_v7 = vpop.xlane.xlu2 %8649 }
 0x941   : > { %v8692_v31 = vmul.f32 %v8650_v7, %v18374_v61  ;;  %v8675_v6 = vsel %vm834_vm1, %v16641_v45, 0.0 }
 0x943   : > { %v16617_v11 = vsub.f32 %v16552_v21, %v8692_v31 }
 0x945   : > { %v8724_v12 = vmul.f32 %v16617_v11, %v16617_v11 }
 0x947   : > { %v8744_v0 = vsel %vm834_vm1, %v8724_v12, 0.0 }
 0x948   : > { %8745 = vadd.xlane.f32.xlu1 %v8744_v0 }
 0x950   : > { %8670 = vadd.xlane.f32.xlu1 %v8669_v58 }
 0x958   : > { %8673 = vadd.xlane.f32.xlu1 %v8672_v38 }
 0x977   : > { %v8614_v25 = vpop.f32.mrf.mxu3 }
 0x978   : > { %v8656_v28 = vpop.xlane.xlu1 %8655  ;;  %v8615_v32 = vadd.f32 %v16497_v47, %v8614_v25 }
 0x979   : > { %v8694_v54 = vmul.f32 %v8656_v28, %v18374_v61 }
 0x97a   : > { %v16652_v36 = vadd.f32 %v10954_v35, %v8615_v32 }
 0x97b   : > { %v16634_v46 = vsub.f32 %v16569_v29, %v8694_v54 }
 0x97c   : > { %v8678_v27 = vsel %vm834_vm1, %v16652_v36, 0.0 }
 0x97d   : > { %v8726_v10 = vmul.f32 %v16634_v46, %v16634_v46 }
 0x97f   : > { %v8750_v62 = vsel %vm834_vm1, %v8726_v10, 0.0  ;;  %v8616_v16 = vpop.f32.mrf.mxu3 }
 0x980   : > { %v8659_v50 = vpop.xlane.xlu2 %8658  ;;  %8751 = vadd.xlane.f32.xlu2 %v8750_v62  ;;  %v8617_v41 = vadd.f32 %v16497_v47, %v8616_v16 }
 0x981   : > { %v8695_v24 = vmul.f32 %v8659_v50, %v18374_v61 }
 0x982   : > { %v16666_v7 = vadd.f32 %v10955_v44, %v8617_v41 }
 0x983   : > { %v16644_v60 = vsub.f32 %v16574_v52, %v8695_v24 }
 0x984   : > { %v8681_v48 = vsel %vm834_vm1, %v16666_v7, 0.0 }
 0x985   : > { %v8727_v42 = vmul.f32 %v16644_v60, %v16644_v60 }
 0x987   : > { %v8753_v43 = vsel %vm834_vm1, %v8727_v42, 0.0  ;;  %v8619_v2 = vpop.f32.mrf.mxu3 }
 0x988   : > { %8754 = vadd.xlane.f32.xlu0 %v8753_v43  ;;  %8676 = vadd.xlane.f32.xlu2 %v8675_v6  ;;  %v8620_v34 = vadd.f32 %v16497_v47, %v8619_v2 }
 0x98a   : > { %v16684_v62 = vadd.f32 %v10957_v19, %v8620_v34 }
 0x98c   : > { %v8740_v63 = vpop.xlane.xlu0 %8739  ;;  %v8684_v32 = vsel %vm834_vm1, %v16684_v62, 0.0 }
 0x98d   : > { %v8662_v59 = vpop.xlane.xlu2 %8661  ;;  %v8786_v49 = vmul.f32 %v8740_v63, %v18374_v61 }
 0x98e   : > { %v8696_v14 = vmul.f32 %v8662_v59, %v18374_v61 }
 0x98f   : > { %v8802_v53 = vadd.f32 1e-05, %v8786_v49  ;;  %v8621_v39 = vpop.f32.mrf.mxu3 }
 0x990   : > { %8679 = vadd.xlane.f32.xlu2 %v8678_v27  ;;  %v16659_v9 = vsub.f32 %v16586_v37, %v8696_v14  ;;  %v8622_v40 = vadd.f32 %v16497_v47, %v8621_v39 }
 0x991   : > { %10846 = vrsqrt.f32 %v8802_v53  ;;  %vm8824_vm7 = vweird.f32 %v8802_v53 }
 0x992   : > { %v8728_v30 = vmul.f32 %v16659_v9, %v16659_v9  ;;  %v16677_v58 = vadd.f32 %v10956_v33, %v8622_v40 }
 0x994   : > { %v8756_v3 = vsel %vm834_vm1, %v8728_v30, 0.0  ;;  %v8743_v54 = vpop.xlane.xlu1 %8742  ;;  %v8687_v26 = vsel %vm834_vm1, %v16677_v58, 0.0 }
 0x995   : > { %8757 = vadd.xlane.f32.xlu0 %v8756_v3  ;;  %v8665_v57 = vpop.xlane.xlu0 %8664  ;;  %v8787_v47 = vmul.f32 %v8743_v54, %v18374_v61 }
 0x996   : > { %v8697_v20 = vmul.f32 %v8665_v57, %v18374_v61  ;;  %v10368_v57 = vld [vmem:[%s11226_s19 + $0x8] sm:$0xff] }
 0x997   : > { %v10847_v1 = vpop.eup %10846  ;;  %v8803_v24 = vadd.f32 1e-05, %v8787_v47  ;;  %9090 = vmatpush.bf16.msrb.mxu1 %v10368_v57  ;;  %10377 = vmatpush.bf16.msra.mxu3 %v10368_v57 }
 0x998   : > { %v16669_v31 = vsub.f32 %v16592_v4, %v8697_v20  ;;  %v8819_v12 = vmul.f32 %v10847_v1, %v8802_v53  ;;  %8688 = vadd.xlane.f32.xlu2 %v8687_v26  ;;  %vm8825_vm6 = vweird.f32 %v10847_v1  ;;  %v16702_v20 = vld [vmem:[%s18375_s23] ss:$0 sm:$0xff] }
 0x999   : > { %10848 = vrsqrt.f32 %v8803_v24  ;;  %vm8826_vm9 = vmor %vm8824_vm7, %vm8825_vm6  ;;  %vm8834_vm3 = vweird.f32 %v8803_v24 }
 0x99a   : > { %v8729_v0 = vmul.f32 %v16669_v31, %v16669_v31  ;;  %v8820_v28 = vmul.f32 %v10847_v1, %v8819_v12 }
 0x99c   : > { %v8759_v23 = vsel %vm834_vm1, %v8729_v0, 0.0  ;;  %v8821_v25 = vmul.f32 0.5, %v8820_v28 }
 0x99d   : > { %8682 = vadd.xlane.f32.xlu0 %v8681_v48  ;;  %v8668_v38 = vpop.xlane.xlu0 %8667  ;;  %8760 = vadd.xlane.f32.xlu1 %v8759_v23 }
 0x99e   : > { %v8698_v10 = vmul.f32 %v8668_v38, %v18374_v61  ;;  %v8822_v43 = vsub.f32 1.5, %v8821_v25 }
 0x99f   : > { %v10849_v16 = vpop.eup %10848 }
 0x9a0   : > { %v16687_v50 = vsub.f32 %v16601_v8, %v8698_v10  ;;  %v8823_v63 = vmul.f32 %v10847_v1, %v8822_v43  ;;  %v8829_v59 = vmul.f32 %v10849_v16, %v8803_v24  ;;  %vm8835_vm2 = vweird.f32 %v10849_v16 }
 0x9a1   : > { %vm8836_vm4 = vmor %vm8834_vm3, %vm8835_vm2 }
 0x9a2   : > { %v8730_v18 = vmul.f32 %v16687_v50, %v16687_v50  ;;  %v8830_v14 = vmul.f32 %v10849_v16, %v8829_v59  ;;  %v8827_v27 = vsel %vm8826_vm9, %v10847_v1, %v8823_v63  ;;  %v10367_v1 = vld [vmem:[%s11226_s19] sm:$0xff] }
 0x9a3   : > { %v8978_v41 = vmul.f32 %v8827_v27, %v16581_v17  ;;  %v16712_v17 = vld [vmem:[%s686_s4] ss:$0 sm:$0xff]  ;;  %9091 = vmatpush.bf16.msrb.mxu1 %v10367_v1  ;;  %10378 = vmatpush.bf16.msra.mxu3 %v10367_v1 }
 0x9a4   : > { %v8762_v42 = vsel %vm834_vm1, %v8730_v18, 0.0  ;;  %v8831_v2 = vmul.f32 0.5, %v8830_v14 }
 0x9a5   : > { %8763 = vadd.xlane.f32.xlu0 %v8762_v42  ;;  %8685 = vadd.xlane.f32.xlu1 %v8684_v32  ;;  %v8997_v12 = vmul.f32 %v16702_v20, %v8978_v41 }
 0x9a6   : > { %v8832_v30 = vsub.f32 1.5, %v8831_v2 }
 0x9a7   : > { %v9016_v34 = vadd.f32 %v16712_v17, %v8997_v12 }
 0x9a8   : > { %v8833_v3 = vmul.f32 %v10849_v16, %v8832_v30 }
 0x9a9   : > { %v8749_v6 = vpop.xlane.xlu2 %8748 }
 0x9aa   : > { %v8789_v35 = vmul.f32 %v8749_v6, %v18374_v61  ;;  %v8837_v44 = vsel %vm8836_vm4, %v10849_v16, %v8833_v3 }
 0x9ab   : > { %v8979_v39 = vmul.f32 %v8837_v44, %v16599_v56 }
 0x9ac   : > { %v8805_v49 = vadd.f32 1e-05, %v8789_v35 }
 0x9ad   : > { %v8998_v0 = vmul.f32 %v16702_v20, %v8979_v39 }
 0x9ae   : > { %10850 = vrsqrt.f32 %v8805_v49  ;;  %vm8854_vm8 = vweird.f32 %v8805_v49 }
 0x9af   : > { %v9017_v48 = vadd.f32 %v16712_v17, %v8998_v0 }
 0x9b1   : > { %v9032_v56 = vpack.c.bf16 %v9017_v48, %v9016_v34 }
 0x9b3   : > { %10298 = vmatmul.msk.bf16.vlgmr.msrb.gmra.mxu1 %vm834_vm1, %v9032_v56 }
 0x9b4   : > { %v10851_v53 = vpop.eup %10850 }
 0x9b5   : > { %v8849_v40 = vmul.f32 %v10851_v53, %v8805_v49  ;;  %vm8855_vm5 = vweird.f32 %v10851_v53 }
 0x9b6   : > { %vm8856_vm10 = vmor %vm8854_vm8, %vm8855_vm5 }
 0x9b7   : > { %v8850_v33 = vmul.f32 %v10851_v53, %v8849_v40 }
 0x9b9   : > { %v8851_v54 = vmul.f32 0.5, %v8850_v33 }
 0x9bb   : > { %v8746_v23 = vpop.xlane.xlu1 %8745  ;;  %v8852_v26 = vsub.f32 1.5, %v8851_v54 }
 0x9bc   : > { %v8788_v38 = vmul.f32 %v8746_v23, %v18374_v61 }
 0x9bd   : > { %v8853_v25 = vmul.f32 %v10851_v53, %v8852_v26 }
 0x9be   : > { %v8804_v28 = vadd.f32 1e-05, %v8788_v38 }
 0x9bf   : > { %v8857_v6 = vsel %vm8856_vm10, %v10851_v53, %v8853_v25 }
 0x9c0   : > { %10852 = vrsqrt.f32 %v8804_v28  ;;  %v8981_v14 = vmul.f32 %v8857_v6, %v16610_v13  ;;  %vm8844_vm12 = vweird.f32 %v8804_v28 }
 0x9c2   : > { %v9000_v57 = vmul.f32 %v16702_v20, %v8981_v14 }
 0x9c3   : > { %v8671_v10 = vpop.xlane.xlu1 %8670 }
 0x9c4   : > { %v8699_v47 = vmul.f32 %v8671_v10, %v18374_v61  ;;  %v9019_v44 = vadd.f32 %v16712_v17, %v9000_v57 }
 0x9c6   : > { %v10853_v19 = vpop.eup %10852  ;;  %v16721_v24 = vsub.f32 %v16623_v55, %v8699_v47 }
 0x9c7   : > { %v8839_v18 = vmul.f32 %v10853_v19, %v8804_v28  ;;  %vm8845_vm11 = vweird.f32 %v10853_v19 }
 0x9c8   : > { %v8731_v42 = vmul.f32 %v16721_v24, %v16721_v24  ;;  %vm8846_vm13 = vmor %vm8844_vm12, %vm8845_vm11 }
 0x9c9   : > { %v8840_v32 = vmul.f32 %v10853_v19, %v8839_v18 }
 0x9ca   : > { %v8765_v43 = vsel %vm834_vm1, %v8731_v42, 0.0 }
 0x9cb   : > { %v8841_v16 = vmul.f32 0.5, %v8840_v32  ;;  %8766 = vadd.xlane.f32.xlu1 %v8765_v43  ;;  %v8674_v35 = vpop.xlane.xlu1 %8673 }
 0x9cc   : > { %v8700_v63 = vmul.f32 %v8674_v35, %v18374_v61 }
 0x9cd   : > { %v8842_v59 = vsub.f32 1.5, %v8841_v16 }
 0x9ce   : > { %v16729_v27 = vsub.f32 %v16628_v15, %v8700_v63 }
 0x9cf   : > { %v8843_v2 = vmul.f32 %v10853_v19, %v8842_v59 }
 0x9d0   : > { %v8732_v49 = vmul.f32 %v16729_v27, %v16729_v27 }
 0x9d1   : > { %v8847_v30 = vsel %vm8846_vm13, %v10853_v19, %v8843_v2 }
 0x9d2   : > { %v8980_v41 = vmul.f32 %v8847_v30, %v16617_v11  ;;  %v8768_v3 = vsel %vm834_vm1, %v8732_v49, 0.0 }
 0x9d3   : > { %8769 = vadd.xlane.f32.xlu2 %v8768_v3 }
 0x9d4   : > { %v8999_v53 = vmul.f32 %v16702_v20, %v8980_v41 }
 0x9d6   : > { %v9018_v13 = vadd.f32 %v16712_v17, %v8999_v53 }
 0x9d8   : > { %v9033_v1 = vpack.c.bf16 %v9019_v44, %v9018_v13 }
 0x9da   : > { %10299 = vmatmul.msk.bf16.gmra.mxu1 %vm834_vm1, %v9033_v1 }
 0x9f3   : > { %v8752_v39 = vpop.xlane.xlu2 %8751 }
 0x9f4   : > { %v8790_v12 = vmul.f32 %v8752_v39, %v18374_v61 }
 0x9f6   : > { %v8806_v40 = vadd.f32 1e-05, %v8790_v12 }
 0x9f8   : > { %10854 = vrsqrt.f32 %v8806_v40  ;;  %vm8864_vm15 = vweird.f32 %v8806_v40 }
 0x9fb   : > { %v8755_v11 = vpop.xlane.xlu0 %8754  ;;  %v8677_v0 = vpop.xlane.xlu2 %8676 }
 0x9fc   : > { %v8791_v34 = vmul.f32 %v8755_v11, %v18374_v61  ;;  %v8701_v48 = vmul.f32 %v8677_v0, %v18374_v61 }
 0x9fe   : > { %v10855_v33 = vpop.eup %10854  ;;  %v8807_v23 = vadd.f32 1e-05, %v8791_v34  ;;  %v16744_v56 = vsub.f32 %v16641_v45, %v8701_v48 }
 0x9ff   : > { %v8859_v38 = vmul.f32 %v10855_v33, %v8806_v40  ;;  %vm8865_vm14 = vweird.f32 %v10855_v33 }
 0xa00   : > { %10856 = vrsqrt.f32 %v8807_v23  ;;  %v8733_v28 = vmul.f32 %v16744_v56, %v16744_v56  ;;  %vm8866_vm0 = vmor %vm8864_vm15, %vm8865_vm14  ;;  %vm8874_vm7 = vweird.f32 %v8807_v23 }
 0xa01   : > { %v8860_v54 = vmul.f32 %v10855_v33, %v8859_v38 }
 0xa02   : > { %v8771_v26 = vsel %vm834_vm1, %v8733_v28, 0.0 }
 0xa03   : > { %v8861_v10 = vmul.f32 0.5, %v8860_v54  ;;  %8772 = vadd.xlane.f32.xlu0 %v8771_v26  ;;  %v8680_v47 = vpop.xlane.xlu2 %8679 }
 0xa04   : > { %v8702_v19 = vmul.f32 %v8680_v47, %v18374_v61 }
 0xa05   : > { %v8862_v25 = vsub.f32 1.5, %v8861_v10 }
 0xa06   : > { %v10857_v18 = vpop.eup %10856  ;;  %v16751_v42 = vsub.f32 %v16652_v36, %v8702_v19 }
 0xa07   : > { %v8869_v32 = vmul.f32 %v10857_v18, %v8807_v23  ;;  %v8863_v43 = vmul.f32 %v10855_v33, %v8862_v25  ;;  %vm8875_vm6 = vweird.f32 %v10857_v18 }
 0xa08   : > { %v8734_v6 = vmul.f32 %v16751_v42, %v16751_v42  ;;  %v8758_v35 = vpop.xlane.xlu0 %8757  ;;  %vm8876_vm9 = vmor %vm8874_vm7, %vm8875_vm6 }
 0xa09   : > { %v8870_v16 = vmul.f32 %v10857_v18, %v8869_v32  ;;  %v8792_v63 = vmul.f32 %v8758_v35, %v18374_v61  ;;  %v8867_v2 = vsel %vm8866_vm0, %v10855_v33, %v8863_v43 }
 0xa0a   : > { %v8774_v59 = vsel %vm834_vm1, %v8734_v6, 0.0  ;;  %v8982_v41 = vmul.f32 %v8867_v2, %v16634_v46 }
 0xa0b   : > { %v8871_v14 = vmul.f32 0.5, %v8870_v16  ;;  %8775 = vadd.xlane.f32.xlu1 %v8774_v59  ;;  %v8808_v49 = vadd.f32 1e-05, %v8792_v63  ;;  %v8689_v12 = vpop.xlane.xlu2 %8688 }
 0xa0c   : > { %v9001_v40 = vmul.f32 %v16702_v20, %v8982_v41  ;;  %v8705_v46 = vmul.f32 %v8689_v12, %v18374_v61 }
 0xa0d   : > { %v8872_v30 = vsub.f32 1.5, %v8871_v14  ;;  %10858 = vrsqrt.f32 %v8808_v49  ;;  %vm8884_vm3 = vweird.f32 %v8808_v49 }
 0xa0e   : > { %v16770_v23 = vsub.f32 %v16677_v58, %v8705_v46  ;;  %v9020_v28 = vadd.f32 %v16712_v17, %v9001_v40 }
 0xa0f   : > { %v8873_v3 = vmul.f32 %v10857_v18, %v8872_v30 }
 0xa10   : > { %v8683_v53 = vpop.xlane.xlu0 %8682  ;;  %v8761_v13 = vpop.xlane.xlu1 %8760  ;;  %v8737_v10 = vmul.f32 %v16770_v23, %v16770_v23 }
 0xa11   : > { %v8877_v57 = vsel %vm8876_vm9, %v10857_v18, %v8873_v3  ;;  %v8703_v1 = vmul.f32 %v8683_v53, %v18374_v61  ;;  %v8793_v39 = vmul.f32 %v8761_v13, %v18374_v61 }
 0xa12   : > { %v8983_v44 = vmul.f32 %v8877_v57, %v16644_v60  ;;  %v8783_v18 = vsel %vm834_vm1, %v8737_v10, 0.0 }
 0xa13   : > { %v10859_v11 = vpop.eup %10858  ;;  %v16763_v0 = vsub.f32 %v16666_v7, %v8703_v1  ;;  %v8809_v34 = vadd.f32 1e-05, %v8793_v39  ;;  %8784 = vadd.xlane.f32.xlu1 %v8783_v18 }
 0xa14   : > { %v9002_v48 = vmul.f32 %v16702_v20, %v8983_v44  ;;  %v8879_v33 = vmul.f32 %v10859_v11, %v8808_v49  ;;  %vm8885_vm2 = vweird.f32 %v10859_v11 }
 0xa15   : > { %v8735_v60 = vmul.f32 %v16763_v0, %v16763_v0  ;;  %10860 = vrsqrt.f32 %v8809_v34  ;;  %vm8886_vm4 = vmor %vm8884_vm3, %vm8885_vm2  ;;  %vm8894_vm8 = vweird.f32 %v8809_v34 }
 0xa16   : > { %v8880_v38 = vmul.f32 %v10859_v11, %v8879_v33  ;;  %v9021_v54 = vadd.f32 %v16712_v17, %v9002_v48 }
 0xa17   : > { %v8777_v26 = vsel %vm834_vm1, %v8735_v60, 0.0 }
 0xa18   : > { %v8881_v47 = vmul.f32 0.5, %v8880_v38  ;;  %8778 = vadd.xlane.f32.xlu2 %v8777_v26  ;;  %v9034_v19 = vpack.c.bf16 %v9021_v54, %v9020_v28  ;;  %v8686_v25 = vpop.xlane.xlu1 %8685  ;;  %v8764_v1 = vpop.xlane.xlu0 %8763 }
 0xa19   : > { %v8704_v32 = vmul.f32 %v8686_v25, %v18374_v61 }
 0xa1a   : > { %v8882_v43 = vsub.f32 1.5, %v8881_v47  ;;  %10300 = vmatmul.msk.bf16.gmra.mxu1 %vm834_vm1, %v9034_v19 }
 0xa1b   : > { %v10861_v6 = vpop.eup %10860  ;;  %v16781_v16 = vsub.f32 %v16684_v62, %v8704_v32 }
 0xa1c   : > { %v8883_v35 = vmul.f32 %v10859_v11, %v8882_v43  ;;  %v8889_v63 = vmul.f32 %v10861_v6, %v8809_v34  ;;  %vm8895_vm5 = vweird.f32 %v10861_v6  ;;  %v10376_v43 = vld [vmem:[%s11240_s24 + $0x38] sm:$0xff] }
 0xa1d   : > { %v8736_v59 = vmul.f32 %v16781_v16, %v16781_v16  ;;  %vm8896_vm10 = vmor %vm8894_vm8, %vm8895_vm5  ;;  %9545 = vmatpush.bf16.msra.mxu0 %v10376_v43  ;;  %10379 = vmatpush.bf16.msrb.mxu2 %v10376_v43 }
 0xa1e   : > { %v8890_v14 = vmul.f32 %v10861_v6, %v8889_v63  ;;  %v8887_v30 = vsel %vm8886_vm4, %v10859_v11, %v8883_v35  ;;  %v8794_v11 = vmul.f32 %v8764_v1, %v18374_v61  ;;  %v10375_v63 = vld [vmem:[%s11240_s24 + $0x30] sm:$0xff] }
 0xa1f   : > { %v8780_v2 = vsel %vm834_vm1, %v8736_v59, 0.0  ;;  %v8984_v57 = vmul.f32 %v8887_v30, %v16659_v9 }
 0xa20   : > { %v8891_v41 = vmul.f32 0.5, %v8890_v14  ;;  %8781 = vadd.xlane.f32.xlu0 %v8780_v2  ;;  %v8810_v9 = vadd.f32 1e-05, %v8794_v11 }
 0xa21   : > { %v9003_v49 = vmul.f32 %v16702_v20, %v8984_v57  ;;  %9546 = vmatpush.bf16.msra.mxu0 %v10375_v63  ;;  %10380 = vmatpush.bf16.msrb.mxu2 %v10375_v63 }
 0xa22   : > { %v8892_v3 = vsub.f32 1.5, %v8891_v41  ;;  %10862 = vrsqrt.f32 %v8810_v9  ;;  %v10374_v41 = vld [vmem:[%s11240_s24 + $0x28] sm:$0xff]  ;;  %vm8904_vm12 = vweird.f32 %v8810_v9 }
 0xa23   : > { %v9022_v12 = vadd.f32 %v16712_v17, %v9003_v49 }
 0xa24   : > { %v8893_v53 = vmul.f32 %v10861_v6, %v8892_v3 }
 0xa25   : > { %9547 = vmatpush.bf16.msra.mxu0 %v10374_v41  ;;  %10381 = vmatpush.bf16.msrb.mxu2 %v10374_v41 }
 0xa26   : > { %v8897_v13 = vsel %vm8896_vm10, %v10861_v6, %v8893_v53 }
 0xa27   : > { %v8985_v44 = vmul.f32 %v8897_v13, %v16669_v31  ;;  %v16799_v31 = vld [vmem:[%s694_s6] ss:$0 sm:$0xff] }
 0xa28   : > { %v10863_v34 = vpop.eup %10862 }
 0xa29   : > { %v9004_v39 = vmul.f32 %v16702_v20, %v8985_v44  ;;  %v8899_v60 = vmul.f32 %v10863_v34, %v8810_v9  ;;  %vm8905_vm11 = vweird.f32 %v10863_v34 }
 0xa2a   : > { %vm8906_vm13 = vmor %vm8904_vm12, %vm8905_vm11 }
 0xa2b   : > { %v9023_v40 = vadd.f32 %v16712_v17, %v9004_v39  ;;  %v8900_v10 = vmul.f32 %v10863_v34, %v8899_v60 }
 0xa2d   : > { %v9035_v46 = vpack.c.bf16 %v9023_v40, %v9022_v12  ;;  %v8901_v18 = vmul.f32 0.5, %v8900_v10 }
 0xa2f   : > { %10301 = vmatmul.msk.bf16.gmra.mxu1 %vm834_vm1, %v9035_v46  ;;  %v8902_v2 = vsub.f32 1.5, %v8901_v18  ;;  %v10372_v18 = vld [vmem:[%s11240_s24 + $0x18] sm:$0xff] }
 0xa30   : > { %v9093_v48 = vpop.f32.mrf.mxu1 }
 0xa31   : > { %v16802_v33 = vadd.f32 %v16799_v31, %v9093_v48  ;;  %v8903_v57 = vmul.f32 %v10863_v34, %v8902_v2 }
 0xa33   : > { %v10306_v38 = vmul.f32 -1.702, %v16802_v33  ;;  %v8907_v39 = vsel %vm8906_vm13, %v10863_v34, %v8903_v57  ;;  %v10373_v34 = vld [vmem:[%s11240_s24 + $0x20] sm:$0xff] }
 0xa34   : > { %v8986_v11 = vmul.f32 %v8907_v39, %v16687_v50  ;;  %9548 = vmatpush.bf16.msra.mxu0 %v10373_v34  ;;  %10382 = vmatpush.bf16.msrb.mxu2 %v10373_v34 }
 0xa35   : > { %v9165_v26 = vmul.f32 1.442695, %v10306_v38 }
 0xa37   : > { %10864 = vpow2.f32 %v9165_v26  ;;  %v9005_v26 = vmul.f32 %v16702_v20, %v8986_v11 }
 0xa38   : > { %v9095_v19 = vpop.f32.mrf.mxu1  ;;  %9549 = vmatpush.bf16.msra.mxu0 %v10372_v18  ;;  %10383 = vmatpush.bf16.msrb.mxu2 %v10372_v18 }
 0xa39   : > { %v16807_v25 = vadd.f32 %v16799_v31, %v9095_v19  ;;  %v9024_v43 = vadd.f32 %v16712_v17, %v9005_v26 }
 0xa3b   : > { %v10307_v32 = vmul.f32 -1.702, %v16807_v25 }
 0xa3d   : > { %v10865_v6 = vpop.eup %10864  ;;  %v9167_v35 = vmul.f32 1.442695, %v10307_v32 }
 0xa3e   : > { %v8767_v28 = vpop.xlane.xlu1 %8766  ;;  %v16812_v59 = vadd.f32 1.0, %v10865_v6 }
 0xa3f   : > { %v8795_v54 = vmul.f32 %v8767_v28, %v18374_v61 }
 0xa40   : > { %vm9218_vm9 = vweird.f32 %v16812_v59 }
 0xa41   : > { %v8811_v47 = vadd.f32 1e-05, %v8795_v54 }
 0xa43   : > { %10866 = vrsqrt.f32 %v8811_v47  ;;  %vm8914_vm15 = vweird.f32 %v8811_v47 }
 0xa44   : > { %10868 = vpow2.f32 %v9167_v35 }
 0xa45   : > { %10870 = vrcp.f32 %v16812_v59 }
 0xa46   : > { %v8770_v28 = vpop.xlane.xlu2 %8769 }
 0xa49   : > { %v10867_v14 = vpop.eup %10866 }
 0xa4a   : > { %v8909_v30 = vmul.f32 %v10867_v14, %v8811_v47  ;;  %v10869_v13 = vpop.eup %10868  ;;  %vm8915_vm14 = vweird.f32 %v10867_v14 }
 0xa4b   : > { %v16816_v44 = vpop.eup %10870  ;;  %v9198_v1 = vadd.f32 1.0, %v10869_v13  ;;  %vm8916_vm0 = vmor %vm8914_vm15, %vm8915_vm14 }
 0xa4c   : > { %v8910_v3 = vmul.f32 %v10867_v14, %v8909_v30  ;;  %v9214_v12 = vmul.f32 %v16816_v44, %v16812_v59  ;;  %vm9219_vm6 = vweird.f32 %v16816_v44 }
 0xa4d   : > { %10872 = vrcp.f32 %v9198_v1  ;;  %v9237_v35 = vand.u32 2147483647, %v9198_v1  ;;  %v9239_v63 = vand.u32 2147483648, %v9198_v1  ;;  %vm16838_vm2 = vmor %vm9218_vm9, %vm9219_vm6  ;;  %vm9233_vm3 = vweird.f32 %v9198_v1 }
 0xa4e   : > { %v8911_v53 = vmul.f32 0.5, %v8910_v3  ;;  %v9215_v48 = vsub.f32 1.0, %v9214_v12  ;;  %v9224_v3 = vand.u32 2147483648, %v16812_v59 }
 0xa4f   : > { %v9240_v39 = vor.u32 1.1754944e-38, %v9239_v63  ;;  %vm9238_vm5 = vcmp.eq.f32.partialorder %v9237_v35, 8.507059e+37 }
 0xa50   : > { %v8912_v49 = vsub.f32 1.5, %v8911_v53  ;;  %v9216_v47 = vmul.f32 %v16816_v44, %v9215_v48  ;;  %v9222_v53 = vand.u32 2147483647, %v16812_v59  ;;  %v9225_v59 = vor.u32 1.1754944e-38, %v9224_v3 }
 0xa52   : > { %v8913_v40 = vmul.f32 %v10867_v14, %v8912_v49  ;;  %v9217_v2 = vadd.f32 %v16816_v44, %v9216_v47  ;;  %vm9223_vm8 = vcmp.eq.f32.partialorder %v9222_v53, 8.507059e+37 }
 0xa53   : > { %v10873_v38 = vpop.eup %10872 }
 0xa54   : > { %v8917_v46 = vsel %vm8916_vm0, %v10867_v14, %v8913_v40  ;;  %v9229_v19 = vmul.f32 %v10873_v38, %v9198_v1  ;;  %vm9234_vm7 = vweird.f32 %v10873_v38  ;;  %v10371_v40 = vld [vmem:[%s11240_s24 + $0x10] sm:$0xff]  ;;  %v9221_v11 = vsel %vm16838_vm2, %v16816_v44, %v9217_v2 }
 0xa55   : > { %v8987_v9 = vmul.f32 %v8917_v46, %v16721_v24  ;;  %v8796_v24 = vmul.f32 %v8770_v28, %v18374_v61  ;;  %vm9235_vm4 = vmor %vm9233_vm3, %vm9234_vm7  ;;  %9550 = vmatpush.bf16.msra.mxu0 %v10371_v40  ;;  %10384 = vmatpush.bf16.msrb.mxu2 %v10371_v40  ;;  %v9226_v34 = vsel %vm9223_vm8, %v9225_v59, %v9221_v11 }
 0xa56   : > { %v9230_v32 = vsub.f32 1.0, %v9229_v19  ;;  %v9453_v47 = vmul.f32 %v9226_v34, %v16802_v33 }
 0xa57   : > { %v9098_v60 = vpop.f32.mrf.mxu1  ;;  %v9006_v10 = vmul.f32 %v16702_v20, %v8987_v9  ;;  %v16851_v46 = vadd.f32 1e-05, %v8796_v24 }
 0xa58   : > { %v16823_v54 = vadd.f32 %v16799_v31, %v9098_v60  ;;  %v9231_v30 = vmul.f32 %v10873_v38, %v9230_v32  ;;  %v10370_v60 = vld [vmem:[%s11240_s24 + $0x8] sm:$0xff] }
 0xa59   : > { %v9025_v6 = vadd.f32 %v16712_v17, %v9006_v10  ;;  %9551 = vmatpush.bf16.msra.mxu0 %v10370_v60  ;;  %10385 = vmatpush.bf16.msrb.mxu2 %v10370_v60  ;;  %vm8924_vm9 = vweird.f32 %v16851_v46 }
 0xa5a   : > { %v10308_v50 = vmul.f32 -1.702, %v16823_v54  ;;  %v9232_v13 = vadd.f32 %v10873_v38, %v9231_v30 }
 0xa5b   : > { %v9036_v41 = vpack.c.bf16 %v9025_v6, %v9024_v43 }
 0xa5c   : > { %v9169_v14 = vmul.f32 1.442695, %v10308_v50  ;;  %v9236_v9 = vsel %vm9235_vm4, %v10873_v38, %v9232_v13  ;;  %v10369_v38 = vld [vmem:[%s11240_s24] sm:$0xff] }
 0xa5d   : > { %10302 = vmatmul.msk.bf16.gmra.mxu1 %vm834_vm1, %v9036_v41  ;;  %v9241_v1 = vsel %vm9238_vm5, %v9240_v39, %v9236_v9  ;;  %9552 = vmatpush.bf16.msra.mxu0 %v10369_v38 }
 0xa5e   : > { %10874 = vpow2.f32 %v9169_v14  ;;  %v9454_v44 = vmul.f32 %v9241_v1, %v16807_v25  ;;  %10386 = vmatpush.bf16.msrb.mxu2 %v10369_v38 }
 0xa5f   : > { %v9100_v49 = vpop.f32.mrf.mxu1  ;;  %10876 = vrsqrt.f32 %v16851_v46 }
 0xa60   : > { %v16845_v12 = vadd.f32 %v16799_v31, %v9100_v49  ;;  %v9469_v19 = vpack.c.bf16 %v9454_v44, %v9453_v47 }
 0xa62   : > { %v10309_v48 = vmul.f32 -1.702, %v16845_v12  ;;  %9553 = vmatmul.bf16.vlgmr.msra.gmra.mxu0 %v9469_v19 }
 0xa64   : > { %v10875_v28 = vpop.eup %10874  ;;  %v9171_v26 = vmul.f32 1.442695, %v10309_v48 }
 0xa65   : > { %v9199_v10 = vadd.f32 1.0, %v10875_v28  ;;  %v10877_v50 = vpop.eup %10876 }
 0xa66   : > { %10878 = vpow2.f32 %v9171_v26  ;;  %v8919_v6 = vmul.f32 %v10877_v50, %v16851_v46  ;;  %vm8925_vm7 = vweird.f32 %v10877_v50 }
 0xa67   : > { %10880 = vrcp.f32 %v9199_v10  ;;  %v9254_v57 = vand.u32 2147483648, %v9199_v10  ;;  %vm9248_vm11 = vweird.f32 %v9199_v10  ;;  %v9252_v53 = vand.u32 2147483647, %v9199_v10  ;;  %vm8926_vm2 = vmor %vm8924_vm9, %vm8925_vm7 }
 0xa68   : > { %v8920_v63 = vmul.f32 %v10877_v50, %v8919_v6 }
 0xa69   : > { %v9255_v59 = vor.u32 1.1754944e-38, %v9254_v57  ;;  %vm9253_vm14 = vcmp.eq.f32.partialorder %v9252_v53, 8.507059e+37 }
 0xa6a   : > { %v8921_v3 = vmul.f32 0.5, %v8920_v63 }
 0xa6c   : > { %v10879_v18 = vpop.eup %10878  ;;  %v8922_v1 = vsub.f32 1.5, %v8921_v3 }
 0xa6d   : > { %v10881_v24 = vpop.eup %10880  ;;  %v9200_v32 = vadd.f32 1.0, %v10879_v18 }
 0xa6e   : > { %v9244_v43 = vmul.f32 %v10881_v24, %v9199_v10  ;;  %vm9249_vm10 = vweird.f32 %v10881_v24  ;;  %v8923_v47 = vmul.f32 %v10877_v50, %v8922_v1 }
 0xa6f   : > { %10882 = vrcp.f32 %v9200_v32  ;;  %vm9250_vm12 = vmor %vm9248_vm11, %vm9249_vm10  ;;  %v9267_v39 = vand.u32 2147483647, %v9200_v32  ;;  %v9269_v40 = vand.u32 2147483648, %v9200_v32  ;;  %vm9263_vm15 = vweird.f32 %v9200_v32 }
 0xa70   : > { %v9245_v25 = vsub.f32 1.0, %v9244_v43 }
 0xa71   : > { %v9270_v28 = vor.u32 1.1754944e-38, %v9269_v40  ;;  %vm9268_vm6 = vcmp.eq.f32.partialorder %v9267_v39, 8.507059e+37 }
 0xa72   : > { %v9246_v35 = vmul.f32 %v10881_v24, %v9245_v25  ;;  %v8927_v25 = vsel %vm8926_vm2, %v10877_v50, %v8923_v47 }
 0xa73   : > { %v8988_v63 = vmul.f32 %v8927_v25, %v16729_v27 }
 0xa74   : > { %v9247_v30 = vadd.f32 %v10881_v24, %v9246_v35 }
 0xa75   : > { %v10883_v14 = vpop.eup %10882  ;;  %v9007_v46 = vmul.f32 %v16702_v20, %v8988_v63 }
 0xa76   : > { %v8773_v2 = vpop.xlane.xlu0 %8772  ;;  %v9259_v33 = vmul.f32 %v10883_v14, %v9200_v32  ;;  %v9251_v11 = vsel %vm9250_vm12, %v10881_v24, %v9247_v30  ;;  %vm9264_vm13 = vweird.f32 %v10883_v14 }
 0xa77   : > { %v8797_v41 = vmul.f32 %v8773_v2, %v18374_v61  ;;  %v9256_v60 = vsel %vm9253_vm14, %v9255_v59, %v9251_v11  ;;  %vm9265_vm0 = vmor %vm9263_vm15, %vm9264_vm13  ;;  %v9026_v39 = vadd.f32 %v16712_v17, %v9007_v46 }
 0xa78   : > { %v9260_v13 = vsub.f32 1.0, %v9259_v33  ;;  %v9455_v19 = vmul.f32 %v9256_v60, %v16823_v54 }
 0xa79   : > { %v8813_v49 = vadd.f32 1e-05, %v8797_v41 }
 0xa7a   : > { %v9261_v9 = vmul.f32 %v10883_v14, %v9260_v13 }
 0xa7b   : > { %10884 = vrsqrt.f32 %v8813_v49  ;;  %vm8934_vm4 = vweird.f32 %v8813_v49 }
 0xa7c   : > { %v9262_v48 = vadd.f32 %v10883_v14, %v9261_v9 }
 0xa7e   : > { %v8776_v34 = vpop.xlane.xlu1 %8775  ;;  %v9266_v26 = vsel %vm9265_vm0, %v10883_v14, %v9262_v48 }
 0xa7f   : > { %v8798_v44 = vmul.f32 %v8776_v34, %v18374_v61  ;;  %v9271_v10 = vsel %vm9268_vm6, %v9270_v28, %v9266_v26 }
 0xa80   : > { %v9456_v18 = vmul.f32 %v9271_v10, %v16845_v12 }
 0xa81   : > { %v10885_v38 = vpop.eup %10884  ;;  %v8814_v24 = vadd.f32 1e-05, %v8798_v44 }
 0xa82   : > { %v8929_v43 = vmul.f32 %v10885_v38, %v8813_v49  ;;  %v9470_v32 = vpack.c.bf16 %v9456_v18, %v9455_v19  ;;  %vm8935_vm3 = vweird.f32 %v10885_v38 }
 0xa83   : > { %10886 = vrsqrt.f32 %v8814_v24  ;;  %vm8936_vm5 = vmor %vm8934_vm4, %vm8935_vm3  ;;  %vm8944_vm10 = vweird.f32 %v8814_v24 }
 0xa84   : > { %v8930_v6 = vmul.f32 %v10885_v38, %v8929_v43  ;;  %9558 = vmatmul.bf16.vlgmr.msrb.gmra.mxu2 %v9470_v32 }
 0xa86   : > { %v8931_v35 = vmul.f32 0.5, %v8930_v6  ;;  %v8785_v57 = vpop.xlane.xlu1 %8784 }
 0xa87   : > { %v8801_v27 = vmul.f32 %v8785_v57, %v18374_v61 }
 0xa88   : > { %v8932_v14 = vsub.f32 1.5, %v8931_v35 }
 0xa89   : > { %v10887_v2 = vpop.eup %10886  ;;  %v8817_v40 = vadd.f32 1e-05, %v8801_v27 }
 0xa8a   : > { %v8933_v30 = vmul.f32 %v10885_v38, %v8932_v14  ;;  %v8939_v54 = vmul.f32 %v10887_v2, %v8814_v24  ;;  %vm8945_vm8 = vweird.f32 %v10887_v2 }
 0xa8b   : > { %v8779_v33 = vpop.xlane.xlu2 %8778  ;;  %vm8946_vm11 = vmor %vm8944_vm10, %vm8945_vm8  ;;  %vm8974_vm0 = vweird.f32 %v8817_v40 }
 0xa8c   : > { %v8937_v12 = vsel %vm8936_vm5, %v10885_v38, %v8933_v30  ;;  %v8940_v3 = vmul.f32 %v10887_v2, %v8939_v54  ;;  %v8799_v50 = vmul.f32 %v8779_v33, %v18374_v61 }
 0xa8d   : > { %v8989_v41 = vmul.f32 %v8937_v12, %v16744_v56 }
 0xa8e   : > { %v8815_v53 = vadd.f32 1e-05, %v8799_v50  ;;  %v8941_v49 = vmul.f32 0.5, %v8940_v3 }
 0xa8f   : > { %v9008_v13 = vmul.f32 %v16702_v20, %v8989_v41 }
 0xa90   : > { %10888 = vrsqrt.f32 %v8815_v53  ;;  %v8942_v59 = vsub.f32 1.5, %v8941_v49  ;;  %vm8954_vm13 = vweird.f32 %v8815_v53 }
 0xa91   : > { %v9027_v11 = vadd.f32 %v16712_v17, %v9008_v13  ;;  %10890 = vrsqrt.f32 %v8817_v40 }
 0xa92   : > { %v8943_v28 = vmul.f32 %v10887_v2, %v8942_v59 }
 0xa93   : > { %v9037_v9 = vpack.c.bf16 %v9027_v11, %v9026_v39  ;;  %v8782_v26 = vpop.xlane.xlu0 %8781 }
 0xa94   : > { %v8800_v38 = vmul.f32 %v8782_v26, %v18374_v61  ;;  %v8947_v32 = vsel %vm8946_vm11, %v10887_v2, %v8943_v28 }
 0xa95   : > { %10303 = vmatmul.msk.bf16.gmra.mxu1 %vm834_vm1, %v9037_v9  ;;  %v8990_v30 = vmul.f32 %v8947_v32, %v16751_v42 }
 0xa96   : > { %v10889_v56 = vpop.eup %10888  ;;  %v8816_v43 = vadd.f32 1e-05, %v8800_v38 }
 0xa97   : > { %v8949_v1 = vmul.f32 %v10889_v56, %v8815_v53  ;;  %v9103_v48 = vpop.f32.mrf.mxu1  ;;  %v10891_v60 = vpop.eup %10890  ;;  %vm8955_vm12 = vweird.f32 %v10889_v56  ;;  %v9009_v57 = vmul.f32 %v16702_v20, %v8990_v30 }
 0xa98   : > { %v16875_v34 = vadd.f32 %v16799_v31, %v9103_v48  ;;  %v8969_v10 = vmul.f32 %v10891_v60, %v8817_v40  ;;  %10892 = vrsqrt.f32 %v8816_v43  ;;  %vm8956_vm14 = vmor %vm8954_vm13, %vm8955_vm12  ;;  %vm8975_vm15 = vweird.f32 %v10891_v60 }
 0xa99   : > { %v8950_v44 = vmul.f32 %v10889_v56, %v8949_v1  ;;  %vm8976_vm6 = vmor %vm8974_vm0, %vm8975_vm15  ;;  %v9028_v39 = vadd.f32 %v16712_v17, %v9009_v57  ;;  %vm8964_vm9 = vweird.f32 %v8816_v43 }
 0xa9a   : > { %v10310_v47 = vmul.f32 -1.702, %v16875_v34  ;;  %v8970_v18 = vmul.f32 %v10891_v60, %v8969_v10 }
 0xa9b   : > { %v8951_v19 = vmul.f32 0.5, %v8950_v44 }
 0xa9c   : > { %v9173_v6 = vmul.f32 1.442695, %v10310_v47  ;;  %v8971_v35 = vmul.f32 0.5, %v8970_v18 }
 0xa9d   : > { %v8952_v25 = vsub.f32 1.5, %v8951_v19 }
 0xa9e   : > { %10894 = vpow2.f32 %v9173_v6  ;;  %v8972_v61 = vsub.f32 1.5, %v8971_v35  ;;  %v10893_v33 = vpop.eup %10892 }
 0xa9f   : > { %v8953_v63 = vmul.f32 %v10889_v56, %v8952_v25  ;;  %v9105_v14 = vpop.f32.mrf.mxu1  ;;  %v8959_v3 = vmul.f32 %v10893_v33, %v8816_v43  ;;  %vm8965_vm7 = vweird.f32 %v10893_v33 }
 0xaa0   : > { %v16881_v24 = vadd.f32 %v16799_v31, %v9105_v14  ;;  %v8973_v41 = vmul.f32 %v10891_v60, %v8972_v61  ;;  %vm8966_vm2 = vmor %vm8964_vm9, %vm8965_vm7 }
 0xaa1   : > { %v8957_v54 = vsel %vm8956_vm14, %v10889_v56, %v8953_v63  ;;  %v8960_v27 = vmul.f32 %v10893_v33, %v8959_v3 }
 0xaa2   : > { %v8991_v12 = vmul.f32 %v8957_v54, %v16763_v0  ;;  %v10311_v2 = vmul.f32 -1.702, %v16881_v24  ;;  %v8977_v13 = vsel %vm8976_vm6, %v10891_v60, %v8973_v41 }
 0xaa3   : > { %v8961_v0 = vmul.f32 0.5, %v8960_v27  ;;  %v8993_v59 = vmul.f32 %v8977_v13, %v16770_v23 }
 0xaa4   : > { %v10895_v46 = vpop.eup %10894  ;;  %v9175_v50 = vmul.f32 1.442695, %v10311_v2  ;;  %v9010_v42 = vmul.f32 %v16702_v20, %v8991_v12 }
 0xaa5   : > { %v9201_v53 = vadd.f32 1.0, %v10895_v46  ;;  %v8962_v11 = vsub.f32 1.5, %v8961_v0  ;;  %v9012_v10 = vmul.f32 %v16702_v20, %v8993_v59 }
 0xaa6   : > { %10896 = vpow2.f32 %v9175_v50  ;;  %v9029_v49 = vadd.f32 %v16712_v17, %v9010_v42 }
 0xaa7   : > { %10898 = vrcp.f32 %v9201_v53  ;;  %v8963_v1 = vmul.f32 %v10893_v33, %v8962_v11  ;;  %v9031_v32 = vadd.f32 %v16712_v17, %v9012_v10  ;;  %v9284_v61 = vand.u32 2147483648, %v9201_v53 }
 0xaa8   : > { %v9038_v9 = vpack.c.bf16 %v9029_v49, %v9028_v39  ;;  %vm9278_vm4 = vweird.f32 %v9201_v53  ;;  %v9282_v54 = vand.u32 2147483647, %v9201_v53 }
 0xaa9   : > { %v8967_v44 = vsel %vm8966_vm2, %v10893_v33, %v8963_v1  ;;  %v9285_v3 = vor.u32 1.1754944e-38, %v9284_v61 }
 0xaaa   : > { %10304 = vmatmul.msk.bf16.gmra.mxu1 %vm834_vm1, %v9038_v9  ;;  %v8992_v38 = vmul.f32 %v8967_v44, %v16781_v16  ;;  %vm9283_vm10 = vcmp.eq.f32.partialorder %v9282_v54, 8.507059e+37 }
 0xaac   : > { %v10897_v56 = vpop.eup %10896  ;;  %v9108_v40 = vpop.f32.mrf.mxu1  ;;  %v9011_v19 = vmul.f32 %v16702_v20, %v8992_v38 }
 0xaad   : > { %v10899_v48 = vpop.eup %10898  ;;  %v9202_v28 = vadd.f32 1.0, %v10897_v56  ;;  %v16892_v60 = vadd.f32 %v16799_v31, %v9108_v40 }
 0xaae   : > { %v9274_v26 = vmul.f32 %v10899_v48, %v9201_v53  ;;  %v9030_v6 = vadd.f32 %v16712_v17, %v9011_v19  ;;  %vm9279_vm3 = vweird.f32 %v10899_v48 }
 0xaaf   : > { %10900 = vrcp.f32 %v9202_v28  ;;  %v10312_v47 = vmul.f32 -1.702, %v16892_v60  ;;  %vm9280_vm5 = vmor %vm9278_vm4, %vm9279_vm3  ;;  %v9299_v17 = vand.u32 2147483648, %v9202_v28  ;;  %v9297_v41 = vand.u32 2147483647, %v9202_v28 }
 0xab0   : > { %v9275_v23 = vsub.f32 1.0, %v9274_v26  ;;  %v9039_v63 = vpack.c.bf16 %v9031_v32, %v9030_v6  ;;  %vm9293_vm11 = vweird.f32 %v9202_v28 }
 0xab1   : > { %v9177_v43 = vmul.f32 1.442695, %v10312_v47  ;;  %v9300_v27 = vor.u32 1.1754944e-38, %v9299_v17  ;;  %vm9298_vm13 = vcmp.eq.f32.partialorder %v9297_v41, 8.507059e+37 }
 0xab2   : > { %v9276_v18 = vmul.f32 %v10899_v48, %v9275_v23  ;;  %10305 = vmatmul.msk.bf16.vlgmr.msra.gmra.mxu3 %vm834_vm1, %v9039_v63 }
 0xab3   : > { %10902 = vpow2.f32 %v9177_v43 }
 0xab4   : > { %v9110_v25 = vpop.f32.mrf.mxu1  ;;  %v9277_v30 = vadd.f32 %v10899_v48, %v9276_v18 }
 0xab5   : > { %v10901_v35 = vpop.eup %10900  ;;  %v16901_v14 = vadd.f32 %v16799_v31, %v9110_v25 }
 0xab6   : > { %v9289_v16 = vmul.f32 %v10901_v35, %v9202_v28  ;;  %v9281_v33 = vsel %vm9280_vm5, %v10899_v48, %v9277_v30  ;;  %vm9294_vm8 = vweird.f32 %v10901_v35 }
 0xab7   : > { %v10313_v20 = vmul.f32 -1.702, %v16901_v14  ;;  %v9286_v42 = vsel %vm9283_vm10, %v9285_v3, %v9281_v33  ;;  %vm9295_vm12 = vmor %vm9293_vm11, %vm9294_vm8 }
 0xab8   : > { %v9290_v12 = vsub.f32 1.0, %v9289_v16  ;;  %v9457_v39 = vmul.f32 %v9286_v42, %v16875_v34 }
 0xab9   : > { %v9179_v2 = vmul.f32 1.442695, %v10313_v20  ;;  %v10903_v50 = vpop.eup %10902 }
 0xaba   : > { %v9291_v46 = vmul.f32 %v10901_v35, %v9290_v12  ;;  %v9203_v0 = vadd.f32 1.0, %v10903_v50 }
 0xabb   : > { %10904 = vpow2.f32 %v9179_v2 }
 0xabc   : > { %v9292_v57 = vadd.f32 %v10901_v35, %v9291_v46  ;;  %10906 = vrcp.f32 %v9203_v0  ;;  %v9314_v47 = vand.u32 2147483648, %v9203_v0  ;;  %vm9308_vm7 = vweird.f32 %v9203_v0  ;;  %v16916_v46 = vld [vmem:[%s702_s10] ss:$0 sm:$0xff]  ;;  %s18379_s10 = sld [smem:[#allocation224_spill]] (!%p10354_p8) }
 0xabd   : > { %v9312_v19 = vand.u32 2147483647, %v9203_v0 }
 0xabe   : > { %v9296_v13 = vsel %vm9295_vm12, %v10901_v35, %v9292_v57  ;;  %v9315_v35 = vor.u32 1.1754944e-38, %v9314_v47 }
 0xabf   : > { %v9301_v53 = vsel %vm9298_vm13, %v9300_v27, %v9296_v13  ;;  %vm9313_vm3 = vcmp.eq.f32.partialorder %v9312_v19, 8.507059e+37 }
 0xac0   : > { %v9458_v49 = vmul.f32 %v9301_v53, %v16881_v24 }
 0xac1   : > { %v10905_v11 = vpop.eup %10904 }
 0xac2   : > { %v9204_v9 = vadd.f32 1.0, %v10905_v11  ;;  %v9471_v59 = vpack.c.bf16 %v9458_v49, %v9457_v39  ;;  %v10907_v56 = vpop.eup %10906 }
 0xac3   : > { %v9304_v48 = vmul.f32 %v10907_v56, %v9203_v0  ;;  %vm9309_vm15 = vweird.f32 %v10907_v56 }
 0xac4   : > { %10908 = vrcp.f32 %v9204_v9  ;;  %9563 = vmatmul.bf16.gmra.mxu2 %v9471_v59  ;;  %v9329_v23 = vand.u32 2147483648, %v9204_v9  ;;  %vm9323_vm0 = vweird.f32 %v9204_v9  ;;  %v9327_v24 = vand.u32 2147483647, %v9204_v9  ;;  %vm9310_vm9 = vmor %vm9308_vm7, %vm9309_vm15 }
 0xac5   : > { %v9305_v26 = vsub.f32 1.0, %v9304_v48 }
 0xac6   : > { %v9330_v43 = vor.u32 1.1754944e-38, %v9329_v23  ;;  %vm9328_vm2 = vcmp.eq.f32.partialorder %v9327_v24, 8.507059e+37 }
 0xac7   : > { %v9306_v10 = vmul.f32 %v10907_v56, %v9305_v26 }
 0xac9   : > { %v9307_v34 = vadd.f32 %v10907_v56, %v9306_v10 }
 0xaca   : > { %v10909_v1 = vpop.eup %10908 }
 0xacb   : > { %v9319_v40 = vmul.f32 %v10909_v1, %v9204_v9  ;;  %vm9324_vm14 = vweird.f32 %v10909_v1  ;;  %v9311_v6 = vsel %vm9310_vm9, %v10907_v56, %v9307_v34 }
 0xacc   : > { %vm9325_vm6 = vmor %vm9323_vm0, %vm9324_vm14  ;;  %v9316_v16 = vsel %vm9313_vm3, %v9315_v35, %v9311_v6 }
 0xacd   : > { %v9320_v28 = vsub.f32 1.0, %v9319_v40  ;;  %v9459_v54 = vmul.f32 %v9316_v16, %v16892_v60 }
 0xacf   : > { %v9321_v44 = vmul.f32 %v10909_v1, %v9320_v28 }
 0xad1   : > { %v9322_v38 = vadd.f32 %v10909_v1, %v9321_v44 }
 0xad3   : > { %v9326_v18 = vsel %vm9325_vm6, %v10909_v1, %v9322_v38 }
 0xad4   : > { %v9331_v63 = vsel %vm9328_vm2, %v9330_v43, %v9326_v18 }
 0xad5   : > { %v9460_v61 = vmul.f32 %v9331_v63, %v16901_v14 }
 0xad7   : > { %v9472_v2 = vpack.c.bf16 %v9460_v61, %v9459_v54 }
 0xad9   : > { %9568 = vmatmul.bf16.gmra.mxu2 %v9472_v2 }
 0xada   : > { %v9113_v32 = vpop.f32.mrf.mxu1 }
 0xadb   : > { %v9114_v25 = vadd.f32 %v16799_v31, %v9113_v32 }
 0xadd   : > { %v10314_v30 = vmul.f32 -1.702, %v9114_v25 }
 0xadf   : > { %v9181_v20 = vmul.f32 1.442695, %v10314_v30  ;;  %v9554_v14 = vpop.f32.mrf.mxu0 }
 0xae0   : > { %v9555_v60 = vadd.f32 %v16916_v46, %v9554_v14 }
 0xae1   : > { %10910 = vpow2.f32 %v9181_v20 }
 0xae2   : > { %v9115_v12 = vpop.f32.mrf.mxu1  ;;  %v16920_v57 = vadd.f32 %v9555_v60, %v16514_v51 }
 0xae3   : > { %v9116_v17 = vadd.f32 %v16799_v31, %v9115_v12 }
 0xae4   : > { %9610 = vst.msk [vmem:[#allocation2] sm:$0xff] %vm834_vm1, %v16920_v57 }
 0xae5   : > { %v10315_v33 = vmul.f32 -1.702, %v9116_v17 }
 0xae7   : > { %v10911_v41 = vpop.eup %10910  ;;  %v9183_v3 = vmul.f32 1.442695, %v10315_v33  ;;  %v9556_v53 = vpop.f32.mrf.mxu0 }
 0xae8   : > { %v9205_v50 = vadd.f32 1.0, %v10911_v41  ;;  %v9557_v39 = vadd.f32 %v16916_v46, %v9556_v53 }
 0xae9   : > { %10912 = vpow2.f32 %v9183_v3 }
 0xaea   : > { %10914 = vrcp.f32 %v9205_v50  ;;  %v16926_v11 = vadd.f32 %v9557_v39, %v16540_v5  ;;  %v9344_v1 = vand.u32 2147483648, %v9205_v50  ;;  %vm9338_vm5 = vweird.f32 %v9205_v50 }
 0xaeb   : > { %v9342_v40 = vand.u32 2147483647, %v9205_v50 }
 0xaec   : > { %9611 = vst.msk [vmem:[#allocation2 + $0x8] sm:$0xff] %vm834_vm1, %v16926_v11  ;;  %v9345_v5 = vor.u32 1.1754944e-38, %v9344_v1 }
 0xaed   : > { %vm9343_vm11 = vcmp.eq.f32.partialorder %v9342_v40, 8.507059e+37 }
 0xaef   : > { %v10913_v42 = vpop.eup %10912 }
 0xaf0   : > { %v10915_v27 = vpop.eup %10914  ;;  %v9206_v13 = vadd.f32 1.0, %v10913_v42 }
 0xaf1   : > { %v9334_v0 = vmul.f32 %v10915_v27, %v9205_v50  ;;  %vm9339_vm4 = vweird.f32 %v10915_v27 }
 0xaf2   : > { %10916 = vrcp.f32 %v9206_v13  ;;  %vm9340_vm8 = vmor %vm9338_vm5, %vm9339_vm4  ;;  %v9359_v28 = vand.u32 2147483648, %v9206_v13  ;;  %v9357_v10 = vand.u32 2147483647, %v9206_v13  ;;  %vm9353_vm12 = vweird.f32 %v9206_v13 }
 0xaf3   : > { %v9335_v49 = vsub.f32 1.0, %v9334_v0 }
 0xaf4   : > { %v9360_v34 = vor.u32 1.1754944e-38, %v9359_v28  ;;  %vm9358_vm14 = vcmp.eq.f32.partialorder %v9357_v10, 8.507059e+37 }
 0xaf5   : > { %v9336_v9 = vmul.f32 %v10915_v27, %v9335_v49 }
 0xaf7   : > { %v9337_v59 = vadd.f32 %v10915_v27, %v9336_v9 }
 0xaf8   : > { %v10917_v51 = vpop.eup %10916 }
 0xaf9   : > { %v9349_v56 = vmul.f32 %v10917_v51, %v9206_v13  ;;  %v9341_v26 = vsel %vm9340_vm8, %v10915_v27, %v9337_v59  ;;  %vm9354_vm10 = vweird.f32 %v10917_v51 }
 0xafa   : > { %v9346_v23 = vsel %vm9343_vm11, %v9345_v5, %v9341_v26  ;;  %vm9355_vm13 = vmor %vm9353_vm12, %vm9354_vm10 }
 0xafb   : > { %v9350_v48 = vsub.f32 1.0, %v9349_v56  ;;  %v9461_v19 = vmul.f32 %v9346_v23, %v9114_v25 }
 0xafd   : > { %v9351_v44 = vmul.f32 %v10917_v51, %v9350_v48 }
 0xaff   : > { %v9352_v38 = vadd.f32 %v10917_v51, %v9351_v44 }
 0xb01   : > { %v9356_v24 = vsel %vm9355_vm13, %v10917_v51, %v9352_v38 }
 0xb02   : > { %v9361_v47 = vsel %vm9358_vm14, %v9360_v34, %v9356_v24 }
 0xb03   : > { %v9462_v18 = vmul.f32 %v9361_v47, %v9116_v17 }
 0xb05   : > { %v9473_v32 = vpack.c.bf16 %v9462_v18, %v9461_v19 }
 0xb07   : > { %v9559_v43 = vpop.f32.mrf.mxu2  ;;  %9573 = vmatmul.bf16.gmra.mxu2 %v9473_v32 }
 0xb08   : > { %v9560_v6 = vadd.f32 %v16916_v46, %v9559_v43 }
 0xb0a   : > { %v16932_v35 = vadd.f32 %v9560_v6, %v16552_v21 }
 0xb0c   : > { %9612 = vst.msk [vmem:[#allocation2 + $0x10] sm:$0xff] %vm834_vm1, %v16932_v35 }
 0xb0f   : > { %v9561_v63 = vpop.f32.mrf.mxu2 }
 0xb10   : > { %v9562_v30 = vadd.f32 %v16916_v46, %v9561_v63 }
 0xb12   : > { %v9118_v16 = vpop.f32.mrf.mxu1  ;;  %v16938_v61 = vadd.f32 %v9562_v30, %v16547_v22 }
 0xb13   : > { %v9119_v25 = vadd.f32 %v16799_v31, %v9118_v16 }
 0xb14   : > { %9613 = vst.msk [vmem:[#allocation2 + $0x18] sm:$0xff] %vm834_vm1, %v16938_v61 }
 0xb15   : > { %v10316_v20 = vmul.f32 -1.702, %v9119_v25 }
 0xb17   : > { %v9185_v54 = vmul.f32 1.442695, %v10316_v20 }
 0xb19   : > { %10918 = vpow2.f32 %v9185_v54 }
 0xb1a   : > { %v9120_v21 = vpop.f32.mrf.mxu1 }
 0xb1b   : > { %v9121_v12 = vadd.f32 %v16799_v31, %v9120_v21 }
 0xb1d   : > { %v10317_v17 = vmul.f32 -1.702, %v9121_v12 }
 0xb1f   : > { %v10919_v2 = vpop.eup %10918  ;;  %v9187_v33 = vmul.f32 1.442695, %v10317_v17 }
 0xb20   : > { %v9207_v41 = vadd.f32 1.0, %v10919_v2 }
 0xb21   : > { %10920 = vpow2.f32 %v9187_v33 }
 0xb22   : > { %10922 = vrcp.f32 %v9207_v41  ;;  %v9374_v51 = vand.u32 2147483648, %v9207_v41  ;;  %vm9368_vm0 = vweird.f32 %v9207_v41  ;;  %v9372_v56 = vand.u32 2147483647, %v9207_v41 }
 0xb24   : > { %v9375_v5 = vor.u32 1.1754944e-38, %v9374_v51  ;;  %vm9373_vm9 = vcmp.eq.f32.partialorder %v9372_v56, 8.507059e+37 }
 0xb27   : > { %v10921_v3 = vpop.eup %10920  ;;  %v9123_v60 = vpop.f32.mrf.mxu1 }
 0xb28   : > { %v10923_v22 = vpop.eup %10922  ;;  %v9208_v50 = vadd.f32 1.0, %v10921_v3  ;;  %v16945_v27 = vadd.f32 %v16799_v31, %v9123_v60 }
 0xb29   : > { %v9364_v14 = vmul.f32 %v10923_v22, %v9207_v41  ;;  %vm9369_vm15 = vweird.f32 %v10923_v22 }
 0xb2a   : > { %10924 = vrcp.f32 %v9208_v50  ;;  %v10318_v53 = vmul.f32 -1.702, %v16945_v27  ;;  %vm9370_vm6 = vmor %vm9368_vm0, %vm9369_vm15  ;;  %v9387_v48 = vand.u32 2147483647, %v9208_v50  ;;  %v9389_v28 = vand.u32 2147483648, %v9208_v50 }
 0xb2b   : > { %v9365_v42 = vsub.f32 1.0, %v9364_v14  ;;  %vm9383_vm2 = vweird.f32 %v9208_v50 }
 0xb2c   : > { %v9189_v0 = vmul.f32 1.442695, %v10318_v53  ;;  %v9390_v47 = vor.u32 1.1754944e-38, %v9389_v28  ;;  %vm9388_vm4 = vcmp.eq.f32.partialorder %v9387_v48, 8.507059e+37 }
 0xb2d   : > { %v9366_v13 = vmul.f32 %v10923_v22, %v9365_v42 }
 0xb2e   : > { %10926 = vpow2.f32 %v9189_v0 }
 0xb2f   : > { %v9367_v49 = vadd.f32 %v10923_v22, %v9366_v13  ;;  %v9125_v59 = vpop.f32.mrf.mxu1 }
 0xb30   : > { %v10925_v39 = vpop.eup %10924  ;;  %v16949_v40 = vadd.f32 %v16799_v31, %v9125_v59 }
 0xb31   : > { %v9379_v9 = vmul.f32 %v10925_v39, %v9208_v50  ;;  %v9371_v26 = vsel %vm9370_vm6, %v10923_v22, %v9367_v49  ;;  %vm9384_vm7 = vweird.f32 %v10925_v39 }
 0xb32   : > { %v10319_v10 = vmul.f32 -1.702, %v16949_v40  ;;  %v9376_v24 = vsel %vm9373_vm9, %v9375_v5, %v9371_v26  ;;  %vm9385_vm3 = vmor %vm9383_vm2, %vm9384_vm7 }
 0xb33   : > { %v9380_v1 = vsub.f32 1.0, %v9379_v9  ;;  %v9463_v32 = vmul.f32 %v9376_v24, %v9119_v25 }
 0xb34   : > { %v10927_v38 = vpop.eup %10926  ;;  %v9191_v34 = vmul.f32 1.442695, %v10319_v10 }
 0xb35   : > { %v9381_v44 = vmul.f32 %v10925_v39, %v9380_v1  ;;  %v9209_v19 = vadd.f32 1.0, %v10927_v38  ;;  %v9128_v63 = vpop.f32.mrf.mxu3 }
 0xb36   : > { %10928 = vpow2.f32 %v9191_v34  ;;  %v16953_v30 = vadd.f32 %v16799_v31, %v9128_v63 }
 0xb37   : > { %v9382_v23 = vadd.f32 %v10925_v39, %v9381_v44  ;;  %10930 = vrcp.f32 %v9209_v19  ;;  %vm9398_vm8 = vweird.f32 %v9209_v19  ;;  %v9402_v9 = vand.u32 2147483647, %v9209_v19 }
 0xb38   : > { %v10320_v20 = vmul.f32 -1.702, %v16953_v30 }
 0xb39   : > { %v9386_v18 = vsel %vm9385_vm3, %v10925_v39, %v9382_v23  ;;  %v9404_v39 = vand.u32 2147483648, %v9209_v19  ;;  %vm9403_vm12 = vcmp.eq.f32.partialorder %v9402_v9, 8.507059e+37 }
 0xb3a   : > { %v9391_v43 = vsel %vm9388_vm4, %v9390_v47, %v9386_v18  ;;  %v9193_v2 = vmul.f32 1.442695, %v10320_v20 }
 0xb3b   : > { %v9464_v6 = vmul.f32 %v9391_v43, %v9121_v12  ;;  %v9405_v28 = vor.u32 1.1754944e-38, %v9404_v39 }
 0xb3c   : > { %v10929_v54 = vpop.eup %10928 }
 0xb3d   : > { %v9474_v16 = vpack.c.bf16 %v9464_v6, %v9463_v32  ;;  %v10931_v21 = vpop.eup %10930  ;;  %v9210_v17 = vadd.f32 1.0, %v10929_v54  ;;  %v9130_v3 = vpop.f32.mrf.mxu3 }
 0xb3e   : > { %v9394_v33 = vmul.f32 %v10931_v21, %v9209_v19  ;;  %v16957_v25 = vadd.f32 %v16799_v31, %v9130_v3  ;;  %vm9399_vm5 = vweird.f32 %v10931_v21 }
 0xb3f   : > { %9578 = vmatmul.bf16.gmra.mxu2 %v9474_v16  ;;  %10932 = vrcp.f32 %v9210_v17  ;;  %vm9400_vm10 = vmor %vm9398_vm8, %vm9399_vm5  ;;  %v9419_v59 = vand.u32 2147483648, %v9210_v17  ;;  %v9417_v48 = vand.u32 2147483647, %v9210_v17  ;;  %vm9413_vm13 = vweird.f32 %v9210_v17 }
 0xb40   : > { %v9395_v41 = vsub.f32 1.0, %v9394_v33  ;;  %10934 = vpow2.f32 %v9193_v2  ;;  %v10321_v22 = vmul.f32 -1.702, %v16957_v25 }
 0xb41   : > { %v9420_v5 = vor.u32 1.1754944e-38, %v9419_v59  ;;  %vm9418_vm15 = vcmp.eq.f32.partialorder %v9417_v48, 8.507059e+37 }
 0xb42   : > { %v9396_v12 = vmul.f32 %v10931_v21, %v9395_v41  ;;  %v9195_v14 = vmul.f32 1.442695, %v10321_v22 }
 0xb44   : > { %v9397_v13 = vadd.f32 %v10931_v21, %v9396_v12  ;;  %10936 = vpow2.f32 %v9195_v14 }
 0xb45   : > { %v10933_v50 = vpop.eup %10932 }
 0xb46   : > { %v10935_v42 = vpop.eup %10934  ;;  %v9409_v53 = vmul.f32 %v10933_v50, %v9210_v17  ;;  %v9401_v56 = vsel %vm9400_vm10, %v10931_v21, %v9397_v13  ;;  %vm9414_vm11 = vweird.f32 %v10933_v50 }
 0xb47   : > { %v9564_v60 = vpop.f32.mrf.mxu2  ;;  %v9211_v49 = vadd.f32 1.0, %v10935_v42  ;;  %v9406_v10 = vsel %vm9403_vm12, %v9405_v28, %v9401_v56  ;;  %vm9415_vm14 = vmor %vm9413_vm13, %vm9414_vm11 }
 0xb48   : > { %v9565_v0 = vadd.f32 %v16916_v46, %v9564_v60  ;;  %v9410_v51 = vsub.f32 1.0, %v9409_v53  ;;  %v9465_v19 = vmul.f32 %v9406_v10, %v16945_v27 }
 0xb49   : > { %10938 = vrcp.f32 %v9211_v49  ;;  %v9434_v17 = vand.u32 2147483648, %v9211_v49  ;;  %vm9428_vm6 = vweird.f32 %v9211_v49  ;;  %v9432_v27 = vand.u32 2147483647, %v9211_v49 }
 0xb4a   : > { %v16962_v31 = vadd.f32 %v9565_v0, %v16569_v29  ;;  %v9411_v1 = vmul.f32 %v10933_v50, %v9410_v51  ;;  %v10937_v44 = vpop.eup %10936 }
 0xb4b   : > { %v9212_v23 = vadd.f32 1.0, %v10937_v44  ;;  %v9435_v3 = vor.u32 1.1754944e-38, %v9434_v17  ;;  %vm9433_vm2 = vcmp.eq.f32.partialorder %v9432_v27, 8.507059e+37 }
 0xb4c   : > { %9614 = vst.msk [vmem:[#allocation2 + $0x20] sm:$0xff] %vm834_vm1, %v16962_v31  ;;  %v9412_v26 = vadd.f32 %v10933_v50, %v9411_v1 }
 0xb4d   : > { %10940 = vrcp.f32 %v9212_v23  ;;  %v9449_v2 = vand.u32 2147483648, %v9212_v23  ;;  %v9447_v41 = vand.u32 2147483647, %v9212_v23  ;;  %vm9443_vm3 = vweird.f32 %v9212_v23 }
 0xb4e   : > { %v9416_v38 = vsel %vm9415_vm14, %v10933_v50, %v9412_v26 }
 0xb4f   : > { %v9566_v29 = vpop.f32.mrf.mxu2  ;;  %v10939_v24 = vpop.eup %10938  ;;  %v9421_v47 = vsel %vm9418_vm15, %v9420_v5, %v9416_v38  ;;  %v9450_v50 = vor.u32 1.1754944e-38, %v9449_v2  ;;  %vm9448_vm5 = vcmp.eq.f32.partialorder %v9447_v41, 8.507059e+37 }
 0xb50   : > { %v9567_v34 = vadd.f32 %v16916_v46, %v9566_v29  ;;  %v9466_v18 = vmul.f32 %v9421_v47, %v16949_v40  ;;  %v9424_v43 = vmul.f32 %v10939_v24, %v9211_v49  ;;  %vm9429_vm0 = vweird.f32 %v10939_v24 }
 0xb51   : > { %vm9430_vm7 = vmor %vm9428_vm6, %vm9429_vm0 }
 0xb52   : > { %v16970_v32 = vadd.f32 %v9567_v34, %v16574_v52  ;;  %v9425_v6 = vsub.f32 1.0, %v9424_v43  ;;  %v9475_v63 = vpack.c.bf16 %v9466_v18, %v9465_v19 }
 0xb53   : > { %v10941_v20 = vpop.eup %10940 }
 0xb54   : > { %9615 = vst.msk [vmem:[#allocation2 + $0x28] sm:$0xff] %vm834_vm1, %v16970_v32  ;;  %v9426_v16 = vmul.f32 %v10939_v24, %v9425_v6  ;;  %9583 = vmatmul.bf16.gmra.mxu2 %v9475_v63  ;;  %v9439_v21 = vmul.f32 %v10941_v20, %v9212_v23  ;;  %vm9444_vm9 = vweird.f32 %v10941_v20 }
 0xb55   : > { %vm9445_vm4 = vmor %vm9443_vm3, %vm9444_vm9 }
 0xb56   : > { %v9427_v54 = vadd.f32 %v10939_v24, %v9426_v16  ;;  %v9440_v40 = vsub.f32 1.0, %v9439_v21 }
 0xb58   : > { %v9431_v33 = vsel %vm9430_vm7, %v10939_v24, %v9427_v54  ;;  %v9441_v52 = vmul.f32 %v10941_v20, %v9440_v40 }
 0xb59   : > { %v9436_v22 = vsel %vm9433_vm2, %v9435_v3, %v9431_v33 }
 0xb5a   : > { %v9442_v12 = vadd.f32 %v10941_v20, %v9441_v52  ;;  %v9467_v42 = vmul.f32 %v9436_v22, %v16953_v30 }
 0xb5c   : > { %v9446_v14 = vsel %vm9445_vm4, %v10941_v20, %v9442_v12  ;;  %v9569_v0 = vpop.f32.mrf.mxu2 }
 0xb5d   : > { %v9451_v60 = vsel %vm9448_vm5, %v9450_v50, %v9446_v14  ;;  %v9570_v39 = vadd.f32 %v16916_v46, %v9569_v0 }
 0xb5e   : > { %v9468_v13 = vmul.f32 %v9451_v60, %v16957_v25 }
 0xb5f   : > { %v16978_v49 = vadd.f32 %v9570_v39, %v16586_v37 }
 0xb60   : > { %v9476_v53 = vpack.c.bf16 %v9468_v13, %v9467_v42 }
 0xb61   : > { %9616 = vst.msk [vmem:[#allocation2 + $0x30] sm:$0xff] %vm834_vm1, %v16978_v49 }
 0xb64   : > { %9588 = vmatmul.bf16.gmra.mxu2 %v9476_v53  ;;  %v9571_v9 = vpop.f32.mrf.mxu2 }
 0xb65   : > { %v9572_v51 = vadd.f32 %v16916_v46, %v9571_v9 }
 0xb67   : > { %v16984_v59 = vadd.f32 %v9572_v51, %v16592_v4 }
 0xb69   : > { %9617 = vst.msk [vmem:[#allocation2 + $0x38] sm:$0xff] %vm834_vm1, %v16984_v59 }
 0xb8a   : > { %v9574_v30 = vpop.f32.mrf.mxu2 }
 0xb8b   : > { %v9575_v25 = vadd.f32 %v16916_v46, %v9574_v30 }
 0xb8d   : > { %v16990_v56 = vadd.f32 %v9575_v25, %v16601_v8 }
 0xb8f   : > { %9618 = vst.msk [vmem:[#allocation2 + $0x40] sm:$0xff] %vm834_vm1, %v16990_v56 }
 0xb92   : > { %v9576_v37 = vpop.f32.mrf.mxu2 }
 0xb93   : > { %v9577_v1 = vadd.f32 %v16916_v46, %v9576_v37 }
 0xb95   : > { %v16996_v48 = vadd.f32 %v9577_v1, %v16623_v55 }
 0xb97   : > { %9619 = vst.msk [vmem:[#allocation2 + $0x48] sm:$0xff] %vm834_vm1, %v16996_v48 }
 0xbc2   : > { %v9579_v4 = vpop.f32.mrf.mxu2 }
 0xbc3   : > { %v9580_v28 = vadd.f32 %v16916_v46, %v9579_v4 }
 0xbc5   : > { %v17002_v26 = vadd.f32 %v9580_v28, %v16628_v15 }
 0xbc7   : > { %9620 = vst.msk [vmem:[#allocation2 + $0x50] sm:$0xff] %vm834_vm1, %v17002_v26 }
 0xbca   : > { %v9581_v8 = vpop.f32.mrf.mxu2 }
 0xbcb   : > { %v9582_v44 = vadd.f32 %v16916_v46, %v9581_v8 }
 0xbcd   : > { %v17008_v10 = vadd.f32 %v9582_v44, %v16641_v45 }
 0xbcf   : > { %9621 = vst.msk [vmem:[#allocation2 + $0x58] sm:$0xff] %vm834_vm1, %v17008_v10 }
 0xbd7   : > { %v9584_v55 = vpop.f32.mrf.mxu2 }
 0xbd8   : > { %v9585_v5 = vadd.f32 %v16916_v46, %v9584_v55 }
 0xbda   : > { %v17014_v29 = vadd.f32 %v9585_v5, %v16652_v36 }
 0xbdc   : > { %9622 = vst.msk [vmem:[#allocation2 + $0x60] sm:$0xff] %vm834_vm1, %v17014_v29 }
 0xbdf   : > { %v9586_v15 = vpop.f32.mrf.mxu2 }
 0xbe0   : > { %v9587_v38 = vadd.f32 %v16916_v46, %v9586_v15 }
 0xbe2   : > { %v17020_v23 = vadd.f32 %v9587_v38, %v16666_v7 }
 0xbe4   : > { %9623 = vst.msk [vmem:[#allocation2 + $0x68] sm:$0xff] %vm834_vm1, %v17020_v23 }
 0xbe7   : > { %v9589_v45 = vpop.f32.mrf.mxu2 }
 0xbe8   : > { %v9590_v34 = vadd.f32 %v16916_v46, %v9589_v45 }
 0xbea   : > { %v17026_v24 = vadd.f32 %v9590_v34, %v16684_v62 }
 0xbec   : > { %9624 = vst.msk [vmem:[#allocation2 + $0x70] sm:$0xff] %vm834_vm1, %v17026_v24 }
 0xbef   : > { %v9591_v36 = vpop.f32.mrf.mxu2 }
 0xbf0   : > { %v9592_v47 = vadd.f32 %v16916_v46, %v9591_v36  ;;  %9629 = sbr.rel (%p10354_p8) target bundleno = 3379 (0xd33), region = 88 }
 0xbf2   : > { %v17032_v19 = vadd.f32 %v9592_v47, %v16677_v58 }
 0xbf4   : > { %9625 = vst.msk [vmem:[#allocation2 + $0x78] sm:$0xff] %vm834_vm1, %v17032_v19 }
 0xbf5   : > { %v9644_v7 = vsel %vm834_vm1, %v16962_v31, 0.0  ;;  %v9638_v62 = vsel %vm834_vm1, %v16932_v35, 0.0  ;;  %v9632_v18 = vsel %vm834_vm1, %v16920_v57, 0.0  ;;  %v9647_v58 = vsel %vm834_vm1, %v16970_v32, 0.0  ;;  %v18378_v41 = vld [vmem:[#allocation14_spill] sm:$0xff] }
 0xbf6   : > { %9645 = vadd.xlane.f32.xlu2 %v9644_v7  ;;  %9639 = vadd.xlane.f32.xlu1 %v9638_v62  ;;  %v9641_v46 = vsel %vm834_vm1, %v16938_v61, 0.0  ;;  %v9635_v43 = vsel %vm834_vm1, %v16926_v11, 0.0  ;;  %v9656_v6 = vsel %vm834_vm1, %v16990_v56, 0.0  ;;  %v9653_v63 = vsel %vm834_vm1, %v16984_v59, 0.0 }
 0xbf7   : > { %9633 = vadd.xlane.f32.xlu0 %v9632_v18  ;;  %v9650_v16 = vsel %vm834_vm1, %v16978_v49, 0.0  ;;  %v9665_v20 = vsel %vm834_vm1, %v17008_v10, 0.0  ;;  %v9662_v54 = vsel %vm834_vm1, %v17002_v26, 0.0  ;;  %v9659_v21 = vsel %vm834_vm1, %v16996_v48, 0.0 }
 0xbf8   : > { %v9674_v17 = vsel %vm834_vm1, %v17026_v24, 0.0  ;;  %v9671_v27 = vsel %vm834_vm1, %v17020_v23, 0.0  ;;  %v9668_v40 = vsel %vm834_vm1, %v17014_v29, 0.0  ;;  %v9677_v2 = vsel %vm834_vm1, %v17032_v19, 0.0 }
 0xbfe   : > { %9648 = vadd.xlane.f32.xlu2 %v9647_v58  ;;  %9642 = vadd.xlane.f32.xlu1 %v9641_v46 }
 0xbff   : > { %9636 = vadd.xlane.f32.xlu0 %v9635_v43 }
 0xc06   : > { %9657 = vadd.xlane.f32.xlu2 %v9656_v6  ;;  %9654 = vadd.xlane.f32.xlu1 %v9653_v63 }
 0xc07   : > { %9651 = vadd.xlane.f32.xlu0 %v9650_v16 }
 0xc0e   : > { %9666 = vadd.xlane.f32.xlu2 %v9665_v20  ;;  %9663 = vadd.xlane.f32.xlu1 %v9662_v54 }
 0xc0f   : > { %9660 = vadd.xlane.f32.xlu0 %v9659_v21 }
 0xc16   : > { %9675 = vadd.xlane.f32.xlu2 %v9674_v17  ;;  %9672 = vadd.xlane.f32.xlu1 %v9671_v27 }
 0xc17   : > { %9669 = vadd.xlane.f32.xlu0 %v9668_v40 }
 0xc1f   : > { %9678 = vadd.xlane.f32.xlu0 %v9677_v2 }
 0xc69   : > { %v9646_v33 = vpop.xlane.xlu2 %9645  ;;  %v9640_v52 = vpop.xlane.xlu1 %9639 }
 0xc6a   : > { %v9682_v3 = vmul.f32 %v9640_v52, %v18378_v41  ;;  %v9634_v12 = vpop.xlane.xlu0 %9633  ;;  %v9684_v37 = vmul.f32 %v9646_v33, %v18378_v41 }
 0xc6b   : > { %v9680_v22 = vmul.f32 %v9634_v12, %v18378_v41 }
 0xc6c   : > { %v17072_v50 = vsub.f32 %v16932_v35, %v9682_v3 }
 0xc6d   : > { %v17075_v14 = vsub.f32 %v16920_v57, %v9680_v22 }
 0xc6e   : > { %v9714_v60 = vmul.f32 %v17072_v50, %v17072_v50 }
 0xc6f   : > { %v9712_v42 = vmul.f32 %v17075_v14, %v17075_v14 }
 0xc70   : > { %v9734_v13 = vsel %vm834_vm1, %v9714_v60, 0.0 }
 0xc71   : > { %v9649_v53 = vpop.xlane.xlu2 %9648  ;;  %v9643_v0 = vpop.xlane.xlu1 %9642  ;;  %9735 = vadd.xlane.f32.xlu0 %v9734_v13  ;;  %v9728_v39 = vsel %vm834_vm1, %v9712_v42, 0.0 }
 0xc72   : > { %v9685_v9 = vmul.f32 %v9649_v53, %v18378_v41  ;;  %v9683_v35 = vmul.f32 %v9643_v0, %v18378_v41  ;;  %9729 = vadd.xlane.f32.xlu1 %v9728_v39  ;;  %v9637_v57 = vpop.xlane.xlu0 %9636 }
 0xc73   : > { %v9681_v51 = vmul.f32 %v9637_v57, %v18378_v41 }
 0xc74   : > { %v17087_v30 = vsub.f32 %v16970_v32, %v9685_v9  ;;  %v17090_v25 = vsub.f32 %v16938_v61, %v9683_v35  ;;  %v17105_v61 = vsub.f32 %v16962_v31, %v9684_v37 }
 0xc75   : > { %v17094_v1 = vsub.f32 %v16926_v11, %v9681_v51 }
 0xc76   : > { %v9717_v4 = vmul.f32 %v17087_v30, %v17087_v30  ;;  %v9715_v28 = vmul.f32 %v17090_v25, %v17090_v25  ;;  %v9716_v47 = vmul.f32 %v17105_v61, %v17105_v61 }
 0xc77   : > { %v9713_v8 = vmul.f32 %v17094_v1, %v17094_v1 }
 0xc78   : > { %v9743_v32 = vsel %vm834_vm1, %v9717_v4, 0.0  ;;  %v9737_v44 = vsel %vm834_vm1, %v9715_v28, 0.0 }
 0xc79   : > { %v9658_v55 = vpop.xlane.xlu2 %9657  ;;  %9744 = vadd.xlane.f32.xlu0 %v9743_v32  ;;  %v9731_v11 = vsel %vm834_vm1, %v9713_v8, 0.0  ;;  %v9655_v5 = vpop.xlane.xlu1 %9654 }
 0xc7a   : > { %v9688_v15 = vmul.f32 %v9658_v55, %v18378_v41  ;;  %9738 = vadd.xlane.f32.xlu1 %v9737_v44  ;;  %9732 = vadd.xlane.f32.xlu2 %v9731_v11  ;;  %v9652_v38 = vpop.xlane.xlu0 %9651  ;;  %v9687_v34 = vmul.f32 %v9655_v5, %v18378_v41 }
 0xc7b   : > { %v9686_v45 = vmul.f32 %v9652_v38, %v18378_v41 }
 0xc7c   : > { %v17112_v36 = vsub.f32 %v16990_v56, %v9688_v15  ;;  %v17122_v62 = vsub.f32 %v16984_v59, %v9687_v34  ;;  %v9740_v56 = vsel %vm834_vm1, %v9716_v47, 0.0 }
 0xc7d   : > { %v17115_v31 = vsub.f32 %v16978_v49, %v9686_v45 }
 0xc7e   : > { %v9720_v7 = vmul.f32 %v17112_v36, %v17112_v36  ;;  %v9719_v20 = vmul.f32 %v17122_v62, %v17122_v62 }
 0xc7f   : > { %v9718_v18 = vmul.f32 %v17115_v31, %v17115_v31 }
 0xc80   : > { %v9752_v58 = vsel %vm834_vm1, %v9720_v7, 0.0  ;;  %v9749_v40 = vsel %vm834_vm1, %v9719_v20, 0.0 }
 0xc81   : > { %v9667_v46 = vpop.xlane.xlu2 %9666  ;;  %9753 = vadd.xlane.f32.xlu0 %v9752_v58  ;;  %v9746_v49 = vsel %vm834_vm1, %v9718_v18, 0.0  ;;  %v9664_v43 = vpop.xlane.xlu1 %9663 }
 0xc82   : > { %v9691_v6 = vmul.f32 %v9667_v46, %v18378_v41  ;;  %9741 = vadd.xlane.f32.xlu2 %v9740_v56  ;;  %9747 = vadd.xlane.f32.xlu1 %v9746_v49  ;;  %v9661_v63 = vpop.xlane.xlu0 %9660  ;;  %v9690_v16 = vmul.f32 %v9664_v43, %v18378_v41 }
 0xc83   : > { %v9689_v59 = vmul.f32 %v9661_v63, %v18378_v41 }
 0xc84   : > { %v17135_v54 = vsub.f32 %v17008_v10, %v9691_v6  ;;  %v17143_v27 = vsub.f32 %v17002_v26, %v9690_v16 }
 0xc85   : > { %v17138_v21 = vsub.f32 %v16996_v48, %v9689_v59 }
 0xc86   : > { %v9723_v17 = vmul.f32 %v17135_v54, %v17135_v54  ;;  %v9722_v60 = vmul.f32 %v17143_v27, %v17143_v27 }
 0xc87   : > { %v9721_v2 = vmul.f32 %v17138_v21, %v17138_v21 }
 0xc88   : > { %v9761_v33 = vsel %vm834_vm1, %v9723_v17, 0.0  ;;  %v9758_v39 = vsel %vm834_vm1, %v9722_v60, 0.0 }
 0xc89   : > { %v9676_v52 = vpop.xlane.xlu2 %9675  ;;  %9762 = vadd.xlane.f32.xlu0 %v9761_v33  ;;  %v9755_v10 = vsel %vm834_vm1, %v9721_v2, 0.0  ;;  %v9673_v3 = vpop.xlane.xlu1 %9672 }
 0xc8a   : > { %v9694_v48 = vmul.f32 %v9676_v52, %v18378_v41  ;;  %9750 = vadd.xlane.f32.xlu2 %v9749_v40  ;;  %9756 = vadd.xlane.f32.xlu1 %v9755_v10  ;;  %v9670_v12 = vpop.xlane.xlu0 %9669  ;;  %v9693_v22 = vmul.f32 %v9673_v3, %v18378_v41 }
 0xc8b   : > { %v9692_v26 = vmul.f32 %v9670_v12, %v18378_v41 }
 0xc8c   : > { %v17156_v42 = vsub.f32 %v17026_v24, %v9694_v48  ;;  %v17164_v0 = vsub.f32 %v17020_v23, %v9693_v22 }
 0xc8d   : > { %v17159_v13 = vsub.f32 %v17014_v29, %v9692_v26 }
 0xc8e   : > { %v9726_v53 = vmul.f32 %v17156_v42, %v17156_v42  ;;  %v9725_v51 = vmul.f32 %v17164_v0, %v17164_v0 }
 0xc8f   : > { %v9724_v9 = vmul.f32 %v17159_v13, %v17159_v13 }
 0xc90   : > { %v9770_v35 = vsel %vm834_vm1, %v9726_v53, 0.0  ;;  %v9767_v37 = vsel %vm834_vm1, %v9725_v51, 0.0 }
 0xc91   : > { %9771 = vadd.xlane.f32.xlu0 %v9770_v35  ;;  %v9764_v24 = vsel %vm834_vm1, %v9724_v9, 0.0  ;;  %v17211_v9 = vld [vmem:[%s18379_s10] ss:$0 sm:$0xff] }
 0xc92   : > { %9759 = vadd.xlane.f32.xlu2 %v9758_v39  ;;  %9765 = vadd.xlane.f32.xlu1 %v9764_v24  ;;  %v9679_v29 = vpop.xlane.xlu0 %9678 }
 0xc93   : > { %v9695_v57 = vmul.f32 %v9679_v29, %v18378_v41 }
 0xc95   : > { %v17175_v23 = vsub.f32 %v17032_v19, %v9695_v57 }
 0xc97   : > { %v9727_v4 = vmul.f32 %v17175_v23, %v17175_v23 }
 0xc99   : > { %v9773_v28 = vsel %vm834_vm1, %v9727_v4, 0.0 }
 0xc9a   : > { %9768 = vadd.xlane.f32.xlu2 %v9767_v37  ;;  %9774 = vadd.xlane.f32.xlu1 %v9773_v28  ;;  %v17226_v28 = vld [vmem:[%s18380_s27] ss:$0 sm:$0xff] }
 0xce4   : > { %v9736_v8 = vpop.xlane.xlu0 %9735 }
 0xce5   : > { %v9730_v32 = vpop.xlane.xlu1 %9729  ;;  %v9778_v44 = vmul.f32 %v9736_v8, %v18378_v41 }
 0xce6   : > { %v9776_v55 = vmul.f32 %v9730_v32, %v18378_v41 }
 0xce7   : > { %v9794_v11 = vadd.f32 1e-05, %v9778_v44 }
 0xce8   : > { %v9792_v5 = vadd.f32 1e-05, %v9776_v55 }
 0xce9   : > { %10960 = vrsqrt.f32 %v9794_v11  ;;  %vm9834_vm11 = vweird.f32 %v9794_v11 }
 0xcea   : > { %10962 = vrsqrt.f32 %v9792_v5  ;;  %vm9814_vm12 = vweird.f32 %v9792_v5 }
 0xcec   : > { %v9745_v19 = vpop.xlane.xlu0 %9744 }
 0xced   : > { %v9739_v15 = vpop.xlane.xlu1 %9738  ;;  %v9733_v38 = vpop.xlane.xlu2 %9732  ;;  %v9781_v45 = vmul.f32 %v9745_v19, %v18378_v41 }
 0xcee   : > { %v9779_v34 = vmul.f32 %v9739_v15, %v18378_v41  ;;  %v9777_v47 = vmul.f32 %v9733_v38, %v18378_v41 }
 0xcef   : > { %v10961_v7 = vpop.eup %10960  ;;  %v17186_v18 = vadd.f32 1e-05, %v9781_v45 }
 0xcf0   : > { %v10963_v58 = vpop.eup %10962  ;;  %v9829_v46 = vmul.f32 %v10961_v7, %v9794_v11  ;;  %v17188_v56 = vadd.f32 1e-05, %v9779_v34  ;;  %v17190_v49 = vadd.f32 1e-05, %v9777_v47  ;;  %vm9835_vm8 = vweird.f32 %v10961_v7 }
 0xcf1   : > { %v9809_v43 = vmul.f32 %v10963_v58, %v9792_v5  ;;  %10964 = vrsqrt.f32 %v17186_v18  ;;  %vm9815_vm10 = vweird.f32 %v10963_v58  ;;  %vm9836_vm13 = vmor %vm9834_vm11, %vm9835_vm8  ;;  %vm9864_vm15 = vweird.f32 %v17186_v18 }
 0xcf2   : > { %v9830_v6 = vmul.f32 %v10961_v7, %v9829_v46  ;;  %10966 = vrsqrt.f32 %v17188_v56  ;;  %vm9816_vm14 = vmor %vm9814_vm12, %vm9815_vm10  ;;  %vm9844_vm9 = vweird.f32 %v17188_v56  ;;  %vm9824_vm2 = vweird.f32 %v17190_v49 }
 0xcf3   : > { %v9810_v63 = vmul.f32 %v10963_v58, %v9809_v43  ;;  %10968 = vrsqrt.f32 %v17190_v49 }
 0xcf4   : > { %v9831_v59 = vmul.f32 0.5, %v9830_v6  ;;  %v9754_v16 = vpop.xlane.xlu0 %9753 }
 0xcf5   : > { %v9811_v20 = vmul.f32 0.5, %v9810_v63  ;;  %v9742_v17 = vpop.xlane.xlu2 %9741  ;;  %v9748_v40 = vpop.xlane.xlu1 %9747  ;;  %v9784_v10 = vmul.f32 %v9754_v16, %v18378_v41 }
 0xcf6   : > { %v9832_v2 = vsub.f32 1.5, %v9831_v59  ;;  %v9780_v33 = vmul.f32 %v9742_v17, %v18378_v41  ;;  %v9782_v52 = vmul.f32 %v9748_v40, %v18378_v41 }
 0xcf7   : > { %v17198_v3 = vpop.eup %10964  ;;  %v9812_v48 = vsub.f32 1.5, %v9811_v20  ;;  %v17221_v37 = vadd.f32 1e-05, %v9784_v10 }
 0xcf8   : > { %v17200_v12 = vpop.eup %10966  ;;  %v9833_v26 = vmul.f32 %v10961_v7, %v9832_v2  ;;  %v9859_v22 = vmul.f32 %v17198_v3, %v17186_v18  ;;  %v17204_v60 = vadd.f32 1e-05, %v9780_v33  ;;  %v17216_v24 = vadd.f32 1e-05, %v9782_v52 }
 0xcf9   : > { %v17206_v53 = vpop.eup %10968  ;;  %v9813_v39 = vmul.f32 %v10963_v58, %v9812_v48  ;;  %v9839_v35 = vmul.f32 %v17200_v12, %v17188_v56  ;;  %vm9865_vm0 = vweird.f32 %v17198_v3  ;;  %vm9845_vm6 = vweird.f32 %v17200_v12 }
 0xcfa   : > { %v9837_v29 = vsel %vm9836_vm13, %v10961_v7, %v9833_v26  ;;  %v9819_v57 = vmul.f32 %v17206_v53, %v17190_v49  ;;  %v9860_v51 = vmul.f32 %v17198_v3, %v9859_v22  ;;  %10970 = vrsqrt.f32 %v17204_v60  ;;  %vm9866_vm3 = vmor %vm9864_vm15, %vm9865_vm0 }
 0xcfb   : > { %v9817_v4 = vsel %vm9816_vm14, %v10963_v58, %v9813_v39  ;;  %v9970_v8 = vmul.f32 %v9837_v29, %v17072_v50  ;;  %v9840_v32 = vmul.f32 %v17200_v12, %v9839_v35  ;;  %10972 = vrsqrt.f32 %v17216_v24  ;;  %vm9846_vm4 = vmor %vm9844_vm9, %vm9845_vm6 }
 0xcfc   : > { %v9968_v44 = vmul.f32 %v9817_v4, %v17075_v14  ;;  %v9820_v55 = vmul.f32 %v17206_v53, %v9819_v57  ;;  %v9861_v11 = vmul.f32 0.5, %v9860_v51  ;;  %10974 = vrsqrt.f32 %v17221_v37  ;;  %v9763_v6 = vpop.xlane.xlu0 %9762 }
 0xcfd   : > { %v9989_v5 = vmul.f32 %v17211_v9, %v9970_v8  ;;  %v9841_v19 = vmul.f32 0.5, %v9840_v32  ;;  %v9751_v15 = vpop.xlane.xlu2 %9750  ;;  %v9757_v7 = vpop.xlane.xlu1 %9756  ;;  %vm9825_vm7 = vweird.f32 %v17206_v53  ;;  %vm9854_vm5 = vweird.f32 %v17204_v60 }
 0xcfe   : > { %v9987_v50 = vmul.f32 %v17211_v9, %v9968_v44  ;;  %v9821_v38 = vmul.f32 0.5, %v9820_v55  ;;  %v9862_v45 = vsub.f32 1.5, %v9861_v11  ;;  %v9783_v47 = vmul.f32 %v9751_v15, %v18378_v41  ;;  %vm9826_vm8 = vmor %vm9824_vm2, %vm9825_vm7 }
 0xcff   : > { %v10008_v14 = vadd.f32 %v17226_v28, %v9989_v5  ;;  %v9842_v34 = vsub.f32 1.5, %v9841_v19  ;;  %v9785_v49 = vmul.f32 %v9757_v7, %v18378_v41  ;;  %v9787_v33 = vmul.f32 %v9763_v6, %v18378_v41 }
 0xd00   : > { %v10006_v58 = vadd.f32 %v17226_v28, %v9987_v50  ;;  %v9822_v46 = vsub.f32 1.5, %v9821_v38  ;;  %v9863_v43 = vmul.f32 %v17198_v3, %v9862_v45  ;;  %v17245_v63 = vpop.eup %10970  ;;  %v17256_v16 = vadd.f32 1e-05, %v9783_v47 }
 0xd01   : > { %10024 = vst.msk [vmem:[%s11245_s3 + $0x10] sm:$0xff] %vm834_vm1, %v10008_v14  ;;  %v9843_v59 = vmul.f32 %v17200_v12, %v9842_v34  ;;  %v9849_v56 = vmul.f32 %v17245_v63, %v17204_v60  ;;  %v17268_v18 = vpop.eup %10972  ;;  %vm9874_vm10 = vweird.f32 %v17216_v24  ;;  %vm9855_vm11 = vweird.f32 %v17245_v63 }
 0xd02   : > { %10022 = vst.msk [vmem:[%s11245_s3] sm:$0xff] %vm834_vm1, %v10006_v58  ;;  %v9823_v20 = vmul.f32 %v17206_v53, %v9822_v46  ;;  %v9867_v17 = vsel %vm9866_vm3, %v17198_v3, %v9863_v43  ;;  %10976 = vrsqrt.f32 %v17256_v16  ;;  %v10975_v52 = vpop.eup %10974  ;;  %v9869_v26 = vmul.f32 %v17268_v18, %v17216_v24  ;;  %vm9856_vm14 = vmor %vm9854_vm5, %vm9855_vm11 }
 0xd03   : > { %v9847_v40 = vsel %vm9846_vm4, %v17200_v12, %v9843_v59  ;;  %v9973_v2 = vmul.f32 %v9867_v17, %v17087_v30  ;;  %v9850_v48 = vmul.f32 %v17245_v63, %v9849_v56  ;;  %v9889_v30 = vmul.f32 %v10975_v52, %v17221_v37 }
 0xd04   : > { %v9971_v10 = vmul.f32 %v9847_v40, %v17090_v25  ;;  %v9827_v3 = vsel %vm9826_vm8, %v17206_v53, %v9823_v20  ;;  %v9870_v53 = vmul.f32 %v17268_v18, %v9869_v26  ;;  %v17290_v51 = vadd.f32 1e-05, %v9785_v49  ;;  %v9772_v34 = vpop.xlane.xlu0 %9771 }
 0xd05   : > { %v9969_v12 = vmul.f32 %v9827_v3, %v17094_v1  ;;  %v9992_v22 = vmul.f32 %v17211_v9, %v9973_v2  ;;  %v9760_v39 = vpop.xlane.xlu2 %9759  ;;  %v9851_v25 = vmul.f32 0.5, %v9850_v48  ;;  %v9890_v57 = vmul.f32 %v10975_v52, %v9889_v30  ;;  %v9766_v19 = vpop.xlane.xlu1 %9765 }
 0xd06   : > { %v9990_v35 = vmul.f32 %v17211_v9, %v9971_v10  ;;  %v9871_v32 = vmul.f32 0.5, %v9870_v53  ;;  %v17293_v44 = vadd.f32 1e-05, %v9787_v33  ;;  %vm9894_vm12 = vweird.f32 %v17221_v37 }
 0xd07   : > { %v9988_v29 = vmul.f32 %v17211_v9, %v9969_v12  ;;  %v10011_v1 = vadd.f32 %v17226_v28, %v9992_v22  ;;  %v9852_v8 = vsub.f32 1.5, %v9851_v25  ;;  %v9891_v5 = vmul.f32 0.5, %v9890_v57 }
 0xd08   : > { %v10009_v4 = vadd.f32 %v17226_v28, %v9990_v35  ;;  %v17295_v55 = vpop.eup %10976  ;;  %10978 = vrsqrt.f32 %v17290_v51  ;;  %v9872_v50 = vsub.f32 1.5, %v9871_v32  ;;  %vm9875_vm13 = vweird.f32 %v17268_v18 }
 0xd09   : > { %v10007_v11 = vadd.f32 %v17226_v28, %v9988_v29  ;;  %10027 = vst.msk [vmem:[%s11245_s3 + $0x28] sm:$0xff] %vm834_vm1, %v10011_v1  ;;  %v9853_v15 = vmul.f32 %v17245_v63, %v9852_v8  ;;  %v9879_v38 = vmul.f32 %v17295_v55, %v17256_v16  ;;  %v9892_v45 = vsub.f32 1.5, %v9891_v5  ;;  %vm9876_vm0 = vmor %vm9874_vm10, %vm9875_vm13 }
 0xd0a   : > { %10025 = vst.msk [vmem:[%s11245_s3 + $0x18] sm:$0xff] %vm834_vm1, %v10009_v4  ;;  %vm9895_vm15 = vweird.f32 %v10975_v52  ;;  %10980 = vrsqrt.f32 %v17293_v44  ;;  %v9786_v14 = vmul.f32 %v9760_v39, %v18378_v41  ;;  %v9873_v7 = vmul.f32 %v17268_v18, %v9872_v50 }
 0xd0b   : > { %10023 = vst.msk [vmem:[%s11245_s3 + $0x8] sm:$0xff] %vm834_vm1, %v10007_v11  ;;  %v9857_v47 = vsel %vm9856_vm14, %v17245_v63, %v9853_v15  ;;  %v9880_v58 = vmul.f32 %v17295_v55, %v9879_v38  ;;  %v9788_v46 = vmul.f32 %v9766_v19, %v18378_v41  ;;  %v9893_v60 = vmul.f32 %v10975_v52, %v9892_v45  ;;  %vm9896_vm7 = vmor %vm9894_vm12, %vm9895_vm15 }
 0xd0c   : > { %v9972_v43 = vmul.f32 %v9857_v47, %v17105_v61  ;;  %vm9884_vm6 = vweird.f32 %v17256_v16  ;;  %v17324_v6 = vadd.f32 1e-05, %v9786_v14  ;;  %v9877_v59 = vsel %vm9876_vm0, %v17268_v18, %v9873_v7 }
 0xd0d   : > { %v9881_v63 = vmul.f32 0.5, %v9880_v58  ;;  %v17329_v20 = vadd.f32 1e-05, %v9788_v46  ;;  %v9790_v17 = vmul.f32 %v9772_v34, %v18378_v41  ;;  %v9769_v56 = vpop.xlane.xlu2 %9768  ;;  %v9974_v49 = vmul.f32 %v9877_v59, %v17115_v31  ;;  %v9775_v53 = vpop.xlane.xlu1 %9774 }
 0xd0e   : > { %v10979_v61 = vpop.eup %10978  ;;  %v9991_v24 = vmul.f32 %v17211_v9, %v9972_v43  ;;  %v9897_v40 = vsel %vm9896_vm7, %v10975_v52, %v9893_v60  ;;  %10982 = vrsqrt.f32 %v17324_v6  ;;  %vm9885_vm9 = vweird.f32 %v17295_v55 }
 0xd0f   : > { %v9976_v18 = vmul.f32 %v9897_v40, %v17112_v36  ;;  %v9882_v2 = vsub.f32 1.5, %v9881_v63  ;;  %v9899_v37 = vmul.f32 %v10979_v61, %v17290_v51  ;;  %v9993_v3 = vmul.f32 %v17211_v9, %v9974_v49  ;;  %vm9886_vm2 = vmor %vm9884_vm6, %vm9885_vm9 }
 0xd10   : > { %v10981_v33 = vpop.eup %10980  ;;  %v10010_v10 = vadd.f32 %v17226_v28, %v9991_v24  ;;  %10984 = vrsqrt.f32 %v17329_v20  ;;  %v9789_v31 = vmul.f32 %v9769_v56, %v18378_v41  ;;  %vm9904_vm3 = vweird.f32 %v17290_v51 }
 0xd11   : > { %v9995_v52 = vmul.f32 %v17211_v9, %v9976_v18  ;;  %v9883_v48 = vmul.f32 %v17295_v55, %v9882_v2  ;;  %v9900_v36 = vmul.f32 %v10979_v61, %v9899_v37  ;;  %v9919_v26 = vmul.f32 %v10981_v33, %v17293_v44 }
 0xd12   : > { %10026 = vst.msk [vmem:[%s11245_s3 + $0x20] sm:$0xff] %vm834_vm1, %v10010_v10  ;;  %v10012_v12 = vadd.f32 %v17226_v28, %v9993_v3  ;;  %v17351_v22 = vadd.f32 1e-05, %v9790_v17  ;;  %vm9924_vm4 = vweird.f32 %v17293_v44  ;;  %v17360_v16 = vadd.f32 1e-05, %v9789_v31 }
 0xd13   : > { %v10014_v30 = vadd.f32 %v17226_v28, %v9995_v52  ;;  %v9887_v39 = vsel %vm9886_vm2, %v17295_v55, %v9883_v48  ;;  %v9901_v35 = vmul.f32 0.5, %v9900_v36  ;;  %v9920_v25 = vmul.f32 %v10981_v33, %v9919_v26 }
 0xd14   : > { %v10983_v29 = vpop.eup %10982  ;;  %10028 = vst.msk [vmem:[%s11245_s3 + $0x30] sm:$0xff] %vm834_vm1, %v10012_v12  ;;  %v9975_v1 = vmul.f32 %v9887_v39, %v17122_v62  ;;  %10986 = vrsqrt.f32 %v17351_v22  ;;  %vm9905_vm5 = vweird.f32 %v10979_v61  ;;  %vm9925_vm8 = vweird.f32 %v10981_v33 }
 0xd15   : > { %10030 = vst.msk [vmem:[%s11245_s3 + $0x40] sm:$0xff] %vm834_vm1, %v10014_v30  ;;  %v9902_v57 = vsub.f32 1.5, %v9901_v35  ;;  %v9921_v4 = vmul.f32 0.5, %v9920_v25  ;;  %v9909_v8 = vmul.f32 %v10983_v29, %v17324_v6  ;;  %10988 = vrsqrt.f32 %v17360_v16  ;;  %vm9906_vm10 = vmor %vm9904_vm3, %vm9905_vm5 }
 0xd16   : > { %v10985_v32 = vpop.eup %10984  ;;  %v9994_v55 = vmul.f32 %v17211_v9, %v9975_v1  ;;  %v9791_v62 = vmul.f32 %v9775_v53, %v18378_v41  ;;  %vm9926_vm11 = vmor %vm9924_vm4, %vm9925_vm8  ;;  %vm9915_vm12 = vweird.f32 %v10983_v29  ;;  %vm9914_vm13 = vweird.f32 %v17324_v6 }
 0xd17   : > { %v9903_v11 = vmul.f32 %v10979_v61, %v9902_v57  ;;  %v9922_v5 = vsub.f32 1.5, %v9921_v4  ;;  %v9910_v19 = vmul.f32 %v10983_v29, %v9909_v8  ;;  %v9929_v15 = vmul.f32 %v10985_v32, %v17329_v20  ;;  %vm9916_vm15 = vmor %vm9914_vm13, %vm9915_vm12 }
 0xd18   : > { %v10013_v50 = vadd.f32 %v17226_v28, %v9994_v55  ;;  %v17372_v38 = vadd.f32 1e-05, %v9791_v62  ;;  %vm9935_vm14 = vweird.f32 %v10985_v32  ;;  %vm9934_vm0 = vweird.f32 %v17329_v20 }
 0xd19   : > { %v9907_v45 = vsel %vm9906_vm10, %v10979_v61, %v9903_v11  ;;  %v9923_v14 = vmul.f32 %v10981_v33, %v9922_v5  ;;  %v9911_v34 = vmul.f32 0.5, %v9910_v19  ;;  %v9930_v47 = vmul.f32 %v10985_v32, %v9929_v15  ;;  %vm9936_vm6 = vmor %vm9934_vm0, %vm9935_vm14 }
 0xd1a   : > { %v10987_v7 = vpop.eup %10986  ;;  %10029 = vst.msk [vmem:[%s11245_s3 + $0x38] sm:$0xff] %vm834_vm1, %v10013_v50  ;;  %v9977_v41 = vmul.f32 %v9907_v45, %v17138_v21  ;;  %10990 = vrsqrt.f32 %v17372_v38  ;;  %vm9954_vm7 = vweird.f32 %v17351_v22  ;;  %vm9944_vm4 = vweird.f32 %v17360_v16 }
 0xd1b   : > { %v9927_v51 = vsel %vm9926_vm11, %v10981_v33, %v9923_v14  ;;  %v9912_v58 = vsub.f32 1.5, %v9911_v34  ;;  %v9931_v46 = vmul.f32 0.5, %v9930_v47  ;;  %v9949_v43 = vmul.f32 %v10987_v7, %v17351_v22  ;;  %v10989_v60 = vpop.eup %10988 }
 0xd1c   : > { %v9996_v59 = vmul.f32 %v17211_v9, %v9977_v41  ;;  %v9979_v63 = vmul.f32 %v9927_v51, %v17135_v54  ;;  %v9939_v56 = vmul.f32 %v10989_v60, %v17360_v16  ;;  %vm9955_vm9 = vweird.f32 %v10987_v7 }
 0xd1d   : > { %v9913_v21 = vmul.f32 %v10983_v29, %v9912_v58  ;;  %v9932_v44 = vsub.f32 1.5, %v9931_v46  ;;  %v9950_v17 = vmul.f32 %v10987_v7, %v9949_v43  ;;  %vm9945_vm2 = vweird.f32 %v10989_v60  ;;  %vm9956_vm3 = vmor %vm9954_vm7, %vm9955_vm9 }
 0xd1e   : > { %v10015_v61 = vadd.f32 %v17226_v28, %v9996_v59  ;;  %v9998_v24 = vmul.f32 %v17211_v9, %v9979_v63  ;;  %v9940_v18 = vmul.f32 %v10989_v60, %v9939_v56  ;;  %vm9946_vm5 = vmor %vm9944_vm4, %vm9945_vm2  ;;  %vm9964_vm10 = vweird.f32 %v17372_v38 }
 0xd1f   : > { %v9917_v49 = vsel %vm9916_vm15, %v10983_v29, %v9913_v21  ;;  %v9933_v54 = vmul.f32 %v10985_v32, %v9932_v44  ;;  %v9951_v40 = vmul.f32 0.5, %v9950_v17 }
 0xd20   : > { %v10991_v6 = vpop.eup %10990  ;;  %10031 = vst.msk [vmem:[%s11245_s3 + $0x48] sm:$0xff] %vm834_vm1, %v10015_v61  ;;  %v10017_v2 = vadd.f32 %v17226_v28, %v9998_v24  ;;  %v9978_v37 = vmul.f32 %v9917_v49, %v17143_v27  ;;  %v9941_v20 = vmul.f32 0.5, %v9940_v18 }
 0xd21   : > { %v9937_v33 = vsel %vm9936_vm6, %v10985_v32, %v9933_v54  ;;  %v9952_v10 = vsub.f32 1.5, %v9951_v40  ;;  %v9959_v3 = vmul.f32 %v10991_v6, %v17372_v38  ;;  %vm9965_vm8 = vweird.f32 %v10991_v6 }
 0xd22   : > { %10033 = vst.msk [vmem:[%s11245_s3 + $0x58] sm:$0xff] %vm834_vm1, %v10017_v2  ;;  %v9997_v31 = vmul.f32 %v17211_v9, %v9978_v37  ;;  %v9980_v52 = vmul.f32 %v9937_v33, %v17159_v13  ;;  %v9942_v36 = vsub.f32 1.5, %v9941_v20  ;;  %vm9966_vm11 = vmor %vm9964_vm10, %vm9965_vm8 }
 0xd23   : > { %v9953_v48 = vmul.f32 %v10987_v7, %v9952_v10  ;;  %v9960_v27 = vmul.f32 %v10991_v6, %v9959_v3 }
 0xd24   : > { %v10016_v26 = vadd.f32 %v17226_v28, %v9997_v31  ;;  %v9999_v12 = vmul.f32 %v17211_v9, %v9980_v52  ;;  %v9943_v39 = vmul.f32 %v10989_v60, %v9942_v36 }
 0xd25   : > { %v9957_v30 = vsel %vm9956_vm3, %v10987_v7, %v9953_v48  ;;  %v9961_v35 = vmul.f32 0.5, %v9960_v27 }
 0xd26   : > { %10032 = vst.msk [vmem:[%s11245_s3 + $0x50] sm:$0xff] %vm834_vm1, %v10016_v26  ;;  %v10018_v13 = vadd.f32 %v17226_v28, %v9999_v12  ;;  %v9982_v25 = vmul.f32 %v9957_v30, %v17156_v42  ;;  %v9947_v53 = vsel %vm9946_vm5, %v10989_v60, %v9943_v39 }
 0xd27   : > { %v9962_v29 = vsub.f32 1.5, %v9961_v35  ;;  %v9981_v1 = vmul.f32 %v9947_v53, %v17164_v0 }
 0xd28   : > { %10034 = vst.msk [vmem:[%s11245_s3 + $0x60] sm:$0xff] %vm834_vm1, %v10018_v13  ;;  %v10001_v22 = vmul.f32 %v17211_v9, %v9982_v25 }
 0xd29   : > { %v9963_v16 = vmul.f32 %v10991_v6, %v9962_v29  ;;  %v10000_v4 = vmul.f32 %v17211_v9, %v9981_v1 }
 0xd2a   : > { %v10020_v57 = vadd.f32 %v17226_v28, %v10001_v22 }
 0xd2b   : > { %v9967_v42 = vsel %vm9966_vm11, %v10991_v6, %v9963_v16  ;;  %v10019_v8 = vadd.f32 %v17226_v28, %v10000_v4 }
 0xd2c   : > { %10036 = vst.msk [vmem:[%s11245_s3 + $0x70] sm:$0xff] %vm834_vm1, %v10020_v57  ;;  %v9983_v32 = vmul.f32 %v9967_v42, %v17175_v23 }
 0xd2d   : > { %10035 = vst.msk [vmem:[%s11245_s3 + $0x68] sm:$0xff] %vm834_vm1, %v10019_v8 }
 0xd2e   : > { %v10002_v55 = vmul.f32 %v17211_v9, %v9983_v32 }
 0xd30   : > { %v10021_v0 = vadd.f32 %v17226_v28, %v10002_v55 }
 0xd32   : > { %10037 = vst.msk [vmem:[%s11245_s3 + $0x78] sm:$0xff] %vm834_vm1, %v10021_v0 }
 0xd33 PF: > { %s18381_s14 = sld [smem:[#allocation9_spill]] }
 0xd34   : > { %s18382_s25 = sld [smem:[#allocation7_spill]] }
 0xd35   : > { %s18383_s26 = sld [smem:[#allocation8_spill]] }
 0xd36   : > { %s18384_s27 = sld [smem:[#allocation10_spill]] }
 0xd37   : > { %s18385_s28 = sld [smem:[#allocation11_spill]] }
 0xd39   : > { %s34_s29 = sadd.s32 1, %s18381_s14  }
 0xd3a   : > { %p31_p9 = scmp.ge.s32.totalorder %s34_s29, 6  }
 0xd3c   :  { %33 = sbr.rel (!%p31_p9) target bundleno = 23 (0x17), region = 154 }

</bundles_post_ra>
